<compile_context>
chip_gen: v7x
topology: tpu7x:2x2x1
jax: 0.10.0
libtpu: 0.0.40
codegen_flags: <defaults>
</compile_context>

<pallas_src>
import functools
import math

import jax
import jax.numpy as jnp
from jax import lax
from jax.experimental import pallas as pl
from jax.experimental.pallas import tpu as pltpu

D_MODEL = 256
N_HEAD = 12
HEAD_SIZE = D_MODEL // N_HEAD          # 21 (n_head * head_size = 252 != d_model)
CAT_DIM = N_HEAD * HEAD_SIZE           # 252
HEAD_PAD = 32                          # zero-padded head width
QKV_DIM = N_HEAD * HEAD_PAD            # 384
BLOCK_SIZE = 32                        # max sequence length in the reference module
NORM_EPS = 1e-5
FF_HIDDEN = 4 * D_MODEL                # 1024
_NEG_INF = -1e30                       # additive mask value (exp underflows to 0)


# ----------------------------- fused Block kernel ----------------------------
def _block_kernel(
    x_ref,
    g1_ref, be1_ref, g2_ref, be2_ref,
    u_wqkv_ref, u_bqkv_ref, u_wp_ref, u_bp_ref,
    m_wqkv_ref, m_bqkv_ref, m_wp_ref, m_bp_ref,
    fw1_ref, fb1_ref, fw2_ref, fb2_ref,
    o_ref,
    qkv_lin, q_s, k_s, v_s, ctx_m,
    *, n_head, head_pad, eps):
    """Whole transformer Block for one batch element; activations are (T, C) f32."""
    x = x_ref[0].astype(jnp.float32)                      # (T, C)
    T = x.shape[0]
    d = n_head * head_pad                                 # 384

    g1 = g1_ref[...]
    be1 = be1_ref[...]
    g2 = g2_ref[...]
    be2 = be2_ref[...]

    def layer_norm(z, g, b):
        mu = jnp.mean(z, axis=-1, keepdims=True)
        var = jnp.mean((z - mu) ** 2, axis=-1, keepdims=True)   # biased var (torch LN)
        return (z - mu) * lax.rsqrt(var + eps) * g + b

    inv_sqrt2 = jnp.float32(1.0 / math.sqrt(2.0))

    def ffn(z):                                           # (T, C) -> (T, C)
        h = jnp.dot(z.astype(jnp.bfloat16), fw1_ref[...],
                    preferred_element_type=jnp.float32) + fb1_ref[...]
        h = 0.5 * h * (1.0 + lax.erf(h * inv_sqrt2))      # exact GELU (f32 VPU/EUP)
        return jnp.dot(h.astype(jnp.bfloat16), fw2_ref[...],
                       preferred_element_type=jnp.float32) + fb2_ref[...]

    # Causal additive bias built in-kernel — no (T,T) HBM input.
    row = lax.broadcasted_iota(jnp.int32, (T, T), 0)
    col = lax.broadcasted_iota(jnp.int32, (T, T), 1)
    causal_bias = jnp.where(col <= row, 0.0, _NEG_INF).astype(jnp.float32)

    def attention(zn, wqkv_ref, bqkv_ref, wp_ref, bp_ref, bias):
        # ONE fused QKV matmul: (T, 256) @ (256, 1152).  Padded head columns are
        # zero and 1/sqrt(head_size) is folded into wq/bq at pack time, so the
        # math matches per-head torch Linears exactly.
        qkv = jnp.dot(zn.astype(jnp.bfloat16), wqkv_ref[...],
                      preferred_element_type=jnp.float32) + bqkv_ref[...]
        qkv_lin[...] = qkv
        # Head split via small VMEM copies (ref slicing only — no value
        # reshape/transpose, which keeps the lowering trivially supported).
        for h in range(n_head):
            lo = h * head_pad
            q_s[h] = qkv_lin[:, lo:lo + head_pad]
            k_s[h] = qkv_lin[:, d + lo:d + lo + head_pad]
            v_s[h] = qkv_lin[:, 2 * d + lo:2 * d + lo + head_pad]
        q = q_s[...].astype(jnp.bfloat16)                 # (NH, T, HP)
        k = k_s[...].astype(jnp.bfloat16)
        v = v_s[...].astype(jnp.bfloat16)

        s = jnp.einsum("htd,hsd->hts", q, k,
                       preferred_element_type=jnp.float32)        # (NH, T, T)
        if bias is not None:
            s = s + bias[None, :, :]
        s = s - jnp.max(s, axis=-1, keepdims=True)
        p = jnp.exp(s)
        p = p * pl.reciprocal(jnp.sum(p, axis=-1, keepdims=True), approx=True)
        ctx = jnp.einsum("hts,hsd->htd", p.astype(jnp.bfloat16), v,
                         preferred_element_type=jnp.float32)      # (NH, T, HP)

        # Merge heads back into a lane-contiguous (T, 384) slab, then ONE
        # K=384 output-projection matmul (no per-head reduction on the VPU).
        for h in range(n_head):
            ctx_m[:, h * head_pad:(h + 1) * head_pad] = ctx[h]
        return jnp.dot(ctx_m[...].astype(jnp.bfloat16), wp_ref[...],
                       preferred_element_type=jnp.float32) + bp_ref[...]

    # ---- Block body (dropout layers are identity in inference mode) ----
    # TODO(synk): training-mode dropout (p=0.2) is not implemented.
    xn = layer_norm(x, g1, be1)
    x2 = x + attention(xn, u_wqkv_ref, u_bqkv_ref, u_wp_ref, u_bp_ref, None)
    x = x2 + layer_norm(ffn(x2), g2, be2)

    xn = layer_norm(x, g1, be1)
    x2 = x + attention(xn, m_wqkv_ref, m_bqkv_ref, m_wp_ref, m_bp_ref, causal_bias)
    x = x2 + layer_norm(ffn(x2), g2, be2)

    o_ref[0] = x.astype(o_ref.dtype)


# ------------------------------- host wrapper --------------------------------
def block_forward(x, pp):
    """x: (B, T, C) float32; pp: packed params (see pack_params)."""
    B, T, C = x.shape
    assert C == D_MODEL and T <= BLOCK_SIZE

    weights = [
        pp["g1"], pp["b1"], pp["g2"], pp["b2"],
        *pp["attn_unmasked"], *pp["attn_masked"], *pp["ffn"],
    ]

    def resident(arr):
        # Full-array block with a constant index map: DMA'd once, stays in VMEM
        # across all grid steps.
        zeros = (0,) * arr.ndim
        return pl.BlockSpec(arr.shape, lambda b, _z=zeros: _z)

    kern = functools.partial(_block_kernel, n_head=N_HEAD, head_pad=HEAD_PAD,
                             eps=NORM_EPS)

    return pl.pallas_call(
        kern,
        out_shape=jax.ShapeDtypeStruct((B, T, C), x.dtype),
        grid=(B,),
        in_specs=[pl.BlockSpec((1, T, C), lambda b: (b, 0, 0))]
                 + [resident(w) for w in weights],
        out_specs=pl.BlockSpec((1, T, C), lambda b: (b, 0, 0)),
        scratch_shapes=[
            pltpu.VMEM((T, 3 * QKV_DIM), jnp.float32),     # fused QKV result
            pltpu.VMEM((N_HEAD, T, HEAD_PAD), jnp.float32),  # q (head-major)
            pltpu.VMEM((N_HEAD, T, HEAD_PAD), jnp.float32),  # k
            pltpu.VMEM((N_HEAD, T, HEAD_PAD), jnp.float32),  # v
            pltpu.VMEM((T, QKV_DIM), jnp.float32),           # merged ctx heads
        ],
        compiler_params=pltpu.CompilerParams(
            dimension_semantics=("parallel",),   # batch grid -> both v7x TCs
            # ~3 MB of bf16 weights (double-buffered) + small per-step blocks:
            # 48 MiB fits every generation (v7x physical VMEM is 64 MiB).
            vmem_limit_bytes=48 * 1024 * 1024),
    )(x, *weights)


# ------------------------------ parameter packing -----------------------------
def pack_params(p):
    """Re-pack plain (in,out)-layout f32 params into fused, padded bf16 form."""
    pad = HEAD_PAD - HEAD_SIZE
    scale = jnp.float32(HEAD_SIZE ** -0.5)

    def pad_heads_w(w):                                   # (256, 252) -> (256, 384)
        w = w.reshape(D_MODEL, N_HEAD, HEAD_SIZE)
        w = jnp.pad(w, ((0, 0), (0, 0), (0, pad)))
        return w.reshape(D_MODEL, QKV_DIM)

    def pad_heads_b(b):                                   # (252,) -> (384,)
        b = jnp.pad(b.reshape(N_HEAD, HEAD_SIZE), ((0, 0), (0, pad)))
        return b.reshape(QKV_DIM)

    def pack_attn(t):
        wq, bq, wk, bk, wv, bv, wp, bp = t
        # 1/sqrt(head_size) folded into the query projection (zero runtime cost).
        wqkv = jnp.concatenate(
            [pad_heads_w(wq) * scale, pad_heads_w(wk), pad_heads_w(wv)],
            axis=1).astype(jnp.bfloat16)                  # (256, 1152)
        bqkv = jnp.concatenate(
            [pad_heads_b(bq) * scale, pad_heads_b(bk), pad_heads_b(bv)]
        ).reshape(1, 3 * QKV_DIM).astype(jnp.float32)
        wp_p = jnp.pad(wp.reshape(N_HEAD, HEAD_SIZE, D_MODEL),
                       ((0, 0), (0, pad), (0, 0))).reshape(QKV_DIM, D_MODEL)
        return (wqkv, bqkv, wp_p.astype(jnp.bfloat16),
                bp.reshape(1, D_MODEL).astype(jnp.float32))

    w1, b1, w2, b2 = p["ffn"]
    return {
        "attn_unmasked": pack_attn(p["attn_unmasked"]),
        "attn_masked": pack_attn(p["attn_masked"]),
        "ffn": (w1.astype(jnp.bfloat16), b1.reshape(1, -1).astype(jnp.float32),
                w2.astype(jnp.bfloat16), b2.reshape(1, -1).astype(jnp.float32)),
        "g1": p["g1"].reshape(1, -1), "b1": p["b1"].reshape(1, -1),
        "g2": p["g2"].reshape(1, -1), "b2": p["b2"].reshape(1, -1),
    }


def init_params(key):
    def lin(k, fan_in, fan_out):
        k1, k2 = jax.random.split(k)
        w = jax.random.normal(k1, (fan_in, fan_out), jnp.float32) * 0.02
        b = jax.random.normal(k2, (fan_out,), jnp.float32) * 0.02
        return w, b

    ks = jax.random.split(key, 10)

    def attn_params(k0, k1, k2, k3):
        wq, bq = lin(k0, D_MODEL, CAT_DIM)
        wk, bk = lin(k1, D_MODEL, CAT_DIM)
        wv, bv = lin(k2, D_MODEL, CAT_DIM)
        wp, bp = lin(k3, CAT_DIM, D_MODEL)
        return (wq, bq, wk, bk, wv, bv, wp, bp)

    w1, b1 = lin(ks[8], D_MODEL, FF_HIDDEN)
    w2, b2 = lin(ks[9], FF_HIDDEN, D_MODEL)

    return {
        "attn_unmasked": attn_params(ks[0], ks[1], ks[2], ks[3]),
        "attn_masked": attn_params(ks[4], ks[5], ks[6], ks[7]),
        "ffn": (w1, b1, w2, b2),
        "g1": jnp.ones((D_MODEL,), jnp.float32),
        "b1": jnp.zeros((D_MODEL,), jnp.float32),
        "g2": jnp.ones((D_MODEL,), jnp.float32),
        "b2": jnp.zeros((D_MODEL,), jnp.float32),
    }


# ------------------------------ pure-JAX reference ----------------------------
def _reference_block(x, p):
    def ln(z, g, b):
        mu = jnp.mean(z, axis=-1, keepdims=True)
        var = jnp.mean((z - mu) ** 2, axis=-1, keepdims=True)
        return (z - mu) / jnp.sqrt(var + NORM_EPS) * g + b

    def attn(z, t, masked):
        wq, bq, wk, bk, wv, bv, wp, bp = t
        B, T, _ = z.shape
        q = (z @ wq + bq).reshape(B, T, N_HEAD, HEAD_SIZE)
        k = (z @ wk + bk).reshape(B, T, N_HEAD, HEAD_SIZE)
        v = (z @ wv + bv).reshape(B, T, N_HEAD, HEAD_SIZE)
        s = jnp.einsum("bqhd,bkhd->bhqk", q, k) * (HEAD_SIZE ** -0.5)
        if masked:
            mask = jnp.tril(jnp.ones((T, T), bool))
            s = jnp.where(mask[None, None], s, -jnp.inf)
        w = jax.nn.softmax(s, axis=-1)
        o = jnp.einsum("bhqk,bkhd->bqhd", w, v).reshape(B, T, CAT_DIM)
        return o @ wp + bp

    def ffw(z):
        w1, b1, w2, b2 = p["ffn"]
        h = jax.nn.gelu(z @ w1 + b1, approximate=False)
        return h @ w2 + b2

    xn = ln(x, p["g1"], p["b1"])
    x2 = x + attn(xn, p["attn_unmasked"], False)
    x = x2 + ln(ffw(x2), p["g2"], p["b2"])
    xn = ln(x, p["g1"], p["b1"])
    x2 = x + attn(xn, p["attn_masked"], True)
    x = x2 + ln(ffw(x2), p["g2"], p["b2"])
    return x


if __name__ == "__main__":
    B, T = 2, 8                         # T <= block_size (32)
    key = jax.random.PRNGKey(0)
    kx, kp = jax.random.split(key)
    x = jax.random.normal(kx, (B, T, D_MODEL), jnp.float32)
    params = init_params(kp)
    packed = pack_params(params)

    out = jax.jit(block_forward)(x, packed)
    out = jax.block_until_ready(out)
    assert out.shape == (B, T, D_MODEL)
    assert bool(jnp.all(jnp.isfinite(out)))

    ref = _reference_block(x, params)
    err = float(jnp.max(jnp.abs(out - ref)))
    # bf16 MXU operands (f32 accumulation) + approx reciprocal in the softmax
    # denominator -> tolerance loosened vs. the pure-f32 reference.
    assert err < 5e-2, f"max abs err vs reference: {err}"
    print("KERNEL_OK")
</pallas_src>

<mosaic_0001>
module attributes {stable_mosaic.version = 11 : i64} {
  func.func @_block_kernel(%arg0: i32, %arg1: memref<1x8x256xf32, #tpu.memory_space<vmem>>, %arg2: memref<1x256xf32, #tpu.memory_space<vmem>>, %arg3: memref<1x256xf32, #tpu.memory_space<vmem>>, %arg4: memref<1x256xf32, #tpu.memory_space<vmem>>, %arg5: memref<1x256xf32, #tpu.memory_space<vmem>>, %arg6: memref<256x1152xbf16, #tpu.memory_space<vmem>>, %arg7: memref<1x1152xf32, #tpu.memory_space<vmem>>, %arg8: memref<384x256xbf16, #tpu.memory_space<vmem>>, %arg9: memref<1x256xf32, #tpu.memory_space<vmem>>, %arg10: memref<256x1152xbf16, #tpu.memory_space<vmem>>, %arg11: memref<1x1152xf32, #tpu.memory_space<vmem>>, %arg12: memref<384x256xbf16, #tpu.memory_space<vmem>>, %arg13: memref<1x256xf32, #tpu.memory_space<vmem>>, %arg14: memref<256x1024xbf16, #tpu.memory_space<vmem>>, %arg15: memref<1x1024xf32, #tpu.memory_space<vmem>>, %arg16: memref<1024x256xbf16, #tpu.memory_space<vmem>>, %arg17: memref<1x256xf32, #tpu.memory_space<vmem>>, %arg18: memref<1x8x256xf32, #tpu.memory_space<vmem>>, %arg19: memref<8x1152xf32, #tpu.memory_space<vmem>>, %arg20: memref<12x8x32xf32, #tpu.memory_space<vmem>>, %arg21: memref<12x8x32xf32, #tpu.memory_space<vmem>>, %arg22: memref<12x8x32xf32, #tpu.memory_space<vmem>>, %arg23: memref<8x384xf32, #tpu.memory_space<vmem>>) attributes {dimension_semantics = [#tpu.dimension_semantics<parallel>], iteration_bounds = array<i64: 2>, scalar_prefetch = 0 : i64, scratch_operands = 5 : i64, tpu.core_type = #tpu.core_type<tc>, window_params = [{transform_indices = @transform_0, window_bounds = array<i64: 1, 8, 256>}, {pipeline_mode = #tpu.pipeline_mode<synchronous>, transform_indices = @transform_1, window_bounds = array<i64: 1, 256>}, {pipeline_mode = #tpu.pipeline_mode<synchronous>, transform_indices = @transform_2, window_bounds = array<i64: 1, 256>}, {pipeline_mode = #tpu.pipeline_mode<synchronous>, transform_indices = @transform_3, window_bounds = array<i64: 1, 256>}, {pipeline_mode = #tpu.pipeline_mode<synchronous>, transform_indices = @transform_4, window_bounds = array<i64: 1, 256>}, {pipeline_mode = #tpu.pipeline_mode<synchronous>, transform_indices = @transform_5, window_bounds = array<i64: 256, 1152>}, {pipeline_mode = #tpu.pipeline_mode<synchronous>, transform_indices = @transform_6, window_bounds = array<i64: 1, 1152>}, {pipeline_mode = #tpu.pipeline_mode<synchronous>, transform_indices = @transform_7, window_bounds = array<i64: 384, 256>}, {pipeline_mode = #tpu.pipeline_mode<synchronous>, transform_indices = @transform_8, window_bounds = array<i64: 1, 256>}, {pipeline_mode = #tpu.pipeline_mode<synchronous>, transform_indices = @transform_9, window_bounds = array<i64: 256, 1152>}, {pipeline_mode = #tpu.pipeline_mode<synchronous>, transform_indices = @transform_10, window_bounds = array<i64: 1, 1152>}, {pipeline_mode = #tpu.pipeline_mode<synchronous>, transform_indices = @transform_11, window_bounds = array<i64: 384, 256>}, {pipeline_mode = #tpu.pipeline_mode<synchronous>, transform_indices = @transform_12, window_bounds = array<i64: 1, 256>}, {pipeline_mode = #tpu.pipeline_mode<synchronous>, transform_indices = @transform_13, window_bounds = array<i64: 256, 1024>}, {pipeline_mode = #tpu.pipeline_mode<synchronous>, transform_indices = @transform_14, window_bounds = array<i64: 1, 1024>}, {pipeline_mode = #tpu.pipeline_mode<synchronous>, transform_indices = @transform_15, window_bounds = array<i64: 1024, 256>}, {pipeline_mode = #tpu.pipeline_mode<synchronous>, transform_indices = @transform_16, window_bounds = array<i64: 1, 256>}, {transform_indices = @transform_17, window_bounds = array<i64: 1, 8, 256>}]} {
    %c0 = arith.constant 0 : index
    %c0_0 = arith.constant 0 : index
    %c0_1 = arith.constant 0 : index
    %0 = vector.load %arg1[%c0, %c0_0, %c0_1] : memref<1x8x256xf32, #tpu.memory_space<vmem>>, vector<1x8x256xf32>
    %1 = vector.shape_cast %0 : vector<1x8x256xf32> to vector<8x256xf32>
    %c0_2 = arith.constant 0 : index
    %c0_3 = arith.constant 0 : index
    %2 = vector.load %arg2[%c0_2, %c0_3] : memref<1x256xf32, #tpu.memory_space<vmem>>, vector<1x256xf32>
    %c0_4 = arith.constant 0 : index
    %c0_5 = arith.constant 0 : index
    %3 = vector.load %arg3[%c0_4, %c0_5] : memref<1x256xf32, #tpu.memory_space<vmem>>, vector<1x256xf32>
    %c0_6 = arith.constant 0 : index
    %c0_7 = arith.constant 0 : index
    %4 = vector.load %arg4[%c0_6, %c0_7] : memref<1x256xf32, #tpu.memory_space<vmem>>, vector<1x256xf32>
    %c0_8 = arith.constant 0 : index
    %c0_9 = arith.constant 0 : index
    %5 = vector.load %arg5[%c0_8, %c0_9] : memref<1x256xf32, #tpu.memory_space<vmem>>, vector<1x256xf32>
    %6 = tpu.iota {dimensions = array<i32: 0>} : vector<8x8xi32>
    %7 = tpu.iota {dimensions = array<i32: 1>} : vector<8x8xi32>
    %8 = arith.cmpi sle, %7, %6 : vector<8x8xi32>
    %cst = arith.constant 0.000000e+00 : f32
    %cst_10 = arith.constant -1.000000e+30 : f32
    %9 = vector.broadcast %cst : f32 to vector<8x8xf32>
    %10 = vector.broadcast %cst_10 : f32 to vector<8x8xf32>
    %11 = arith.select %8, %9, %10 : vector<8x8xi1>, vector<8x8xf32>
    %cst_11 = arith.constant dense<0.000000e+00> : vector<8xf32>
    %12 = vector.multi_reduction <add>, %1, %cst_11 [1] : vector<8x256xf32> to vector<8xf32>
    %13 = vector.shape_cast %12 : vector<8xf32> to vector<8x1xf32>
    %cst_12 = arith.constant 2.560000e+02 : f32
    %14 = vector.broadcast %cst_12 : f32 to vector<8x1xf32>
    %15 = arith.divf %13, %14 : vector<8x1xf32>
    %16 = vector.broadcast %15 : vector<8x1xf32> to vector<8x256xf32>
    %17 = arith.subf %1, %16 : vector<8x256xf32>
    %18 = arith.mulf %17, %17 : vector<8x256xf32>
    %cst_13 = arith.constant dense<0.000000e+00> : vector<8xf32>
    %19 = vector.multi_reduction <add>, %18, %cst_13 [1] : vector<8x256xf32> to vector<8xf32>
    %20 = vector.shape_cast %19 : vector<8xf32> to vector<8x1xf32>
    %cst_14 = arith.constant 2.560000e+02 : f32
    %21 = vector.broadcast %cst_14 : f32 to vector<8x1xf32>
    %22 = arith.divf %20, %21 : vector<8x1xf32>
    %23 = vector.broadcast %15 : vector<8x1xf32> to vector<8x256xf32>
    %24 = arith.subf %1, %23 : vector<8x256xf32>
    %cst_15 = arith.constant 9.99999974E-6 : f32
    %25 = vector.broadcast %cst_15 : f32 to vector<8x1xf32>
    %26 = arith.addf %22, %25 : vector<8x1xf32>
    %27 = math.rsqrt %26 : vector<8x1xf32>
    %28 = vector.broadcast %27 : vector<8x1xf32> to vector<8x256xf32>
    %29 = arith.mulf %24, %28 : vector<8x256xf32>
    %30 = vector.broadcast %2 : vector<1x256xf32> to vector<8x256xf32>
    %31 = arith.mulf %29, %30 : vector<8x256xf32>
    %32 = vector.broadcast %3 : vector<1x256xf32> to vector<8x256xf32>
    %33 = arith.addf %31, %32 : vector<8x256xf32>
    %34 = arith.truncf %33 : vector<8x256xf32> to vector<8x256xbf16>
    %c0_16 = arith.constant 0 : index
    %c0_17 = arith.constant 0 : index
    %35 = vector.load %arg6[%c0_16, %c0_17] : memref<256x1152xbf16, #tpu.memory_space<vmem>>, vector<256x1152xbf16>
    %cst_18 = arith.constant dense<0.000000e+00> : vector<8x1152xf32>
    %36 = tpu.matmul %34, %35, %cst_18 {dimension_numbers = #tpu.dot_dimension_numbers<[1], [0], [0], [1], [0, 0, 1, 1], [], []>} : vector<8x256xbf16>, vector<256x1152xbf16>, vector<8x1152xf32> -> vector<8x1152xf32>
    %c0_19 = arith.constant 0 : index
    %c0_20 = arith.constant 0 : index
    %37 = vector.load %arg7[%c0_19, %c0_20] : memref<1x1152xf32, #tpu.memory_space<vmem>>, vector<1x1152xf32>
    %38 = vector.broadcast %37 : vector<1x1152xf32> to vector<8x1152xf32>
    %39 = arith.addf %36, %38 : vector<8x1152xf32>
    %c0_21 = arith.constant 0 : index
    %c0_22 = arith.constant 0 : index
    %40 = vector.load %arg19[%c0_21, %c0_22] : memref<8x1152xf32, #tpu.memory_space<vmem>>, vector<8x1152xf32>
    tpu.vector_store %arg19[%c0_21, %c0_22], %39 {strides = array<i32>} : memref<8x1152xf32, #tpu.memory_space<vmem>>, vector<8x1152xf32>,
    %c0_23 = arith.constant 0 : index
    %c0_24 = arith.constant 0 : index
    %41 = vector.load %arg19[%c0_23, %c0_24] : memref<8x1152xf32, #tpu.memory_space<vmem>>, vector<8x32xf32>
    %c0_25 = arith.constant 0 : index
    %c0_26 = arith.constant 0 : index
    %c0_27 = arith.constant 0 : index
    %42 = vector.load %arg20[%c0_25, %c0_26, %c0_27] : memref<12x8x32xf32, #tpu.memory_space<vmem>>, vector<1x8x32xf32>
    %43 = vector.shape_cast %42 : vector<1x8x32xf32> to vector<8x32xf32>
    %44 = vector.shape_cast %41 : vector<8x32xf32> to vector<1x8x32xf32>
    tpu.vector_store %arg20[%c0_25, %c0_26, %c0_27], %44 {strides = array<i32>} : memref<12x8x32xf32, #tpu.memory_space<vmem>>, vector<1x8x32xf32>,
    %c0_28 = arith.constant 0 : index
    %c384 = arith.constant 384 : index
    %45 = vector.load %arg19[%c0_28, %c384] : memref<8x1152xf32, #tpu.memory_space<vmem>>, vector<8x32xf32>
    %c0_29 = arith.constant 0 : index
    %c0_30 = arith.constant 0 : index
    %c0_31 = arith.constant 0 : index
    %46 = vector.load %arg21[%c0_29, %c0_30, %c0_31] : memref<12x8x32xf32, #tpu.memory_space<vmem>>, vector<1x8x32xf32>
    %47 = vector.shape_cast %46 : vector<1x8x32xf32> to vector<8x32xf32>
    %48 = vector.shape_cast %45 : vector<8x32xf32> to vector<1x8x32xf32>
    tpu.vector_store %arg21[%c0_29, %c0_30, %c0_31], %48 {strides = array<i32>} : memref<12x8x32xf32, #tpu.memory_space<vmem>>, vector<1x8x32xf32>,
    %c0_32 = arith.constant 0 : index
    %c768 = arith.constant 768 : index
    %49 = vector.load %arg19[%c0_32, %c768] : memref<8x1152xf32, #tpu.memory_space<vmem>>, vector<8x32xf32>
    %c0_33 = arith.constant 0 : index
    %c0_34 = arith.constant 0 : index
    %c0_35 = arith.constant 0 : index
    %50 = vector.load %arg22[%c0_33, %c0_34, %c0_35] : memref<12x8x32xf32, #tpu.memory_space<vmem>>, vector<1x8x32xf32>
    %51 = vector.shape_cast %50 : vector<1x8x32xf32> to vector<8x32xf32>
    %52 = vector.shape_cast %49 : vector<8x32xf32> to vector<1x8x32xf32>
    tpu.vector_store %arg22[%c0_33, %c0_34, %c0_35], %52 {strides = array<i32>} : memref<12x8x32xf32, #tpu.memory_space<vmem>>, vector<1x8x32xf32>,
    %c0_36 = arith.constant 0 : index
    %c32 = arith.constant 32 : index
    %53 = vector.load %arg19[%c0_36, %c32] : memref<8x1152xf32, #tpu.memory_space<vmem>>, vector<8x32xf32>
    %c1 = arith.constant 1 : index
    %c0_37 = arith.constant 0 : index
    %c0_38 = arith.constant 0 : index
    %54 = vector.load %arg20[%c1, %c0_37, %c0_38] : memref<12x8x32xf32, #tpu.memory_space<vmem>>, vector<1x8x32xf32>
    %55 = vector.shape_cast %54 : vector<1x8x32xf32> to vector<8x32xf32>
    %56 = vector.shape_cast %53 : vector<8x32xf32> to vector<1x8x32xf32>
    tpu.vector_store %arg20[%c1, %c0_37, %c0_38], %56 {strides = array<i32>} : memref<12x8x32xf32, #tpu.memory_space<vmem>>, vector<1x8x32xf32>,
    %c0_39 = arith.constant 0 : index
    %c416 = arith.constant 416 : index
    %57 = vector.load %arg19[%c0_39, %c416] : memref<8x1152xf32, #tpu.memory_space<vmem>>, vector<8x32xf32>
    %c1_40 = arith.constant 1 : index
    %c0_41 = arith.constant 0 : index
    %c0_42 = arith.constant 0 : index
    %58 = vector.load %arg21[%c1_40, %c0_41, %c0_42] : memref<12x8x32xf32, #tpu.memory_space<vmem>>, vector<1x8x32xf32>
    %59 = vector.shape_cast %58 : vector<1x8x32xf32> to vector<8x32xf32>
    %60 = vector.shape_cast %57 : vector<8x32xf32> to vector<1x8x32xf32>
    tpu.vector_store %arg21[%c1_40, %c0_41, %c0_42], %60 {strides = array<i32>} : memref<12x8x32xf32, #tpu.memory_space<vmem>>, vector<1x8x32xf32>,
    %c0_43 = arith.constant 0 : index
    %c800 = arith.constant 800 : index
    %61 = vector.load %arg19[%c0_43, %c800] : memref<8x1152xf32, #tpu.memory_space<vmem>>, vector<8x32xf32>
    %c1_44 = arith.constant 1 : index
    %c0_45 = arith.constant 0 : index
    %c0_46 = arith.constant 0 : index
    %62 = vector.load %arg22[%c1_44, %c0_45, %c0_46] : memref<12x8x32xf32, #tpu.memory_space<vmem>>, vector<1x8x32xf32>
    %63 = vector.shape_cast %62 : vector<1x8x32xf32> to vector<8x32xf32>
    %64 = vector.shape_cast %61 : vector<8x32xf32> to vector<1x8x32xf32>
    tpu.vector_store %arg22[%c1_44, %c0_45, %c0_46], %64 {strides = array<i32>} : memref<12x8x32xf32, #tpu.memory_space<vmem>>, vector<1x8x32xf32>,
    %c0_47 = arith.constant 0 : index
    %c64 = arith.constant 64 : index
    %65 = vector.load %arg19[%c0_47, %c64] : memref<8x1152xf32, #tpu.memory_space<vmem>>, vector<8x32xf32>
    %c2 = arith.constant 2 : index
    %c0_48 = arith.constant 0 : index
    %c0_49 = arith.constant 0 : index
    %66 = vector.load %arg20[%c2, %c0_48, %c0_49] : memref<12x8x32xf32, #tpu.memory_space<vmem>>, vector<1x8x32xf32>
    %67 = vector.shape_cast %66 : vector<1x8x32xf32> to vector<8x32xf32>
    %68 = vector.shape_cast %65 : vector<8x32xf32> to vector<1x8x32xf32>
    tpu.vector_store %arg20[%c2, %c0_48, %c0_49], %68 {strides = array<i32>} : memref<12x8x32xf32, #tpu.memory_space<vmem>>, vector<1x8x32xf32>,
    %c0_50 = arith.constant 0 : index
    %c448 = arith.constant 448 : index
    %69 = vector.load %arg19[%c0_50, %c448] : memref<8x1152xf32, #tpu.memory_space<vmem>>, vector<8x32xf32>
    %c2_51 = arith.constant 2 : index
    %c0_52 = arith.constant 0 : index
    %c0_53 = arith.constant 0 : index
    %70 = vector.load %arg21[%c2_51, %c0_52, %c0_53] : memref<12x8x32xf32, #tpu.memory_space<vmem>>, vector<1x8x32xf32>
    %71 = vector.shape_cast %70 : vector<1x8x32xf32> to vector<8x32xf32>
    %72 = vector.shape_cast %69 : vector<8x32xf32> to vector<1x8x32xf32>
    tpu.vector_store %arg21[%c2_51, %c0_52, %c0_53], %72 {strides = array<i32>} : memref<12x8x32xf32, #tpu.memory_space<vmem>>, vector<1x8x32xf32>,
    %c0_54 = arith.constant 0 : index
    %c832 = arith.constant 832 : index
    %73 = vector.load %arg19[%c0_54, %c832] : memref<8x1152xf32, #tpu.memory_space<vmem>>, vector<8x32xf32>
    %c2_55 = arith.constant 2 : index
    %c0_56 = arith.constant 0 : index
    %c0_57 = arith.constant 0 : index
    %74 = vector.load %arg22[%c2_55, %c0_56, %c0_57] : memref<12x8x32xf32, #tpu.memory_space<vmem>>, vector<1x8x32xf32>
    %75 = vector.shape_cast %74 : vector<1x8x32xf32> to vector<8x32xf32>
    %76 = vector.shape_cast %73 : vector<8x32xf32> to vector<1x8x32xf32>
    tpu.vector_store %arg22[%c2_55, %c0_56, %c0_57], %76 {strides = array<i32>} : memref<12x8x32xf32, #tpu.memory_space<vmem>>, vector<1x8x32xf32>,
    %c0_58 = arith.constant 0 : index
    %c96 = arith.constant 96 : index
    %77 = vector.load %arg19[%c0_58, %c96] : memref<8x1152xf32, #tpu.memory_space<vmem>>, vector<8x32xf32>
    %c3 = arith.constant 3 : index
    %c0_59 = arith.constant 0 : index
    %c0_60 = arith.constant 0 : index
    %78 = vector.load %arg20[%c3, %c0_59, %c0_60] : memref<12x8x32xf32, #tpu.memory_space<vmem>>, vector<1x8x32xf32>
    %79 = vector.shape_cast %78 : vector<1x8x32xf32> to vector<8x32xf32>
    %80 = vector.shape_cast %77 : vector<8x32xf32> to vector<1x8x32xf32>
    tpu.vector_store %arg20[%c3, %c0_59, %c0_60], %80 {strides = array<i32>} : memref<12x8x32xf32, #tpu.memory_space<vmem>>, vector<1x8x32xf32>,
    %c0_61 = arith.constant 0 : index
    %c480 = arith.constant 480 : index
    %81 = vector.load %arg19[%c0_61, %c480] : memref<8x1152xf32, #tpu.memory_space<vmem>>, vector<8x32xf32>
    %c3_62 = arith.constant 3 : index
    %c0_63 = arith.constant 0 : index
    %c0_64 = arith.constant 0 : index
    %82 = vector.load %arg21[%c3_62, %c0_63, %c0_64] : memref<12x8x32xf32, #tpu.memory_space<vmem>>, vector<1x8x32xf32>
    %83 = vector.shape_cast %82 : vector<1x8x32xf32> to vector<8x32xf32>
    %84 = vector.shape_cast %81 : vector<8x32xf32> to vector<1x8x32xf32>
    tpu.vector_store %arg21[%c3_62, %c0_63, %c0_64], %84 {strides = array<i32>} : memref<12x8x32xf32, #tpu.memory_space<vmem>>, vector<1x8x32xf32>,
    %c0_65 = arith.constant 0 : index
    %c864 = arith.constant 864 : index
    %85 = vector.load %arg19[%c0_65, %c864] : memref<8x1152xf32, #tpu.memory_space<vmem>>, vector<8x32xf32>
    %c3_66 = arith.constant 3 : index
    %c0_67 = arith.constant 0 : index
    %c0_68 = arith.constant 0 : index
    %86 = vector.load %arg22[%c3_66, %c0_67, %c0_68] : memref<12x8x32xf32, #tpu.memory_space<vmem>>, vector<1x8x32xf32>
    %87 = vector.shape_cast %86 : vector<1x8x32xf32> to vector<8x32xf32>
    %88 = vector.shape_cast %85 : vector<8x32xf32> to vector<1x8x32xf32>
    tpu.vector_store %arg22[%c3_66, %c0_67, %c0_68], %88 {strides = array<i32>} : memref<12x8x32xf32, #tpu.memory_space<vmem>>, vector<1x8x32xf32>,
    %c0_69 = arith.constant 0 : index
    %c128 = arith.constant 128 : index
    %89 = vector.load %arg19[%c0_69, %c128] : memref<8x1152xf32, #tpu.memory_space<vmem>>, vector<8x32xf32>
    %c4 = arith.constant 4 : index
    %c0_70 = arith.constant 0 : index
    %c0_71 = arith.constant 0 : index
    %90 = vector.load %arg20[%c4, %c0_70, %c0_71] : memref<12x8x32xf32, #tpu.memory_space<vmem>>, vector<1x8x32xf32>
    %91 = vector.shape_cast %90 : vector<1x8x32xf32> to vector<8x32xf32>
    %92 = vector.shape_cast %89 : vector<8x32xf32> to vector<1x8x32xf32>
    tpu.vector_store %arg20[%c4, %c0_70, %c0_71], %92 {strides = array<i32>} : memref<12x8x32xf32, #tpu.memory_space<vmem>>, vector<1x8x32xf32>,
    %c0_72 = arith.constant 0 : index
    %c512 = arith.constant 512 : index
    %93 = vector.load %arg19[%c0_72, %c512] : memref<8x1152xf32, #tpu.memory_space<vmem>>, vector<8x32xf32>
    %c4_73 = arith.constant 4 : index
    %c0_74 = arith.constant 0 : index
    %c0_75 = arith.constant 0 : index
    %94 = vector.load %arg21[%c4_73, %c0_74, %c0_75] : memref<12x8x32xf32, #tpu.memory_space<vmem>>, vector<1x8x32xf32>
    %95 = vector.shape_cast %94 : vector<1x8x32xf32> to vector<8x32xf32>
    %96 = vector.shape_cast %93 : vector<8x32xf32> to vector<1x8x32xf32>
    tpu.vector_store %arg21[%c4_73, %c0_74, %c0_75], %96 {strides = array<i32>} : memref<12x8x32xf32, #tpu.memory_space<vmem>>, vector<1x8x32xf32>,
    %c0_76 = arith.constant 0 : index
    %c896 = arith.constant 896 : index
    %97 = vector.load %arg19[%c0_76, %c896] : memref<8x1152xf32, #tpu.memory_space<vmem>>, vector<8x32xf32>
    %c4_77 = arith.constant 4 : index
    %c0_78 = arith.constant 0 : index
    %c0_79 = arith.constant 0 : index
    %98 = vector.load %arg22[%c4_77, %c0_78, %c0_79] : memref<12x8x32xf32, #tpu.memory_space<vmem>>, vector<1x8x32xf32>
    %99 = vector.shape_cast %98 : vector<1x8x32xf32> to vector<8x32xf32>
    %100 = vector.shape_cast %97 : vector<8x32xf32> to vector<1x8x32xf32>
    tpu.vector_store %arg22[%c4_77, %c0_78, %c0_79], %100 {strides = array<i32>} : memref<12x8x32xf32, #tpu.memory_space<vmem>>, vector<1x8x32xf32>,
    %c0_80 = arith.constant 0 : index
    %c160 = arith.constant 160 : index
    %101 = vector.load %arg19[%c0_80, %c160] : memref<8x1152xf32, #tpu.memory_space<vmem>>, vector<8x32xf32>
    %c5 = arith.constant 5 : index
    %c0_81 = arith.constant 0 : index
    %c0_82 = arith.constant 0 : index
    %102 = vector.load %arg20[%c5, %c0_81, %c0_82] : memref<12x8x32xf32, #tpu.memory_space<vmem>>, vector<1x8x32xf32>
    %103 = vector.shape_cast %102 : vector<1x8x32xf32> to vector<8x32xf32>
    %104 = vector.shape_cast %101 : vector<8x32xf32> to vector<1x8x32xf32>
    tpu.vector_store %arg20[%c5, %c0_81, %c0_82], %104 {strides = array<i32>} : memref<12x8x32xf32, #tpu.memory_space<vmem>>, vector<1x8x32xf32>,
    %c0_83 = arith.constant 0 : index
    %c544 = arith.constant 544 : index
    %105 = vector.load %arg19[%c0_83, %c544] : memref<8x1152xf32, #tpu.memory_space<vmem>>, vector<8x32xf32>
    %c5_84 = arith.constant 5 : index
    %c0_85 = arith.constant 0 : index
    %c0_86 = arith.constant 0 : index
    %106 = vector.load %arg21[%c5_84, %c0_85, %c0_86] : memref<12x8x32xf32, #tpu.memory_space<vmem>>, vector<1x8x32xf32>
    %107 = vector.shape_cast %106 : vector<1x8x32xf32> to vector<8x32xf32>
    %108 = vector.shape_cast %105 : vector<8x32xf32> to vector<1x8x32xf32>
    tpu.vector_store %arg21[%c5_84, %c0_85, %c0_86], %108 {strides = array<i32>} : memref<12x8x32xf32, #tpu.memory_space<vmem>>, vector<1x8x32xf32>,
    %c0_87 = arith.constant 0 : index
    %c928 = arith.constant 928 : index
    %109 = vector.load %arg19[%c0_87, %c928] : memref<8x1152xf32, #tpu.memory_space<vmem>>, vector<8x32xf32>
    %c5_88 = arith.constant 5 : index
    %c0_89 = arith.constant 0 : index
    %c0_90 = arith.constant 0 : index
    %110 = vector.load %arg22[%c5_88, %c0_89, %c0_90] : memref<12x8x32xf32, #tpu.memory_space<vmem>>, vector<1x8x32xf32>
    %111 = vector.shape_cast %110 : vector<1x8x32xf32> to vector<8x32xf32>
    %112 = vector.shape_cast %109 : vector<8x32xf32> to vector<1x8x32xf32>
    tpu.vector_store %arg22[%c5_88, %c0_89, %c0_90], %112 {strides = array<i32>} : memref<12x8x32xf32, #tpu.memory_space<vmem>>, vector<1x8x32xf32>,
    %c0_91 = arith.constant 0 : index
    %c192 = arith.constant 192 : index
    %113 = vector.load %arg19[%c0_91, %c192] : memref<8x1152xf32, #tpu.memory_space<vmem>>, vector<8x32xf32>
    %c6 = arith.constant 6 : index
    %c0_92 = arith.constant 0 : index
    %c0_93 = arith.constant 0 : index
    %114 = vector.load %arg20[%c6, %c0_92, %c0_93] : memref<12x8x32xf32, #tpu.memory_space<vmem>>, vector<1x8x32xf32>
    %115 = vector.shape_cast %114 : vector<1x8x32xf32> to vector<8x32xf32>
    %116 = vector.shape_cast %113 : vector<8x32xf32> to vector<1x8x32xf32>
    tpu.vector_store %arg20[%c6, %c0_92, %c0_93], %116 {strides = array<i32>} : memref<12x8x32xf32, #tpu.memory_space<vmem>>, vector<1x8x32xf32>,
    %c0_94 = arith.constant 0 : index
    %c576 = arith.constant 576 : index
    %117 = vector.load %arg19[%c0_94, %c576] : memref<8x1152xf32, #tpu.memory_space<vmem>>, vector<8x32xf32>
    %c6_95 = arith.constant 6 : index
    %c0_96 = arith.constant 0 : index
    %c0_97 = arith.constant 0 : index
    %118 = vector.load %arg21[%c6_95, %c0_96, %c0_97] : memref<12x8x32xf32, #tpu.memory_space<vmem>>, vector<1x8x32xf32>
    %119 = vector.shape_cast %118 : vector<1x8x32xf32> to vector<8x32xf32>
    %120 = vector.shape_cast %117 : vector<8x32xf32> to vector<1x8x32xf32>
    tpu.vector_store %arg21[%c6_95, %c0_96, %c0_97], %120 {strides = array<i32>} : memref<12x8x32xf32, #tpu.memory_space<vmem>>, vector<1x8x32xf32>,
    %c0_98 = arith.constant 0 : index
    %c960 = arith.constant 960 : index
    %121 = vector.load %arg19[%c0_98, %c960] : memref<8x1152xf32, #tpu.memory_space<vmem>>, vector<8x32xf32>
    %c6_99 = arith.constant 6 : index
    %c0_100 = arith.constant 0 : index
    %c0_101 = arith.constant 0 : index
    %122 = vector.load %arg22[%c6_99, %c0_100, %c0_101] : memref<12x8x32xf32, #tpu.memory_space<vmem>>, vector<1x8x32xf32>
    %123 = vector.shape_cast %122 : vector<1x8x32xf32> to vector<8x32xf32>
    %124 = vector.shape_cast %121 : vector<8x32xf32> to vector<1x8x32xf32>
    tpu.vector_store %arg22[%c6_99, %c0_100, %c0_101], %124 {strides = array<i32>} : memref<12x8x32xf32, #tpu.memory_space<vmem>>, vector<1x8x32xf32>,
    %c0_102 = arith.constant 0 : index
    %c224 = arith.constant 224 : index
    %125 = vector.load %arg19[%c0_102, %c224] : memref<8x1152xf32, #tpu.memory_space<vmem>>, vector<8x32xf32>
    %c7 = arith.constant 7 : index
    %c0_103 = arith.constant 0 : index
    %c0_104 = arith.constant 0 : index
    %126 = vector.load %arg20[%c7, %c0_103, %c0_104] : memref<12x8x32xf32, #tpu.memory_space<vmem>>, vector<1x8x32xf32>
    %127 = vector.shape_cast %126 : vector<1x8x32xf32> to vector<8x32xf32>
    %128 = vector.shape_cast %125 : vector<8x32xf32> to vector<1x8x32xf32>
    tpu.vector_store %arg20[%c7, %c0_103, %c0_104], %128 {strides = array<i32>} : memref<12x8x32xf32, #tpu.memory_space<vmem>>, vector<1x8x32xf32>,
    %c0_105 = arith.constant 0 : index
    %c608 = arith.constant 608 : index
    %129 = vector.load %arg19[%c0_105, %c608] : memref<8x1152xf32, #tpu.memory_space<vmem>>, vector<8x32xf32>
    %c7_106 = arith.constant 7 : index
    %c0_107 = arith.constant 0 : index
    %c0_108 = arith.constant 0 : index
    %130 = vector.load %arg21[%c7_106, %c0_107, %c0_108] : memref<12x8x32xf32, #tpu.memory_space<vmem>>, vector<1x8x32xf32>
    %131 = vector.shape_cast %130 : vector<1x8x32xf32> to vector<8x32xf32>
    %132 = vector.shape_cast %129 : vector<8x32xf32> to vector<1x8x32xf32>
    tpu.vector_store %arg21[%c7_106, %c0_107, %c0_108], %132 {strides = array<i32>} : memref<12x8x32xf32, #tpu.memory_space<vmem>>, vector<1x8x32xf32>,
    %c0_109 = arith.constant 0 : index
    %c992 = arith.constant 992 : index
    %133 = vector.load %arg19[%c0_109, %c992] : memref<8x1152xf32, #tpu.memory_space<vmem>>, vector<8x32xf32>
    %c7_110 = arith.constant 7 : index
    %c0_111 = arith.constant 0 : index
    %c0_112 = arith.constant 0 : index
    %134 = vector.load %arg22[%c7_110, %c0_111, %c0_112] : memref<12x8x32xf32, #tpu.memory_space<vmem>>, vector<1x8x32xf32>
    %135 = vector.shape_cast %134 : vector<1x8x32xf32> to vector<8x32xf32>
    %136 = vector.shape_cast %133 : vector<8x32xf32> to vector<1x8x32xf32>
    tpu.vector_store %arg22[%c7_110, %c0_111, %c0_112], %136 {strides = array<i32>} : memref<12x8x32xf32, #tpu.memory_space<vmem>>, vector<1x8x32xf32>,
    %c0_113 = arith.constant 0 : index
    %c256 = arith.constant 256 : index
    %137 = vector.load %arg19[%c0_113, %c256] : memref<8x1152xf32, #tpu.memory_space<vmem>>, vector<8x32xf32>
    %c8 = arith.constant 8 : index
    %c0_114 = arith.constant 0 : index
    %c0_115 = arith.constant 0 : index
    %138 = vector.load %arg20[%c8, %c0_114, %c0_115] : memref<12x8x32xf32, #tpu.memory_space<vmem>>, vector<1x8x32xf32>
    %139 = vector.shape_cast %138 : vector<1x8x32xf32> to vector<8x32xf32>
    %140 = vector.shape_cast %137 : vector<8x32xf32> to vector<1x8x32xf32>
    tpu.vector_store %arg20[%c8, %c0_114, %c0_115], %140 {strides = array<i32>} : memref<12x8x32xf32, #tpu.memory_space<vmem>>, vector<1x8x32xf32>,
    %c0_116 = arith.constant 0 : index
    %c640 = arith.constant 640 : index
    %141 = vector.load %arg19[%c0_116, %c640] : memref<8x1152xf32, #tpu.memory_space<vmem>>, vector<8x32xf32>
    %c8_117 = arith.constant 8 : index
    %c0_118 = arith.constant 0 : index
    %c0_119 = arith.constant 0 : index
    %142 = vector.load %arg21[%c8_117, %c0_118, %c0_119] : memref<12x8x32xf32, #tpu.memory_space<vmem>>, vector<1x8x32xf32>
    %143 = vector.shape_cast %142 : vector<1x8x32xf32> to vector<8x32xf32>
    %144 = vector.shape_cast %141 : vector<8x32xf32> to vector<1x8x32xf32>
    tpu.vector_store %arg21[%c8_117, %c0_118, %c0_119], %144 {strides = array<i32>} : memref<12x8x32xf32, #tpu.memory_space<vmem>>, vector<1x8x32xf32>,
    %c0_120 = arith.constant 0 : index
    %c1024 = arith.constant 1024 : index
    %145 = vector.load %arg19[%c0_120, %c1024] : memref<8x1152xf32, #tpu.memory_space<vmem>>, vector<8x32xf32>
    %c8_121 = arith.constant 8 : index
    %c0_122 = arith.constant 0 : index
    %c0_123 = arith.constant 0 : index
    %146 = vector.load %arg22[%c8_121, %c0_122, %c0_123] : memref<12x8x32xf32, #tpu.memory_space<vmem>>, vector<1x8x32xf32>
    %147 = vector.shape_cast %146 : vector<1x8x32xf32> to vector<8x32xf32>
    %148 = vector.shape_cast %145 : vector<8x32xf32> to vector<1x8x32xf32>
    tpu.vector_store %arg22[%c8_121, %c0_122, %c0_123], %148 {strides = array<i32>} : memref<12x8x32xf32, #tpu.memory_space<vmem>>, vector<1x8x32xf32>,
    %c0_124 = arith.constant 0 : index
    %c288 = arith.constant 288 : index
    %149 = vector.load %arg19[%c0_124, %c288] : memref<8x1152xf32, #tpu.memory_space<vmem>>, vector<8x32xf32>
    %c9 = arith.constant 9 : index
    %c0_125 = arith.constant 0 : index
    %c0_126 = arith.constant 0 : index
    %150 = vector.load %arg20[%c9, %c0_125, %c0_126] : memref<12x8x32xf32, #tpu.memory_space<vmem>>, vector<1x8x32xf32>
    %151 = vector.shape_cast %150 : vector<1x8x32xf32> to vector<8x32xf32>
    %152 = vector.shape_cast %149 : vector<8x32xf32> to vector<1x8x32xf32>
    tpu.vector_store %arg20[%c9, %c0_125, %c0_126], %152 {strides = array<i32>} : memref<12x8x32xf32, #tpu.memory_space<vmem>>, vector<1x8x32xf32>,
    %c0_127 = arith.constant 0 : index
    %c672 = arith.constant 672 : index
    %153 = vector.load %arg19[%c0_127, %c672] : memref<8x1152xf32, #tpu.memory_space<vmem>>, vector<8x32xf32>
    %c9_128 = arith.constant 9 : index
    %c0_129 = arith.constant 0 : index
    %c0_130 = arith.constant 0 : index
    %154 = vector.load %arg21[%c9_128, %c0_129, %c0_130] : memref<12x8x32xf32, #tpu.memory_space<vmem>>, vector<1x8x32xf32>
    %155 = vector.shape_cast %154 : vector<1x8x32xf32> to vector<8x32xf32>
    %156 = vector.shape_cast %153 : vector<8x32xf32> to vector<1x8x32xf32>
    tpu.vector_store %arg21[%c9_128, %c0_129, %c0_130], %156 {strides = array<i32>} : memref<12x8x32xf32, #tpu.memory_space<vmem>>, vector<1x8x32xf32>,
    %c0_131 = arith.constant 0 : index
    %c1056 = arith.constant 1056 : index
    %157 = vector.load %arg19[%c0_131, %c1056] : memref<8x1152xf32, #tpu.memory_space<vmem>>, vector<8x32xf32>
    %c9_132 = arith.constant 9 : index
    %c0_133 = arith.constant 0 : index
    %c0_134 = arith.constant 0 : index
    %158 = vector.load %arg22[%c9_132, %c0_133, %c0_134] : memref<12x8x32xf32, #tpu.memory_space<vmem>>, vector<1x8x32xf32>
    %159 = vector.shape_cast %158 : vector<1x8x32xf32> to vector<8x32xf32>
    %160 = vector.shape_cast %157 : vector<8x32xf32> to vector<1x8x32xf32>
    tpu.vector_store %arg22[%c9_132, %c0_133, %c0_134], %160 {strides = array<i32>} : memref<12x8x32xf32, #tpu.memory_space<vmem>>, vector<1x8x32xf32>,
    %c0_135 = arith.constant 0 : index
    %c320 = arith.constant 320 : index
    %161 = vector.load %arg19[%c0_135, %c320] : memref<8x1152xf32, #tpu.memory_space<vmem>>, vector<8x32xf32>
    %c10 = arith.constant 10 : index
    %c0_136 = arith.constant 0 : index
    %c0_137 = arith.constant 0 : index
    %162 = vector.load %arg20[%c10, %c0_136, %c0_137] : memref<12x8x32xf32, #tpu.memory_space<vmem>>, vector<1x8x32xf32>
    %163 = vector.shape_cast %162 : vector<1x8x32xf32> to vector<8x32xf32>
    %164 = vector.shape_cast %161 : vector<8x32xf32> to vector<1x8x32xf32>
    tpu.vector_store %arg20[%c10, %c0_136, %c0_137], %164 {strides = array<i32>} : memref<12x8x32xf32, #tpu.memory_space<vmem>>, vector<1x8x32xf32>,
    %c0_138 = arith.constant 0 : index
    %c704 = arith.constant 704 : index
    %165 = vector.load %arg19[%c0_138, %c704] : memref<8x1152xf32, #tpu.memory_space<vmem>>, vector<8x32xf32>
    %c10_139 = arith.constant 10 : index
    %c0_140 = arith.constant 0 : index
    %c0_141 = arith.constant 0 : index
    %166 = vector.load %arg21[%c10_139, %c0_140, %c0_141] : memref<12x8x32xf32, #tpu.memory_space<vmem>>, vector<1x8x32xf32>
    %167 = vector.shape_cast %166 : vector<1x8x32xf32> to vector<8x32xf32>
    %168 = vector.shape_cast %165 : vector<8x32xf32> to vector<1x8x32xf32>
    tpu.vector_store %arg21[%c10_139, %c0_140, %c0_141], %168 {strides = array<i32>} : memref<12x8x32xf32, #tpu.memory_space<vmem>>, vector<1x8x32xf32>,
    %c0_142 = arith.constant 0 : index
    %c1088 = arith.constant 1088 : index
    %169 = vector.load %arg19[%c0_142, %c1088] : memref<8x1152xf32, #tpu.memory_space<vmem>>, vector<8x32xf32>
    %c10_143 = arith.constant 10 : index
    %c0_144 = arith.constant 0 : index
    %c0_145 = arith.constant 0 : index
    %170 = vector.load %arg22[%c10_143, %c0_144, %c0_145] : memref<12x8x32xf32, #tpu.memory_space<vmem>>, vector<1x8x32xf32>
    %171 = vector.shape_cast %170 : vector<1x8x32xf32> to vector<8x32xf32>
    %172 = vector.shape_cast %169 : vector<8x32xf32> to vector<1x8x32xf32>
    tpu.vector_store %arg22[%c10_143, %c0_144, %c0_145], %172 {strides = array<i32>} : memref<12x8x32xf32, #tpu.memory_space<vmem>>, vector<1x8x32xf32>,
    %c0_146 = arith.constant 0 : index
    %c352 = arith.constant 352 : index
    %173 = vector.load %arg19[%c0_146, %c352] : memref<8x1152xf32, #tpu.memory_space<vmem>>, vector<8x32xf32>
    %c11 = arith.constant 11 : index
    %c0_147 = arith.constant 0 : index
    %c0_148 = arith.constant 0 : index
    %174 = vector.load %arg20[%c11, %c0_147, %c0_148] : memref<12x8x32xf32, #tpu.memory_space<vmem>>, vector<1x8x32xf32>
    %175 = vector.shape_cast %174 : vector<1x8x32xf32> to vector<8x32xf32>
    %176 = vector.shape_cast %173 : vector<8x32xf32> to vector<1x8x32xf32>
    tpu.vector_store %arg20[%c11, %c0_147, %c0_148], %176 {strides = array<i32>} : memref<12x8x32xf32, #tpu.memory_space<vmem>>, vector<1x8x32xf32>,
    %c0_149 = arith.constant 0 : index
    %c736 = arith.constant 736 : index
    %177 = vector.load %arg19[%c0_149, %c736] : memref<8x1152xf32, #tpu.memory_space<vmem>>, vector<8x32xf32>
    %c11_150 = arith.constant 11 : index
    %c0_151 = arith.constant 0 : index
    %c0_152 = arith.constant 0 : index
    %178 = vector.load %arg21[%c11_150, %c0_151, %c0_152] : memref<12x8x32xf32, #tpu.memory_space<vmem>>, vector<1x8x32xf32>
    %179 = vector.shape_cast %178 : vector<1x8x32xf32> to vector<8x32xf32>
    %180 = vector.shape_cast %177 : vector<8x32xf32> to vector<1x8x32xf32>
    tpu.vector_store %arg21[%c11_150, %c0_151, %c0_152], %180 {strides = array<i32>} : memref<12x8x32xf32, #tpu.memory_space<vmem>>, vector<1x8x32xf32>,
    %c0_153 = arith.constant 0 : index
    %c1120 = arith.constant 1120 : index
    %181 = vector.load %arg19[%c0_153, %c1120] : memref<8x1152xf32, #tpu.memory_space<vmem>>, vector<8x32xf32>
    %c11_154 = arith.constant 11 : index
    %c0_155 = arith.constant 0 : index
    %c0_156 = arith.constant 0 : index
    %182 = vector.load %arg22[%c11_154, %c0_155, %c0_156] : memref<12x8x32xf32, #tpu.memory_space<vmem>>, vector<1x8x32xf32>
    %183 = vector.shape_cast %182 : vector<1x8x32xf32> to vector<8x32xf32>
    %184 = vector.shape_cast %181 : vector<8x32xf32> to vector<1x8x32xf32>
    tpu.vector_store %arg22[%c11_154, %c0_155, %c0_156], %184 {strides = array<i32>} : memref<12x8x32xf32, #tpu.memory_space<vmem>>, vector<1x8x32xf32>,
    %c0_157 = arith.constant 0 : index
    %c0_158 = arith.constant 0 : index
    %c0_159 = arith.constant 0 : index
    %185 = vector.load %arg20[%c0_157, %c0_158, %c0_159] : memref<12x8x32xf32, #tpu.memory_space<vmem>>, vector<12x8x32xf32>
    %186 = arith.truncf %185 : vector<12x8x32xf32> to vector<12x8x32xbf16>
    %c0_160 = arith.constant 0 : index
    %c0_161 = arith.constant 0 : index
    %c0_162 = arith.constant 0 : index
    %187 = vector.load %arg21[%c0_160, %c0_161, %c0_162] : memref<12x8x32xf32, #tpu.memory_space<vmem>>, vector<12x8x32xf32>
    %188 = arith.truncf %187 : vector<12x8x32xf32> to vector<12x8x32xbf16>
    %c0_163 = arith.constant 0 : index
    %c0_164 = arith.constant 0 : index
    %c0_165 = arith.constant 0 : index
    %189 = vector.load %arg22[%c0_163, %c0_164, %c0_165] : memref<12x8x32xf32, #tpu.memory_space<vmem>>, vector<12x8x32xf32>
    %190 = arith.truncf %189 : vector<12x8x32xf32> to vector<12x8x32xbf16>
    "tpu.trace_start"() <{level = 10 : i32, message = "htd,hsd->hts"}> : () -> ()
    %cst_166 = arith.constant dense<0.000000e+00> : vector<12x8x8xf32>
    %191 = tpu.matmul %186, %188, %cst_166 {dimension_numbers = #tpu.dot_dimension_numbers<[2], [2], [1], [1], [0, 0, 0, 1, 1, 1], [0], [0]>} : vector<12x8x32xbf16>, vector<12x8x32xbf16>, vector<12x8x8xf32> -> vector<12x8x8xf32>
    "tpu.trace_stop"() : () -> ()
    %cst_167 = arith.constant dense<0xFF800000> : vector<12x8xf32>
    %192 = vector.multi_reduction <maximumf>, %191, %cst_167 [2] : vector<12x8x8xf32> to vector<12x8xf32>
    %193 = vector.shape_cast %192 : vector<12x8xf32> to vector<12x8x1xf32>
    %194 = vector.broadcast %193 : vector<12x8x1xf32> to vector<12x8x8xf32>
    %195 = arith.subf %191, %194 : vector<12x8x8xf32>
    %196 = math.exp %195 : vector<12x8x8xf32>
    %cst_168 = arith.constant dense<0.000000e+00> : vector<12x8xf32>
    %197 = vector.multi_reduction <add>, %196, %cst_168 [2] : vector<12x8x8xf32> to vector<12x8xf32>
    %198 = vector.shape_cast %197 : vector<12x8xf32> to vector<12x8x1xf32>
    %199 = tpu.reciprocal %198 {approx = true} : vector<12x8x1xf32> -> vector<12x8x1xf32>
    %200 = vector.broadcast %199 : vector<12x8x1xf32> to vector<12x8x8xf32>
    %201 = arith.mulf %196, %200 : vector<12x8x8xf32>
    %202 = arith.truncf %201 : vector<12x8x8xf32> to vector<12x8x8xbf16>
    "tpu.trace_start"() <{level = 10 : i32, message = "hts,hsd->htd"}> : () -> ()
    %cst_169 = arith.constant dense<0.000000e+00> : vector<12x8x32xf32>
    %203 = tpu.matmul %202, %190, %cst_169 {dimension_numbers = #tpu.dot_dimension_numbers<[2], [1], [1], [2], [0, 0, 0, 1, 1, 2], [0], [0]>} : vector<12x8x8xbf16>, vector<12x8x32xbf16>, vector<12x8x32xf32> -> vector<12x8x32xf32>
    "tpu.trace_stop"() : () -> ()
    %204 = vector.extract_strided_slice %203 {offsets = [0, 0, 0], sizes = [1, 8, 32], strides = [1, 1, 1]} : vector<12x8x32xf32> to vector<1x8x32xf32>
    %205 = vector.shape_cast %204 : vector<1x8x32xf32> to vector<8x32xf32>
    %c0_170 = arith.constant 0 : index
    %c0_171 = arith.constant 0 : index
    %206 = vector.load %arg23[%c0_170, %c0_171] : memref<8x384xf32, #tpu.memory_space<vmem>>, vector<8x32xf32>
    tpu.vector_store %arg23[%c0_170, %c0_171], %205 {strides = array<i32>} : memref<8x384xf32, #tpu.memory_space<vmem>>, vector<8x32xf32>,
    %207 = vector.extract_strided_slice %203 {offsets = [1, 0, 0], sizes = [1, 8, 32], strides = [1, 1, 1]} : vector<12x8x32xf32> to vector<1x8x32xf32>
    %208 = vector.shape_cast %207 : vector<1x8x32xf32> to vector<8x32xf32>
    %c0_172 = arith.constant 0 : index
    %c32_173 = arith.constant 32 : index
    %209 = vector.load %arg23[%c0_172, %c32_173] : memref<8x384xf32, #tpu.memory_space<vmem>>, vector<8x32xf32>
    tpu.vector_store %arg23[%c0_172, %c32_173], %208 {strides = array<i32>} : memref<8x384xf32, #tpu.memory_space<vmem>>, vector<8x32xf32>,
    %210 = vector.extract_strided_slice %203 {offsets = [2, 0, 0], sizes = [1, 8, 32], strides = [1, 1, 1]} : vector<12x8x32xf32> to vector<1x8x32xf32>
    %211 = vector.shape_cast %210 : vector<1x8x32xf32> to vector<8x32xf32>
    %c0_174 = arith.constant 0 : index
    %c64_175 = arith.constant 64 : index
    %212 = vector.load %arg23[%c0_174, %c64_175] : memref<8x384xf32, #tpu.memory_space<vmem>>, vector<8x32xf32>
    tpu.vector_store %arg23[%c0_174, %c64_175], %211 {strides = array<i32>} : memref<8x384xf32, #tpu.memory_space<vmem>>, vector<8x32xf32>,
    %213 = vector.extract_strided_slice %203 {offsets = [3, 0, 0], sizes = [1, 8, 32], strides = [1, 1, 1]} : vector<12x8x32xf32> to vector<1x8x32xf32>
    %214 = vector.shape_cast %213 : vector<1x8x32xf32> to vector<8x32xf32>
    %c0_176 = arith.constant 0 : index
    %c96_177 = arith.constant 96 : index
    %215 = vector.load %arg23[%c0_176, %c96_177] : memref<8x384xf32, #tpu.memory_space<vmem>>, vector<8x32xf32>
    tpu.vector_store %arg23[%c0_176, %c96_177], %214 {strides = array<i32>} : memref<8x384xf32, #tpu.memory_space<vmem>>, vector<8x32xf32>,
    %216 = vector.extract_strided_slice %203 {offsets = [4, 0, 0], sizes = [1, 8, 32], strides = [1, 1, 1]} : vector<12x8x32xf32> to vector<1x8x32xf32>
    %217 = vector.shape_cast %216 : vector<1x8x32xf32> to vector<8x32xf32>
    %c0_178 = arith.constant 0 : index
    %c128_179 = arith.constant 128 : index
    %218 = vector.load %arg23[%c0_178, %c128_179] : memref<8x384xf32, #tpu.memory_space<vmem>>, vector<8x32xf32>
    tpu.vector_store %arg23[%c0_178, %c128_179], %217 {strides = array<i32>} : memref<8x384xf32, #tpu.memory_space<vmem>>, vector<8x32xf32>,
    %219 = vector.extract_strided_slice %203 {offsets = [5, 0, 0], sizes = [1, 8, 32], strides = [1, 1, 1]} : vector<12x8x32xf32> to vector<1x8x32xf32>
    %220 = vector.shape_cast %219 : vector<1x8x32xf32> to vector<8x32xf32>
    %c0_180 = arith.constant 0 : index
    %c160_181 = arith.constant 160 : index
    %221 = vector.load %arg23[%c0_180, %c160_181] : memref<8x384xf32, #tpu.memory_space<vmem>>, vector<8x32xf32>
    tpu.vector_store %arg23[%c0_180, %c160_181], %220 {strides = array<i32>} : memref<8x384xf32, #tpu.memory_space<vmem>>, vector<8x32xf32>,
    %222 = vector.extract_strided_slice %203 {offsets = [6, 0, 0], sizes = [1, 8, 32], strides = [1, 1, 1]} : vector<12x8x32xf32> to vector<1x8x32xf32>
    %223 = vector.shape_cast %222 : vector<1x8x32xf32> to vector<8x32xf32>
    %c0_182 = arith.constant 0 : index
    %c192_183 = arith.constant 192 : index
    %224 = vector.load %arg23[%c0_182, %c192_183] : memref<8x384xf32, #tpu.memory_space<vmem>>, vector<8x32xf32>
    tpu.vector_store %arg23[%c0_182, %c192_183], %223 {strides = array<i32>} : memref<8x384xf32, #tpu.memory_space<vmem>>, vector<8x32xf32>,
    %225 = vector.extract_strided_slice %203 {offsets = [7, 0, 0], sizes = [1, 8, 32], strides = [1, 1, 1]} : vector<12x8x32xf32> to vector<1x8x32xf32>
    %226 = vector.shape_cast %225 : vector<1x8x32xf32> to vector<8x32xf32>
    %c0_184 = arith.constant 0 : index
    %c224_185 = arith.constant 224 : index
    %227 = vector.load %arg23[%c0_184, %c224_185] : memref<8x384xf32, #tpu.memory_space<vmem>>, vector<8x32xf32>
    tpu.vector_store %arg23[%c0_184, %c224_185], %226 {strides = array<i32>} : memref<8x384xf32, #tpu.memory_space<vmem>>, vector<8x32xf32>,
    %228 = vector.extract_strided_slice %203 {offsets = [8, 0, 0], sizes = [1, 8, 32], strides = [1, 1, 1]} : vector<12x8x32xf32> to vector<1x8x32xf32>
    %229 = vector.shape_cast %228 : vector<1x8x32xf32> to vector<8x32xf32>
    %c0_186 = arith.constant 0 : index
    %c256_187 = arith.constant 256 : index
    %230 = vector.load %arg23[%c0_186, %c256_187] : memref<8x384xf32, #tpu.memory_space<vmem>>, vector<8x32xf32>
    tpu.vector_store %arg23[%c0_186, %c256_187], %229 {strides = array<i32>} : memref<8x384xf32, #tpu.memory_space<vmem>>, vector<8x32xf32>,
    %231 = vector.extract_strided_slice %203 {offsets = [9, 0, 0], sizes = [1, 8, 32], strides = [1, 1, 1]} : vector<12x8x32xf32> to vector<1x8x32xf32>
    %232 = vector.shape_cast %231 : vector<1x8x32xf32> to vector<8x32xf32>
    %c0_188 = arith.constant 0 : index
    %c288_189 = arith.constant 288 : index
    %233 = vector.load %arg23[%c0_188, %c288_189] : memref<8x384xf32, #tpu.memory_space<vmem>>, vector<8x32xf32>
    tpu.vector_store %arg23[%c0_188, %c288_189], %232 {strides = array<i32>} : memref<8x384xf32, #tpu.memory_space<vmem>>, vector<8x32xf32>,
    %234 = vector.extract_strided_slice %203 {offsets = [10, 0, 0], sizes = [1, 8, 32], strides = [1, 1, 1]} : vector<12x8x32xf32> to vector<1x8x32xf32>
    %235 = vector.shape_cast %234 : vector<1x8x32xf32> to vector<8x32xf32>
    %c0_190 = arith.constant 0 : index
    %c320_191 = arith.constant 320 : index
    %236 = vector.load %arg23[%c0_190, %c320_191] : memref<8x384xf32, #tpu.memory_space<vmem>>, vector<8x32xf32>
    tpu.vector_store %arg23[%c0_190, %c320_191], %235 {strides = array<i32>} : memref<8x384xf32, #tpu.memory_space<vmem>>, vector<8x32xf32>,
    %237 = vector.extract_strided_slice %203 {offsets = [11, 0, 0], sizes = [1, 8, 32], strides = [1, 1, 1]} : vector<12x8x32xf32> to vector<1x8x32xf32>
    %238 = vector.shape_cast %237 : vector<1x8x32xf32> to vector<8x32xf32>
    %c0_192 = arith.constant 0 : index
    %c352_193 = arith.constant 352 : index
    %239 = vector.load %arg23[%c0_192, %c352_193] : memref<8x384xf32, #tpu.memory_space<vmem>>, vector<8x32xf32>
    tpu.vector_store %arg23[%c0_192, %c352_193], %238 {strides = array<i32>} : memref<8x384xf32, #tpu.memory_space<vmem>>, vector<8x32xf32>,
    %c0_194 = arith.constant 0 : index
    %c0_195 = arith.constant 0 : index
    %240 = vector.load %arg23[%c0_194, %c0_195] : memref<8x384xf32, #tpu.memory_space<vmem>>, vector<8x384xf32>
    %241 = arith.truncf %240 : vector<8x384xf32> to vector<8x384xbf16>
    %c0_196 = arith.constant 0 : index
    %c0_197 = arith.constant 0 : index
    %242 = vector.load %arg8[%c0_196, %c0_197] : memref<384x256xbf16, #tpu.memory_space<vmem>>, vector<384x256xbf16>
    %cst_198 = arith.constant dense<0.000000e+00> : vector<8x256xf32>
    %243 = tpu.matmul %241, %242, %cst_198 {dimension_numbers = #tpu.dot_dimension_numbers<[1], [0], [0], [1], [0, 0, 1, 1], [], []>} : vector<8x384xbf16>, vector<384x256xbf16>, vector<8x256xf32> -> vector<8x256xf32>
    %c0_199 = arith.constant 0 : index
    %c0_200 = arith.constant 0 : index
    %244 = vector.load %arg9[%c0_199, %c0_200] : memref<1x256xf32, #tpu.memory_space<vmem>>, vector<1x256xf32>
    %245 = vector.broadcast %244 : vector<1x256xf32> to vector<8x256xf32>
    %246 = arith.addf %243, %245 : vector<8x256xf32>
    %247 = arith.addf %1, %246 : vector<8x256xf32>
    %248 = arith.truncf %247 : vector<8x256xf32> to vector<8x256xbf16>
    %c0_201 = arith.constant 0 : index
    %c0_202 = arith.constant 0 : index
    %249 = vector.load %arg14[%c0_201, %c0_202] : memref<256x1024xbf16, #tpu.memory_space<vmem>>, vector<256x1024xbf16>
    %cst_203 = arith.constant dense<0.000000e+00> : vector<8x1024xf32>
    %250 = tpu.matmul %248, %249, %cst_203 {dimension_numbers = #tpu.dot_dimension_numbers<[1], [0], [0], [1], [0, 0, 1, 1], [], []>} : vector<8x256xbf16>, vector<256x1024xbf16>, vector<8x1024xf32> -> vector<8x1024xf32>
    %c0_204 = arith.constant 0 : index
    %c0_205 = arith.constant 0 : index
    %251 = vector.load %arg15[%c0_204, %c0_205] : memref<1x1024xf32, #tpu.memory_space<vmem>>, vector<1x1024xf32>
    %252 = vector.broadcast %251 : vector<1x1024xf32> to vector<8x1024xf32>
    %253 = arith.addf %250, %252 : vector<8x1024xf32>
    %cst_206 = arith.constant 5.000000e-01 : f32
    %254 = vector.broadcast %cst_206 : f32 to vector<8x1024xf32>
    %255 = arith.mulf %254, %253 : vector<8x1024xf32>
    %cst_207 = arith.constant 0.707106769 : f32
    %256 = vector.broadcast %cst_207 : f32 to vector<8x1024xf32>
    %257 = arith.mulf %253, %256 : vector<8x1024xf32>
    %258 = math.erf %257 : vector<8x1024xf32>
    %cst_208 = arith.constant 1.000000e+00 : f32
    %259 = vector.broadcast %cst_208 : f32 to vector<8x1024xf32>
    %260 = arith.addf %259, %258 : vector<8x1024xf32>
    %261 = arith.mulf %255, %260 : vector<8x1024xf32>
    %262 = arith.truncf %261 : vector<8x1024xf32> to vector<8x1024xbf16>
    %c0_209 = arith.constant 0 : index
    %c0_210 = arith.constant 0 : index
    %263 = vector.load %arg16[%c0_209, %c0_210] : memref<1024x256xbf16, #tpu.memory_space<vmem>>, vector<1024x256xbf16>
    %cst_211 = arith.constant dense<0.000000e+00> : vector<8x256xf32>
    %264 = tpu.matmul %262, %263, %cst_211 {dimension_numbers = #tpu.dot_dimension_numbers<[1], [0], [0], [1], [0, 0, 1, 1], [], []>} : vector<8x1024xbf16>, vector<1024x256xbf16>, vector<8x256xf32> -> vector<8x256xf32>
    %c0_212 = arith.constant 0 : index
    %c0_213 = arith.constant 0 : index
    %265 = vector.load %arg17[%c0_212, %c0_213] : memref<1x256xf32, #tpu.memory_space<vmem>>, vector<1x256xf32>
    %266 = vector.broadcast %265 : vector<1x256xf32> to vector<8x256xf32>
    %267 = arith.addf %264, %266 : vector<8x256xf32>
    %cst_214 = arith.constant dense<0.000000e+00> : vector<8xf32>
    %268 = vector.multi_reduction <add>, %267, %cst_214 [1] : vector<8x256xf32> to vector<8xf32>
    %269 = vector.shape_cast %268 : vector<8xf32> to vector<8x1xf32>
    %cst_215 = arith.constant 2.560000e+02 : f32
    %270 = vector.broadcast %cst_215 : f32 to vector<8x1xf32>
    %271 = arith.divf %269, %270 : vector<8x1xf32>
    %272 = vector.broadcast %271 : vector<8x1xf32> to vector<8x256xf32>
    %273 = arith.subf %267, %272 : vector<8x256xf32>
    %274 = arith.mulf %273, %273 : vector<8x256xf32>
    %cst_216 = arith.constant dense<0.000000e+00> : vector<8xf32>
    %275 = vector.multi_reduction <add>, %274, %cst_216 [1] : vector<8x256xf32> to vector<8xf32>
    %276 = vector.shape_cast %275 : vector<8xf32> to vector<8x1xf32>
    %cst_217 = arith.constant 2.560000e+02 : f32
    %277 = vector.broadcast %cst_217 : f32 to vector<8x1xf32>
    %278 = arith.divf %276, %277 : vector<8x1xf32>
    %279 = vector.broadcast %271 : vector<8x1xf32> to vector<8x256xf32>
    %280 = arith.subf %267, %279 : vector<8x256xf32>
    %cst_218 = arith.constant 9.99999974E-6 : f32
    %281 = vector.broadcast %cst_218 : f32 to vector<8x1xf32>
    %282 = arith.addf %278, %281 : vector<8x1xf32>
    %283 = math.rsqrt %282 : vector<8x1xf32>
    %284 = vector.broadcast %283 : vector<8x1xf32> to vector<8x256xf32>
    %285 = arith.mulf %280, %284 : vector<8x256xf32>
    %286 = vector.broadcast %4 : vector<1x256xf32> to vector<8x256xf32>
    %287 = arith.mulf %285, %286 : vector<8x256xf32>
    %288 = vector.broadcast %5 : vector<1x256xf32> to vector<8x256xf32>
    %289 = arith.addf %287, %288 : vector<8x256xf32>
    %290 = arith.addf %247, %289 : vector<8x256xf32>
    %cst_219 = arith.constant dense<0.000000e+00> : vector<8xf32>
    %291 = vector.multi_reduction <add>, %290, %cst_219 [1] : vector<8x256xf32> to vector<8xf32>
    %292 = vector.shape_cast %291 : vector<8xf32> to vector<8x1xf32>
    %cst_220 = arith.constant 2.560000e+02 : f32
    %293 = vector.broadcast %cst_220 : f32 to vector<8x1xf32>
    %294 = arith.divf %292, %293 : vector<8x1xf32>
    %295 = vector.broadcast %294 : vector<8x1xf32> to vector<8x256xf32>
    %296 = arith.subf %290, %295 : vector<8x256xf32>
    %297 = arith.mulf %296, %296 : vector<8x256xf32>
    %cst_221 = arith.constant dense<0.000000e+00> : vector<8xf32>
    %298 = vector.multi_reduction <add>, %297, %cst_221 [1] : vector<8x256xf32> to vector<8xf32>
    %299 = vector.shape_cast %298 : vector<8xf32> to vector<8x1xf32>
    %cst_222 = arith.constant 2.560000e+02 : f32
    %300 = vector.broadcast %cst_222 : f32 to vector<8x1xf32>
    %301 = arith.divf %299, %300 : vector<8x1xf32>
    %302 = vector.broadcast %294 : vector<8x1xf32> to vector<8x256xf32>
    %303 = arith.subf %290, %302 : vector<8x256xf32>
    %cst_223 = arith.constant 9.99999974E-6 : f32
    %304 = vector.broadcast %cst_223 : f32 to vector<8x1xf32>
    %305 = arith.addf %301, %304 : vector<8x1xf32>
    %306 = math.rsqrt %305 : vector<8x1xf32>
    %307 = vector.broadcast %306 : vector<8x1xf32> to vector<8x256xf32>
    %308 = arith.mulf %303, %307 : vector<8x256xf32>
    %309 = vector.broadcast %2 : vector<1x256xf32> to vector<8x256xf32>
    %310 = arith.mulf %308, %309 : vector<8x256xf32>
    %311 = vector.broadcast %3 : vector<1x256xf32> to vector<8x256xf32>
    %312 = arith.addf %310, %311 : vector<8x256xf32>
    %313 = arith.truncf %312 : vector<8x256xf32> to vector<8x256xbf16>
    %c0_224 = arith.constant 0 : index
    %c0_225 = arith.constant 0 : index
    %314 = vector.load %arg10[%c0_224, %c0_225] : memref<256x1152xbf16, #tpu.memory_space<vmem>>, vector<256x1152xbf16>
    %cst_226 = arith.constant dense<0.000000e+00> : vector<8x1152xf32>
    %315 = tpu.matmul %313, %314, %cst_226 {dimension_numbers = #tpu.dot_dimension_numbers<[1], [0], [0], [1], [0, 0, 1, 1], [], []>} : vector<8x256xbf16>, vector<256x1152xbf16>, vector<8x1152xf32> -> vector<8x1152xf32>
    %c0_227 = arith.constant 0 : index
    %c0_228 = arith.constant 0 : index
    %316 = vector.load %arg11[%c0_227, %c0_228] : memref<1x1152xf32, #tpu.memory_space<vmem>>, vector<1x1152xf32>
    %317 = vector.broadcast %316 : vector<1x1152xf32> to vector<8x1152xf32>
    %318 = arith.addf %315, %317 : vector<8x1152xf32>
    %c0_229 = arith.constant 0 : index
    %c0_230 = arith.constant 0 : index
    %319 = vector.load %arg19[%c0_229, %c0_230] : memref<8x1152xf32, #tpu.memory_space<vmem>>, vector<8x1152xf32>
    tpu.vector_store %arg19[%c0_229, %c0_230], %318 {strides = array<i32>} : memref<8x1152xf32, #tpu.memory_space<vmem>>, vector<8x1152xf32>,
    %c0_231 = arith.constant 0 : index
    %c0_232 = arith.constant 0 : index
    %320 = vector.load %arg19[%c0_231, %c0_232] : memref<8x1152xf32, #tpu.memory_space<vmem>>, vector<8x32xf32>
    %c0_233 = arith.constant 0 : index
    %c0_234 = arith.constant 0 : index
    %c0_235 = arith.constant 0 : index
    %321 = vector.load %arg20[%c0_233, %c0_234, %c0_235] : memref<12x8x32xf32, #tpu.memory_space<vmem>>, vector<1x8x32xf32>
    %322 = vector.shape_cast %321 : vector<1x8x32xf32> to vector<8x32xf32>
    %323 = vector.shape_cast %320 : vector<8x32xf32> to vector<1x8x32xf32>
    tpu.vector_store %arg20[%c0_233, %c0_234, %c0_235], %323 {strides = array<i32>} : memref<12x8x32xf32, #tpu.memory_space<vmem>>, vector<1x8x32xf32>,
    %c0_236 = arith.constant 0 : index
    %c384_237 = arith.constant 384 : index
    %324 = vector.load %arg19[%c0_236, %c384_237] : memref<8x1152xf32, #tpu.memory_space<vmem>>, vector<8x32xf32>
    %c0_238 = arith.constant 0 : index
    %c0_239 = arith.constant 0 : index
    %c0_240 = arith.constant 0 : index
    %325 = vector.load %arg21[%c0_238, %c0_239, %c0_240] : memref<12x8x32xf32, #tpu.memory_space<vmem>>, vector<1x8x32xf32>
    %326 = vector.shape_cast %325 : vector<1x8x32xf32> to vector<8x32xf32>
    %327 = vector.shape_cast %324 : vector<8x32xf32> to vector<1x8x32xf32>
    tpu.vector_store %arg21[%c0_238, %c0_239, %c0_240], %327 {strides = array<i32>} : memref<12x8x32xf32, #tpu.memory_space<vmem>>, vector<1x8x32xf32>,
    %c0_241 = arith.constant 0 : index
    %c768_242 = arith.constant 768 : index
    %328 = vector.load %arg19[%c0_241, %c768_242] : memref<8x1152xf32, #tpu.memory_space<vmem>>, vector<8x32xf32>
    %c0_243 = arith.constant 0 : index
    %c0_244 = arith.constant 0 : index
    %c0_245 = arith.constant 0 : index
    %329 = vector.load %arg22[%c0_243, %c0_244, %c0_245] : memref<12x8x32xf32, #tpu.memory_space<vmem>>, vector<1x8x32xf32>
    %330 = vector.shape_cast %329 : vector<1x8x32xf32> to vector<8x32xf32>
    %331 = vector.shape_cast %328 : vector<8x32xf32> to vector<1x8x32xf32>
    tpu.vector_store %arg22[%c0_243, %c0_244, %c0_245], %331 {strides = array<i32>} : memref<12x8x32xf32, #tpu.memory_space<vmem>>, vector<1x8x32xf32>,
    %c0_246 = arith.constant 0 : index
    %c32_247 = arith.constant 32 : index
    %332 = vector.load %arg19[%c0_246, %c32_247] : memref<8x1152xf32, #tpu.memory_space<vmem>>, vector<8x32xf32>
    %c1_248 = arith.constant 1 : index
    %c0_249 = arith.constant 0 : index
    %c0_250 = arith.constant 0 : index
    %333 = vector.load %arg20[%c1_248, %c0_249, %c0_250] : memref<12x8x32xf32, #tpu.memory_space<vmem>>, vector<1x8x32xf32>
    %334 = vector.shape_cast %333 : vector<1x8x32xf32> to vector<8x32xf32>
    %335 = vector.shape_cast %332 : vector<8x32xf32> to vector<1x8x32xf32>
    tpu.vector_store %arg20[%c1_248, %c0_249, %c0_250], %335 {strides = array<i32>} : memref<12x8x32xf32, #tpu.memory_space<vmem>>, vector<1x8x32xf32>,
    %c0_251 = arith.constant 0 : index
    %c416_252 = arith.constant 416 : index
    %336 = vector.load %arg19[%c0_251, %c416_252] : memref<8x1152xf32, #tpu.memory_space<vmem>>, vector<8x32xf32>
    %c1_253 = arith.constant 1 : index
    %c0_254 = arith.constant 0 : index
    %c0_255 = arith.constant 0 : index
    %337 = vector.load %arg21[%c1_253, %c0_254, %c0_255] : memref<12x8x32xf32, #tpu.memory_space<vmem>>, vector<1x8x32xf32>
    %338 = vector.shape_cast %337 : vector<1x8x32xf32> to vector<8x32xf32>
    %339 = vector.shape_cast %336 : vector<8x32xf32> to vector<1x8x32xf32>
    tpu.vector_store %arg21[%c1_253, %c0_254, %c0_255], %339 {strides = array<i32>} : memref<12x8x32xf32, #tpu.memory_space<vmem>>, vector<1x8x32xf32>,
    %c0_256 = arith.constant 0 : index
    %c800_257 = arith.constant 800 : index
    %340 = vector.load %arg19[%c0_256, %c800_257] : memref<8x1152xf32, #tpu.memory_space<vmem>>, vector<8x32xf32>
    %c1_258 = arith.constant 1 : index
    %c0_259 = arith.constant 0 : index
    %c0_260 = arith.constant 0 : index
    %341 = vector.load %arg22[%c1_258, %c0_259, %c0_260] : memref<12x8x32xf32, #tpu.memory_space<vmem>>, vector<1x8x32xf32>
    %342 = vector.shape_cast %341 : vector<1x8x32xf32> to vector<8x32xf32>
    %343 = vector.shape_cast %340 : vector<8x32xf32> to vector<1x8x32xf32>
    tpu.vector_store %arg22[%c1_258, %c0_259, %c0_260], %343 {strides = array<i32>} : memref<12x8x32xf32, #tpu.memory_space<vmem>>, vector<1x8x32xf32>,
    %c0_261 = arith.constant 0 : index
    %c64_262 = arith.constant 64 : index
    %344 = vector.load %arg19[%c0_261, %c64_262] : memref<8x1152xf32, #tpu.memory_space<vmem>>, vector<8x32xf32>
    %c2_263 = arith.constant 2 : index
    %c0_264 = arith.constant 0 : index
    %c0_265 = arith.constant 0 : index
    %345 = vector.load %arg20[%c2_263, %c0_264, %c0_265] : memref<12x8x32xf32, #tpu.memory_space<vmem>>, vector<1x8x32xf32>
    %346 = vector.shape_cast %345 : vector<1x8x32xf32> to vector<8x32xf32>
    %347 = vector.shape_cast %344 : vector<8x32xf32> to vector<1x8x32xf32>
    tpu.vector_store %arg20[%c2_263, %c0_264, %c0_265], %347 {strides = array<i32>} : memref<12x8x32xf32, #tpu.memory_space<vmem>>, vector<1x8x32xf32>,
    %c0_266 = arith.constant 0 : index
    %c448_267 = arith.constant 448 : index
    %348 = vector.load %arg19[%c0_266, %c448_267] : memref<8x1152xf32, #tpu.memory_space<vmem>>, vector<8x32xf32>
    %c2_268 = arith.constant 2 : index
    %c0_269 = arith.constant 0 : index
    %c0_270 = arith.constant 0 : index
    %349 = vector.load %arg21[%c2_268, %c0_269, %c0_270] : memref<12x8x32xf32, #tpu.memory_space<vmem>>, vector<1x8x32xf32>
    %350 = vector.shape_cast %349 : vector<1x8x32xf32> to vector<8x32xf32>
    %351 = vector.shape_cast %348 : vector<8x32xf32> to vector<1x8x32xf32>
    tpu.vector_store %arg21[%c2_268, %c0_269, %c0_270], %351 {strides = array<i32>} : memref<12x8x32xf32, #tpu.memory_space<vmem>>, vector<1x8x32xf32>,
    %c0_271 = arith.constant 0 : index
    %c832_272 = arith.constant 832 : index
    %352 = vector.load %arg19[%c0_271, %c832_272] : memref<8x1152xf32, #tpu.memory_space<vmem>>, vector<8x32xf32>
    %c2_273 = arith.constant 2 : index
    %c0_274 = arith.constant 0 : index
    %c0_275 = arith.constant 0 : index
    %353 = vector.load %arg22[%c2_273, %c0_274, %c0_275] : memref<12x8x32xf32, #tpu.memory_space<vmem>>, vector<1x8x32xf32>
    %354 = vector.shape_cast %353 : vector<1x8x32xf32> to vector<8x32xf32>
    %355 = vector.shape_cast %352 : vector<8x32xf32> to vector<1x8x32xf32>
    tpu.vector_store %arg22[%c2_273, %c0_274, %c0_275], %355 {strides = array<i32>} : memref<12x8x32xf32, #tpu.memory_space<vmem>>, vector<1x8x32xf32>,
    %c0_276 = arith.constant 0 : index
    %c96_277 = arith.constant 96 : index
    %356 = vector.load %arg19[%c0_276, %c96_277] : memref<8x1152xf32, #tpu.memory_space<vmem>>, vector<8x32xf32>
    %c3_278 = arith.constant 3 : index
    %c0_279 = arith.constant 0 : index
    %c0_280 = arith.constant 0 : index
    %357 = vector.load %arg20[%c3_278, %c0_279, %c0_280] : memref<12x8x32xf32, #tpu.memory_space<vmem>>, vector<1x8x32xf32>
    %358 = vector.shape_cast %357 : vector<1x8x32xf32> to vector<8x32xf32>
    %359 = vector.shape_cast %356 : vector<8x32xf32> to vector<1x8x32xf32>
    tpu.vector_store %arg20[%c3_278, %c0_279, %c0_280], %359 {strides = array<i32>} : memref<12x8x32xf32, #tpu.memory_space<vmem>>, vector<1x8x32xf32>,
    %c0_281 = arith.constant 0 : index
    %c480_282 = arith.constant 480 : index
    %360 = vector.load %arg19[%c0_281, %c480_282] : memref<8x1152xf32, #tpu.memory_space<vmem>>, vector<8x32xf32>
    %c3_283 = arith.constant 3 : index
    %c0_284 = arith.constant 0 : index
    %c0_285 = arith.constant 0 : index
    %361 = vector.load %arg21[%c3_283, %c0_284, %c0_285] : memref<12x8x32xf32, #tpu.memory_space<vmem>>, vector<1x8x32xf32>
    %362 = vector.shape_cast %361 : vector<1x8x32xf32> to vector<8x32xf32>
    %363 = vector.shape_cast %360 : vector<8x32xf32> to vector<1x8x32xf32>
    tpu.vector_store %arg21[%c3_283, %c0_284, %c0_285], %363 {strides = array<i32>} : memref<12x8x32xf32, #tpu.memory_space<vmem>>, vector<1x8x32xf32>,
    %c0_286 = arith.constant 0 : index
    %c864_287 = arith.constant 864 : index
    %364 = vector.load %arg19[%c0_286, %c864_287] : memref<8x1152xf32, #tpu.memory_space<vmem>>, vector<8x32xf32>
    %c3_288 = arith.constant 3 : index
    %c0_289 = arith.constant 0 : index
    %c0_290 = arith.constant 0 : index
    %365 = vector.load %arg22[%c3_288, %c0_289, %c0_290] : memref<12x8x32xf32, #tpu.memory_space<vmem>>, vector<1x8x32xf32>
    %366 = vector.shape_cast %365 : vector<1x8x32xf32> to vector<8x32xf32>
    %367 = vector.shape_cast %364 : vector<8x32xf32> to vector<1x8x32xf32>
    tpu.vector_store %arg22[%c3_288, %c0_289, %c0_290], %367 {strides = array<i32>} : memref<12x8x32xf32, #tpu.memory_space<vmem>>, vector<1x8x32xf32>,
    %c0_291 = arith.constant 0 : index
    %c128_292 = arith.constant 128 : index
    %368 = vector.load %arg19[%c0_291, %c128_292] : memref<8x1152xf32, #tpu.memory_space<vmem>>, vector<8x32xf32>
    %c4_293 = arith.constant 4 : index
    %c0_294 = arith.constant 0 : index
    %c0_295 = arith.constant 0 : index
    %369 = vector.load %arg20[%c4_293, %c0_294, %c0_295] : memref<12x8x32xf32, #tpu.memory_space<vmem>>, vector<1x8x32xf32>
    %370 = vector.shape_cast %369 : vector<1x8x32xf32> to vector<8x32xf32>
    %371 = vector.shape_cast %368 : vector<8x32xf32> to vector<1x8x32xf32>
    tpu.vector_store %arg20[%c4_293, %c0_294, %c0_295], %371 {strides = array<i32>} : memref<12x8x32xf32, #tpu.memory_space<vmem>>, vector<1x8x32xf32>,
    %c0_296 = arith.constant 0 : index
    %c512_297 = arith.constant 512 : index
    %372 = vector.load %arg19[%c0_296, %c512_297] : memref<8x1152xf32, #tpu.memory_space<vmem>>, vector<8x32xf32>
    %c4_298 = arith.constant 4 : index
    %c0_299 = arith.constant 0 : index
    %c0_300 = arith.constant 0 : index
    %373 = vector.load %arg21[%c4_298, %c0_299, %c0_300] : memref<12x8x32xf32, #tpu.memory_space<vmem>>, vector<1x8x32xf32>
    %374 = vector.shape_cast %373 : vector<1x8x32xf32> to vector<8x32xf32>
    %375 = vector.shape_cast %372 : vector<8x32xf32> to vector<1x8x32xf32>
    tpu.vector_store %arg21[%c4_298, %c0_299, %c0_300], %375 {strides = array<i32>} : memref<12x8x32xf32, #tpu.memory_space<vmem>>, vector<1x8x32xf32>,
    %c0_301 = arith.constant 0 : index
    %c896_302 = arith.constant 896 : index
    %376 = vector.load %arg19[%c0_301, %c896_302] : memref<8x1152xf32, #tpu.memory_space<vmem>>, vector<8x32xf32>
    %c4_303 = arith.constant 4 : index
    %c0_304 = arith.constant 0 : index
    %c0_305 = arith.constant 0 : index
    %377 = vector.load %arg22[%c4_303, %c0_304, %c0_305] : memref<12x8x32xf32, #tpu.memory_space<vmem>>, vector<1x8x32xf32>
    %378 = vector.shape_cast %377 : vector<1x8x32xf32> to vector<8x32xf32>
    %379 = vector.shape_cast %376 : vector<8x32xf32> to vector<1x8x32xf32>
    tpu.vector_store %arg22[%c4_303, %c0_304, %c0_305], %379 {strides = array<i32>} : memref<12x8x32xf32, #tpu.memory_space<vmem>>, vector<1x8x32xf32>,
    %c0_306 = arith.constant 0 : index
    %c160_307 = arith.constant 160 : index
    %380 = vector.load %arg19[%c0_306, %c160_307] : memref<8x1152xf32, #tpu.memory_space<vmem>>, vector<8x32xf32>
    %c5_308 = arith.constant 5 : index
    %c0_309 = arith.constant 0 : index
    %c0_310 = arith.constant 0 : index
    %381 = vector.load %arg20[%c5_308, %c0_309, %c0_310] : memref<12x8x32xf32, #tpu.memory_space<vmem>>, vector<1x8x32xf32>
    %382 = vector.shape_cast %381 : vector<1x8x32xf32> to vector<8x32xf32>
    %383 = vector.shape_cast %380 : vector<8x32xf32> to vector<1x8x32xf32>
    tpu.vector_store %arg20[%c5_308, %c0_309, %c0_310], %383 {strides = array<i32>} : memref<12x8x32xf32, #tpu.memory_space<vmem>>, vector<1x8x32xf32>,
    %c0_311 = arith.constant 0 : index
    %c544_312 = arith.constant 544 : index
    %384 = vector.load %arg19[%c0_311, %c544_312] : memref<8x1152xf32, #tpu.memory_space<vmem>>, vector<8x32xf32>
    %c5_313 = arith.constant 5 : index
    %c0_314 = arith.constant 0 : index
    %c0_315 = arith.constant 0 : index
    %385 = vector.load %arg21[%c5_313, %c0_314, %c0_315] : memref<12x8x32xf32, #tpu.memory_space<vmem>>, vector<1x8x32xf32>
    %386 = vector.shape_cast %385 : vector<1x8x32xf32> to vector<8x32xf32>
    %387 = vector.shape_cast %384 : vector<8x32xf32> to vector<1x8x32xf32>
    tpu.vector_store %arg21[%c5_313, %c0_314, %c0_315], %387 {strides = array<i32>} : memref<12x8x32xf32, #tpu.memory_space<vmem>>, vector<1x8x32xf32>,
    %c0_316 = arith.constant 0 : index
    %c928_317 = arith.constant 928 : index
    %388 = vector.load %arg19[%c0_316, %c928_317] : memref<8x1152xf32, #tpu.memory_space<vmem>>, vector<8x32xf32>
    %c5_318 = arith.constant 5 : index
    %c0_319 = arith.constant 0 : index
    %c0_320 = arith.constant 0 : index
    %389 = vector.load %arg22[%c5_318, %c0_319, %c0_320] : memref<12x8x32xf32, #tpu.memory_space<vmem>>, vector<1x8x32xf32>
    %390 = vector.shape_cast %389 : vector<1x8x32xf32> to vector<8x32xf32>
    %391 = vector.shape_cast %388 : vector<8x32xf32> to vector<1x8x32xf32>
    tpu.vector_store %arg22[%c5_318, %c0_319, %c0_320], %391 {strides = array<i32>} : memref<12x8x32xf32, #tpu.memory_space<vmem>>, vector<1x8x32xf32>,
    %c0_321 = arith.constant 0 : index
    %c192_322 = arith.constant 192 : index
    %392 = vector.load %arg19[%c0_321, %c192_322] : memref<8x1152xf32, #tpu.memory_space<vmem>>, vector<8x32xf32>
    %c6_323 = arith.constant 6 : index
    %c0_324 = arith.constant 0 : index
    %c0_325 = arith.constant 0 : index
    %393 = vector.load %arg20[%c6_323, %c0_324, %c0_325] : memref<12x8x32xf32, #tpu.memory_space<vmem>>, vector<1x8x32xf32>
    %394 = vector.shape_cast %393 : vector<1x8x32xf32> to vector<8x32xf32>
    %395 = vector.shape_cast %392 : vector<8x32xf32> to vector<1x8x32xf32>
    tpu.vector_store %arg20[%c6_323, %c0_324, %c0_325], %395 {strides = array<i32>} : memref<12x8x32xf32, #tpu.memory_space<vmem>>, vector<1x8x32xf32>,
    %c0_326 = arith.constant 0 : index
    %c576_327 = arith.constant 576 : index
    %396 = vector.load %arg19[%c0_326, %c576_327] : memref<8x1152xf32, #tpu.memory_space<vmem>>, vector<8x32xf32>
    %c6_328 = arith.constant 6 : index
    %c0_329 = arith.constant 0 : index
    %c0_330 = arith.constant 0 : index
    %397 = vector.load %arg21[%c6_328, %c0_329, %c0_330] : memref<12x8x32xf32, #tpu.memory_space<vmem>>, vector<1x8x32xf32>
    %398 = vector.shape_cast %397 : vector<1x8x32xf32> to vector<8x32xf32>
    %399 = vector.shape_cast %396 : vector<8x32xf32> to vector<1x8x32xf32>
    tpu.vector_store %arg21[%c6_328, %c0_329, %c0_330], %399 {strides = array<i32>} : memref<12x8x32xf32, #tpu.memory_space<vmem>>, vector<1x8x32xf32>,
    %c0_331 = arith.constant 0 : index
    %c960_332 = arith.constant 960 : index
    %400 = vector.load %arg19[%c0_331, %c960_332] : memref<8x1152xf32, #tpu.memory_space<vmem>>, vector<8x32xf32>
    %c6_333 = arith.constant 6 : index
    %c0_334 = arith.constant 0 : index
    %c0_335 = arith.constant 0 : index
    %401 = vector.load %arg22[%c6_333, %c0_334, %c0_335] : memref<12x8x32xf32, #tpu.memory_space<vmem>>, vector<1x8x32xf32>
    %402 = vector.shape_cast %401 : vector<1x8x32xf32> to vector<8x32xf32>
    %403 = vector.shape_cast %400 : vector<8x32xf32> to vector<1x8x32xf32>
    tpu.vector_store %arg22[%c6_333, %c0_334, %c0_335], %403 {strides = array<i32>} : memref<12x8x32xf32, #tpu.memory_space<vmem>>, vector<1x8x32xf32>,
    %c0_336 = arith.constant 0 : index
    %c224_337 = arith.constant 224 : index
    %404 = vector.load %arg19[%c0_336, %c224_337] : memref<8x1152xf32, #tpu.memory_space<vmem>>, vector<8x32xf32>
    %c7_338 = arith.constant 7 : index
    %c0_339 = arith.constant 0 : index
    %c0_340 = arith.constant 0 : index
    %405 = vector.load %arg20[%c7_338, %c0_339, %c0_340] : memref<12x8x32xf32, #tpu.memory_space<vmem>>, vector<1x8x32xf32>
    %406 = vector.shape_cast %405 : vector<1x8x32xf32> to vector<8x32xf32>
    %407 = vector.shape_cast %404 : vector<8x32xf32> to vector<1x8x32xf32>
    tpu.vector_store %arg20[%c7_338, %c0_339, %c0_340], %407 {strides = array<i32>} : memref<12x8x32xf32, #tpu.memory_space<vmem>>, vector<1x8x32xf32>,
    %c0_341 = arith.constant 0 : index
    %c608_342 = arith.constant 608 : index
    %408 = vector.load %arg19[%c0_341, %c608_342] : memref<8x1152xf32, #tpu.memory_space<vmem>>, vector<8x32xf32>
    %c7_343 = arith.constant 7 : index
    %c0_344 = arith.constant 0 : index
    %c0_345 = arith.constant 0 : index
    %409 = vector.load %arg21[%c7_343, %c0_344, %c0_345] : memref<12x8x32xf32, #tpu.memory_space<vmem>>, vector<1x8x32xf32>
    %410 = vector.shape_cast %409 : vector<1x8x32xf32> to vector<8x32xf32>
    %411 = vector.shape_cast %408 : vector<8x32xf32> to vector<1x8x32xf32>
    tpu.vector_store %arg21[%c7_343, %c0_344, %c0_345], %411 {strides = array<i32>} : memref<12x8x32xf32, #tpu.memory_space<vmem>>, vector<1x8x32xf32>,
    %c0_346 = arith.constant 0 : index
    %c992_347 = arith.constant 992 : index
    %412 = vector.load %arg19[%c0_346, %c992_347] : memref<8x1152xf32, #tpu.memory_space<vmem>>, vector<8x32xf32>
    %c7_348 = arith.constant 7 : index
    %c0_349 = arith.constant 0 : index
    %c0_350 = arith.constant 0 : index
    %413 = vector.load %arg22[%c7_348, %c0_349, %c0_350] : memref<12x8x32xf32, #tpu.memory_space<vmem>>, vector<1x8x32xf32>
    %414 = vector.shape_cast %413 : vector<1x8x32xf32> to vector<8x32xf32>
    %415 = vector.shape_cast %412 : vector<8x32xf32> to vector<1x8x32xf32>
    tpu.vector_store %arg22[%c7_348, %c0_349, %c0_350], %415 {strides = array<i32>} : memref<12x8x32xf32, #tpu.memory_space<vmem>>, vector<1x8x32xf32>,
    %c0_351 = arith.constant 0 : index
    %c256_352 = arith.constant 256 : index
    %416 = vector.load %arg19[%c0_351, %c256_352] : memref<8x1152xf32, #tpu.memory_space<vmem>>, vector<8x32xf32>
    %c8_353 = arith.constant 8 : index
    %c0_354 = arith.constant 0 : index
    %c0_355 = arith.constant 0 : index
    %417 = vector.load %arg20[%c8_353, %c0_354, %c0_355] : memref<12x8x32xf32, #tpu.memory_space<vmem>>, vector<1x8x32xf32>
    %418 = vector.shape_cast %417 : vector<1x8x32xf32> to vector<8x32xf32>
    %419 = vector.shape_cast %416 : vector<8x32xf32> to vector<1x8x32xf32>
    tpu.vector_store %arg20[%c8_353, %c0_354, %c0_355], %419 {strides = array<i32>} : memref<12x8x32xf32, #tpu.memory_space<vmem>>, vector<1x8x32xf32>,
    %c0_356 = arith.constant 0 : index
    %c640_357 = arith.constant 640 : index
    %420 = vector.load %arg19[%c0_356, %c640_357] : memref<8x1152xf32, #tpu.memory_space<vmem>>, vector<8x32xf32>
    %c8_358 = arith.constant 8 : index
    %c0_359 = arith.constant 0 : index
    %c0_360 = arith.constant 0 : index
    %421 = vector.load %arg21[%c8_358, %c0_359, %c0_360] : memref<12x8x32xf32, #tpu.memory_space<vmem>>, vector<1x8x32xf32>
    %422 = vector.shape_cast %421 : vector<1x8x32xf32> to vector<8x32xf32>
    %423 = vector.shape_cast %420 : vector<8x32xf32> to vector<1x8x32xf32>
    tpu.vector_store %arg21[%c8_358, %c0_359, %c0_360], %423 {strides = array<i32>} : memref<12x8x32xf32, #tpu.memory_space<vmem>>, vector<1x8x32xf32>,
    %c0_361 = arith.constant 0 : index
    %c1024_362 = arith.constant 1024 : index
    %424 = vector.load %arg19[%c0_361, %c1024_362] : memref<8x1152xf32, #tpu.memory_space<vmem>>, vector<8x32xf32>
    %c8_363 = arith.constant 8 : index
    %c0_364 = arith.constant 0 : index
    %c0_365 = arith.constant 0 : index
    %425 = vector.load %arg22[%c8_363, %c0_364, %c0_365] : memref<12x8x32xf32, #tpu.memory_space<vmem>>, vector<1x8x32xf32>
    %426 = vector.shape_cast %425 : vector<1x8x32xf32> to vector<8x32xf32>
    %427 = vector.shape_cast %424 : vector<8x32xf32> to vector<1x8x32xf32>
    tpu.vector_store %arg22[%c8_363, %c0_364, %c0_365], %427 {strides = array<i32>} : memref<12x8x32xf32, #tpu.memory_space<vmem>>, vector<1x8x32xf32>,
    %c0_366 = arith.constant 0 : index
    %c288_367 = arith.constant 288 : index
    %428 = vector.load %arg19[%c0_366, %c288_367] : memref<8x1152xf32, #tpu.memory_space<vmem>>, vector<8x32xf32>
    %c9_368 = arith.constant 9 : index
    %c0_369 = arith.constant 0 : index
    %c0_370 = arith.constant 0 : index
    %429 = vector.load %arg20[%c9_368, %c0_369, %c0_370] : memref<12x8x32xf32, #tpu.memory_space<vmem>>, vector<1x8x32xf32>
    %430 = vector.shape_cast %429 : vector<1x8x32xf32> to vector<8x32xf32>
    %431 = vector.shape_cast %428 : vector<8x32xf32> to vector<1x8x32xf32>
    tpu.vector_store %arg20[%c9_368, %c0_369, %c0_370], %431 {strides = array<i32>} : memref<12x8x32xf32, #tpu.memory_space<vmem>>, vector<1x8x32xf32>,
    %c0_371 = arith.constant 0 : index
    %c672_372 = arith.constant 672 : index
    %432 = vector.load %arg19[%c0_371, %c672_372] : memref<8x1152xf32, #tpu.memory_space<vmem>>, vector<8x32xf32>
    %c9_373 = arith.constant 9 : index
    %c0_374 = arith.constant 0 : index
    %c0_375 = arith.constant 0 : index
    %433 = vector.load %arg21[%c9_373, %c0_374, %c0_375] : memref<12x8x32xf32, #tpu.memory_space<vmem>>, vector<1x8x32xf32>
    %434 = vector.shape_cast %433 : vector<1x8x32xf32> to vector<8x32xf32>
    %435 = vector.shape_cast %432 : vector<8x32xf32> to vector<1x8x32xf32>
    tpu.vector_store %arg21[%c9_373, %c0_374, %c0_375], %435 {strides = array<i32>} : memref<12x8x32xf32, #tpu.memory_space<vmem>>, vector<1x8x32xf32>,
    %c0_376 = arith.constant 0 : index
    %c1056_377 = arith.constant 1056 : index
    %436 = vector.load %arg19[%c0_376, %c1056_377] : memref<8x1152xf32, #tpu.memory_space<vmem>>, vector<8x32xf32>
    %c9_378 = arith.constant 9 : index
    %c0_379 = arith.constant 0 : index
    %c0_380 = arith.constant 0 : index
    %437 = vector.load %arg22[%c9_378, %c0_379, %c0_380] : memref<12x8x32xf32, #tpu.memory_space<vmem>>, vector<1x8x32xf32>
    %438 = vector.shape_cast %437 : vector<1x8x32xf32> to vector<8x32xf32>
    %439 = vector.shape_cast %436 : vector<8x32xf32> to vector<1x8x32xf32>
    tpu.vector_store %arg22[%c9_378, %c0_379, %c0_380], %439 {strides = array<i32>} : memref<12x8x32xf32, #tpu.memory_space<vmem>>, vector<1x8x32xf32>,
    %c0_381 = arith.constant 0 : index
    %c320_382 = arith.constant 320 : index
    %440 = vector.load %arg19[%c0_381, %c320_382] : memref<8x1152xf32, #tpu.memory_space<vmem>>, vector<8x32xf32>
    %c10_383 = arith.constant 10 : index
    %c0_384 = arith.constant 0 : index
    %c0_385 = arith.constant 0 : index
    %441 = vector.load %arg20[%c10_383, %c0_384, %c0_385] : memref<12x8x32xf32, #tpu.memory_space<vmem>>, vector<1x8x32xf32>
    %442 = vector.shape_cast %441 : vector<1x8x32xf32> to vector<8x32xf32>
    %443 = vector.shape_cast %440 : vector<8x32xf32> to vector<1x8x32xf32>
    tpu.vector_store %arg20[%c10_383, %c0_384, %c0_385], %443 {strides = array<i32>} : memref<12x8x32xf32, #tpu.memory_space<vmem>>, vector<1x8x32xf32>,
    %c0_386 = arith.constant 0 : index
    %c704_387 = arith.constant 704 : index
    %444 = vector.load %arg19[%c0_386, %c704_387] : memref<8x1152xf32, #tpu.memory_space<vmem>>, vector<8x32xf32>
    %c10_388 = arith.constant 10 : index
    %c0_389 = arith.constant 0 : index
    %c0_390 = arith.constant 0 : index
    %445 = vector.load %arg21[%c10_388, %c0_389, %c0_390] : memref<12x8x32xf32, #tpu.memory_space<vmem>>, vector<1x8x32xf32>
    %446 = vector.shape_cast %445 : vector<1x8x32xf32> to vector<8x32xf32>
    %447 = vector.shape_cast %444 : vector<8x32xf32> to vector<1x8x32xf32>
    tpu.vector_store %arg21[%c10_388, %c0_389, %c0_390], %447 {strides = array<i32>} : memref<12x8x32xf32, #tpu.memory_space<vmem>>, vector<1x8x32xf32>,
    %c0_391 = arith.constant 0 : index
    %c1088_392 = arith.constant 1088 : index
    %448 = vector.load %arg19[%c0_391, %c1088_392] : memref<8x1152xf32, #tpu.memory_space<vmem>>, vector<8x32xf32>
    %c10_393 = arith.constant 10 : index
    %c0_394 = arith.constant 0 : index
    %c0_395 = arith.constant 0 : index
    %449 = vector.load %arg22[%c10_393, %c0_394, %c0_395] : memref<12x8x32xf32, #tpu.memory_space<vmem>>, vector<1x8x32xf32>
    %450 = vector.shape_cast %449 : vector<1x8x32xf32> to vector<8x32xf32>
    %451 = vector.shape_cast %448 : vector<8x32xf32> to vector<1x8x32xf32>
    tpu.vector_store %arg22[%c10_393, %c0_394, %c0_395], %451 {strides = array<i32>} : memref<12x8x32xf32, #tpu.memory_space<vmem>>, vector<1x8x32xf32>,
    %c0_396 = arith.constant 0 : index
    %c352_397 = arith.constant 352 : index
    %452 = vector.load %arg19[%c0_396, %c352_397] : memref<8x1152xf32, #tpu.memory_space<vmem>>, vector<8x32xf32>
    %c11_398 = arith.constant 11 : index
    %c0_399 = arith.constant 0 : index
    %c0_400 = arith.constant 0 : index
    %453 = vector.load %arg20[%c11_398, %c0_399, %c0_400] : memref<12x8x32xf32, #tpu.memory_space<vmem>>, vector<1x8x32xf32>
    %454 = vector.shape_cast %453 : vector<1x8x32xf32> to vector<8x32xf32>
    %455 = vector.shape_cast %452 : vector<8x32xf32> to vector<1x8x32xf32>
    tpu.vector_store %arg20[%c11_398, %c0_399, %c0_400], %455 {strides = array<i32>} : memref<12x8x32xf32, #tpu.memory_space<vmem>>, vector<1x8x32xf32>,
    %c0_401 = arith.constant 0 : index
    %c736_402 = arith.constant 736 : index
    %456 = vector.load %arg19[%c0_401, %c736_402] : memref<8x1152xf32, #tpu.memory_space<vmem>>, vector<8x32xf32>
    %c11_403 = arith.constant 11 : index
    %c0_404 = arith.constant 0 : index
    %c0_405 = arith.constant 0 : index
    %457 = vector.load %arg21[%c11_403, %c0_404, %c0_405] : memref<12x8x32xf32, #tpu.memory_space<vmem>>, vector<1x8x32xf32>
    %458 = vector.shape_cast %457 : vector<1x8x32xf32> to vector<8x32xf32>
    %459 = vector.shape_cast %456 : vector<8x32xf32> to vector<1x8x32xf32>
    tpu.vector_store %arg21[%c11_403, %c0_404, %c0_405], %459 {strides = array<i32>} : memref<12x8x32xf32, #tpu.memory_space<vmem>>, vector<1x8x32xf32>,
    %c0_406 = arith.constant 0 : index
    %c1120_407 = arith.constant 1120 : index
    %460 = vector.load %arg19[%c0_406, %c1120_407] : memref<8x1152xf32, #tpu.memory_space<vmem>>, vector<8x32xf32>
    %c11_408 = arith.constant 11 : index
    %c0_409 = arith.constant 0 : index
    %c0_410 = arith.constant 0 : index
    %461 = vector.load %arg22[%c11_408, %c0_409, %c0_410] : memref<12x8x32xf32, #tpu.memory_space<vmem>>, vector<1x8x32xf32>
    %462 = vector.shape_cast %461 : vector<1x8x32xf32> to vector<8x32xf32>
    %463 = vector.shape_cast %460 : vector<8x32xf32> to vector<1x8x32xf32>
    tpu.vector_store %arg22[%c11_408, %c0_409, %c0_410], %463 {strides = array<i32>} : memref<12x8x32xf32, #tpu.memory_space<vmem>>, vector<1x8x32xf32>,
    %c0_411 = arith.constant 0 : index
    %c0_412 = arith.constant 0 : index
    %c0_413 = arith.constant 0 : index
    %464 = vector.load %arg20[%c0_411, %c0_412, %c0_413] : memref<12x8x32xf32, #tpu.memory_space<vmem>>, vector<12x8x32xf32>
    %465 = arith.truncf %464 : vector<12x8x32xf32> to vector<12x8x32xbf16>
    %c0_414 = arith.constant 0 : index
    %c0_415 = arith.constant 0 : index
    %c0_416 = arith.constant 0 : index
    %466 = vector.load %arg21[%c0_414, %c0_415, %c0_416] : memref<12x8x32xf32, #tpu.memory_space<vmem>>, vector<12x8x32xf32>
    %467 = arith.truncf %466 : vector<12x8x32xf32> to vector<12x8x32xbf16>
    %c0_417 = arith.constant 0 : index
    %c0_418 = arith.constant 0 : index
    %c0_419 = arith.constant 0 : index
    %468 = vector.load %arg22[%c0_417, %c0_418, %c0_419] : memref<12x8x32xf32, #tpu.memory_space<vmem>>, vector<12x8x32xf32>
    %469 = arith.truncf %468 : vector<12x8x32xf32> to vector<12x8x32xbf16>
    "tpu.trace_start"() <{level = 10 : i32, message = "htd,hsd->hts"}> : () -> ()
    %cst_420 = arith.constant dense<0.000000e+00> : vector<12x8x8xf32>
    %470 = tpu.matmul %465, %467, %cst_420 {dimension_numbers = #tpu.dot_dimension_numbers<[2], [2], [1], [1], [0, 0, 0, 1, 1, 1], [0], [0]>} : vector<12x8x32xbf16>, vector<12x8x32xbf16>, vector<12x8x8xf32> -> vector<12x8x8xf32>
    "tpu.trace_stop"() : () -> ()
    %471 = vector.shape_cast %11 : vector<8x8xf32> to vector<1x8x8xf32>
    %472 = vector.broadcast %471 : vector<1x8x8xf32> to vector<12x8x8xf32>
    %473 = arith.addf %470, %472 : vector<12x8x8xf32>
    %cst_421 = arith.constant dense<0xFF800000> : vector<12x8xf32>
    %474 = vector.multi_reduction <maximumf>, %473, %cst_421 [2] : vector<12x8x8xf32> to vector<12x8xf32>
    %475 = vector.shape_cast %474 : vector<12x8xf32> to vector<12x8x1xf32>
    %476 = vector.broadcast %475 : vector<12x8x1xf32> to vector<12x8x8xf32>
    %477 = arith.subf %473, %476 : vector<12x8x8xf32>
    %478 = math.exp %477 : vector<12x8x8xf32>
    %cst_422 = arith.constant dense<0.000000e+00> : vector<12x8xf32>
    %479 = vector.multi_reduction <add>, %478, %cst_422 [2] : vector<12x8x8xf32> to vector<12x8xf32>
    %480 = vector.shape_cast %479 : vector<12x8xf32> to vector<12x8x1xf32>
    %481 = tpu.reciprocal %480 {approx = true} : vector<12x8x1xf32> -> vector<12x8x1xf32>
    %482 = vector.broadcast %481 : vector<12x8x1xf32> to vector<12x8x8xf32>
    %483 = arith.mulf %478, %482 : vector<12x8x8xf32>
    %484 = arith.truncf %483 : vector<12x8x8xf32> to vector<12x8x8xbf16>
    "tpu.trace_start"() <{level = 10 : i32, message = "hts,hsd->htd"}> : () -> ()
    %cst_423 = arith.constant dense<0.000000e+00> : vector<12x8x32xf32>
    %485 = tpu.matmul %484, %469, %cst_423 {dimension_numbers = #tpu.dot_dimension_numbers<[2], [1], [1], [2], [0, 0, 0, 1, 1, 2], [0], [0]>} : vector<12x8x8xbf16>, vector<12x8x32xbf16>, vector<12x8x32xf32> -> vector<12x8x32xf32>
    "tpu.trace_stop"() : () -> ()
    %486 = vector.extract_strided_slice %485 {offsets = [0, 0, 0], sizes = [1, 8, 32], strides = [1, 1, 1]} : vector<12x8x32xf32> to vector<1x8x32xf32>
    %487 = vector.shape_cast %486 : vector<1x8x32xf32> to vector<8x32xf32>
    %c0_424 = arith.constant 0 : index
    %c0_425 = arith.constant 0 : index
    %488 = vector.load %arg23[%c0_424, %c0_425] : memref<8x384xf32, #tpu.memory_space<vmem>>, vector<8x32xf32>
    tpu.vector_store %arg23[%c0_424, %c0_425], %487 {strides = array<i32>} : memref<8x384xf32, #tpu.memory_space<vmem>>, vector<8x32xf32>,
    %489 = vector.extract_strided_slice %485 {offsets = [1, 0, 0], sizes = [1, 8, 32], strides = [1, 1, 1]} : vector<12x8x32xf32> to vector<1x8x32xf32>
    %490 = vector.shape_cast %489 : vector<1x8x32xf32> to vector<8x32xf32>
    %c0_426 = arith.constant 0 : index
    %c32_427 = arith.constant 32 : index
    %491 = vector.load %arg23[%c0_426, %c32_427] : memref<8x384xf32, #tpu.memory_space<vmem>>, vector<8x32xf32>
    tpu.vector_store %arg23[%c0_426, %c32_427], %490 {strides = array<i32>} : memref<8x384xf32, #tpu.memory_space<vmem>>, vector<8x32xf32>,
    %492 = vector.extract_strided_slice %485 {offsets = [2, 0, 0], sizes = [1, 8, 32], strides = [1, 1, 1]} : vector<12x8x32xf32> to vector<1x8x32xf32>
    %493 = vector.shape_cast %492 : vector<1x8x32xf32> to vector<8x32xf32>
    %c0_428 = arith.constant 0 : index
    %c64_429 = arith.constant 64 : index
    %494 = vector.load %arg23[%c0_428, %c64_429] : memref<8x384xf32, #tpu.memory_space<vmem>>, vector<8x32xf32>
    tpu.vector_store %arg23[%c0_428, %c64_429], %493 {strides = array<i32>} : memref<8x384xf32, #tpu.memory_space<vmem>>, vector<8x32xf32>,
    %495 = vector.extract_strided_slice %485 {offsets = [3, 0, 0], sizes = [1, 8, 32], strides = [1, 1, 1]} : vector<12x8x32xf32> to vector<1x8x32xf32>
    %496 = vector.shape_cast %495 : vector<1x8x32xf32> to vector<8x32xf32>
    %c0_430 = arith.constant 0 : index
    %c96_431 = arith.constant 96 : index
    %497 = vector.load %arg23[%c0_430, %c96_431] : memref<8x384xf32, #tpu.memory_space<vmem>>, vector<8x32xf32>
    tpu.vector_store %arg23[%c0_430, %c96_431], %496 {strides = array<i32>} : memref<8x384xf32, #tpu.memory_space<vmem>>, vector<8x32xf32>,
    %498 = vector.extract_strided_slice %485 {offsets = [4, 0, 0], sizes = [1, 8, 32], strides = [1, 1, 1]} : vector<12x8x32xf32> to vector<1x8x32xf32>
    %499 = vector.shape_cast %498 : vector<1x8x32xf32> to vector<8x32xf32>
    %c0_432 = arith.constant 0 : index
    %c128_433 = arith.constant 128 : index
    %500 = vector.load %arg23[%c0_432, %c128_433] : memref<8x384xf32, #tpu.memory_space<vmem>>, vector<8x32xf32>
    tpu.vector_store %arg23[%c0_432, %c128_433], %499 {strides = array<i32>} : memref<8x384xf32, #tpu.memory_space<vmem>>, vector<8x32xf32>,
    %501 = vector.extract_strided_slice %485 {offsets = [5, 0, 0], sizes = [1, 8, 32], strides = [1, 1, 1]} : vector<12x8x32xf32> to vector<1x8x32xf32>
    %502 = vector.shape_cast %501 : vector<1x8x32xf32> to vector<8x32xf32>
    %c0_434 = arith.constant 0 : index
    %c160_435 = arith.constant 160 : index
    %503 = vector.load %arg23[%c0_434, %c160_435] : memref<8x384xf32, #tpu.memory_space<vmem>>, vector<8x32xf32>
    tpu.vector_store %arg23[%c0_434, %c160_435], %502 {strides = array<i32>} : memref<8x384xf32, #tpu.memory_space<vmem>>, vector<8x32xf32>,
    %504 = vector.extract_strided_slice %485 {offsets = [6, 0, 0], sizes = [1, 8, 32], strides = [1, 1, 1]} : vector<12x8x32xf32> to vector<1x8x32xf32>
    %505 = vector.shape_cast %504 : vector<1x8x32xf32> to vector<8x32xf32>
    %c0_436 = arith.constant 0 : index
    %c192_437 = arith.constant 192 : index
    %506 = vector.load %arg23[%c0_436, %c192_437] : memref<8x384xf32, #tpu.memory_space<vmem>>, vector<8x32xf32>
    tpu.vector_store %arg23[%c0_436, %c192_437], %505 {strides = array<i32>} : memref<8x384xf32, #tpu.memory_space<vmem>>, vector<8x32xf32>,
    %507 = vector.extract_strided_slice %485 {offsets = [7, 0, 0], sizes = [1, 8, 32], strides = [1, 1, 1]} : vector<12x8x32xf32> to vector<1x8x32xf32>
    %508 = vector.shape_cast %507 : vector<1x8x32xf32> to vector<8x32xf32>
    %c0_438 = arith.constant 0 : index
    %c224_439 = arith.constant 224 : index
    %509 = vector.load %arg23[%c0_438, %c224_439] : memref<8x384xf32, #tpu.memory_space<vmem>>, vector<8x32xf32>
    tpu.vector_store %arg23[%c0_438, %c224_439], %508 {strides = array<i32>} : memref<8x384xf32, #tpu.memory_space<vmem>>, vector<8x32xf32>,
    %510 = vector.extract_strided_slice %485 {offsets = [8, 0, 0], sizes = [1, 8, 32], strides = [1, 1, 1]} : vector<12x8x32xf32> to vector<1x8x32xf32>
    %511 = vector.shape_cast %510 : vector<1x8x32xf32> to vector<8x32xf32>
    %c0_440 = arith.constant 0 : index
    %c256_441 = arith.constant 256 : index
    %512 = vector.load %arg23[%c0_440, %c256_441] : memref<8x384xf32, #tpu.memory_space<vmem>>, vector<8x32xf32>
    tpu.vector_store %arg23[%c0_440, %c256_441], %511 {strides = array<i32>} : memref<8x384xf32, #tpu.memory_space<vmem>>, vector<8x32xf32>,
    %513 = vector.extract_strided_slice %485 {offsets = [9, 0, 0], sizes = [1, 8, 32], strides = [1, 1, 1]} : vector<12x8x32xf32> to vector<1x8x32xf32>
    %514 = vector.shape_cast %513 : vector<1x8x32xf32> to vector<8x32xf32>
    %c0_442 = arith.constant 0 : index
    %c288_443 = arith.constant 288 : index
    %515 = vector.load %arg23[%c0_442, %c288_443] : memref<8x384xf32, #tpu.memory_space<vmem>>, vector<8x32xf32>
    tpu.vector_store %arg23[%c0_442, %c288_443], %514 {strides = array<i32>} : memref<8x384xf32, #tpu.memory_space<vmem>>, vector<8x32xf32>,
    %516 = vector.extract_strided_slice %485 {offsets = [10, 0, 0], sizes = [1, 8, 32], strides = [1, 1, 1]} : vector<12x8x32xf32> to vector<1x8x32xf32>
    %517 = vector.shape_cast %516 : vector<1x8x32xf32> to vector<8x32xf32>
    %c0_444 = arith.constant 0 : index
    %c320_445 = arith.constant 320 : index
    %518 = vector.load %arg23[%c0_444, %c320_445] : memref<8x384xf32, #tpu.memory_space<vmem>>, vector<8x32xf32>
    tpu.vector_store %arg23[%c0_444, %c320_445], %517 {strides = array<i32>} : memref<8x384xf32, #tpu.memory_space<vmem>>, vector<8x32xf32>,
    %519 = vector.extract_strided_slice %485 {offsets = [11, 0, 0], sizes = [1, 8, 32], strides = [1, 1, 1]} : vector<12x8x32xf32> to vector<1x8x32xf32>
    %520 = vector.shape_cast %519 : vector<1x8x32xf32> to vector<8x32xf32>
    %c0_446 = arith.constant 0 : index
    %c352_447 = arith.constant 352 : index
    %521 = vector.load %arg23[%c0_446, %c352_447] : memref<8x384xf32, #tpu.memory_space<vmem>>, vector<8x32xf32>
    tpu.vector_store %arg23[%c0_446, %c352_447], %520 {strides = array<i32>} : memref<8x384xf32, #tpu.memory_space<vmem>>, vector<8x32xf32>,
    %c0_448 = arith.constant 0 : index
    %c0_449 = arith.constant 0 : index
    %522 = vector.load %arg23[%c0_448, %c0_449] : memref<8x384xf32, #tpu.memory_space<vmem>>, vector<8x384xf32>
    %523 = arith.truncf %522 : vector<8x384xf32> to vector<8x384xbf16>
    %c0_450 = arith.constant 0 : index
    %c0_451 = arith.constant 0 : index
    %524 = vector.load %arg12[%c0_450, %c0_451] : memref<384x256xbf16, #tpu.memory_space<vmem>>, vector<384x256xbf16>
    %cst_452 = arith.constant dense<0.000000e+00> : vector<8x256xf32>
    %525 = tpu.matmul %523, %524, %cst_452 {dimension_numbers = #tpu.dot_dimension_numbers<[1], [0], [0], [1], [0, 0, 1, 1], [], []>} : vector<8x384xbf16>, vector<384x256xbf16>, vector<8x256xf32> -> vector<8x256xf32>
    %c0_453 = arith.constant 0 : index
    %c0_454 = arith.constant 0 : index
    %526 = vector.load %arg13[%c0_453, %c0_454] : memref<1x256xf32, #tpu.memory_space<vmem>>, vector<1x256xf32>
    %527 = vector.broadcast %526 : vector<1x256xf32> to vector<8x256xf32>
    %528 = arith.addf %525, %527 : vector<8x256xf32>
    %529 = arith.addf %290, %528 : vector<8x256xf32>
    %530 = arith.truncf %529 : vector<8x256xf32> to vector<8x256xbf16>
    %c0_455 = arith.constant 0 : index
    %c0_456 = arith.constant 0 : index
    %531 = vector.load %arg14[%c0_455, %c0_456] : memref<256x1024xbf16, #tpu.memory_space<vmem>>, vector<256x1024xbf16>
    %cst_457 = arith.constant dense<0.000000e+00> : vector<8x1024xf32>
    %532 = tpu.matmul %530, %531, %cst_457 {dimension_numbers = #tpu.dot_dimension_numbers<[1], [0], [0], [1], [0, 0, 1, 1], [], []>} : vector<8x256xbf16>, vector<256x1024xbf16>, vector<8x1024xf32> -> vector<8x1024xf32>
    %c0_458 = arith.constant 0 : index
    %c0_459 = arith.constant 0 : index
    %533 = vector.load %arg15[%c0_458, %c0_459] : memref<1x1024xf32, #tpu.memory_space<vmem>>, vector<1x1024xf32>
    %534 = vector.broadcast %533 : vector<1x1024xf32> to vector<8x1024xf32>
    %535 = arith.addf %532, %534 : vector<8x1024xf32>
    %cst_460 = arith.constant 5.000000e-01 : f32
    %536 = vector.broadcast %cst_460 : f32 to vector<8x1024xf32>
    %537 = arith.mulf %536, %535 : vector<8x1024xf32>
    %cst_461 = arith.constant 0.707106769 : f32
    %538 = vector.broadcast %cst_461 : f32 to vector<8x1024xf32>
    %539 = arith.mulf %535, %538 : vector<8x1024xf32>
    %540 = math.erf %539 : vector<8x1024xf32>
    %cst_462 = arith.constant 1.000000e+00 : f32
    %541 = vector.broadcast %cst_462 : f32 to vector<8x1024xf32>
    %542 = arith.addf %541, %540 : vector<8x1024xf32>
    %543 = arith.mulf %537, %542 : vector<8x1024xf32>
    %544 = arith.truncf %543 : vector<8x1024xf32> to vector<8x1024xbf16>
    %c0_463 = arith.constant 0 : index
    %c0_464 = arith.constant 0 : index
    %545 = vector.load %arg16[%c0_463, %c0_464] : memref<1024x256xbf16, #tpu.memory_space<vmem>>, vector<1024x256xbf16>
    %cst_465 = arith.constant dense<0.000000e+00> : vector<8x256xf32>
    %546 = tpu.matmul %544, %545, %cst_465 {dimension_numbers = #tpu.dot_dimension_numbers<[1], [0], [0], [1], [0, 0, 1, 1], [], []>} : vector<8x1024xbf16>, vector<1024x256xbf16>, vector<8x256xf32> -> vector<8x256xf32>
    %c0_466 = arith.constant 0 : index
    %c0_467 = arith.constant 0 : index
    %547 = vector.load %arg17[%c0_466, %c0_467] : memref<1x256xf32, #tpu.memory_space<vmem>>, vector<1x256xf32>
    %548 = vector.broadcast %547 : vector<1x256xf32> to vector<8x256xf32>
    %549 = arith.addf %546, %548 : vector<8x256xf32>
    %cst_468 = arith.constant dense<0.000000e+00> : vector<8xf32>
    %550 = vector.multi_reduction <add>, %549, %cst_468 [1] : vector<8x256xf32> to vector<8xf32>
    %551 = vector.shape_cast %550 : vector<8xf32> to vector<8x1xf32>
    %cst_469 = arith.constant 2.560000e+02 : f32
    %552 = vector.broadcast %cst_469 : f32 to vector<8x1xf32>
    %553 = arith.divf %551, %552 : vector<8x1xf32>
    %554 = vector.broadcast %553 : vector<8x1xf32> to vector<8x256xf32>
    %555 = arith.subf %549, %554 : vector<8x256xf32>
    %556 = arith.mulf %555, %555 : vector<8x256xf32>
    %cst_470 = arith.constant dense<0.000000e+00> : vector<8xf32>
    %557 = vector.multi_reduction <add>, %556, %cst_470 [1] : vector<8x256xf32> to vector<8xf32>
    %558 = vector.shape_cast %557 : vector<8xf32> to vector<8x1xf32>
    %cst_471 = arith.constant 2.560000e+02 : f32
    %559 = vector.broadcast %cst_471 : f32 to vector<8x1xf32>
    %560 = arith.divf %558, %559 : vector<8x1xf32>
    %561 = vector.broadcast %553 : vector<8x1xf32> to vector<8x256xf32>
    %562 = arith.subf %549, %561 : vector<8x256xf32>
    %cst_472 = arith.constant 9.99999974E-6 : f32
    %563 = vector.broadcast %cst_472 : f32 to vector<8x1xf32>
    %564 = arith.addf %560, %563 : vector<8x1xf32>
    %565 = math.rsqrt %564 : vector<8x1xf32>
    %566 = vector.broadcast %565 : vector<8x1xf32> to vector<8x256xf32>
    %567 = arith.mulf %562, %566 : vector<8x256xf32>
    %568 = vector.broadcast %4 : vector<1x256xf32> to vector<8x256xf32>
    %569 = arith.mulf %567, %568 : vector<8x256xf32>
    %570 = vector.broadcast %5 : vector<1x256xf32> to vector<8x256xf32>
    %571 = arith.addf %569, %570 : vector<8x256xf32>
    %572 = arith.addf %529, %571 : vector<8x256xf32>
    %c0_473 = arith.constant 0 : index
    %c0_474 = arith.constant 0 : index
    %c0_475 = arith.constant 0 : index
    %573 = vector.load %arg18[%c0_473, %c0_474, %c0_475] : memref<1x8x256xf32, #tpu.memory_space<vmem>>, vector<1x8x256xf32>
    %574 = vector.shape_cast %573 : vector<1x8x256xf32> to vector<8x256xf32>
    %575 = vector.shape_cast %572 : vector<8x256xf32> to vector<1x8x256xf32>
    tpu.vector_store %arg18[%c0_473, %c0_474, %c0_475], %575 {strides = array<i32>} : memref<1x8x256xf32, #tpu.memory_space<vmem>>, vector<1x8x256xf32>,
    return
  }
  func.func @transform_0(%arg0: i32) -> (i32, i32, i32) {
    %c0_i32 = arith.constant 0 : i32
    %c0_i32_0 = arith.constant 0 : i32
    %c0_i32_1 = arith.constant 0 : i32
    return %arg0, %c0_i32, %c0_i32_0 : i32, i32, i32
  }
  func.func @transform_1(%arg0: i32) -> (i32, i32) {
    %c0_i32 = arith.constant 0 : i32
    %c0_i32_0 = arith.constant 0 : i32
    %c0_i32_1 = arith.constant 0 : i32
    return %c0_i32, %c0_i32_0 : i32, i32
  }
  func.func @transform_2(%arg0: i32) -> (i32, i32) {
    %c0_i32 = arith.constant 0 : i32
    %c0_i32_0 = arith.constant 0 : i32
    %c0_i32_1 = arith.constant 0 : i32
    return %c0_i32, %c0_i32_0 : i32, i32
  }
  func.func @transform_3(%arg0: i32) -> (i32, i32) {
    %c0_i32 = arith.constant 0 : i32
    %c0_i32_0 = arith.constant 0 : i32
    %c0_i32_1 = arith.constant 0 : i32
    return %c0_i32, %c0_i32_0 : i32, i32
  }
  func.func @transform_4(%arg0: i32) -> (i32, i32) {
    %c0_i32 = arith.constant 0 : i32
    %c0_i32_0 = arith.constant 0 : i32
    %c0_i32_1 = arith.constant 0 : i32
    return %c0_i32, %c0_i32_0 : i32, i32
  }
  func.func @transform_5(%arg0: i32) -> (i32, i32) {
    %c0_i32 = arith.constant 0 : i32
    %c0_i32_0 = arith.constant 0 : i32
    %c0_i32_1 = arith.constant 0 : i32
    return %c0_i32, %c0_i32_0 : i32, i32
  }
  func.func @transform_6(%arg0: i32) -> (i32, i32) {
    %c0_i32 = arith.constant 0 : i32
    %c0_i32_0 = arith.constant 0 : i32
    %c0_i32_1 = arith.constant 0 : i32
    return %c0_i32, %c0_i32_0 : i32, i32
  }
  func.func @transform_7(%arg0: i32) -> (i32, i32) {
    %c0_i32 = arith.constant 0 : i32
    %c0_i32_0 = arith.constant 0 : i32
    %c0_i32_1 = arith.constant 0 : i32
    return %c0_i32, %c0_i32_0 : i32, i32
  }
  func.func @transform_8(%arg0: i32) -> (i32, i32) {
    %c0_i32 = arith.constant 0 : i32
    %c0_i32_0 = arith.constant 0 : i32
    %c0_i32_1 = arith.constant 0 : i32
    return %c0_i32, %c0_i32_0 : i32, i32
  }
  func.func @transform_9(%arg0: i32) -> (i32, i32) {
    %c0_i32 = arith.constant 0 : i32
    %c0_i32_0 = arith.constant 0 : i32
    %c0_i32_1 = arith.constant 0 : i32
    return %c0_i32, %c0_i32_0 : i32, i32
  }
  func.func @transform_10(%arg0: i32) -> (i32, i32) {
    %c0_i32 = arith.constant 0 : i32
    %c0_i32_0 = arith.constant 0 : i32
    %c0_i32_1 = arith.constant 0 : i32
    return %c0_i32, %c0_i32_0 : i32, i32
  }
  func.func @transform_11(%arg0: i32) -> (i32, i32) {
    %c0_i32 = arith.constant 0 : i32
    %c0_i32_0 = arith.constant 0 : i32
    %c0_i32_1 = arith.constant 0 : i32
    return %c0_i32, %c0_i32_0 : i32, i32
  }
  func.func @transform_12(%arg0: i32) -> (i32, i32) {
    %c0_i32 = arith.constant 0 : i32
    %c0_i32_0 = arith.constant 0 : i32
    %c0_i32_1 = arith.constant 0 : i32
    return %c0_i32, %c0_i32_0 : i32, i32
  }
  func.func @transform_13(%arg0: i32) -> (i32, i32) {
    %c0_i32 = arith.constant 0 : i32
    %c0_i32_0 = arith.constant 0 : i32
    %c0_i32_1 = arith.constant 0 : i32
    return %c0_i32, %c0_i32_0 : i32, i32
  }
  func.func @transform_14(%arg0: i32) -> (i32, i32) {
    %c0_i32 = arith.constant 0 : i32
    %c0_i32_0 = arith.constant 0 : i32
    %c0_i32_1 = arith.constant 0 : i32
    return %c0_i32, %c0_i32_0 : i32, i32
  }
  func.func @transform_15(%arg0: i32) -> (i32, i32) {
    %c0_i32 = arith.constant 0 : i32
    %c0_i32_0 = arith.constant 0 : i32
    %c0_i32_1 = arith.constant 0 : i32
    return %c0_i32, %c0_i32_0 : i32, i32
  }
  func.func @transform_16(%arg0: i32) -> (i32, i32) {
    %c0_i32 = arith.constant 0 : i32
    %c0_i32_0 = arith.constant 0 : i32
    %c0_i32_1 = arith.constant 0 : i32
    return %c0_i32, %c0_i32_0 : i32, i32
  }
  func.func @transform_17(%arg0: i32) -> (i32, i32, i32) {
    %c0_i32 = arith.constant 0 : i32
    %c0_i32_0 = arith.constant 0 : i32
    %c0_i32_1 = arith.constant 0 : i32
    return %arg0, %c0_i32, %c0_i32_0 : i32, i32, i32
  }
}

</mosaic_0001>

<bundles_post_ra>
// kernel: block_forward.1
= control target key start
LH: loop header
LB: loop body
LE: loop exit
PB: predicated region body
PF: predicated region fallthrough
CT: control target
= control target key end

     0   :  { %s15643_s0 = inlined_call_operand.hbm [shape: f32[2,8,256], index: 0, kind: input, shape index: {}]   ;;  %s15644_s1 = inlined_call_operand.vmem [shape: f32[1,256], index: 1, kind: input, shape index: {}]   ;;  %s15645_s2 = inlined_call_operand.vmem [shape: f32[1,256], index: 2, kind: input, shape index: {}]   ;;  %s15646_s3 = inlined_call_operand.vmem [shape: f32[1,256], index: 3, kind: input, shape index: {}]   ;;  %s15647_s4 = inlined_call_operand.vmem [shape: f32[1,256], index: 4, kind: input, shape index: {}]   ;;  %s15648_s5 = inlined_call_operand.hbm [shape: bf16[256,1152], index: 5, kind: input, shape index: {}]   ;;  %s15649_s6 = inlined_call_operand.vmem [shape: f32[1,1152], index: 6, kind: input, shape index: {}]   ;;  %s15650_s7 = inlined_call_operand.hbm [shape: bf16[384,256], index: 7, kind: input, shape index: {}]   ;;  %s15651_s8 = inlined_call_operand.vmem [shape: f32[1,256], index: 8, kind: input, shape index: {}]   ;;  %s15652_s9 = inlined_call_operand.hbm [shape: bf16[256,1152], index: 9, kind: input, shape index: {}]   ;;  %s15653_s10 = inlined_call_operand.hbm [shape: f32[1,1152], index: 10, kind: input, shape index: {}]   ;;  %s15654_s11 = inlined_call_operand.hbm [shape: bf16[384,256], index: 11, kind: input, shape index: {}]   ;;  %s15655_s12 = inlined_call_operand.hbm [shape: f32[1,256], index: 12, kind: input, shape index: {}]   ;;  %s15656_s13 = inlined_call_operand.hbm [shape: bf16[256,1024], index: 13, kind: input, shape index: {}]   ;;  %s15657_s14 = inlined_call_operand.vmem [shape: f32[1,1024], index: 14, kind: input, shape index: {}]   ;;  %s15658_s15 = inlined_call_operand.hbm [shape: bf16[1024,256], index: 15, kind: input, shape index: {}]   ;;  %s15659_s16 = inlined_call_operand.vmem [shape: f32[1,256], index: 16, kind: input, shape index: {}]   ;;  %s15660_s17 = inlined_call_operand.hbm [shape: f32[2,8,256], index: 17, kind: output, shape index: {}]  }
   0x1   :  { %15674 = sst [smem:[#allocation29_spill]] %s15643_s0 }
   0x2   :  { %15675 = sst [smem:[#allocation30_spill]] %s15644_s1 }
   0x3   :  { %15676 = sst [smem:[#allocation31_spill]] %s15646_s3 }
   0x4   :  { %15677 = sst [smem:[#allocation32_spill]] %s15647_s4 }
   0x5   :  { %15678 = sst [smem:[#allocation33_spill]] %s15648_s5 }
   0x6   :  { %15679 = sst [smem:[#allocation34_spill]] %s15649_s6 }
   0x7   :  { %15680 = sst [smem:[#allocation35_spill]] %s15650_s7 }
   0x8   :  { %15681 = sst [smem:[#allocation36_spill]] %s15651_s8 }
   0x9   :  { %15682 = sst [smem:[#allocation37_spill]] %s15657_s14 }
   0xa   :  { %15683 = sst [smem:[#allocation38_spill]] %s15659_s16 }
   0xb   :  { %15684 = sst [smem:[#allocation39_spill]] %s15660_s17 }
   0xc   :  { %22 = vsyncpa [#allocation8], 0 }
   0xd   :  { %24 = vsyncpa [#allocation8 + $0x1], 0 }
   0xe   :  { %25 = vsyncpa [#allocation11], 0 }
   0xf   :  { %26 = vsyncpa [#allocation14], 0 }
  0x10   :  { %27 = vsyncpa [#allocation17], 0 }
  0x11   :  { %28 = vsyncpa [#allocation20], 0 }
  0x12   :  { %29 = vsyncpa [#allocation9], 0 }
  0x13   :  { %31 = vsyncpa [#allocation9 + $0x1], 0  ;;  %s14260_s24 = smov 0   ;;  %s14262_s25 = smov 0  }
  0x14   :  { %s14264_s26 = smov 0   ;;  %s14266_s27 = smov 0  }
  0x15 LB: > { %s14147_s28 = smov [#allocation10]   ;;  %s14281_s0 = sadd.s32 4294967295, %s14145_s27   ;;  %s14145_s27 = sphi %s14266_s27, %s15722_s27   ;;  %s14141_s26 = sphi %s14264_s26, %s15721_s26   ;;  %s14137_s25 = sphi %s14262_s25, %s15720_s25   ;;  %s14133_s24 = sphi %s14260_s24, %s15719_s24  }
  0x16   : > { %s454_s29 = sshll.u32 %s14147_s28, 4  ;;  %p11154_p0 = scmp.ge.s32.totalorder %s14145_s27, 1  ;;  %s14286_s29 = int_to_ptr.vmem [resolvable:$true] %s454_s29 }
  0x17   : > { %p15666_p1 = scmp.eq.s32.totalorder %s14281_s0, 0  ;;  %p430_p2 = scmp.lt.s32.totalorder %s14145_s27, 3 }
  0x18   : > { %s14148_s18 = smov [#allocation13]   ;;  %s14149_s20 = smov [#allocation16]  }
  0x19   : > { %p14288_p3 = pnand %p11154_p0, %p430_p2  ;;  %s486_s19 = sshll.u32 %s14148_s18, 4  ;;  %s14301_s19 = int_to_ptr.vmem [resolvable:$true] %s486_s19 }
  0x1a   : > { %s14303_s21 = sshll.u32 %s14149_s20, 4  ;;  %s15687_s5 = sld [smem:[#allocation33_spill]]  ;;  %s511_s21 = int_to_ptr.vmem [resolvable:$true] %s14303_s21 }
  0x1b   : > { %s15685_s30 = scalar_select %p14288_p3, 1, 0 }
  0x1c   : > { %p12623_p5 = pneg %p14288_p3 }
  0x1e   : > { %p14297_p6 = pnand %p12623_p5, %p15666_p1 }
  0x20   : > { %s13809_s28 = scalar_lea.hbm %s15687_s5, 18432  ;;  %p14313_p8 = pneg %p14297_p6 }
  0x21   : > { %p13810_p7 = scmp.ne.s32.totalorder %s15687_s5, %s13809_s28  ;;  %p13816_p11 = scmp.lt.u32.totalorder %s13809_s28, %s15687_s5 }
  0x23   : > { %p13812_p9 = pnand %p14313_p8, %p13810_p7 }
  0x25   : > { %p13813_p10 = pneg %p13812_p9 }
  0x27   : > { %p13818_p12 = pnand %p13816_p11, %p13813_p10 }
  0x29   : > { %13821 = shalt.err (!%p13818_p12)
}
  0x2a   : > { %s13822_s4 = scalar_lea.vmem %s14286_s29, 18432  ;;  %p13830_p5 = scmp.lt.s32.totalorder %s14286_s29, %s14286_s29 }
  0x2b   : > { %p13823_p13 = scmp.ne.s32.totalorder %s14286_s29, %s13822_s4  ;;  %p13831_p4 = scmp.lt.s32.totalorder %s13822_s4, %s13822_s4 }
  0x2d   : > { %p13825_p0 = pnand %p13823_p13, %p14313_p8  ;;  %p13832_p7 = por %p13831_p4, %p13830_p5 }
  0x2f   : > { %p13826_p2 = pneg %p13825_p0 }
  0x31   : > { %p13833_p9 = pnand %p13832_p7, %p13826_p2 }
  0x33   : > { %13836 = shalt.err (!%p13833_p9)
}
  0x34   : > { %s14150_s17 = smov 576   ;;  %s14151_s3 = smov 36  }
  0x35   : > { %12626 = dma.hbm_to_vmem [thread:$0]  (!%p14297_p6), %s15687_s5, 18432, %s14286_s29, [#allocation11], %s14150_s17, %s14150_s17, %s14151_s3  }
  0x36   : > { %s13837_s16 = scalar_lea.hbm %s15652_s9, 18432 }
  0x37   : > { %p13838_p4 = scmp.ne.s32.totalorder %s15652_s9, %s13837_s16  ;;  %p13844_p12 = scmp.lt.u32.totalorder %s13837_s16, %s15652_s9 }
  0x39   : > { %p13840_p10 = pnand %p13838_p4, %p14313_p8 }
  0x3b   : > { %p13841_p11 = pneg %p13840_p10 }
  0x3d   : > { %p13846_p13 = pnand %p13844_p12, %p13841_p11 }
  0x3f   : > { %13849 = shalt.err (!%p13846_p13)
}
  0x40   : > { %s13850_s29 = scalar_lea.vmem %s14301_s19, 18432  ;;  %p13858_p7 = scmp.lt.s32.totalorder %s14301_s19, %s14301_s19 }
  0x41   : > { %p13851_p0 = scmp.ne.s32.totalorder %s14301_s19, %s13850_s29  ;;  %p13859_p9 = scmp.lt.s32.totalorder %s13850_s29, %s13850_s29 }
  0x43   : > { %p13853_p2 = pnand %p13851_p0, %p14313_p8  ;;  %p13860_p4 = por %p13859_p9, %p13858_p7 }
  0x45   : > { %p13854_p5 = pneg %p13853_p2 }
  0x47   : > { %p13861_p10 = pnand %p13860_p4, %p13854_p5 }
  0x49   : > { %13864 = shalt.err (!%p13861_p10)
}
  0x4a   : > { %12632 = dma.hbm_to_vmem [thread:$0]  (!%p14297_p6), %s15652_s9, 18432, %s14301_s19, [#allocation14], %s14150_s17, %s14150_s17, %s14151_s3  }
  0x4b   : > { %s13865_s22 = scalar_lea.hbm %s15654_s11, 6144 }
  0x4c   : > { %p13866_p11 = scmp.ne.s32.totalorder %s15654_s11, %s13865_s22  ;;  %p13872_p0 = scmp.lt.u32.totalorder %s13865_s22, %s15654_s11 }
  0x4e   : > { %p13868_p12 = pnand %p13866_p11, %p14313_p8 }
  0x50   : > { %p13869_p13 = pneg %p13868_p12 }
  0x52   : > { %p13874_p2 = pnand %p13872_p0, %p13869_p13 }
  0x54   : > { %13877 = shalt.err (!%p13874_p2)
}
  0x55   : > { %s13878_s29 = scalar_lea.vmem %s511_s21, 6144  ;;  %p13886_p4 = scmp.lt.s32.totalorder %s511_s21, %s511_s21 }
  0x56   : > { %p13879_p5 = scmp.ne.s32.totalorder %s511_s21, %s13878_s29  ;;  %p13887_p10 = scmp.lt.s32.totalorder %s13878_s29, %s13878_s29 }
  0x58   : > { %p13881_p7 = pnand %p13879_p5, %p14313_p8  ;;  %p13888_p1 = por %p13887_p10, %p13886_p4 }
  0x5a   : > { %p13882_p9 = pneg %p13881_p7 }
  0x5c   : > { %p13889_p3 = pnand %p13888_p1, %p13882_p9 }
  0x5e   : > { %13892 = shalt.err (!%p13889_p3)
}
  0x5f   : > { %s15668_s19 = smov 128   ;;  %s15670_s17 = smov 8  }
  0x60   : > { %12638 = dma.hbm_to_vmem [thread:$0]  (!%p14297_p6), %s15654_s11, 6144, %s511_s21, [#allocation17], %s15668_s19, %s15668_s19, %s15670_s17  }
  0x61   : > { %s14154_s8 = smov [#allocation19]   ;;  %s13893_s23 = scalar_lea.hbm %s15656_s13, 16384 }
  0x62   : > { %s534_s14 = sshll.u32 %s14154_s8, 4  ;;  %p13894_p1 = scmp.ne.s32.totalorder %s15656_s13, %s13893_s23  ;;  %s535_s14 = int_to_ptr.vmem [resolvable:$true] %s534_s14 }
  0x63   : > { %p13900_p12 = scmp.lt.u32.totalorder %s13893_s23, %s15656_s13 }
  0x64   : > { %p13896_p3 = pnand %p13894_p1, %p14313_p8 }
  0x66   : > { %p13897_p11 = pneg %p13896_p3 }
  0x68   : > { %p13902_p13 = pnand %p13900_p12, %p13897_p11 }
  0x6a   : > { %13905 = shalt.err (!%p13902_p13)
}
  0x6b   : > { %s13906_s21 = scalar_lea.vmem %s535_s14, 16384  ;;  %p13914_p7 = scmp.lt.s32.totalorder %s535_s14, %s535_s14 }
  0x6c   : > { %p13907_p0 = scmp.ne.s32.totalorder %s535_s14, %s13906_s21  ;;  %p13915_p9 = scmp.lt.s32.totalorder %s13906_s21, %s13906_s21 }
  0x6e   : > { %p13909_p2 = pnand %p13907_p0, %p14313_p8  ;;  %p13916_p4 = por %p13915_p9, %p13914_p7 }
  0x70   : > { %p13910_p5 = pneg %p13909_p2 }
  0x72   : > { %p13917_p10 = pnand %p13916_p4, %p13910_p5 }
  0x74   : > { %13920 = shalt.err (!%p13917_p10)
}
  0x75   : > { %s14155_s3 = smov 512   ;;  %s14156_s6 = smov 32  }
  0x76   : > { %12644 = dma.hbm_to_vmem [thread:$0]  (!%p14297_p6), %s15656_s13, 16384, %s535_s14, [#allocation20], %s14155_s3, %s14155_s3, %s14156_s6  }
  0x77   : > { %s14157_s22 = smov [#allocation12]   ;;  %s14158_s28 = smov [#allocation15]  }
  0x78   : > { %s470_s23 = sshll.u32 %s14157_s22, 4  ;;  %s500_s20 = sshll.u32 %s14158_s28, 4  ;;  %s471_s23 = int_to_ptr.vmem [resolvable:$true] %s470_s23  ;;  %s14397_s20 = int_to_ptr.vmem [resolvable:$true] %s500_s20 }
  0x79   : > { %s15689_s7 = sld [smem:[#allocation35_spill]] }
  0x7f   : > { %s13921_s21 = scalar_lea.hbm %s15689_s7, 6144 }
  0x80   : > { %p13922_p1 = scmp.ne.s32.totalorder %s15689_s7, %s13921_s21  ;;  %p13928_p12 = scmp.lt.u32.totalorder %s13921_s21, %s15689_s7 }
  0x82   : > { %p13924_p3 = pnand %p13922_p1, %p14313_p8 }
  0x84   : > { %p13925_p11 = pneg %p13924_p3 }
  0x86   : > { %p13930_p13 = pnand %p13928_p12, %p13925_p11 }
  0x88   : > { %13933 = shalt.err (!%p13930_p13)
}
  0x89   : > { %s13934_s3 = scalar_lea.vmem %s471_s23, 6144  ;;  %p13942_p7 = scmp.lt.s32.totalorder %s471_s23, %s471_s23 }
  0x8a   : > { %p13935_p0 = scmp.ne.s32.totalorder %s471_s23, %s13934_s3  ;;  %p13943_p9 = scmp.lt.s32.totalorder %s13934_s3, %s13934_s3 }
  0x8c   : > { %p13937_p2 = pnand %p13935_p0, %p14313_p8  ;;  %p13944_p4 = por %p13943_p9, %p13942_p7 }
  0x8e   : > { %p13938_p5 = pneg %p13937_p2 }
  0x90   : > { %p13945_p10 = pnand %p13944_p4, %p13938_p5 }
  0x92   : > { %13948 = shalt.err (!%p13945_p10)
}
  0x93   : > { %s15690_s19 = smov 8   ;;  %s15691_s17 = smov 128  }
  0x94   : > { %12629 = dma.hbm_to_vmem [thread:$0]  (!%p14297_p6), %s15689_s7, 6144, %s471_s23, [#allocation11], %s15691_s17, %s15691_s17, %s15690_s19  }
  0x95   : > { %s13949_s4 = scalar_lea.hbm %s15653_s10, 144 }
  0x96   : > { %p13950_p1 = scmp.ne.s32.totalorder %s15653_s10, %s13949_s4  ;;  %p13956_p12 = scmp.lt.u32.totalorder %s13949_s4, %s15653_s10 }
  0x98   : > { %p13952_p3 = pnand %p13950_p1, %p14313_p8 }
  0x9a   : > { %p13953_p11 = pneg %p13952_p3 }
  0x9c   : > { %p13958_p13 = pnand %p13956_p12, %p13953_p11 }
  0x9e   : > { %13961 = shalt.err (!%p13958_p13)
}
  0x9f   : > { %s13962_s23 = scalar_lea.vmem %s14397_s20, 144  ;;  %s13969_s3 = scalar_lea.vmem %s14397_s20, 160 }
  0xa0   : > { %p13963_p0 = scmp.ne.s32.totalorder %s14397_s20, %s13962_s23  ;;  %p13970_p7 = scmp.lt.s32.totalorder %s14397_s20, %s14397_s20 }
  0xa1   : > { %p13971_p9 = scmp.lt.s32.totalorder %s13969_s3, %s13962_s23 }
  0xa2   : > { %p13965_p2 = pnand %p13963_p0, %p14313_p8 }
  0xa3   : > { %p13972_p4 = por %p13971_p9, %p13970_p7 }
  0xa4   : > { %p13966_p5 = pneg %p13965_p2 }
  0xa6   : > { %p13973_p10 = pnand %p13972_p4, %p13966_p5 }
  0xa8   : > { %13976 = shalt.err (!%p13973_p10)
}
  0xa9   : > { %12635 = dma.hbm_to_vmem [thread:$0]  (!%p14297_p6), %s15653_s10, 144, %s14397_s20, [#allocation14]  }
  0xaa   : > { %s14159_s22 = smov [#allocation18]   ;;  %s14160_s4 = smov [#allocation21]  }
  0xab   : > { %s524_s28 = sshll.u32 %s14159_s22, 4  ;;  %s550_s29 = sshll.u32 %s14160_s4, 4  ;;  %s525_s28 = int_to_ptr.vmem [resolvable:$true] %s524_s28  ;;  %s14444_s29 = int_to_ptr.vmem [resolvable:$true] %s550_s29 }
  0xac   : > { %s13977_s14 = scalar_lea.hbm %s15655_s12, 32 }
  0xad   : > { %p13978_p1 = scmp.ne.s32.totalorder %s15655_s12, %s13977_s14  ;;  %p13984_p12 = scmp.lt.u32.totalorder %s13977_s14, %s15655_s12 }
  0xaf   : > { %p13980_p3 = pnand %p13978_p1, %p14313_p8 }
  0xb1   : > { %p13981_p11 = pneg %p13980_p3 }
  0xb3   : > { %p13986_p13 = pnand %p13984_p12, %p13981_p11 }
  0xb5   : > { %13989 = shalt.err (!%p13986_p13)
}
  0xb6   : > { %s13990_s16 = scalar_lea.vmem %s525_s28, 32  ;;  %p13998_p7 = scmp.lt.s32.totalorder %s525_s28, %s525_s28 }
  0xb7   : > { %p13991_p0 = scmp.ne.s32.totalorder %s525_s28, %s13990_s16  ;;  %p13999_p9 = scmp.lt.s32.totalorder %s13990_s16, %s13990_s16 }
  0xb9   : > { %p13993_p2 = pnand %p13991_p0, %p14313_p8  ;;  %p14000_p4 = por %p13999_p9, %p13998_p7 }
  0xbb   : > { %p13994_p5 = pneg %p13993_p2 }
  0xbd   : > { %p14001_p10 = pnand %p14000_p4, %p13994_p5 }
  0xbf   : > { %14004 = shalt.err (!%p14001_p10)
}
  0xc0   : > { %12641 = dma.hbm_to_vmem [thread:$0]  (!%p14297_p6), %s15655_s12, 32, %s525_s28, [#allocation17]  }
  0xc1   : > { %s14005_s14 = scalar_lea.hbm %s15658_s15, 16384 }
  0xc2   : > { %p14006_p1 = scmp.ne.s32.totalorder %s15658_s15, %s14005_s14  ;;  %p14012_p12 = scmp.lt.u32.totalorder %s14005_s14, %s15658_s15 }
  0xc4   : > { %p14008_p3 = pnand %p14006_p1, %p14313_p8 }
  0xc6   : > { %p14009_p11 = pneg %p14008_p3 }
  0xc8   : > { %p14014_p13 = pnand %p14012_p12, %p14009_p11 }
  0xca   : > { %14017 = shalt.err (!%p14014_p13)
}
  0xcb   : > { %s14018_s28 = scalar_lea.vmem %s14444_s29, 16384  ;;  %p14026_p7 = scmp.lt.s32.totalorder %s14444_s29, %s14444_s29 }
  0xcc   : > { %p14019_p0 = scmp.ne.s32.totalorder %s14444_s29, %s14018_s28  ;;  %p14027_p9 = scmp.lt.s32.totalorder %s14018_s28, %s14018_s28 }
  0xce   : > { %p14021_p2 = pnand %p14019_p0, %p14313_p8  ;;  %p14028_p4 = por %p14027_p9, %p14026_p7 }
  0xd0   : > { %p14022_p5 = pneg %p14021_p2 }
  0xd2   : > { %p14029_p10 = pnand %p14028_p4, %p14022_p5 }
  0xd4   : > { %14032 = shalt.err (!%p14029_p10)
}
  0xd5   : > { %12647 = dma.hbm_to_vmem [thread:$0]  (!%p14297_p6), %s15658_s15, 16384, %s14444_s29, [#allocation20], %s15691_s17, %s15691_s17, %s15690_s19  }
  0xd6   : > { %s11153_s1 = sadd.s32 4294967294, %s14145_s27   ;;  %s14492_s18 = sadd.s32 1, %s14145_s27  }
  0xd7   : > { %s41_s4 = ssub.s32 %s14145_s27, %s14492_s18  ;;  %s44_s21 = sadd.s32 1, %s14141_s26 }
  0xd8   : > { %p42_p8 = scmp.eq.s32.totalorder %s41_s4, 0  ;;  %p51_p1 = scmp.ne.s32.totalorder %s14141_s26, %s14137_s25 }
  0xd9   : > { %p52_p3 = scmp.eq.s32.totalorder %s14145_s27, 0  ;;  %p57_p11 = scmp.ne.s32.totalorder %s14137_s25, %s14133_s24 }
  0xda   : > { %s14503_s8 = scalar_select %p42_p8, %s14141_s26, %s44_s21  }
  0xdb   : > { %p14505_p12 = por %p52_p3, %p51_p1  ;;  %p15693_p13 = scmp.eq.s32.totalorder %s14281_s0, 0 }
  0xdc   : > { %p417_p0 = scmp.eq.s32.totalorder %s14281_s0, 1  ;;  %p423_p2 = scmp.eq.s32.totalorder %s11153_s1, 1 }
  0xdd   : > { %p14511_p6 = por %p15693_p13, %p57_p11  ;;  %p12664_p5 = scmp.lt.s32.totalorder %s14145_s27, 2 }
  0xde   : > { %s567_s17 = sand.u32 1, %s14141_s26   ;;  %p14518_p7 = por %p417_p0, %p51_p1 }
  0xdf   : > { %p14522_p9 = por %p423_p2, %p57_p11  ;;  %s11164_s3 = sshll.u32 %s567_s17, 4 }
  0xe0   : > { %s15695_s29 = scalar_select %p14518_p7, 1, 0 }
  0xe1   : > { %s15696_s23 = scalar_select %p14522_p9, 1, 0 }
  0xe2   : > { %s12129_s6 = sshll.u32 %s14145_s27, 8  ;;  %s15697_s16 = sld [smem:[#allocation29_spill]] }
  0xe3   : > { %s571_s1 = scalar_lea.vmem [#allocation7], %s11164_s3  ;;  %p14536_p4 = pnand %p12664_p5, %p14505_p12 }
  0xe4   : > { %s579_s4 = sshll.u32 %s571_s1, 4  ;;  %s568_s5 = scalar_lea.sflag [#allocation8], %s567_s17  ;;  %s14532_s4 = int_to_ptr.vmem [resolvable:$true] %s579_s4 }
  0xe5   : > { %p14035_p8 = pneg %p14536_p4 }
  0xe8   : > { %s14530_s22 = scalar_lea.hbm %s15697_s16, %s12129_s6  ;;  %s14038_s20 = scalar_lea.hbm %s15697_s16, 512 }
  0xe9   : > { %s14033_s7 = scalar_lea.hbm %s14530_s22, 256  ;;  %p14039_p11 = scmp.lt.u32.totalorder %s14530_s22, %s15697_s16 }
  0xea   : > { %p14034_p10 = scmp.ne.s32.totalorder %s14530_s22, %s14033_s7  ;;  %p14040_p12 = scmp.lt.u32.totalorder %s14038_s20, %s14033_s7 }
  0xeb   : > { %p14042_p0 = scmp.lt.u32.totalorder %s14033_s7, %s14530_s22 }
  0xec   : > { %p14036_p1 = pnand %p14035_p8, %p14034_p10  ;;  %p14041_p13 = por %p14040_p12, %p14039_p11 }
  0xee   : > { %p14037_p3 = pneg %p14036_p1  ;;  %p14043_p2 = por %p14042_p0, %p14041_p13 }
  0xf0   : > { %p14044_p5 = pnand %p14043_p2, %p14037_p3 }
  0xf2   : > { %14047 = shalt.err (!%p14044_p5)
}
  0xf3   : > { %s14048_s17 = scalar_lea.vmem %s14532_s4, 256  ;;  %s14161_s1 = smov [#allocation7]  }
  0xf4   : > { %p14049_p10 = scmp.ne.s32.totalorder %s14532_s4, %s14048_s17  ;;  %s14053_s3 = sshll.u32 %s14161_s1, 4  ;;  %s14054_s3 = int_to_ptr.vmem [resolvable:$false] %s14053_s3 }
  0xf5   : > { %s14055_s6 = scalar_lea.vmem %s14054_s3, 512  ;;  %p14056_p7 = scmp.lt.s32.totalorder %s14532_s4, %s14054_s3 }
  0xf6   : > { %p14051_p1 = pnand %p14049_p10, %p14035_p8  ;;  %p14057_p11 = scmp.lt.s32.totalorder %s14055_s6, %s14048_s17 }
  0xf8   : > { %p14052_p9 = pneg %p14051_p1  ;;  %p14058_p12 = por %p14057_p11, %p14056_p7 }
  0xfa   : > { %p14059_p13 = pnand %p14058_p12, %p14052_p9 }
  0xfc   : > { %14062 = shalt.err (!%p14059_p13)
}
  0xfd   : > { %12651 = dma.hbm_to_vmem [thread:$0]  (!%p14536_p4), %s14530_s22, 256, %s14532_s4, %s568_s5  }
  0xfe   : > { %p15699_p3 = scmp.ne.s32.totalorder %s15685_s30, 0 }
  0xff   : > { %s14568_s7 = sand.u32 (!%p15699_p3), 1, %s14137_s25  }
 0x100   : > { %588 = sbr.rel (%p15699_p3) target bundleno = 6032 (0x1790), region = 88  ;;  %s11168_s20 = sshll.u32 (!%p15699_p3), %s14568_s7, 4 }
 0x101   : > { %s591_s14 = scalar_lea.sflag (!%p15699_p3), [#allocation8], %s14568_s7  ;;  %s14574_s28 = scalar_lea.vmem (!%p15699_p3), [#allocation7], %s11168_s20 }
 0x107   : > { %14108 = dma.done.wait (%p14511_p6), %s591_s14, 256  }
 0x108   : > { %14110 = vsyncadd (%p14511_p6), %s591_s14, 4294967040  ;;  %p15700_p7 = scmp.eq.s32.totalorder %s14281_s0, 0 }
 0x10a   : > { %14112 = dma.done.wait (%p15700_p7), [#allocation11], 24576   ;;  %p15701_p9 = pmov %p15700_p7 }
 0x10b   : > { %p15702_p4 = pmov %p15700_p7 }
 0x10c   : > { %14114 = vsyncadd (%p15701_p9), [#allocation11], 4294942720 }
 0x10d   : > { %14116 = dma.done.wait (%p15702_p4), [#allocation14], 18576   ;;  %p15703_p8 = pmov %p15702_p4 }
 0x10e   : > { %p15704_p0 = pmov %p15702_p4 }
 0x10f   : > { %14118 = vsyncadd (%p15703_p8), [#allocation14], 4294948720 }
 0x110   : > { %14120 = dma.done.wait (%p15704_p0), [#allocation17], 6176   ;;  %p15705_p2 = pmov %p15704_p0 }
 0x111   : > { %p15706_p6 = pmov %p15704_p0 }
 0x112   : > { %14122 = vsyncadd (%p15705_p2), [#allocation17], 4294961120 }
 0x113   : > { %14124 = dma.done.wait (%p15706_p6), [#allocation20], 32768   ;;  %p15707_p5 = pmov %p15704_p0 }
 0x114   : > { %v678_v0 = vld [vmem:[%s14574_s28] sm:$0xff]  ;;  %v679_v1 = vld [vmem:[%s14574_s28 + $0x8] sm:$0xff]  ;;  %v684_v45 = vlaneseq  ;;  %s15708_s19 = sld [smem:[#allocation30_spill]]  ;;  %vm14163_vm0 = vmmov 0   ;;  %s15709_s1 = sld [smem:[#allocation34_spill]]  ;;  %vm1894_vm1 = vcmask 261120  }
 0x115   : > { %14126 = vsyncadd (%p15707_p5), [#allocation20], 4294934528  ;;  %v690_v2 = vadd.f32 %v679_v1, %v678_v0  ;;  %v12727_v3 = vld [vmem:[#allocation10 + $0x4] ss:$36 sps:$4 sm:$0xff]   ;;  %v12730_v5 = vld [vmem:[#allocation10 + $0x4c] ss:$36 sps:$4 sm:$0xff]  }
 0x116   : > { %v12729_v4 = vld [vmem:[#allocation10] ss:$36 sps:$4 sm:$0xff]   ;;  %1680 = vmatprep.subr.bf16.mxu0 %v12727_v3  ;;  %v12732_v6 = vld [vmem:[#allocation10 + $0x48] ss:$36 sps:$4 sm:$0xff]   ;;  %v12733_v7 = vld [vmem:[#allocation10 + $0x94] ss:$36 sps:$4 sm:$0xff]  }
 0x117   : > { %691 = vadd.xlane.f32.xlu0 %v690_v2  ;;  %1681 = vmatpush1.bf16.msra.mxu0 %v12729_v4  ;;  %v12735_v8 = vld [vmem:[#allocation10 + $0x90] ss:$36 sps:$4 sm:$0xff]   ;;  %v12736_v9 = vld [vmem:[#allocation10 + $0xdc] ss:$36 sps:$4 sm:$0xff]   ;;  %v12739_v11 = vld [vmem:[#allocation10 + $0x124] ss:$36 sps:$4 sm:$0xff]  }
 0x118   : > { %1682 = vmatprep.subr.bf16.mxu0 %v12730_v5  ;;  %v12738_v10 = vld [vmem:[#allocation10 + $0xd8] ss:$36 sps:$4 sm:$0xff]   ;;  %v12741_v12 = vld [vmem:[#allocation10 + $0x120] ss:$36 sps:$4 sm:$0xff]   ;;  %v12742_v13 = vld [vmem:[#allocation10 + $0x16c] ss:$36 sps:$4 sm:$0xff]  }
 0x119   : > { %v12744_v14 = vld [vmem:[#allocation10 + $0x168] ss:$36 sps:$4 sm:$0xff]   ;;  %v12745_v15 = vld [vmem:[#allocation10 + $0x1b4] ss:$36 sps:$4 sm:$0xff]   ;;  %v12748_v17 = vld [vmem:[#allocation10 + $0x1fc] ss:$36 sps:$4 sm:$0xff]  }
 0x11a   : > { %v12747_v16 = vld [vmem:[#allocation10 + $0x1b0] ss:$36 sps:$4 sm:$0xff]   ;;  %v12750_v18 = vld [vmem:[#allocation10 + $0x1f8] ss:$36 sps:$4 sm:$0xff]   ;;  %v12751_v19 = vld [vmem:[#allocation10 + $0x244] ss:$36 sps:$4 sm:$0xff]  }
 0x11b   : > { %1683 = vmatpush1.bf16.msra.mxu0 %v12732_v6  ;;  %v12753_v20 = vld [vmem:[#allocation10 + $0x240] ss:$36 sps:$4 sm:$0xff]   ;;  %v12754_v21 = vld [vmem:[#allocation10 + $0x28c] ss:$36 sps:$4 sm:$0xff]   ;;  %v12757_v23 = vld [vmem:[#allocation10 + $0x2d4] ss:$36 sps:$4 sm:$0xff]  }
 0x11c   : > { %1684 = vmatprep.subr.bf16.mxu0 %v12733_v7  ;;  %v12756_v22 = vld [vmem:[#allocation10 + $0x288] ss:$36 sps:$4 sm:$0xff]   ;;  %v12759_v31 = vld [vmem:[#allocation10 + $0x2d0] ss:$36 sps:$4 sm:$0xff]   ;;  %v12760_v32 = vld [vmem:[#allocation10 + $0x31c] ss:$36 sps:$4 sm:$0xff]  }
 0x11d   : > { %v12762_v33 = vld [vmem:[#allocation10 + $0x318] ss:$36 sps:$4 sm:$0xff]   ;;  %v12763_v34 = vld [vmem:[#allocation10 + $0x364] ss:$36 sps:$4 sm:$0xff]   ;;  %v12766_v36 = vld [vmem:[#allocation10 + $0x3ac] ss:$36 sps:$4 sm:$0xff]  }
 0x11e   : > { %v12765_v35 = vld [vmem:[#allocation10 + $0x360] ss:$36 sps:$4 sm:$0xff]   ;;  %v12768_v37 = vld [vmem:[#allocation10 + $0x3a8] ss:$36 sps:$4 sm:$0xff]   ;;  %v12769_v38 = vld [vmem:[#allocation10 + $0x3f4] ss:$36 sps:$4 sm:$0xff]  }
 0x11f   : > { %1685 = vmatpush1.bf16.msra.mxu0 %v12735_v8  ;;  %v12771_v39 = vld [vmem:[#allocation10 + $0x3f0] ss:$36 sps:$4 sm:$0xff]   ;;  %v12772_v40 = vld [vmem:[#allocation10 + $0x43c] ss:$36 sps:$4 sm:$0xff]   ;;  %v14599_v47 = vshrl.u32 %v684_v45, 7  ;;  %s14164_s3 = smov 64  }
 0x120   : > { %1686 = vmatprep.subr.bf16.mxu0 %v12736_v9  ;;  %v12774_v41 = vld [vmem:[#allocation10 + $0x438] ss:$36 sps:$4 sm:$0xff]   ;;  %v12777_v42 = vld [vmem:[#allocation10 + $0xc] ss:$36 sps:$4 sm:$0xff]   ;;  %v680_v50 = vld [vmem:[%s15708_s19] sm:$0x3] }
 0x121   : > { %v14602_v48 = vsub.s32 1, %v14599_v47  ;;  %v14605_v49 = vsub.s32 0, %v14599_v47  ;;  %v681_v51 = vld [vmem:[%s15645_s2] sm:$0x3]  ;;  %v12780_v2 = vld [vmem:[#allocation10 + $0x54] ss:$36 sps:$4 sm:$0xff]  }
 0x122   : > { %v12778_v3 = vld [vmem:[#allocation10 + $0x50] ss:$36 sps:$4 sm:$0xff]   ;;  %v12783_v4 = vld [vmem:[#allocation10 + $0x9c] ss:$36 sps:$4 sm:$0xff]   ;;  %v12786_v6 = vld [vmem:[#allocation10 + $0xe4] ss:$36 sps:$4 sm:$0xff]  }
 0x123   : > { %1687 = vmatpush1.bf16.msra.mxu0 %v12738_v10  ;;  %v14614_v52 = vrot.slane %v680_v50, %v14602_v48  ;;  %v14617_v53 = vrot.slane %v680_v50, %v14605_v49  ;;  %v14620_v57 = vrot.slane %v681_v51, %v14602_v48  ;;  %v14623_v58 = vrot.slane %v681_v51, %v14605_v49  ;;  %v12781_v5 = vld [vmem:[#allocation10 + $0x98] ss:$36 sps:$4 sm:$0xff]   ;;  %v12784_v7 = vld [vmem:[#allocation10 + $0xe0] ss:$36 sps:$4 sm:$0xff]   ;;  %v12789_v8 = vld [vmem:[#allocation10 + $0x12c] ss:$36 sps:$4 sm:$0xff]  }
 0x124   : > { %1688 = vmatprep.subr.bf16.mxu0 %v12739_v11  ;;  %v12787_v9 = vld [vmem:[#allocation10 + $0x128] ss:$36 sps:$4 sm:$0xff]   ;;  %v12792_v10 = vld [vmem:[#allocation10 + $0x174] ss:$36 sps:$4 sm:$0xff]   ;;  %s14165_s6 = smov 96   ;;  %s14166_s14 = smov 32  }
 0x125   : > { %v12790_v11 = vld [vmem:[#allocation10 + $0x170] ss:$36 sps:$4 sm:$0xff]   ;;  %v12844_v51 = vld [vmem:[#allocation10 + $0x208] ss:$36 sps:$4 sm:$0xff]   ;;  %vm2879_vm2 = vcmask 1043456   ;;  %vm2731_vm3 = vcmask 64512  }
 0x126   : > { %v12846_v50 = vld [vmem:[#allocation10 + $0x20c] ss:$36 sps:$4 sm:$0xff]   ;;  %vm3434_vm4 = vcmask 523520   ;;  %vm3440_vm5 = vcmask 785920   ;;  %vm3446_vm6 = vcmask 1048320   ;;  %s15710_s4 = sld [smem:[#allocation36_spill]] }
 0x127   : > { %1689 = vmatpush1.bf16.msra.mxu0 %v12741_v12  ;;  %v12795_v12 = vld [vmem:[#allocation10 + $0x1bc] ss:$36 sps:$4 sm:$0xff]   ;;  %s15711_s17 = sld [smem:[#allocation37_spill]]  ;;  %s15712_s19 = sld [smem:[#allocation38_spill]] }
 0x128   : > { %1690 = vmatprep.subr.bf16.mxu0 %v12742_v13  ;;  %v12793_v13 = vld [vmem:[#allocation10 + $0x1b8] ss:$36 sps:$4 sm:$0xff]   ;;  %s15714_s30 = sld [smem:[#allocation32_spill]]  ;;  %p15716_p1 = scmp.ne.s32.totalorder %s15695_s29, 0 }
 0x12b   : > { %1691 = vmatpush1.bf16.msra.mxu0 %v12744_v14  ;;  %v12798_v14 = vld [vmem:[#allocation10 + $0x204] ss:$36 sps:$4 sm:$0xff]  }
 0x12c   : > { %1692 = vmatprep.subr.bf16.mxu0 %v12745_v15  ;;  %v12796_v15 = vld [vmem:[#allocation10 + $0x200] ss:$36 sps:$4 sm:$0xff]  }
 0x12f   : > { %1693 = vmatpush1.bf16.msra.mxu0 %v12747_v16  ;;  %v12801_v16 = vld [vmem:[#allocation10 + $0x24c] ss:$36 sps:$4 sm:$0xff]  }
 0x130   : > { %1694 = vmatprep.subr.bf16.mxu0 %v12748_v17  ;;  %v12799_v17 = vld [vmem:[#allocation10 + $0x248] ss:$36 sps:$4 sm:$0xff]  }
 0x133   : > { %1695 = vmatpush1.bf16.msra.mxu0 %v12750_v18  ;;  %v12804_v18 = vld [vmem:[#allocation10 + $0x294] ss:$36 sps:$4 sm:$0xff]  }
 0x134   : > { %1696 = vmatprep.subr.bf16.mxu0 %v12751_v19  ;;  %v12802_v19 = vld [vmem:[#allocation10 + $0x290] ss:$36 sps:$4 sm:$0xff]  }
 0x137   : > { %1697 = vmatpush1.bf16.msra.mxu0 %v12753_v20  ;;  %v12807_v20 = vld [vmem:[#allocation10 + $0x2dc] ss:$36 sps:$4 sm:$0xff]  }
 0x138   : > { %1698 = vmatprep.subr.bf16.mxu0 %v12754_v21  ;;  %v12805_v21 = vld [vmem:[#allocation10 + $0x2d8] ss:$36 sps:$4 sm:$0xff]  }
 0x13b   : > { %1699 = vmatpush1.bf16.msra.mxu0 %v12756_v22  ;;  %v12810_v22 = vld [vmem:[#allocation10 + $0x324] ss:$36 sps:$4 sm:$0xff]  }
 0x13c   : > { %1700 = vmatprep.subr.bf16.mxu0 %v12757_v23  ;;  %v12808_v23 = vld [vmem:[#allocation10 + $0x320] ss:$36 sps:$4 sm:$0xff]  }
 0x13f   : > { %1701 = vmatpush1.bf16.msra.mxu0 %v12759_v31  ;;  %v12820_v31 = vld [vmem:[#allocation10 + $0x440] ss:$36 sps:$4 sm:$0xff]  }
 0x140   : > { %1702 = vmatprep.subr.bf16.mxu0 %v12760_v32  ;;  %v12825_v32 = vld [vmem:[#allocation10 + $0x14] ss:$36 sps:$4 sm:$0xff]  }
 0x143   : > { %1703 = vmatpush1.bf16.msra.mxu0 %v12762_v33  ;;  %v12823_v33 = vld [vmem:[#allocation10 + $0x10] ss:$36 sps:$4 sm:$0xff]  }
 0x144   : > { %1704 = vmatprep.subr.bf16.mxu0 %v12763_v34  ;;  %v12828_v34 = vld [vmem:[#allocation10 + $0x5c] ss:$36 sps:$4 sm:$0xff]  }
 0x147   : > { %1705 = vmatpush1.bf16.msra.mxu0 %v12765_v35  ;;  %v12826_v35 = vld [vmem:[#allocation10 + $0x58] ss:$36 sps:$4 sm:$0xff]  }
 0x148   : > { %1706 = vmatprep.subr.bf16.mxu0 %v12766_v36  ;;  %v12831_v36 = vld [vmem:[#allocation10 + $0xa4] ss:$36 sps:$4 sm:$0xff]  }
 0x14b   : > { %1707 = vmatpush1.bf16.msra.mxu0 %v12768_v37  ;;  %v12829_v37 = vld [vmem:[#allocation10 + $0xa0] ss:$36 sps:$4 sm:$0xff]  }
 0x14c   : > { %1708 = vmatprep.subr.bf16.mxu0 %v12769_v38  ;;  %v12834_v38 = vld [vmem:[#allocation10 + $0xec] ss:$36 sps:$4 sm:$0xff]  }
 0x14f   : > { %1709 = vmatpush1.bf16.msra.mxu0 %v12771_v39  ;;  %v12832_v39 = vld [vmem:[#allocation10 + $0xe8] ss:$36 sps:$4 sm:$0xff]  }
 0x150   : > { %1710 = vmatprep.subr.bf16.mxu0 %v12772_v40  ;;  %v12837_v40 = vld [vmem:[#allocation10 + $0x134] ss:$36 sps:$4 sm:$0xff]  }
 0x153   : > { %1711 = vmatpush1.bf16.msra.mxu0 %v12774_v41  ;;  %v12835_v41 = vld [vmem:[#allocation10 + $0x130] ss:$36 sps:$4 sm:$0xff]  }
 0x154   : > { %1721 = vmatprep.subr.bf16.mxu0 %v12777_v42  ;;  %v12840_v42 = vld [vmem:[#allocation10 + $0x17c] ss:$36 sps:$4 sm:$0xff]  }
 0x1a4   : > { %v692_v24 = vpop.xlane.xlu0 %691 }
 0x1a5   : > { %v694_v25 = vmul.f32 0.00390625, %v692_v24  ;;  %v12813_v24 = vld [vmem:[#allocation10 + $0x36c] ss:$36 sps:$4 sm:$0xff]  }
 0x1a7   : > { %v695_v26 = vsub.f32 %v678_v0, %v694_v25  ;;  %v696_v27 = vsub.f32 %v679_v1, %v694_v25  ;;  %v12775_v0 = vld [vmem:[#allocation10 + $0x8] ss:$36 sps:$4 sm:$0xff]  }
 0x1a8   : > { %v12811_v25 = vld [vmem:[#allocation10 + $0x368] ss:$36 sps:$4 sm:$0xff]  }
 0x1a9   : > { %v697_v28 = vmul.f32 %v695_v26, %v695_v26  ;;  %v698_v29 = vmul.f32 %v696_v27, %v696_v27 }
 0x1ab   : > { %v699_v30 = vadd.f32 %v698_v29, %v697_v28  ;;  %v12819_v28 = vld [vmem:[#allocation10 + $0x3fc] ss:$36 sps:$4 sm:$0xff]  }
 0x1ac   : > { %v12817_v29 = vld [vmem:[#allocation10 + $0x3f8] ss:$36 sps:$4 sm:$0xff]  }
 0x1ad   : > { %700 = vadd.xlane.f32.xlu0 %v699_v30  ;;  %v12822_v30 = vld [vmem:[#allocation10 + $0x444] ss:$36 sps:$4 sm:$0xff]  }
 0x23a   : > { %v701_v43 = vpop.xlane.xlu0 %700 }
 0x23b   : > { %v702_v44 = vmul.f32 0.00390625, %v701_v43  ;;  %v12838_v43 = vld [vmem:[#allocation10 + $0x178] ss:$36 sps:$4 sm:$0xff]  }
 0x23d   : > { %v703_v46 = vadd.f32 1e-05, %v702_v44  ;;  %v12843_v44 = vld [vmem:[#allocation10 + $0x1c4] ss:$36 sps:$4 sm:$0xff]  }
 0x23f   : > { %13671 = vrsqrt.f32 %v703_v46  ;;  %v12841_v46 = vld [vmem:[#allocation10 + $0x1c0] ss:$36 sps:$4 sm:$0xff]  }
 0x249   : > { %v13672_v54 = vpop.eup %13671 }
 0x24a   : > { %v705_v55 = vmul.f32 %v13672_v54, %v695_v26  ;;  %v706_v56 = vmul.f32 %v13672_v54, %v696_v27  ;;  %v12816_v26 = vld [vmem:[#allocation10 + $0x3b4] ss:$36 sps:$4 sm:$0xff]  }
 0x24b   : > { %v12814_v27 = vld [vmem:[#allocation10 + $0x3b0] ss:$36 sps:$4 sm:$0xff]  }
 0x24c   : > { %v719_v59 = vmul.f32 %v14614_v52, %v706_v56  ;;  %v718_v60 = vmul.f32 %v14617_v53, %v705_v55  ;;  %v12849_v54 = vld [vmem:[#allocation10 + $0x254] ss:$36 sps:$4 sm:$0xff]   ;;  %v12852_v56 = vld [vmem:[#allocation10 + $0x29c] ss:$36 sps:$4 sm:$0xff]  }
 0x24d   : > { %v12847_v55 = vld [vmem:[#allocation10 + $0x250] ss:$36 sps:$4 sm:$0xff]  }
 0x24e   : > { %v732_v61 = vadd.f32 %v14620_v57, %v719_v59  ;;  %v731_v62 = vadd.f32 %v14623_v58, %v718_v60  ;;  %v12850_v59 = vld [vmem:[#allocation10 + $0x298] ss:$36 sps:$4 sm:$0xff]   ;;  %v12855_v60 = vld [vmem:[#allocation10 + $0x2e4] ss:$36 sps:$4 sm:$0xff]  }
 0x250   : > { %v14629_v63 = vpack.c.bf16 %v732_v61, %v732_v61  ;;  %v14631_v1 = vpack.c.bf16 %v731_v62, %v731_v62  ;;  %v12853_v61 = vld [vmem:[#allocation10 + $0x2e0] ss:$36 sps:$4 sm:$0xff]   ;;  %v12858_v62 = vld [vmem:[#allocation10 + $0x32c] ss:$36 sps:$4 sm:$0xff]  }
 0x252   : > { %1712 = vmatprep.mubr.bf16.mxu0 %v14629_v63 }
 0x253   : > { %1713 = vmatmul.mubr.bf16.vlgmr.msra.gmra.mrb[0].mxu0 %v14631_v1 }
 0x254   : > { %1722 = vmatpush1.bf16.msra.mxu0 %v12775_v0  ;;  %1753 = vmatprep.mubr.bf16.mxu0 %v14629_v63  ;;  %v12856_v0 = vld [vmem:[#allocation10 + $0x328] ss:$36 sps:$4 sm:$0xff]  }
 0x255   : > { %1723 = vmatprep.subr.bf16.mxu0 %v12780_v2  ;;  %v12861_v2 = vld [vmem:[#allocation10 + $0x374] ss:$36 sps:$4 sm:$0xff]  }
 0x258   : > { %1724 = vmatpush1.bf16.msra.mxu0 %v12778_v3  ;;  %v12859_v3 = vld [vmem:[#allocation10 + $0x370] ss:$36 sps:$4 sm:$0xff]  }
 0x259   : > { %1725 = vmatprep.subr.bf16.mxu0 %v12783_v4  ;;  %v12864_v4 = vld [vmem:[#allocation10 + $0x3bc] ss:$36 sps:$4 sm:$0xff]  }
 0x25c   : > { %1726 = vmatpush1.bf16.msra.mxu0 %v12781_v5  ;;  %v12862_v5 = vld [vmem:[#allocation10 + $0x3b8] ss:$36 sps:$4 sm:$0xff]  }
 0x25d   : > { %1727 = vmatprep.subr.bf16.mxu0 %v12786_v6  ;;  %v12867_v6 = vld [vmem:[#allocation10 + $0x404] ss:$36 sps:$4 sm:$0xff]  }
 0x260   : > { %1728 = vmatpush1.bf16.msra.mxu0 %v12784_v7  ;;  %v12865_v7 = vld [vmem:[#allocation10 + $0x400] ss:$36 sps:$4 sm:$0xff]  }
 0x261   : > { %1729 = vmatprep.subr.bf16.mxu0 %v12789_v8  ;;  %v12870_v8 = vld [vmem:[#allocation10 + $0x44c] ss:$36 sps:$4 sm:$0xff]  }
 0x264   : > { %1730 = vmatpush1.bf16.msra.mxu0 %v12787_v9  ;;  %v12868_v9 = vld [vmem:[#allocation10 + $0x448] ss:$36 sps:$4 sm:$0xff]  }
 0x265   : > { %1731 = vmatprep.subr.bf16.mxu0 %v12792_v10  ;;  %v12873_v10 = vld [vmem:[#allocation10 + $0x1c] ss:$36 sps:$4 sm:$0xff]  }
 0x268   : > { %1732 = vmatpush1.bf16.msra.mxu0 %v12790_v11  ;;  %v12871_v11 = vld [vmem:[#allocation10 + $0x18] ss:$36 sps:$4 sm:$0xff]  }
 0x269   : > { %1733 = vmatprep.subr.bf16.mxu0 %v12795_v12  ;;  %v12876_v12 = vld [vmem:[#allocation10 + $0x64] ss:$36 sps:$4 sm:$0xff]  }
 0x26c   : > { %1734 = vmatpush1.bf16.msra.mxu0 %v12793_v13  ;;  %v12874_v13 = vld [vmem:[#allocation10 + $0x60] ss:$36 sps:$4 sm:$0xff]  }
 0x26d   : > { %1735 = vmatprep.subr.bf16.mxu0 %v12798_v14  ;;  %v12879_v14 = vld [vmem:[#allocation10 + $0xac] ss:$36 sps:$4 sm:$0xff]  }
 0x270   : > { %1736 = vmatpush1.bf16.msra.mxu0 %v12796_v15  ;;  %v12877_v15 = vld [vmem:[#allocation10 + $0xa8] ss:$36 sps:$4 sm:$0xff]  }
 0x271   : > { %1737 = vmatprep.subr.bf16.mxu0 %v12801_v16  ;;  %v12882_v16 = vld [vmem:[#allocation10 + $0xf4] ss:$36 sps:$4 sm:$0xff]  }
 0x274   : > { %1738 = vmatpush1.bf16.msra.mxu0 %v12799_v17  ;;  %v12880_v17 = vld [vmem:[#allocation10 + $0xf0] ss:$36 sps:$4 sm:$0xff]  }
 0x275   : > { %1739 = vmatprep.subr.bf16.mxu0 %v12804_v18  ;;  %v12885_v18 = vld [vmem:[#allocation10 + $0x13c] ss:$36 sps:$4 sm:$0xff]  }
 0x278   : > { %1740 = vmatpush1.bf16.msra.mxu0 %v12802_v19  ;;  %v12883_v19 = vld [vmem:[#allocation10 + $0x138] ss:$36 sps:$4 sm:$0xff]  }
 0x279   : > { %1741 = vmatprep.subr.bf16.mxu0 %v12807_v20  ;;  %v12888_v20 = vld [vmem:[#allocation10 + $0x184] ss:$36 sps:$4 sm:$0xff]  }
 0x27c   : > { %1742 = vmatpush1.bf16.msra.mxu0 %v12805_v21  ;;  %v12886_v21 = vld [vmem:[#allocation10 + $0x180] ss:$36 sps:$4 sm:$0xff]  }
 0x27d   : > { %1743 = vmatprep.subr.bf16.mxu0 %v12810_v22  ;;  %v12891_v22 = vld [vmem:[#allocation10 + $0x1cc] ss:$36 sps:$4 sm:$0xff]  }
 0x280   : > { %1744 = vmatpush1.bf16.msra.mxu0 %v12808_v23  ;;  %v12889_v23 = vld [vmem:[#allocation10 + $0x1c8] ss:$36 sps:$4 sm:$0xff]  }
 0x281   : > { %1745 = vmatprep.subr.bf16.mxu0 %v12813_v24  ;;  %v12894_v24 = vld [vmem:[#allocation10 + $0x214] ss:$36 sps:$4 sm:$0xff]  }
 0x284   : > { %1746 = vmatpush1.bf16.msra.mxu0 %v12811_v25  ;;  %v12892_v25 = vld [vmem:[#allocation10 + $0x210] ss:$36 sps:$4 sm:$0xff]  }
 0x285   : > { %1747 = vmatprep.subr.bf16.mxu0 %v12816_v26  ;;  %v12897_v26 = vld [vmem:[#allocation10 + $0x25c] ss:$36 sps:$4 sm:$0xff]  }
 0x288   : > { %1748 = vmatpush1.bf16.msra.mxu0 %v12814_v27  ;;  %v12895_v27 = vld [vmem:[#allocation10 + $0x258] ss:$36 sps:$4 sm:$0xff]  }
 0x289   : > { %1749 = vmatprep.subr.bf16.mxu0 %v12819_v28  ;;  %v12900_v28 = vld [vmem:[#allocation10 + $0x2a4] ss:$36 sps:$4 sm:$0xff]  }
 0x28c   : > { %1750 = vmatpush1.bf16.msra.mxu0 %v12817_v29  ;;  %v14162_v29 = vmov 0.0  }
 0x28d   : > { %1751 = vmatprep.subr.bf16.mxu0 %v12822_v30  ;;  %12271 = vmatprep.subr.bf16.mxu1 %v14162_v29  ;;  %v12898_v30 = vld [vmem:[#allocation10 + $0x2a0] ss:$36 sps:$4 sm:$0xff]  }
 0x28e   : > { %12273 = vmatprep.mubr.msk.bf16.mxu1 %vm14163_vm0, %v14162_v29 }
 0x290   : > { %1752 = vmatpush1.bf16.msra.mxu0 %v12820_v31  ;;  %v12903_v31 = vld [vmem:[#allocation10 + $0x2ec] ss:$36 sps:$4 sm:$0xff]  }
 0x291   : > { %1762 = vmatprep.subr.bf16.mxu0 %v12825_v32  ;;  %v12901_v32 = vld [vmem:[#allocation10 + $0x2e8] ss:$36 sps:$4 sm:$0xff]  }
 0x293   : > { %1754 = vmatmul.mubr.bf16.vlgmr.msra.gmra.mrb[4].mxu0 %v14631_v1 }
 0x294   : > { %1763 = vmatpush1.bf16.msra.mxu0 %v12823_v33  ;;  %1794 = vmatprep.mubr.bf16.mxu0 %v14629_v63  ;;  %v12906_v33 = vld [vmem:[#allocation10 + $0x334] ss:$36 sps:$4 sm:$0xff]  }
 0x295   : > { %1764 = vmatprep.subr.bf16.mxu0 %v12828_v34  ;;  %v12904_v34 = vld [vmem:[#allocation10 + $0x330] ss:$36 sps:$4 sm:$0xff]  }
 0x298   : > { %1765 = vmatpush1.bf16.msra.mxu0 %v12826_v35  ;;  %v12909_v35 = vld [vmem:[#allocation10 + $0x37c] ss:$36 sps:$4 sm:$0xff]  }
 0x299   : > { %1766 = vmatprep.subr.bf16.mxu0 %v12831_v36  ;;  %v12907_v36 = vld [vmem:[#allocation10 + $0x378] ss:$36 sps:$4 sm:$0xff]  }
 0x29c   : > { %1767 = vmatpush1.bf16.msra.mxu0 %v12829_v37  ;;  %v12912_v37 = vld [vmem:[#allocation10 + $0x3c4] ss:$36 sps:$4 sm:$0xff]  }
 0x29d   : > { %1768 = vmatprep.subr.bf16.mxu0 %v12834_v38  ;;  %v12910_v38 = vld [vmem:[#allocation10 + $0x3c0] ss:$36 sps:$4 sm:$0xff]  }
 0x2a0   : > { %1769 = vmatpush1.bf16.msra.mxu0 %v12832_v39  ;;  %v12915_v39 = vld [vmem:[#allocation10 + $0x40c] ss:$36 sps:$4 sm:$0xff]  }
 0x2a1   : > { %1770 = vmatprep.subr.bf16.mxu0 %v12837_v40  ;;  %v12913_v40 = vld [vmem:[#allocation10 + $0x408] ss:$36 sps:$4 sm:$0xff]  }
 0x2a4   : > { %1771 = vmatpush1.bf16.msra.mxu0 %v12835_v41  ;;  %v12918_v41 = vld [vmem:[#allocation10 + $0x454] ss:$36 sps:$4 sm:$0xff]  }
 0x2a5   : > { %1772 = vmatprep.subr.bf16.mxu0 %v12840_v42  ;;  %v12916_v42 = vld [vmem:[#allocation10 + $0x450] ss:$36 sps:$4 sm:$0xff]  }
 0x2a8   : > { %1773 = vmatpush1.bf16.msra.mxu0 %v12838_v43  ;;  %v12919_v43 = vld [vmem:[#allocation10 + $0x260] ss:$36 sps:$4 sm:$0xff]  }
 0x2a9   : > { %1774 = vmatprep.subr.bf16.mxu0 %v12843_v44  ;;  %v12920_v44 = vld [vmem:[#allocation10 + $0x20] ss:$36 sps:$4 sm:$0xff]  }
 0x2ac   : > { %1775 = vmatpush1.bf16.msra.mxu0 %v12841_v46  ;;  %v12921_v46 = vld [vmem:[#allocation10 + $0x2a8] ss:$36 sps:$4 sm:$0xff]  }
 0x2ad   : > { %1776 = vmatprep.subr.bf16.mxu0 %v12846_v50  ;;  %v12922_v50 = vld [vmem:[#allocation10 + $0x68] ss:$36 sps:$4 sm:$0xff]  }
 0x2b0   : > { %1777 = vmatpush1.bf16.msra.mxu0 %v12844_v51  ;;  %v12923_v51 = vld [vmem:[#allocation10 + $0x2f0] ss:$36 sps:$4 sm:$0xff]  }
 0x2b1   : > { %1778 = vmatprep.subr.bf16.mxu0 %v12849_v54  ;;  %v12924_v54 = vld [vmem:[#allocation10 + $0xb0] ss:$36 sps:$4 sm:$0xff]  }
 0x2b4   : > { %1779 = vmatpush1.bf16.msra.mxu0 %v12847_v55  ;;  %v12925_v55 = vld [vmem:[#allocation10 + $0x338] ss:$36 sps:$4 sm:$0xff]  }
 0x2b5   : > { %1780 = vmatprep.subr.bf16.mxu0 %v12852_v56  ;;  %v12926_v56 = vld [vmem:[#allocation10 + $0xf8] ss:$36 sps:$4 sm:$0xff]  }
 0x2b8   : > { %1781 = vmatpush1.bf16.msra.mxu0 %v12850_v59  ;;  %v12927_v59 = vld [vmem:[#allocation10 + $0x380] ss:$36 sps:$4 sm:$0xff]  }
 0x2b9   : > { %1782 = vmatprep.subr.bf16.mxu0 %v12855_v60  ;;  %v12928_v60 = vld [vmem:[#allocation10 + $0x140] ss:$36 sps:$4 sm:$0xff]  }
 0x2bc   : > { %1783 = vmatpush1.bf16.msra.mxu0 %v12853_v61  ;;  %v14648_v61 = vld [vmem:[%s15709_s1] sm:$0xff] }
 0x2bd   : > { %1784 = vmatprep.subr.bf16.mxu0 %v12858_v62  ;;  %v902_v62 = vrot.slane %v14648_v61, %v14605_v49 }
 0x2c0   : > { %1785 = vmatpush1.bf16.msra.mxu0 %v12856_v0  ;;  %v906_v0 = vrot.slane %v14648_v61, %v14602_v48 }
 0x2c1   : > { %1786 = vmatprep.subr.bf16.mxu0 %v12861_v2  ;;  %v12930_v2 = vld [vmem:[#allocation10 + $0x188] ss:$36 sps:$4 sm:$0xff]  }
 0x2c4   : > { %1787 = vmatpush1.bf16.msra.mxu0 %v12859_v3  ;;  %v12931_v3 = vld [vmem:[#allocation10 + $0x410] ss:$36 sps:$4 sm:$0xff]  }
 0x2c5   : > { %1788 = vmatprep.subr.bf16.mxu0 %v12864_v4 }
 0x2c8   : > { %1789 = vmatpush1.bf16.msra.mxu0 %v12862_v5 }
 0x2c9   : > { %1790 = vmatprep.subr.bf16.mxu0 %v12867_v6 }
 0x2cc   : > { %1791 = vmatpush1.bf16.msra.mxu0 %v12865_v7 }
 0x2cd   : > { %1792 = vmatprep.subr.bf16.mxu0 %v12870_v8 }
 0x2d0   : > { %1793 = vmatpush1.bf16.msra.mxu0 %v12868_v9  ;;  %v12932_v9 = vld [vmem:[#allocation10 + $0x1d0] ss:$36 sps:$4 sm:$0xff]  }
 0x2d1   : > { %1803 = vmatprep.subr.bf16.mxu0 %v12873_v10 }
 0x2d3   : > { %1795 = vmatmul.mubr.bf16.vlgmr.msra.gmra.mrb[8].mxu0 %v14631_v1 }
 0x2d4   : > { %1804 = vmatpush1.bf16.msra.mxu0 %v12871_v11  ;;  %1835 = vmatprep.mubr.bf16.mxu0 %v14629_v63  ;;  %v12933_v11 = vld [vmem:[#allocation10 + $0x458] ss:$36 sps:$4 sm:$0xff]  }
 0x2d5   : > { %1805 = vmatprep.subr.bf16.mxu0 %v12876_v12  ;;  %v12934_v12 = vld [vmem:[#allocation10 + $0x218] ss:$36 sps:$4 sm:$0xff]  }
 0x2d8   : > { %1806 = vmatpush1.bf16.msra.mxu0 %v12874_v13  ;;  %v14661_v13 = vsub.s32 2, %v14599_v47 }
 0x2d9   : > { %1807 = vmatprep.subr.bf16.mxu0 %v12879_v14  ;;  %v14664_v14 = vsub.s32 3, %v14599_v47 }
 0x2dc   : > { %1808 = vmatpush1.bf16.msra.mxu0 %v12877_v15  ;;  %v910_v15 = vrot.slane %v14648_v61, %v14661_v13 }
 0x2dd   : > { %1809 = vmatprep.subr.bf16.mxu0 %v12882_v16  ;;  %v914_v16 = vrot.slane %v14648_v61, %v14664_v14 }
 0x2e0   : > { %1810 = vmatpush1.bf16.msra.mxu0 %v12880_v17 }
 0x2e1   : > { %1811 = vmatprep.subr.bf16.mxu0 %v12885_v18 }
 0x2e4   : > { %1812 = vmatpush1.bf16.msra.mxu0 %v12883_v19 }
 0x2e5   : > { %1813 = vmatprep.subr.bf16.mxu0 %v12888_v20 }
 0x2e8   : > { %1814 = vmatpush1.bf16.msra.mxu0 %v12886_v21 }
 0x2e9   : > { %1815 = vmatprep.subr.bf16.mxu0 %v12891_v22 }
 0x2ec   : > { %1816 = vmatpush1.bf16.msra.mxu0 %v12889_v23 }
 0x2ed   : > { %1817 = vmatprep.subr.bf16.mxu0 %v12894_v24 }
 0x2f0   : > { %1818 = vmatpush1.bf16.msra.mxu0 %v12892_v25 }
 0x2f1   : > { %1819 = vmatprep.subr.bf16.mxu0 %v12897_v26 }
 0x2f4   : > { %1820 = vmatpush1.bf16.msra.mxu0 %v12895_v27  ;;  %v14686_v27 = vsub.s32 4, %v14599_v47 }
 0x2f5   : > { %1821 = vmatprep.subr.bf16.mxu0 %v12900_v28  ;;  %v14689_v28 = vsub.s32 5, %v14599_v47 }
 0x2f8   : > { %1822 = vmatpush1.bf16.msra.mxu0 %v12898_v30  ;;  %v918_v30 = vrot.slane %v14648_v61, %v14686_v27 }
 0x2f9   : > { %1823 = vmatprep.subr.bf16.mxu0 %v12903_v31  ;;  %v922_v31 = vrot.slane %v14648_v61, %v14689_v28 }
 0x2fc   : > { %1824 = vmatpush1.bf16.msra.mxu0 %v12901_v32 }
 0x2fd   : > { %1825 = vmatprep.subr.bf16.mxu0 %v12906_v33 }
 0x300   : > { %1826 = vmatpush1.bf16.msra.mxu0 %v12904_v34 }
 0x301   : > { %1827 = vmatprep.subr.bf16.mxu0 %v12909_v35 }
 0x304   : > { %1828 = vmatpush1.bf16.msra.mxu0 %v12907_v36 }
 0x305   : > { %1829 = vmatprep.subr.bf16.mxu0 %v12912_v37 }
 0x308   : > { %1830 = vmatpush1.bf16.msra.mxu0 %v12910_v38 }
 0x309   : > { %1831 = vmatprep.subr.bf16.mxu0 %v12915_v39 }
 0x30c   : > { %1832 = vmatpush1.bf16.msra.mxu0 %v12913_v40 }
 0x30d   : > { %1833 = vmatprep.subr.bf16.mxu0 %v12918_v41 }
 0x310   : > { %1834 = vmatpush1.bf16.msra.mxu0 %v12916_v42 }
 0x311   : > { %12131 = vmatprep.subr.bf16.mxu0 %v12919_v43 }
 0x313   : > { %1836 = vmatmul.mubr.bf16.vlgmr.msra.gmra.mrb[12].mxu0 %v14631_v1 }
 0x314   : > { %12132 = vmatpush3.bf16.msra.mxu0 %v12920_v44  ;;  %1876 = vmatprep.mubr.bf16.mxu0 %v14629_v63  ;;  %v12929_v63 = vld [vmem:[#allocation10 + $0x3c8] ss:$36 sps:$4 sm:$0xff]  }
 0x315   : > { %12133 = vmatprep.subr.bf16.mxu0 %v12921_v46  ;;  %v14715_v46 = vsub.s32 6, %v14599_v47 }
 0x318   : > { %12134 = vmatpush3.bf16.msra.mxu0 %v12922_v50 }
 0x319   : > { %12135 = vmatprep.subr.bf16.mxu0 %v12923_v51 }
 0x31c   : > { %12136 = vmatpush3.bf16.msra.mxu0 %v12924_v54  ;;  %v14718_v54 = vsub.s32 7, %v14599_v47 }
 0x31d   : > { %12137 = vmatprep.subr.bf16.mxu0 %v12925_v55  ;;  %v926_v55 = vrot.slane %v14648_v61, %v14715_v46 }
 0x320   : > { %12138 = vmatpush3.bf16.msra.mxu0 %v12926_v56 }
 0x321   : > { %12139 = vmatprep.subr.bf16.mxu0 %v12927_v59 }
 0x324   : > { %12140 = vmatpush3.bf16.msra.mxu0 %v12928_v60  ;;  %v930_v60 = vrot.slane %v14648_v61, %v14718_v54 }
 0x325   : > { %12141 = vmatprep.subr.bf16.mxu0 %v12929_v63 }
 0x326   : > { %v1714_v4 = vpop.f32.mrb[0].mxu0 }
 0x327   : > { %v1715_v5 = vadd.f32 %v1714_v4, %v902_v62  ;;  %v1716_v6 = vpop.f32.mrb[1].mxu0 }
 0x328   : > { %v1717_v7 = vadd.f32 %v1716_v6, %v906_v0  ;;  %12142 = vmatpush3.bf16.msra.mxu0 %v12930_v2  ;;  %v1718_v8 = vpop.f32.mrb[2].mxu0 }
 0x329   : > { %1895 = vst.msk [vmem:[#allocation3] sm:$0xff] %vm1894_vm1, %v1715_v5  ;;  %v1719_v10 = vpop.f32.mrb[3].mxu0  ;;  %12143 = vmatprep.subr.bf16.mxu0 %v12931_v3 }
 0x32a   : > { %1965 = vst.msk [vmem:[#allocation3 + $0x20] sm:$0xff] %vm1894_vm1, %v1717_v7 }
 0x32c   : > { %12144 = vmatpush3.bf16.msra.mxu0 %v12932_v9 }
 0x32d   : > { %12145 = vmatprep.subr.bf16.mxu0 %v12933_v11 }
 0x330   : > { %12146 = vmatpush3.bf16.msra.mxu0 %v12934_v12  ;;  %v2107_v25 = vld [vmem:[#allocation3] sm:$0xff] }
 0x331   : > { %12319 = vmatprep.subr.bf16.mxu0 %v14162_v29  ;;  %v2119_v26 = vpack.c.bf16 %v2107_v25, %v2107_v25  ;;  %v2111_v25 = vld [vmem:[#allocation3 + $0x20] sm:$0xff] }
 0x333   : > { %1877 = vmatmul.mubr.bf16.vlgmr.msra.gmra.mrb[16].mxu0 %v14631_v1 }
 0x334   : > { %12321 = vmatprep.mubr.msk.bf16.mxu0 %vm14163_vm0, %v14162_v29 }
 0x366   : > { %v1755_v17 = vpop.f32.mrb[4].mxu0 }
 0x367   : > { %v1756_v18 = vadd.f32 %v1755_v17, %v910_v15  ;;  %v1757_v19 = vpop.f32.mrb[5].mxu0 }
 0x368   : > { %v1758_v20 = vadd.f32 %v1757_v19, %v914_v16  ;;  %v1759_v1 = vpop.f32.mrb[6].mxu0 }
 0x369   : > { %2037 = vst.msk [vmem:[#allocation3 + $0x40] sm:$0xff] %vm1894_vm1, %v1756_v18  ;;  %v1760_v21 = vpop.f32.mrb[7].mxu0 }
 0x36a   : > { %1897 = vst.msk [vmem:[#allocation4] sm:$0xff] %vm1894_vm1, %v1758_v20  ;;  %1930 = vrot.lane.b32.xlu0 %v1758_v20, %s14164_s3  ;;  %1909 = vrot.lane.b32.xlu1 %v1758_v20, %s14165_s6 }
 0x36e   : > { %1995 = vrot.lane.b32.xlu0 %v1717_v7, %s14164_s3  ;;  %1902 = vrot.lane.b32.xlu1 %v1715_v5, %s14165_s6 }
 0x370   : > { %v2115_v41 = vld [vmem:[#allocation3 + $0x40] sm:$0xff] }
 0x371   : > { %v2131_v22 = vld [vmem:[#allocation4] sm:$0xff]  ;;  %v2127_v42 = vpack.c.bf16 %v2115_v41, %v2115_v41 }
 0x372   : > { %2016 = vrot.lane.b32.xlu0 %v1717_v7, %s14166_s14  ;;  %1923 = vrot.lane.b32.xlu1 %v1715_v5, %s14164_s3  ;;  %v2143_v23 = vpack.c.bf16 %v2131_v22, %v2131_v22 }
 0x374   : > { %v2183_v24 = vsel %vm1894_vm1, %v2143_v23, 0 }
 0x375   : > { %12272 = vmatpush3.bf16.xpose.msra.mxu1 %v2183_v24 }
 0x376   : > { %1951 = vrot.lane.b32.xlu1 %v1758_v20, %s14166_s14  ;;  %12277 = vmatprep.subr.bf16.mxu1 %v14162_v29 }
 0x37a   : > { %1944 = vrot.lane.b32.xlu1 %v1715_v5, %s14166_s14 }
 0x37c   : > { %12274 = vmatmul.mubr.msk.bf16.vlgmr.msra.gmra.mrb[0].mxu1 %vm1894_vm1, %v2119_v26  ;;  %v2123_v26 = vpack.c.bf16 %v2111_v25, %v2111_v25 }
 0x37d   : > { %12279 = vmatprep.mubr.msk.bf16.mxu1 %vm14163_vm0, %v14162_v29 }
 0x3a6   : > { %v1796_v32 = vpop.f32.mrb[8].mxu0 }
 0x3a7   : > { %v1797_v33 = vadd.f32 %v1796_v32, %v918_v30  ;;  %v1798_v34 = vpop.f32.mrb[9].mxu0 }
 0x3a8   : > { %v1799_v35 = vadd.f32 %v1798_v34, %v922_v31  ;;  %v1800_v36 = vpop.f32.mrb[10].mxu0  ;;  %v11178_v31 = vld [vmem:[%s15709_s1 + $0x8] ss:$0 sm:$0xff] }
 0x3a9   : > { %1968 = vst.msk [vmem:[#allocation4 + $0x20] sm:$0xff] %vm1894_vm1, %v1797_v33  ;;  %v1801_v37 = vpop.f32.mrb[11].mxu0  ;;  %1981 = vrot.lane.b32.xlu1 %v1797_v33, %s14165_s6 }
 0x3aa   : > { %2040 = vst.msk [vmem:[#allocation4 + $0x40] sm:$0xff] %vm1894_vm1, %v1799_v35  ;;  %2074 = vrot.lane.b32.xlu0 %v1799_v35, %s14164_s3 }
 0x3ad   : > { %1974 = vrot.lane.b32.xlu1 %v1717_v7, %s14165_s6 }
 0x3ae   : > { %2095 = vrot.lane.b32.xlu0 %v1799_v35, %s14166_s14 }
 0x3b0   : > { %v2135_v1 = vld [vmem:[#allocation4 + $0x20] sm:$0xff] }
 0x3b1   : > { %2002 = vrot.lane.b32.xlu1 %v1797_v33, %s14164_s3  ;;  %v2139_v38 = vld [vmem:[#allocation4 + $0x40] sm:$0xff]  ;;  %v2147_v22 = vpack.c.bf16 %v2135_v1, %v2135_v1 }
 0x3b2   : > { %2088 = vrot.lane.b32.xlu0 %v1756_v18, %s14166_s14  ;;  %v2151_v39 = vpack.c.bf16 %v2139_v38, %v2139_v38 }
 0x3b3   : > { %v2367_v24 = vsel %vm1894_vm1, %v2147_v22, 0 }
 0x3b4   : > { %v2551_v40 = vsel %vm1894_vm1, %v2151_v39, 0 }
 0x3b5   : > { %12320 = vmatpush3.bf16.xpose.msra.mxu0 %v2551_v40  ;;  %2023 = vrot.lane.b32.xlu1 %v1797_v33, %s14166_s14 }
 0x3b6   : > { %12331 = vmatprep.subr.bf16.mxu0 %v14162_v29 }
 0x3b9   : > { %2053 = vrot.lane.b32.xlu1 %v1799_v35, %s14165_s6 }
 0x3bc   : > { %12322 = vmatmul.mubr.msk.bf16.vlgmr.msra.gmra.mrb[20].mxu0 %vm1894_vm1, %v2127_v42 }
 0x3bd   : > { %2046 = vrot.lane.b32.xlu1 %v1756_v18, %s14165_s6  ;;  %12333 = vmatprep.mubr.msk.bf16.mxu0 %vm14163_vm0, %v14162_v29 }
 0x3c1   : > { %2067 = vrot.lane.b32.xlu1 %v1756_v18, %s14164_s3 }
 0x3dc   : > { %v1931_v43 = vpop.permute.xlu0 %1930  ;;  %v1910_v44 = vpop.permute.xlu1 %1909 }
 0x3dd   : > { %1934 = vst.msk [vmem:[#allocation4 + $0x10] sm:$0xff] %vm1894_vm1, %v1931_v43  ;;  %1913 = vst.msk [vmem:[#allocation4 + $0x8] sm:$0xff] %vm1894_vm1, %v1910_v44 }
 0x3e0   : > { %v1996_v50 = vpop.permute.xlu0 %1995  ;;  %v1903_v51 = vpop.permute.xlu1 %1902 }
 0x3e1   : > { %1999 = vst.msk [vmem:[#allocation3 + $0x30] sm:$0xff] %vm1894_vm1, %v1996_v50  ;;  %1906 = vst.msk [vmem:[#allocation3 + $0x8] sm:$0xff] %vm1894_vm1, %v1903_v51 }
 0x3e4   : > { %v2017_v56 = vpop.permute.xlu0 %2016  ;;  %v1924_v59 = vpop.permute.xlu1 %1923  ;;  %v2132_v63 = vld [vmem:[#allocation4 + $0x8] sm:$0xff]  ;;  %v2133_v8 = vld [vmem:[#allocation4 + $0x10] sm:$0xff] }
 0x3e5   : > { %2020 = vst.msk [vmem:[#allocation3 + $0x38] sm:$0xff] %vm1894_vm1, %v2017_v56  ;;  %1927 = vst.msk [vmem:[#allocation3 + $0x10] sm:$0xff] %vm1894_vm1, %v1924_v59  ;;  %v2144_v62 = vpack.c.bf16 %v2132_v63, %v2132_v63  ;;  %v2145_v10 = vpack.c.bf16 %v2133_v8, %v2133_v8 }
 0x3e6   : > { %v1837_v0 = vpop.f32.mrb[12].mxu0 }
 0x3e7   : > { %v14728_v2 = vadd.f32 %v1837_v0, %v926_v55  ;;  %v1839_v3 = vpop.f32.mrb[13].mxu0  ;;  %v2229_v4 = vsel %vm1894_vm1, %v2144_v62, 0  ;;  %v2275_v15 = vsel %vm1894_vm1, %v2145_v10, 0 }
 0x3e8   : > { %v14731_v5 = vadd.f32 %v1839_v3, %v930_v60  ;;  %v1841_v6 = vpop.f32.mrb[14].mxu0  ;;  %v1952_v7 = vpop.permute.xlu1 %1951  ;;  %12278 = vmatpush3.bf16.xpose.msra.mxu1 %v2229_v4  ;;  %v2108_v9 = vld [vmem:[#allocation3 + $0x8] sm:$0xff]  ;;  %v2113_v8 = vld [vmem:[#allocation3 + $0x30] sm:$0xff] }
 0x3e9   : > { %1899 = vst.msk [vmem:[#allocation5] sm:$0xff] %vm1894_vm1, %v14728_v2  ;;  %1955 = vst.msk [vmem:[#allocation4 + $0x18] sm:$0xff] %vm1894_vm1, %v1952_v7  ;;  %v1842_v61 = vpop.f32.mrb[15].mxu0  ;;  %1916 = vrot.lane.b32.xlu0 %v14728_v2, %s14165_s6  ;;  %12283 = vmatprep.subr.bf16.mxu1 %v14162_v29  ;;  %v2120_v12 = vpack.c.bf16 %v2108_v9, %v2108_v9  ;;  %v2125_v10 = vpack.c.bf16 %v2113_v8, %v2113_v8 }
 0x3ea   : > { %1971 = vst.msk [vmem:[#allocation5 + $0x20] sm:$0xff] %vm1894_vm1, %v14731_v5 }
 0x3ec   : > { %v1945_v11 = vpop.permute.xlu1 %1944  ;;  %v2109_v17 = vld [vmem:[#allocation3 + $0x10] sm:$0xff] }
 0x3ed   : > { %1948 = vst.msk [vmem:[#allocation3 + $0x18] sm:$0xff] %vm1894_vm1, %v1945_v11  ;;  %v2121_v19 = vpack.c.bf16 %v2109_v17, %v2109_v17 }
 0x3ef   : > { %12280 = vmatmul.mubr.msk.bf16.vlgmr.msra.gmra.mrb[4].mxu1 %vm1894_vm1, %v2120_v12 }
 0x3f0   : > { %12284 = vmatpush3.bf16.xpose.msra.mxu1 %v2275_v15  ;;  %12285 = vmatprep.mubr.msk.bf16.mxu1 %vm14163_vm0, %v14162_v29  ;;  %v2134_v16 = vld [vmem:[#allocation4 + $0x18] sm:$0xff]  ;;  %v2155_v12 = vld [vmem:[#allocation5] sm:$0xff] }
 0x3f1   : > { %12289 = vmatprep.subr.bf16.mxu1 %v14162_v29  ;;  %v2146_v18 = vpack.c.bf16 %v2134_v16, %v2134_v16  ;;  %v2114_v16 = vld [vmem:[#allocation3 + $0x38] sm:$0xff]  ;;  %v2167_v17 = vpack.c.bf16 %v2155_v12, %v2155_v12 }
 0x3f3   : > { %v2321_v20 = vsel %vm1894_vm1, %v2146_v18, 0 }
 0x3f4   : > { %v2110_v21 = vld [vmem:[#allocation3 + $0x18] sm:$0xff] }
 0x3f5   : > { %v2122_v23 = vpack.c.bf16 %v2110_v21, %v2110_v21  ;;  %v2881_v21 = vsel %vm2879_vm2, %v2167_v17, 0 }
 0x3f7   : > { %12286 = vmatmul.mubr.msk.bf16.vlgmr.msra.gmra.mrb[8].mxu1 %vm1894_vm1, %v2121_v19 }
 0x3f8   : > { %12290 = vmatpush3.bf16.xpose.msra.mxu1 %v2321_v20  ;;  %12291 = vmatprep.mubr.msk.bf16.mxu1 %vm14163_vm0, %v14162_v29  ;;  %v2126_v20 = vpack.c.bf16 %v2114_v16, %v2114_v16 }
 0x3f9   : > { %12295 = vmatprep.subr.bf16.mxu1 %v14162_v29 }
 0x3ff   : > { %12292 = vmatmul.mubr.msk.bf16.vlgmr.msra.gmra.mrb[12].mxu1 %vm1894_vm1, %v2122_v23 }
 0x400   : > { %12296 = vmatpush3.bf16.xpose.msra.mxu1 %v2367_v24  ;;  %12297 = vmatprep.mubr.msk.bf16.mxu1 %vm14163_vm0, %v14162_v29 }
 0x401   : > { %12301 = vmatprep.subr.bf16.mxu1 %v14162_v29 }
 0x406   : > { %v12147_v30 = vpop.f32.mrb[16].mxu0 }
 0x407   : > { %v12148_v32 = vpop.f32.mrb[17].mxu0  ;;  %12298 = vmatmul.mubr.msk.bf16.vlgmr.msra.gmra.mrb[16].mxu1 %vm1894_vm1, %v2123_v26 }
 0x408   : > { %v12149_v33 = vadd.f32 %v12148_v32, %v12147_v30  ;;  %v12150_v34 = vpop.f32.mrb[18].mxu0  ;;  %12303 = vmatprep.mubr.msk.bf16.mxu1 %vm14163_vm0, %v14162_v29 }
 0x409   : > { %v12151_v35 = vpop.f32.mrb[19].mxu0 }
 0x40a   : > { %v14763_v36 = vadd.f32 %v12149_v33, %v11178_v31 }
 0x40c   : > { %2043 = vst.msk [vmem:[#allocation5 + $0x40] sm:$0xff] %vm1894_vm1, %v14763_v36 }
 0x41b   : > { %v1982_v37 = vpop.permute.xlu1 %1981 }
 0x41c   : > { %1985 = vst.msk [vmem:[#allocation4 + $0x28] sm:$0xff] %vm1894_vm1, %v1982_v37  ;;  %v2075_v38 = vpop.permute.xlu0 %2074 }
 0x41d   : > { %2078 = vst.msk [vmem:[#allocation4 + $0x50] sm:$0xff] %vm1894_vm1, %v2075_v38 }
 0x41f   : > { %v1975_v39 = vpop.permute.xlu1 %1974 }
 0x420   : > { %1978 = vst.msk [vmem:[#allocation3 + $0x28] sm:$0xff] %vm1894_vm1, %v1975_v39  ;;  %v2096_v40 = vpop.permute.xlu0 %2095 }
 0x421   : > { %2099 = vst.msk [vmem:[#allocation4 + $0x58] sm:$0xff] %vm1894_vm1, %v2096_v40 }
 0x423   : > { %v2003_v41 = vpop.permute.xlu1 %2002  ;;  %v2136_v42 = vld [vmem:[#allocation4 + $0x28] sm:$0xff] }
 0x424   : > { %2006 = vst.msk [vmem:[#allocation4 + $0x30] sm:$0xff] %vm1894_vm1, %v2003_v41  ;;  %v2089_v43 = vpop.permute.xlu0 %2088  ;;  %v2148_v44 = vpack.c.bf16 %v2136_v42, %v2136_v42  ;;  %v2141_v50 = vld [vmem:[#allocation4 + $0x50] sm:$0xff] }
 0x425   : > { %2092 = vst.msk [vmem:[#allocation3 + $0x58] sm:$0xff] %vm1894_vm1, %v2089_v43  ;;  %v2153_v51 = vpack.c.bf16 %v2141_v50, %v2141_v50 }
 0x426   : > { %v2413_v55 = vsel %vm1894_vm1, %v2148_v44, 0 }
 0x427   : > { %v2024_v56 = vpop.permute.xlu1 %2023  ;;  %12302 = vmatpush3.bf16.xpose.msra.mxu1 %v2413_v55  ;;  %v2643_v59 = vsel %vm1894_vm1, %v2153_v51, 0  ;;  %v2112_v60 = vld [vmem:[#allocation3 + $0x28] sm:$0xff] }
 0x428   : > { %2027 = vst.msk [vmem:[#allocation4 + $0x38] sm:$0xff] %vm1894_vm1, %v2024_v56  ;;  %12332 = vmatpush3.bf16.xpose.msra.mxu0 %v2643_v59  ;;  %12307 = vmatprep.subr.bf16.mxu1 %v14162_v29  ;;  %v2124_v0 = vpack.c.bf16 %v2112_v60, %v2112_v60  ;;  %v2142_v23 = vld [vmem:[#allocation4 + $0x58] sm:$0xff] }
 0x429   : > { %12343 = vmatprep.subr.bf16.mxu0 %v14162_v29  ;;  %v2154_v25 = vpack.c.bf16 %v2142_v23, %v2142_v23 }
 0x42b   : > { %v2054_v63 = vpop.permute.xlu1 %2053  ;;  %v2137_v62 = vld [vmem:[#allocation4 + $0x30] sm:$0xff]  ;;  %v2689_v30 = vsel %vm1894_vm1, %v2154_v25, 0 }
 0x42c   : > { %2057 = vst.msk [vmem:[#allocation4 + $0x48] sm:$0xff] %vm1894_vm1, %v2054_v63  ;;  %v2149_v3 = vpack.c.bf16 %v2137_v62, %v2137_v62  ;;  %v2118_v31 = vld [vmem:[#allocation3 + $0x58] sm:$0xff] }
 0x42d   : > { %v2130_v32 = vpack.c.bf16 %v2118_v31, %v2118_v31 }
 0x42e   : > { %12304 = vmatmul.mubr.msk.bf16.vlgmr.msra.gmra.mrb[20].mxu1 %vm1894_vm1, %v2124_v0  ;;  %v2459_v4 = vsel %vm1894_vm1, %v2149_v3, 0 }
 0x42f   : > { %v2047_v6 = vpop.permute.xlu1 %2046  ;;  %12308 = vmatpush3.bf16.xpose.msra.mxu1 %v2459_v4  ;;  %12309 = vmatprep.mubr.msk.bf16.mxu1 %vm14163_vm0, %v14162_v29  ;;  %v2138_v7 = vld [vmem:[#allocation4 + $0x38] sm:$0xff] }
 0x430   : > { %2050 = vst.msk [vmem:[#allocation3 + $0x48] sm:$0xff] %vm1894_vm1, %v2047_v6  ;;  %12313 = vmatprep.subr.bf16.mxu1 %v14162_v29  ;;  %v2150_v61 = vpack.c.bf16 %v2138_v7, %v2138_v7 }
 0x432   : > { %v2505_v11 = vsel %vm1894_vm1, %v2150_v61, 0 }
 0x433   : > { %v2068_v9 = vpop.permute.xlu1 %2067  ;;  %v2140_v15 = vld [vmem:[#allocation4 + $0x48] sm:$0xff] }
 0x434   : > { %2071 = vst.msk [vmem:[#allocation3 + $0x50] sm:$0xff] %vm1894_vm1, %v2068_v9  ;;  %v2152_v18 = vpack.c.bf16 %v2140_v15, %v2140_v15 }
 0x436   : > { %12310 = vmatmul.mubr.msk.bf16.vlgmr.msra.gmra.mrb[24].mxu1 %vm1894_vm1, %v2125_v10  ;;  %v2597_v22 = vsel %vm1894_vm1, %v2152_v18, 0 }
 0x437   : > { %12314 = vmatpush3.bf16.xpose.msra.mxu1 %v2505_v11  ;;  %12315 = vmatprep.mubr.msk.bf16.mxu1 %vm14163_vm0, %v14162_v29  ;;  %v2116_v24 = vld [vmem:[#allocation3 + $0x48] sm:$0xff] }
 0x438   : > { %12325 = vmatprep.subr.bf16.mxu1 %v14162_v29  ;;  %v2128_v26 = vpack.c.bf16 %v2116_v24, %v2116_v24 }
 0x43b   : > { %v2117_v19 = vld [vmem:[#allocation3 + $0x50] sm:$0xff] }
 0x43c   : > { %v2129_v1 = vpack.c.bf16 %v2117_v19, %v2117_v19 }
 0x43e   : > { %12316 = vmatmul.mubr.msk.bf16.vlgmr.msra.gmra.mrb[28].mxu1 %vm1894_vm1, %v2126_v20  ;;  %12334 = vmatmul.mubr.msk.bf16.vlgmr.msra.gmra.mrb[24].mxu0 %vm1894_vm1, %v2129_v1 }
 0x43f   : > { %12344 = vmatpush3.bf16.msra.mxu0 %v2881_v21  ;;  %12326 = vmatpush3.bf16.xpose.msra.mxu1 %v2597_v22 }
 0x440   : > { %12327 = vmatprep.mubr.msk.bf16.mxu1 %vm14163_vm0, %v14162_v29  ;;  %12337 = vmatprep.subr.bf16.mxu1 %v14162_v29 }
 0x441   : > { %12345 = vmatprep.mubr.msk.bf16.mxu0 %vm14163_vm0, %v14162_v29  ;;  %12355 = vmatprep.subr.bf16.mxu0 %v14162_v29 }
 0x446   : > { %12328 = vmatmul.mubr.msk.bf16.vlgmr.msra.gmra.mrb[32].mxu1 %vm1894_vm1, %v2128_v26 }
 0x447   : > { %12338 = vmatpush3.bf16.xpose.msra.mxu1 %v2689_v30  ;;  %12339 = vmatprep.mubr.msk.bf16.mxu1 %vm14163_vm0, %v14162_v29 }
 0x448   : > { %12349 = vmatprep.subr.bf16.mxu1 %v14162_v29 }
 0x44e   : > { %12340 = vmatmul.mubr.msk.bf16.vlgmr.msra.gmra.mrb[36].mxu1 %vm1894_vm1, %v2130_v32 }
 0x44f   : > { %v2219_v33 = vpop.f32.mrb[0].mxu1  ;;  %12351 = vmatprep.mubr.msk.bf16.mxu1 %vm14163_vm0, %v14162_v29 }
 0x450   : > { %v12275_v34 = vpop.f32.mrb[1].mxu1  ;;  %v2732_v35 = vsel %vm2731_vm3, %v2219_v33, -inf }
 0x451   : > { %2733 = vmax.xlane.f32.xlu1 %v2732_v35  ;;  %v2222_v37 = vpop.f32.mrb[2].mxu1 }
 0x452   : > { %v12276_v38 = vpop.f32.mrb[3].mxu1 }
 0x45b   : > { %v1917_v39 = vpop.permute.xlu0 %1916 }
 0x45c   : > { %1920 = vst.msk [vmem:[#allocation5 + $0x8] sm:$0xff] %vm1894_vm1, %v1917_v39 }
 0x463   : > { %v2156_v40 = vld [vmem:[#allocation5 + $0x8] sm:$0xff] }
 0x464   : > { %v2168_v41 = vpack.c.bf16 %v2156_v40, %v2156_v40 }
 0x466   : > { %v2927_v42 = vsel %vm2879_vm2, %v2168_v41, 0 }
 0x467   : > { %12350 = vmatpush3.bf16.msra.mxu1 %v2927_v42 }
 0x468   : > { %12361 = vmatprep.subr.bf16.mxu1 %v14162_v29 }
 0x48f   : > { %v14813_v43 = vpop.f32.mrb[20].mxu0 }
 0x490   : > { %v12323_v44 = vpop.f32.mrb[21].mxu0  ;;  %v2756_v50 = vsel %vm2731_vm3, %v14813_v43, -inf }
 0x491   : > { %v2590_v51 = vpop.f32.mrb[22].mxu0  ;;  %2757 = vmax.xlane.f32.xlu0 %v2756_v50 }
 0x492   : > { %v12324_v55 = vpop.f32.mrb[23].mxu0 }
 0x4c2   : > { %v14817_v56 = vpop.f32.mrb[4].mxu1 }
 0x4c3   : > { %v12281_v59 = vpop.f32.mrb[5].mxu1  ;;  %v2735_v60 = vsel %vm2731_vm3, %v14817_v56, -inf }
 0x4c4   : > { %2736 = vmax.xlane.f32.xlu0 %v2735_v60  ;;  %v2268_v63 = vpop.f32.mrb[6].mxu1 }
 0x4c5   : > { %v12282_v62 = vpop.f32.mrb[7].mxu1 }
 0x4ca   : > { %v14821_v0 = vpop.f32.mrb[8].mxu1 }
 0x4cb   : > { %v12287_v3 = vpop.f32.mrb[9].mxu1  ;;  %v2738_v4 = vsel %vm2731_vm3, %v14821_v0, -inf }
 0x4cc   : > { %2739 = vmax.xlane.f32.xlu0 %v2738_v4  ;;  %v2314_v6 = vpop.f32.mrb[10].mxu1 }
 0x4cd   : > { %v12288_v7 = vpop.f32.mrb[11].mxu1 }
 0x4d2   : > { %v14825_v8 = vpop.f32.mrb[12].mxu1 }
 0x4d3   : > { %v12293_v61 = vpop.f32.mrb[13].mxu1  ;;  %v2741_v9 = vsel %vm2731_vm3, %v14825_v8, -inf }
 0x4d4   : > { %2742 = vmax.xlane.f32.xlu1 %v2741_v9  ;;  %v2360_v10 = vpop.f32.mrb[14].mxu1 }
 0x4d5   : > { %v12294_v11 = vpop.f32.mrb[15].mxu1 }
 0x4da   : > { %v14829_v12 = vpop.f32.mrb[16].mxu1 }
 0x4db   : > { %v12299_v15 = vpop.f32.mrb[17].mxu1  ;;  %v2744_v1 = vsel %vm2731_vm3, %v14829_v12, -inf }
 0x4dc   : > { %v2406_v16 = vpop.f32.mrb[18].mxu1 }
 0x4dd   : > { %v12300_v17 = vpop.f32.mrb[19].mxu1 }
 0x4de   : > { %v2734_v18 = vpop.xlane.xlu1 %2733 }
 0x4df   : > { %v2768_v19 = vsub.f32 %v2219_v33, %v2734_v18 }
 0x4e1   : > { %v2780_v20 = vmul.f32 1.442695, %v2768_v19 }
 0x4e2   : > { %1958 = vrot.lane.b32.xlu0 %v14728_v2, %s14166_s14 }
 0x4e3   : > { %13673 = vpow2.f32 %v2780_v20 }
 0x4e5   : > { %1937 = vrot.lane.b32.xlu1 %v14728_v2, %s14164_s3 }
 0x4ed   : > { %v14837_v21 = vpop.eup %13673 }
 0x4ee   : > { %v2804_v26 = vsel %vm2731_vm3, %v14837_v21, 0.0 }
 0x501   : > { %2745 = vmax.xlane.f32.xlu0 %v2744_v1  ;;  %v14839_v22 = vpop.f32.mrb[20].mxu1 }
 0x502   : > { %v12305_v23 = vpop.f32.mrb[21].mxu1  ;;  %v2747_v2 = vsel %vm2731_vm3, %v14839_v22, -inf }
 0x503   : > { %v2452_v24 = vpop.f32.mrb[22].mxu1 }
 0x504   : > { %v12306_v25 = vpop.f32.mrb[23].mxu1 }
 0x505   : > { %2805 = vadd.xlane.f32.xlu0 %v2804_v26 }
 0x509   : > { %2748 = vmax.xlane.f32.xlu1 %v2747_v2  ;;  %v14845_v30 = vpop.f32.mrb[24].mxu1 }
 0x50a   : > { %v12311_v31 = vpop.f32.mrb[25].mxu1  ;;  %v2750_v51 = vsel %vm2731_vm3, %v14845_v30, -inf }
 0x50b   : > { %v2498_v32 = vpop.f32.mrb[26].mxu1 }
 0x50c   : > { %v12312_v33 = vpop.f32.mrb[27].mxu1 }
 0x511   : > { %v14847_v34 = vpop.f32.mrb[28].mxu1  ;;  %v14849_v35 = vpop.f32.mrb[24].mxu0 }
 0x512   : > { %v12317_v37 = vpop.f32.mrb[29].mxu1  ;;  %v12335_v38 = vpop.f32.mrb[25].mxu0  ;;  %v2762_v39 = vsel %vm2731_vm3, %v14849_v35, -inf  ;;  %v2753_v40 = vsel %vm2731_vm3, %v14847_v34, -inf }
 0x513   : > { %v2682_v41 = vpop.f32.mrb[26].mxu0  ;;  %2763 = vmax.xlane.f32.xlu0 %v2762_v39  ;;  %2754 = vmax.xlane.f32.xlu1 %v2753_v40  ;;  %v2544_v42 = vpop.f32.mrb[30].mxu1 }
 0x514   : > { %v12318_v44 = vpop.f32.mrb[31].mxu1  ;;  %v12336_v50 = vpop.f32.mrb[27].mxu0 }
 0x517   : > { %2751 = vmax.xlane.f32.xlu0 %v2750_v51 }
 0x519   : > { %v14857_v55 = vpop.f32.mrb[32].mxu1 }
 0x51a   : > { %v12329_v59 = vpop.f32.mrb[33].mxu1  ;;  %v2759_v60 = vsel %vm2731_vm3, %v14857_v55, -inf }
 0x51b   : > { %2760 = vmax.xlane.f32.xlu1 %v2759_v60  ;;  %v2636_v63 = vpop.f32.mrb[34].mxu1 }
 0x51c   : > { %v12330_v62 = vpop.f32.mrb[35].mxu1 }
 0x51e   : > { %v2758_v9 = vpop.xlane.xlu0 %2757 }
 0x51f   : > { %v2776_v10 = vsub.f32 %v14813_v43, %v2758_v9 }
 0x521   : > { %v14861_v3 = vpop.f32.mrb[36].mxu1  ;;  %v2796_v11 = vmul.f32 1.442695, %v2776_v10 }
 0x522   : > { %v12341_v4 = vpop.f32.mrb[37].mxu1  ;;  %v2765_v6 = vsel %vm2731_vm3, %v14861_v3, -inf }
 0x523   : > { %2766 = vmax.xlane.f32.xlu1 %v2765_v6  ;;  %v2728_v7 = vpop.f32.mrb[38].mxu1  ;;  %13675 = vpow2.f32 %v2796_v11 }
 0x524   : > { %v12342_v61 = vpop.f32.mrb[39].mxu1 }
 0x52d   : > { %1988 = vrot.lane.b32.xlu0 %v14731_v5, %s14165_s6  ;;  %v14871_v17 = vpop.eup %13675 }
 0x52e   : > { %v2828_v19 = vsel %vm2731_vm3, %v14871_v17, 0.0 }
 0x534   : > { %2009 = vrot.lane.b32.xlu1 %v14731_v5, %s14164_s3 }
 0x551   : > { %v2737_v15 = vpop.xlane.xlu0 %2736 }
 0x552   : > { %v2769_v16 = vsub.f32 %v14817_v56, %v2737_v15 }
 0x554   : > { %v2782_v18 = vmul.f32 1.442695, %v2769_v16 }
 0x556   : > { %13677 = vpow2.f32 %v2782_v18 }
 0x558   : > { %2829 = vadd.xlane.f32.xlu1 %v2828_v19 }
 0x559   : > { %v2740_v20 = vpop.xlane.xlu0 %2739 }
 0x55a   : > { %v2770_v1 = vsub.f32 %v14821_v0, %v2740_v20 }
 0x55c   : > { %v2784_v23 = vmul.f32 1.442695, %v2770_v1 }
 0x55d   : > { %v1959_v24 = vpop.permute.xlu0 %1958 }
 0x55e   : > { %13679 = vpow2.f32 %v2784_v23  ;;  %1962 = vst.msk [vmem:[#allocation5 + $0x18] sm:$0xff] %vm1894_vm1, %v1959_v24 }
 0x560   : > { %v14877_v43 = vpop.eup %13677 }
 0x561   : > { %v2743_v25 = vpop.xlane.xlu1 %2742  ;;  %v2807_v56 = vsel %vm2731_vm3, %v14877_v43, 0.0 }
 0x562   : > { %v2771_v26 = vsub.f32 %v14825_v8, %v2743_v25  ;;  %2808 = vadd.xlane.f32.xlu1 %v2807_v56 }
 0x564   : > { %v2786_v2 = vmul.f32 1.442695, %v2771_v26 }
 0x565   : > { %v1938_v31 = vpop.permute.xlu1 %1937 }
 0x566   : > { %13681 = vpow2.f32 %v2786_v2  ;;  %1941 = vst.msk [vmem:[#allocation5 + $0x10] sm:$0xff] %vm1894_vm1, %v1938_v31 }
 0x568   : > { %v14883_v0 = vpop.eup %13679 }
 0x569   : > { %v2810_v32 = vsel %vm2731_vm3, %v14883_v0, 0.0 }
 0x56a   : > { %2811 = vadd.xlane.f32.xlu0 %v2810_v32 }
 0x56d   : > { %v2157_v50 = vld [vmem:[#allocation5 + $0x10] sm:$0xff] }
 0x570   : > { %v14887_v33 = vpop.eup %13681 }
 0x571   : > { %v2813_v37 = vsel %vm2731_vm3, %v14887_v33, 0.0 }
 0x572   : > { %2814 = vadd.xlane.f32.xlu1 %v2813_v37 }
 0x580   : > { %2030 = vrot.lane.b32.xlu0 %v14731_v5, %s14166_s14 }
 0x58e   : > { %v2746_v8 = vpop.xlane.xlu0 %2745 }
 0x58f   : > { %v2772_v38 = vsub.f32 %v14829_v12, %v2746_v8  ;;  %v2169_v12 = vpack.c.bf16 %v2157_v50, %v2157_v50 }
 0x591   : > { %v2788_v39 = vmul.f32 1.442695, %v2772_v38  ;;  %v2973_v9 = vsel %vm2879_vm2, %v2169_v12, 0 }
 0x592   : > { %v2806_v40 = vpop.xlane.xlu0 %2805 }
 0x593   : > { %13683 = vpow2.f32 %v2788_v39 }
 0x594   : > { %13685 = vrcp.f32 %v2806_v40  ;;  %v2158_v40 = vld [vmem:[#allocation5 + $0x18] sm:$0xff] }
 0x595   : > { %v2170_v50 = vpack.c.bf16 %v2158_v40, %v2158_v40  ;;  %v2163_v40 = vld [vmem:[#allocation5 + $0x40] sm:$0xff] }
 0x596   : > { %v2749_v41 = vpop.xlane.xlu1 %2748 }
 0x597   : > { %v2773_v42 = vsub.f32 %v14839_v22, %v2749_v41 }
 0x599   : > { %v2790_v44 = vmul.f32 1.442695, %v2773_v42 }
 0x59b   : > { %13687 = vpow2.f32 %v2790_v44 }
 0x59d   : > { %v14895_v51 = vpop.eup %13683 }
 0x59e   : > { %v13686_v59 = vpop.eup %13685  ;;  %v2816_v60 = vsel %vm2731_vm3, %v14895_v51, 0.0 }
 0x59f   : > { %v2852_v5 = vmul.f32 %v13686_v59, %v14837_v21  ;;  %2817 = vadd.xlane.f32.xlu1 %v2816_v60  ;;  %v3019_v60 = vsel %vm2879_vm2, %v2170_v50, 0  ;;  %v2175_v50 = vpack.c.bf16 %v2163_v40, %v2163_v40  ;;  %v12944_v40 = vld [vmem:[#allocation12 + $0x30] ss:$8 sps:$4 sm:$0xff]  }
 0x5a0   : > { %v2764_v63 = vpop.xlane.xlu0 %2763  ;;  %v2755_v62 = vpop.xlane.xlu1 %2754 }
 0x5a1   : > { %v2778_v4 = vsub.f32 %v14849_v35, %v2764_v63  ;;  %v2775_v6 = vsub.f32 %v14847_v34, %v2755_v62  ;;  %v2864_v22 = vpack.c.bf16 %v2852_v5, %v2852_v5  ;;  %v2159_v5 = vld [vmem:[#allocation5 + $0x20] sm:$0xff] }
 0x5a2   : > { %v2171_v63 = vpack.c.bf16 %v2159_v5, %v2159_v5 }
 0x5a3   : > { %v2800_v7 = vmul.f32 1.442695, %v2778_v4  ;;  %v2794_v61 = vmul.f32 1.442695, %v2775_v6  ;;  %12346 = vmatmul.mubr.msk.bf16.vlgmr.msra.gmra.mrb[28].mxu0 %vm2731_vm3, %v2864_v22 }
 0x5a4   : > { %12356 = vmatpush3.bf16.msra.mxu0 %v2973_v9  ;;  %v2752_v10 = vpop.xlane.xlu0 %2751  ;;  %12357 = vmatprep.mubr.msk.bf16.mxu0 %vm14163_vm0, %v14162_v29  ;;  %v3065_v4 = vsel %vm2879_vm2, %v2171_v63, 0 }
 0x5a5   : > { %v14906_v21 = vpop.eup %13687  ;;  %13689 = vpow2.f32 %v2800_v7  ;;  %v2774_v11 = vsub.f32 %v14845_v30, %v2752_v10  ;;  %12367 = vmatprep.subr.bf16.mxu0 %v14162_v29 }
 0x5a6   : > { %13691 = vpow2.f32 %v2794_v61  ;;  %v2819_v34 = vsel %vm2731_vm3, %v14906_v21, 0.0 }
 0x5a7   : > { %v2792_v35 = vmul.f32 1.442695, %v2774_v11  ;;  %2820 = vadd.xlane.f32.xlu1 %v2819_v34 }
 0x5a8   : > { %v1989_v15 = vpop.permute.xlu0 %1988  ;;  %v2761_v16 = vpop.xlane.xlu1 %2760 }
 0x5a9   : > { %13693 = vpow2.f32 %v2792_v35  ;;  %1992 = vst.msk [vmem:[#allocation5 + $0x28] sm:$0xff] %vm1894_vm1, %v1989_v15  ;;  %v2777_v18 = vsub.f32 %v14857_v55, %v2761_v16 }
 0x5ab   : > { %v2798_v19 = vmul.f32 1.442695, %v2777_v18 }
 0x5ad   : > { %13695 = vpow2.f32 %v2798_v19 }
 0x5af   : > { %v14914_v20 = vpop.eup %13689 }
 0x5b0   : > { %v14916_v30 = vpop.eup %13691  ;;  %v2767_v1 = vpop.xlane.xlu1 %2766  ;;  %v2834_v23 = vsel %vm2731_vm3, %v14914_v20, 0.0  ;;  %v2160_v6 = vld [vmem:[#allocation5 + $0x28] sm:$0xff] }
 0x5b1   : > { %v2779_v24 = vsub.f32 %v14861_v3, %v2767_v1  ;;  %2835 = vadd.xlane.f32.xlu0 %v2834_v23  ;;  %v2825_v25 = vsel %vm2731_vm3, %v14916_v30, 0.0  ;;  %v2172_v61 = vpack.c.bf16 %v2160_v6, %v2160_v6 }
 0x5b2   : > { %2826 = vadd.xlane.f32.xlu1 %v2825_v25 }
 0x5b3   : > { %v14923_v56 = vpop.eup %13693  ;;  %v2802_v55 = vmul.f32 1.442695, %v2779_v24 }
 0x5b4   : > { %v2010_v26 = vpop.permute.xlu1 %2009  ;;  %v2822_v2 = vsel %vm2731_vm3, %v14923_v56, 0.0 }
 0x5b5   : > { %13697 = vpow2.f32 %v2802_v55  ;;  %2013 = vst.msk [vmem:[#allocation5 + $0x30] sm:$0xff] %vm1894_vm1, %v2010_v26  ;;  %2823 = vadd.xlane.f32.xlu0 %v2822_v2 }
 0x5b7   : > { %v14928_v31 = vpop.eup %13695 }
 0x5b8   : > { %v2831_v3 = vsel %vm2731_vm3, %v14928_v31, 0.0 }
 0x5b9   : > { %2832 = vadd.xlane.f32.xlu1 %v2831_v3 }
 0x5bc   : > { %v2161_v34 = vld [vmem:[#allocation5 + $0x30] sm:$0xff] }
 0x5bd   : > { %v2173_v15 = vpack.c.bf16 %v2161_v34, %v2161_v34 }
 0x5bf   : > { %v14932_v32 = vpop.eup %13697  ;;  %v3157_v18 = vsel %vm2879_vm2, %v2173_v15, 0 }
 0x5c0   : > { %v2837_v37 = vsel %vm2731_vm3, %v14932_v32, 0.0 }
 0x5c1   : > { %2838 = vadd.xlane.f32.xlu1 %v2837_v37 }
 0x5cb   : > { %2060 = vrot.lane.b32.xlu0 %v14763_v36, %s14165_s6 }
 0x5cf   : > { %2102 = vrot.lane.b32.xlu0 %v14763_v36, %s14166_s14 }
 0x5d2   : > { %2081 = vrot.lane.b32.xlu1 %v14763_v36, %s14164_s3 }
 0x5e5   : > { %v14942_v8 = vpop.xlane.xlu1 %2829 }
 0x5ef   : > { %v2809_v38 = vpop.xlane.xlu1 %2808 }
 0x5f0   : > { %13699 = vrcp.f32 %v2809_v38 }
 0x5f7   : > { %v2812_v39 = vpop.xlane.xlu0 %2811 }
 0x5f8   : > { %13701 = vrcp.f32 %v2812_v39 }
 0x5fa   : > { %v13700_v41 = vpop.eup %13699 }
 0x5fb   : > { %v2853_v42 = vmul.f32 %v13700_v41, %v14877_v43  ;;  %v2031_v44 = vpop.permute.xlu0 %2030 }
 0x5fc   : > { %2034 = vst.msk [vmem:[#allocation5 + $0x38] sm:$0xff] %vm1894_vm1, %v2031_v44 }
 0x5fd   : > { %v2865_v59 = vpack.c.bf16 %v2853_v42, %v2853_v42 }
 0x5ff   : > { %12352 = vmatmul.mubr.msk.bf16.vlgmr.msra.gmra.mrb[40].mxu1 %vm2731_vm3, %v2865_v59  ;;  %v2815_v36 = vpop.xlane.xlu1 %2814 }
 0x600   : > { %12362 = vmatpush3.bf16.msra.mxu1 %v3019_v60  ;;  %13703 = vrcp.f32 %v2815_v36  ;;  %12363 = vmatprep.mubr.msk.bf16.mxu1 %vm14163_vm0, %v14162_v29 }
 0x601   : > { %12373 = vmatprep.subr.bf16.mxu1 %v14162_v29 }
 0x602   : > { %v13702_v12 = vpop.eup %13701 }
 0x603   : > { %v2854_v43 = vmul.f32 %v13702_v12, %v14883_v0  ;;  %v3111_v0 = vsel %vm2879_vm2, %v2172_v61, 0  ;;  %v2162_v19 = vld [vmem:[#allocation5 + $0x38] sm:$0xff] }
 0x605   : > { %v2866_v62 = vpack.c.bf16 %v2854_v43, %v2854_v43 }
 0x607   : > { %12358 = vmatmul.mubr.msk.bf16.vlgmr.msra.gmra.mrb[32].mxu0 %vm2731_vm3, %v2866_v62 }
 0x608   : > { %12368 = vmatpush3.bf16.msra.mxu0 %v3065_v4  ;;  %12369 = vmatprep.mubr.msk.bf16.mxu0 %vm14163_vm0, %v14162_v29 }
 0x609   : > { %12379 = vmatprep.subr.bf16.mxu0 %v14162_v29 }
 0x60a   : > { %v13704_v22 = vpop.eup %13703 }
 0x60b   : > { %v2855_v7 = vmul.f32 %v13704_v22, %v14887_v33 }
 0x60d   : > { %v2867_v9 = vpack.c.bf16 %v2855_v7, %v2855_v7 }
 0x60f   : > { %12364 = vmatmul.mubr.msk.bf16.vlgmr.msra.gmra.mrb[44].mxu1 %vm2731_vm3, %v2867_v9 }
 0x610   : > { %12374 = vmatpush3.bf16.msra.mxu1 %v3111_v0  ;;  %12375 = vmatprep.mubr.msk.bf16.mxu1 %vm14163_vm0, %v14162_v29 }
 0x611   : > { %12385 = vmatprep.subr.bf16.mxu1 %v14162_v29 }
 0x62c   : > { %v2818_v10 = vpop.xlane.xlu1 %2817 }
 0x62d   : > { %13705 = vrcp.f32 %v2818_v10 }
 0x634   : > { %v2821_v11 = vpop.xlane.xlu1 %2820 }
 0x635   : > { %13707 = vrcp.f32 %v2821_v11 }
 0x637   : > { %v13706_v35 = vpop.eup %13705 }
 0x638   : > { %v2856_v33 = vmul.f32 %v13706_v35, %v14895_v51  ;;  %v2174_v51 = vpack.c.bf16 %v2162_v19, %v2162_v19 }
 0x63a   : > { %v2868_v16 = vpack.c.bf16 %v2856_v33, %v2856_v33  ;;  %v3203_v2 = vsel %vm2879_vm2, %v2174_v51, 0  ;;  %v12940_v51 = vld [vmem:[#allocation12 + $0x14] ss:$8 sps:$4 sm:$0xff]  }
 0x63c   : > { %12370 = vmatmul.mubr.msk.bf16.vlgmr.msra.gmra.mrb[36].mxu0 %vm2731_vm3, %v2868_v16 }
 0x63d   : > { %12380 = vmatpush3.bf16.msra.mxu0 %v3157_v18  ;;  %12381 = vmatprep.mubr.msk.bf16.mxu0 %vm14163_vm0, %v14162_v29 }
 0x63e   : > { %v2836_v1 = vpop.xlane.xlu0 %2835  ;;  %12391 = vmatprep.subr.bf16.mxu0 %v14162_v29 }
 0x63f   : > { %v13708_v23 = vpop.eup %13707  ;;  %v2827_v24 = vpop.xlane.xlu1 %2826 }
 0x640   : > { %v2857_v25 = vmul.f32 %v13708_v23, %v14906_v21  ;;  %13709 = vrcp.f32 %v2827_v24  ;;  %v12935_v24 = vld [vmem:[#allocation12] ss:$8 sps:$4 sm:$0xff]  }
 0x642   : > { %v2824_v55 = vpop.xlane.xlu0 %2823  ;;  %v2869_v26 = vpack.c.bf16 %v2857_v25, %v2857_v25  ;;  %v12937_v25 = vld [vmem:[#allocation12 + $0x4] ss:$8 sps:$4 sm:$0xff]  }
 0x643   : > { %13711 = vrcp.f32 %v2824_v55  ;;  %v12938_v55 = vld [vmem:[#allocation12 + $0x10] ss:$8 sps:$4 sm:$0xff]  }
 0x644   : > { %12376 = vmatmul.mubr.msk.bf16.vlgmr.msra.gmra.mrb[48].mxu1 %vm2731_vm3, %v2869_v26  ;;  %13713 = vrcp.f32 %v14942_v8 }
 0x645   : > { %12386 = vmatpush3.bf16.msra.mxu1 %v3203_v2  ;;  %12387 = vmatprep.mubr.msk.bf16.mxu1 %vm14163_vm0, %v14162_v29  ;;  %v12943_v2 = vld [vmem:[#allocation12 + $0x24] ss:$8 sps:$4 sm:$0xff]  }
 0x646   : > { %v2061_v3 = vpop.permute.xlu0 %2060  ;;  %v2833_v37 = vpop.xlane.xlu1 %2832  ;;  %12397 = vmatprep.subr.bf16.mxu1 %v14162_v29 }
 0x647   : > { %2064 = vst.msk [vmem:[#allocation5 + $0x48] sm:$0xff] %vm1894_vm1, %v2061_v3  ;;  %13715 = vrcp.f32 %v2833_v37 }
 0x648   : > { %13717 = vrcp.f32 %v2836_v1 }
 0x64a   : > { %v13710_v21 = vpop.eup %13709  ;;  %v2103_v38 = vpop.permute.xlu0 %2102 }
 0x64b   : > { %v2859_v39 = vmul.f32 %v13710_v21, %v14916_v30  ;;  %2106 = vst.msk [vmem:[#allocation5 + $0x58] sm:$0xff] %vm1894_vm1, %v2103_v38  ;;  %v12941_v38 = vld [vmem:[#allocation12 + $0x20] ss:$8 sps:$4 sm:$0xff]  }
 0x64d   : > { %v13712_v41 = vpop.eup %13711  ;;  %v2871_v42 = vpack.c.bf16 %v2859_v39, %v2859_v39  ;;  %v12946_v39 = vld [vmem:[#allocation12 + $0x34] ss:$8 sps:$4 sm:$0xff]  }
 0x64e   : > { %v2858_v44 = vmul.f32 %v13712_v41, %v14923_v56  ;;  %v2839_v8 = vpop.xlane.xlu1 %2838  ;;  %v2164_v59 = vld [vmem:[#allocation5 + $0x48] sm:$0xff]  ;;  %v13714_v36 = vpop.eup %13713  ;;  %v3249_v56 = vsel %vm2879_vm2, %v2175_v50, 0 }
 0x64f   : > { %12388 = vmatmul.mubr.msk.bf16.vlgmr.msra.gmra.mrb[52].mxu1 %vm2731_vm3, %v2871_v42  ;;  %13719 = vrcp.f32 %v2839_v8  ;;  %v2176_v60 = vpack.c.bf16 %v2164_v59, %v2164_v59  ;;  %v2860_v6 = vmul.f32 %v13714_v36, %v14871_v17  ;;  %v12949_v42 = vld [vmem:[#allocation12 + $0x44] ss:$8 sps:$4 sm:$0xff]   ;;  %v12947_v59 = vld [vmem:[#allocation12 + $0x40] ss:$8 sps:$4 sm:$0xff]   ;;  %v12950_v36 = vld [vmem:[#allocation12 + $0x50] ss:$8 sps:$4 sm:$0xff]  }
 0x650   : > { %v2870_v5 = vpack.c.bf16 %v2858_v44, %v2858_v44  ;;  %12399 = vmatprep.mubr.msk.bf16.mxu1 %vm14163_vm0, %v14162_v29 }
 0x651   : > { %v13716_v30 = vpop.eup %13715  ;;  %v3295_v12 = vsel %vm2879_vm2, %v2176_v60, 0  ;;  %v2872_v61 = vpack.c.bf16 %v2860_v6, %v2860_v6  ;;  %v12952_v60 = vld [vmem:[#allocation12 + $0x54] ss:$8 sps:$4 sm:$0xff]   ;;  %v12967_v6 = vld [vmem:[#allocation12 + $0xa4] ss:$8 sps:$4 sm:$0xff]  }
 0x652   : > { %v2861_v43 = vmul.f32 %v13716_v30, %v14928_v31  ;;  %12382 = vmatmul.mubr.msk.bf16.vlgmr.msra.gmra.mrb[40].mxu0 %vm2731_vm3, %v2870_v5  ;;  %12398 = vmatpush3.bf16.msra.mxu1 %v3295_v12  ;;  %v2082_v63 = vpop.permute.xlu1 %2081  ;;  %v2166_v62 = vld [vmem:[#allocation5 + $0x58] sm:$0xff]  ;;  %v13718_v7 = vpop.eup %13717  ;;  %v12958_v12 = vld [vmem:[#allocation12 + $0x74] ss:$8 sps:$4 sm:$0xff]  }
 0x653   : > { %12392 = vmatpush3.bf16.msra.mxu0 %v3249_v56  ;;  %2085 = vst.msk [vmem:[#allocation5 + $0x50] sm:$0xff] %vm1894_vm1, %v2082_v63  ;;  %12409 = vmatprep.subr.bf16.mxu1 %v14162_v29  ;;  %v2178_v4 = vpack.c.bf16 %v2166_v62, %v2166_v62  ;;  %v2862_v11 = vmul.f32 %v13718_v7, %v14914_v20  ;;  %v12955_v5 = vld [vmem:[#allocation12 + $0x64] ss:$8 sps:$4 sm:$0xff]   ;;  %v12953_v30 = vld [vmem:[#allocation12 + $0x60] ss:$8 sps:$4 sm:$0xff]  }
 0x654   : > { %v2873_v22 = vpack.c.bf16 %v2861_v43, %v2861_v43  ;;  %12393 = vmatprep.mubr.msk.bf16.mxu0 %vm14163_vm0, %v14162_v29  ;;  %12403 = vmatprep.subr.bf16.mxu0 %v14162_v29  ;;  %v12956_v43 = vld [vmem:[#allocation12 + $0x70] ss:$8 sps:$4 sm:$0xff]   ;;  %v12961_v56 = vld [vmem:[#allocation12 + $0x84] ss:$8 sps:$4 sm:$0xff]   ;;  %v12959_v63 = vld [vmem:[#allocation12 + $0x80] ss:$8 sps:$4 sm:$0xff]  }
 0x655   : > { %v3387_v31 = vsel %vm2879_vm2, %v2178_v4, 0  ;;  %v2874_v33 = vpack.c.bf16 %v2862_v11, %v2862_v11  ;;  %v12962_v62 = vld [vmem:[#allocation12 + $0x90] ss:$8 sps:$4 sm:$0xff]   ;;  %v12964_v4 = vld [vmem:[#allocation12 + $0x94] ss:$8 sps:$4 sm:$0xff]  }
 0x656   : > { %v12965_v7 = vld [vmem:[#allocation12 + $0xa0] ss:$8 sps:$4 sm:$0xff]  }
 0x657   : > { %12400 = vmatmul.mubr.msk.bf16.vlgmr.msra.gmra.mrb[56].mxu1 %vm2731_vm3, %v2873_v22  ;;  %v12971_v22 = vld [vmem:[#allocation12 + $0x100] ss:$8 sps:$4 sm:$0xff]  }
 0x658   : > { %12410 = vmatpush3.bf16.msra.mxu1 %v3387_v31  ;;  %12411 = vmatprep.mubr.msk.bf16.mxu1 %vm14163_vm0, %v14162_v29  ;;  %v12973_v31 = vld [vmem:[#allocation12 + $0x104] ss:$8 sps:$4 sm:$0xff]  }
 0x659   : > { %v13720_v9 = vpop.eup %13719  ;;  %3827 = vmatprep.subr.bf16.mxu1 %v12973_v31 }
 0x65a   : > { %v2863_v0 = vmul.f32 %v13720_v9, %v14932_v32  ;;  %12394 = vmatmul.mubr.msk.bf16.vlgmr.msra.gmra.mrb[44].mxu0 %vm2731_vm3, %v2872_v61  ;;  %v2165_v17 = vld [vmem:[#allocation5 + $0x50] sm:$0xff] }
 0x65b   : > { %v2177_v10 = vpack.c.bf16 %v2165_v17, %v2165_v17  ;;  %12405 = vmatprep.mubr.msk.bf16.mxu0 %vm14163_vm0, %v14162_v29  ;;  %v12979_v61 = vld [vmem:[#allocation12 + $0x114] ss:$8 sps:$4 sm:$0xff]  }
 0x65c   : > { %v2875_v34 = vpack.c.bf16 %v2863_v0, %v2863_v0  ;;  %v12970_v0 = vld [vmem:[#allocation12 + $0xb4] ss:$8 sps:$4 sm:$0xff]  }
 0x65d   : > { %v3341_v35 = vsel %vm2879_vm2, %v2177_v10, 0  ;;  %v12977_v10 = vld [vmem:[#allocation12 + $0x110] ss:$8 sps:$4 sm:$0xff]  }
 0x65e   : > { %12404 = vmatpush3.bf16.msra.mxu0 %v3341_v35  ;;  %v12968_v35 = vld [vmem:[#allocation12 + $0xb0] ss:$8 sps:$4 sm:$0xff]  }
 0x65f   : > { %12412 = vmatmul.mubr.msk.bf16.vlgmr.msra.gmra.mrb[60].mxu1 %vm2731_vm3, %v2875_v34  ;;  %3786 = vmatprep.subr.bf16.mxu0 %v12937_v25  ;;  %v12988_v25 = vld [vmem:[#allocation12 + $0xe4] ss:$8 sps:$4 sm:$0xff]  }
 0x660   : > { %3828 = vmatpush1.bf16.msra.mxu1 %v12971_v22  ;;  %v13004_v22 = vld [vmem:[#allocation12 + $0x170] ss:$8 sps:$4 sm:$0xff]  }
 0x661   : > { %3829 = vmatprep.subr.bf16.mxu1 %v12979_v61 }
 0x662   : > { %12406 = vmatmul.mubr.msk.bf16.vlgmr.msra.gmra.mrb[48].mxu0 %vm2731_vm3, %v2874_v33  ;;  %v12976_v33 = vld [vmem:[#allocation12 + $0xc4] ss:$8 sps:$4 sm:$0xff]  }
 0x663   : > { %3787 = vmatpush1.bf16.msra.mxu0 %v12935_v24  ;;  %v12985_v24 = vld [vmem:[#allocation12 + $0x124] ss:$8 sps:$4 sm:$0xff]  }
 0x664   : > { %3788 = vmatprep.subr.bf16.mxu0 %v12940_v51  ;;  %3830 = vmatpush1.bf16.msra.mxu1 %v12977_v10  ;;  %v12989_v51 = vld [vmem:[#allocation12 + $0x130] ss:$8 sps:$4 sm:$0xff]  }
 0x665   : > { %3831 = vmatprep.subr.bf16.mxu1 %v12985_v24  ;;  %v15019_v10 = vld [vmem:[#allocation19 + $0x20] sm:$0xff] }
 0x667   : > { %3789 = vmatpush1.bf16.msra.mxu0 %v12938_v55  ;;  %v12986_v55 = vld [vmem:[#allocation12 + $0xe0] ss:$8 sps:$4 sm:$0xff]  }
 0x668   : > { %3790 = vmatprep.subr.bf16.mxu0 %v12943_v2  ;;  %v12994_v2 = vld [vmem:[#allocation12 + $0xf4] ss:$8 sps:$4 sm:$0xff]  }
 0x66b   : > { %3791 = vmatpush1.bf16.msra.mxu0 %v12941_v38  ;;  %v12997_v38 = vld [vmem:[#allocation12 + $0x144] ss:$8 sps:$4 sm:$0xff]  }
 0x66c   : > { %3792 = vmatprep.subr.bf16.mxu0 %v12946_v39 }
 0x66f   : > { %3793 = vmatpush1.bf16.msra.mxu0 %v12944_v40 }
 0x670   : > { %3794 = vmatprep.subr.bf16.mxu0 %v12949_v42 }
 0x673   : > { %3795 = vmatpush1.bf16.msra.mxu0 %v12947_v59  ;;  %v13000_v59 = vld [vmem:[#allocation12 + $0x154] ss:$8 sps:$4 sm:$0xff]  }
 0x674   : > { %3796 = vmatprep.subr.bf16.mxu0 %v12952_v60 }
 0x676   : > { %v2917_v15 = vpop.f32.mrb[28].mxu0 }
 0x677   : > { %3429 = vst.msk [vmem:[#allocation6] sm:$0xff] %vm1894_vm1, %v2917_v15  ;;  %v12347_v32 = vpop.f32.mrb[29].mxu0  ;;  %3797 = vmatpush1.bf16.msra.mxu0 %v12950_v36  ;;  %v12974_v15 = vld [vmem:[#allocation12 + $0xc0] ss:$8 sps:$4 sm:$0xff]  }
 0x678   : > { %v2920_v16 = vpop.f32.mrb[30].mxu0  ;;  %3798 = vmatprep.subr.bf16.mxu0 %v12955_v5  ;;  %v13001_v5 = vld [vmem:[#allocation12 + $0x160] ss:$8 sps:$4 sm:$0xff]  }
 0x679   : > { %v12348_v18 = vpop.f32.mrb[31].mxu0 }
 0x67b   : > { %3799 = vmatpush1.bf16.msra.mxu0 %v12953_v30  ;;  %v13003_v30 = vld [vmem:[#allocation12 + $0x164] ss:$8 sps:$4 sm:$0xff]  }
 0x67c   : > { %3800 = vmatprep.subr.bf16.mxu0 %v12958_v12 }
 0x67f   : > { %3801 = vmatpush1.bf16.msra.mxu0 %v12956_v43  ;;  %v13006_v43 = vld [vmem:[#allocation12 + $0x174] ss:$8 sps:$4 sm:$0xff]  }
 0x680   : > { %3802 = vmatprep.subr.bf16.mxu0 %v12961_v56  ;;  %v14167_v56 = vmov 0  }
 0x681   : > { %3859 = vmatprep.mubr.bf16.mxu1 %v14167_v56 }
 0x683   : > { %3803 = vmatpush1.bf16.msra.mxu0 %v12959_v63 }
 0x684   : > { %3804 = vmatprep.subr.bf16.mxu0 %v12964_v4 }
 0x687   : > { %3805 = vmatpush1.bf16.msra.mxu0 %v12962_v62 }
 0x688   : > { %3806 = vmatprep.subr.bf16.mxu0 %v12967_v6 }
 0x68b   : > { %3807 = vmatpush1.bf16.msra.mxu0 %v12965_v7 }
 0x68c   : > { %3808 = vmatprep.subr.bf16.mxu0 %v12970_v0 }
 0x68f   : > { %3809 = vmatpush1.bf16.msra.mxu0 %v12968_v35 }
 0x690   : > { %3810 = vmatprep.subr.bf16.mxu0 %v12976_v33 }
 0x693   : > { %3811 = vmatpush1.bf16.msra.mxu0 %v12974_v15 }
 0x6d2   : > { %v2963_v19 = vpop.f32.mrb[40].mxu1 }
 0x6d3   : > { %3431 = vrot.lane.b32.xlu1 %v2963_v19, %s14166_s14  ;;  %v12353_v1 = vpop.f32.mrb[41].mxu1  ;;  %v12980_v19 = vld [vmem:[#allocation12 + $0xd0] ss:$8 sps:$4 sm:$0xff]  }
 0x6d4   : > { %v2966_v20 = vpop.f32.mrb[42].mxu1  ;;  %v12982_v1 = vld [vmem:[#allocation12 + $0xd4] ss:$8 sps:$4 sm:$0xff]  }
 0x6d5   : > { %v12354_v23 = vpop.f32.mrb[43].mxu1  ;;  %3812 = vmatprep.subr.bf16.mxu0 %v12982_v1 }
 0x6d6   : > { %v12983_v23 = vld [vmem:[#allocation12 + $0x120] ss:$8 sps:$4 sm:$0xff]   ;;  %3813 = vmatpush1.bf16.msra.mxu0 %v12980_v19 }
 0x6d7   : > { %3832 = vmatpush1.bf16.msra.mxu1 %v12983_v23  ;;  %3814 = vmatprep.subr.bf16.mxu0 %v12988_v25 }
 0x6da   : > { %v3009_v26 = vpop.f32.mrb[32].mxu0  ;;  %3815 = vmatpush1.bf16.msra.mxu0 %v12986_v55 }
 0x6db   : > { %v12359_v3 = vpop.f32.mrb[33].mxu0  ;;  %3437 = vrot.lane.b32.xlu1 %v3009_v26, %s14164_s3  ;;  %v12991_v26 = vld [vmem:[#allocation12 + $0x134] ss:$8 sps:$4 sm:$0xff]   ;;  %3816 = vmatprep.subr.bf16.mxu0 %v12994_v2 }
 0x6dc   : > { %v3012_v37 = vpop.f32.mrb[34].mxu0  ;;  %3833 = vmatprep.subr.bf16.mxu1 %v12991_v26  ;;  %v12995_v3 = vld [vmem:[#allocation12 + $0x140] ss:$8 sps:$4 sm:$0xff]  }
 0x6dd   : > { %v12360_v21 = vpop.f32.mrb[35].mxu0  ;;  %3834 = vmatpush1.bf16.msra.mxu1 %v12989_v51 }
 0x6de   : > { %v12992_v21 = vld [vmem:[#allocation12 + $0xf0] ss:$8 sps:$4 sm:$0xff]   ;;  %3835 = vmatprep.subr.bf16.mxu1 %v12997_v38 }
 0x6df   : > { %3817 = vmatpush1.bf16.msra.mxu0 %v12992_v21  ;;  %v3885_v21 = vld [vmem:[#allocation19 + $0x68] sm:$0xff] }
 0x6e1   : > { %3836 = vmatpush1.bf16.msra.mxu1 %v12995_v3 }
 0x6e2   : > { %v3055_v41 = vpop.f32.mrb[44].mxu1  ;;  %3837 = vmatprep.subr.bf16.mxu1 %v13000_v59 }
 0x6e3   : > { %3443 = vrot.lane.b32.xlu1 %v3055_v41, %s14165_s6  ;;  %v12365_v44 = vpop.f32.mrb[45].mxu1 }
 0x6e4   : > { %v3058_v8 = vpop.f32.mrb[46].mxu1 }
 0x6e5   : > { %v12366_v50 = vpop.f32.mrb[47].mxu1 }
 0x6e6   : > { %v12998_v50 = vld [vmem:[#allocation12 + $0x150] ss:$8 sps:$4 sm:$0xff]  }
 0x6e7   : > { %3838 = vmatpush1.bf16.msra.mxu1 %v12998_v50 }
 0x6e8   : > { %3839 = vmatprep.subr.bf16.mxu1 %v13003_v30 }
 0x6eb   : > { %3840 = vmatpush1.bf16.msra.mxu1 %v13001_v5  ;;  %v3901_v5 = vld [vmem:[#allocation19 + $0xe8] sm:$0xff] }
 0x6ec   : > { %3841 = vmatprep.subr.bf16.mxu1 %v13006_v43 }
 0x6ef   : > { %3842 = vmatpush1.bf16.msra.mxu1 %v13004_v22 }
 0x70f   : > { %v3101_v9 = vpop.f32.mrb[36].mxu0 }
 0x710   : > { %3448 = vst.msk [vmem:[#allocation6 + $0x8] sm:$0xff] %vm1894_vm1, %v3101_v9  ;;  %v12371_v17 = vpop.f32.mrb[37].mxu0 }
 0x711   : > { %v3104_v11 = vpop.f32.mrb[38].mxu0  ;;  %v15017_v17 = vld [vmem:[#allocation19] sm:$0xff] }
 0x712   : > { %v12372_v34 = vpop.f32.mrb[39].mxu0  ;;  %v3873_v11 = vld [vmem:[#allocation19 + $0x8] sm:$0xff]  ;;  %v11395_v33 = vcombine.low %v15017_v17, %v15019_v10  ;;  %v11396_v15 = vcombine.high %v15017_v17, %v15019_v10  ;;  %v3908_v10 = vld [vmem:[#allocation19 + $0x120] sm:$0xff] }
 0x714   : > { %4682 = vmatprep.subr.bf16.mxu1 %v11396_v15 }
 0x717   : > { %v3147_v32 = vpop.f32.mrb[48].mxu1 }
 0x718   : > { %3450 = vrot.lane.b32.xlu0 %v3147_v32, %s14166_s14  ;;  %v12377_v16 = vpop.f32.mrb[49].mxu1  ;;  %v3877_v32 = vld [vmem:[#allocation19 + $0x28] sm:$0xff] }
 0x719   : > { %v3150_v18 = vpop.f32.mrb[50].mxu1  ;;  %v11398_v19 = vcombine.high %v3873_v11, %v3877_v32 }
 0x71a   : > { %v12378_v20 = vpop.f32.mrb[51].mxu1  ;;  %v11397_v18 = vcombine.low %v3873_v11, %v3877_v32  ;;  %v3913_v11 = vld [vmem:[#allocation19 + $0x148] sm:$0xff] }
 0x71b   : > { %4723 = vmatprep.subr.bf16.mxu0 %v11398_v19  ;;  %v3900_v19 = vld [vmem:[#allocation19 + $0xe0] sm:$0xff] }
 0x722   : > { %v3239_v37 = vpop.f32.mrb[52].mxu1 }
 0x723   : > { %v12389_v39 = vpop.f32.mrb[53].mxu1 }
 0x724   : > { %v3242_v40 = vpop.f32.mrb[54].mxu1 }
 0x725   : > { %v12390_v41 = vpop.f32.mrb[55].mxu1  ;;  %v3193_v42 = vpop.f32.mrb[40].mxu0 }
 0x726   : > { %v12383_v44 = vpop.f32.mrb[41].mxu0  ;;  %3455 = vrot.lane.b32.xlu0 %v3193_v42, %s14164_s3  ;;  %v3889_v42 = vld [vmem:[#allocation19 + $0x88] sm:$0xff] }
 0x727   : > { %v3196_v8 = vpop.f32.mrb[42].mxu0  ;;  %v3893_v44 = vld [vmem:[#allocation19 + $0xa8] sm:$0xff] }
 0x728   : > { %v12384_v60 = vpop.f32.mrb[43].mxu0  ;;  %v11413_v30 = vcombine.low %v3889_v42, %v3893_v44 }
 0x729   : > { %v11414_v60 = vcombine.high %v3889_v42, %v3893_v44 }
 0x72a   : > { %v3331_v36 = vpop.f32.mrb[56].mxu1  ;;  %3460 = vrot.lane.b32.xlu0 %v3239_v37, %s14165_s6  ;;  %v3881_v37 = vld [vmem:[#allocation19 + $0x48] sm:$0xff] }
 0x72b   : > { %v12401_v12 = vpop.f32.mrb[57].mxu1  ;;  %v11406_v41 = vcombine.high %v3881_v37, %v3885_v21  ;;  %v11405_v59 = vcombine.low %v3881_v37, %v3885_v21  ;;  %v3912_v37 = vld [vmem:[#allocation19 + $0x140] sm:$0xff] }
 0x72c   : > { %v3334_v63 = vpop.f32.mrb[58].mxu1  ;;  %v3880_v12 = vld [vmem:[#allocation19 + $0x40] sm:$0xff] }
 0x72d   : > { %v12402_v62 = vpop.f32.mrb[59].mxu1  ;;  %v3285_v4 = vpop.f32.mrb[44].mxu0  ;;  %v3884_v63 = vld [vmem:[#allocation19 + $0x60] sm:$0xff] }
 0x72e   : > { %3464 = vst.msk [vmem:[#allocation6 + $0x10] sm:$0xff] %vm1894_vm1, %v3285_v4  ;;  %v12395_v6 = vpop.f32.mrb[45].mxu0  ;;  %3466 = vrot.lane.b32.xlu0 %v3331_v36, %s14166_s14  ;;  %v3897_v36 = vld [vmem:[#allocation19 + $0xc8] sm:$0xff] }
 0x72f   : > { %v3288_v31 = vpop.f32.mrb[46].mxu0  ;;  %v11422_v43 = vcombine.high %v3897_v36, %v3901_v5  ;;  %v3905_v62 = vld [vmem:[#allocation19 + $0x108] sm:$0xff]  ;;  %v11421_v22 = vcombine.low %v3897_v36, %v3901_v5 }
 0x730   : > { %v12396_v7 = vpop.f32.mrb[47].mxu0  ;;  %v3909_v4 = vld [vmem:[#allocation19 + $0x128] sm:$0xff] }
 0x731   : > { %v11404_v7 = vcombine.high %v3880_v12, %v3884_v63  ;;  %v11429_v15 = vcombine.low %v3905_v62, %v3909_v4  ;;  %v3949_v36 = vld [vmem:[#allocation19 + $0x268] sm:$0xff] }
 0x732   : > { %v3423_v61 = vpop.f32.mrb[60].mxu1 }
 0x733   : > { %3476 = vrot.lane.b32.xlu0 %v3423_v61, %s14165_s6  ;;  %v12413_v9 = vpop.f32.mrb[61].mxu1  ;;  %v3888_v61 = vld [vmem:[#allocation19 + $0x80] sm:$0xff] }
 0x734   : > { %v3426_v0 = vpop.f32.mrb[62].mxu1  ;;  %v11430_v9 = vcombine.high %v3905_v62, %v3909_v4  ;;  %v3932_v62 = vld [vmem:[#allocation19 + $0x1e0] sm:$0xff]  ;;  %v3953_v4 = vld [vmem:[#allocation19 + $0x288] sm:$0xff] }
 0x735   : > { %v12414_v34 = vpop.f32.mrb[63].mxu1  ;;  %v3377_v35 = vpop.f32.mrb[48].mxu0  ;;  %v3892_v0 = vld [vmem:[#allocation19 + $0xa0] sm:$0xff] }
 0x736   : > { %v12407_v16 = vpop.f32.mrb[49].mxu0  ;;  %3471 = vrot.lane.b32.xlu1 %v3377_v35, %s14164_s3  ;;  %v3917_v34 = vld [vmem:[#allocation19 + $0x168] sm:$0xff]  ;;  %v11403_v35 = vcombine.low %v3880_v12, %v3884_v63  ;;  %v11412_v32 = vcombine.high %v3888_v61, %v3892_v0 }
 0x737   : > { %v3380_v1 = vpop.f32.mrb[50].mxu0  ;;  %v3896_v16 = vld [vmem:[#allocation19 + $0xc0] sm:$0xff] }
 0x738   : > { %v12408_v20 = vpop.f32.mrb[51].mxu0  ;;  %v3921_v1 = vld [vmem:[#allocation19 + $0x188] sm:$0xff] }
 0x739   : > { %v3925_v20 = vld [vmem:[#allocation19 + $0x1a8] sm:$0xff] }
 0x73a   : > { %v11446_v17 = vcombine.high %v3921_v1, %v3925_v20 }
 0x745   : > { %v3432_v23 = vpop.permute.xlu1 %3431 }
 0x746   : > { %3435 = vst.msk [vmem:[#allocation6] sm:$0xff] %vm3434_vm4, %v3432_v23  ;;  %v11411_v23 = vcombine.low %v3888_v61, %v3892_v0  ;;  %v3940_v0 = vld [vmem:[#allocation19 + $0x220] sm:$0xff] }
 0x74d   : > { %v3438_v24 = vpop.permute.xlu1 %3437 }
 0x74e   : > { %3441 = vst.msk [vmem:[#allocation6] sm:$0xff] %vm3440_vm5, %v3438_v24  ;;  %v11437_v24 = vcombine.low %v3913_v11, %v3917_v34 }
 0x755   : > { %v3444_v25 = vpop.permute.xlu1 %3443 }
 0x756   : > { %3447 = vst.msk [vmem:[#allocation6] sm:$0xff] %vm3446_vm6, %v3444_v25  ;;  %v11420_v25 = vcombine.high %v3896_v16, %v3900_v19 }
 0x75d   : > { %v3480_v3 = vld [vmem:[#allocation6] sm:$0xff] }
 0x75e   : > { %v3483_v40 = vpack.c.bf16 %v3480_v3, %v3480_v3 }
 0x78a   : > { %v3451_v51 = vpop.permute.xlu0 %3450 }
 0x78b   : > { %3453 = vst.msk [vmem:[#allocation6 + $0x8] sm:$0xff] %vm3434_vm4, %v3451_v51  ;;  %v3904_v51 = vld [vmem:[#allocation19 + $0x100] sm:$0xff] }
 0x78c   : > { %v11428_v3 = vcombine.high %v3904_v51, %v3908_v10 }
 0x798   : > { %v3456_v55 = vpop.permute.xlu0 %3455 }
 0x799   : > { %3458 = vst.msk [vmem:[#allocation6 + $0x8] sm:$0xff] %vm3440_vm5, %v3456_v55  ;;  %v3933_v55 = vld [vmem:[#allocation19 + $0x1e8] sm:$0xff] }
 0x79c   : > { %v3461_v26 = vpop.permute.xlu0 %3460 }
 0x79d   : > { %3463 = vst.msk [vmem:[#allocation6 + $0x8] sm:$0xff] %vm3446_vm6, %v3461_v26  ;;  %v11419_v26 = vcombine.low %v3896_v16, %v3900_v19  ;;  %v3952_v19 = vld [vmem:[#allocation19 + $0x280] sm:$0xff] }
 0x7a0   : > { %v3467_v2 = vpop.permute.xlu0 %3466 }
 0x7a1   : > { %3469 = vst.msk [vmem:[#allocation6 + $0x10] sm:$0xff] %vm3434_vm4, %v3467_v2  ;;  %v11445_v2 = vcombine.low %v3921_v1, %v3925_v20  ;;  %v3956_v1 = vld [vmem:[#allocation19 + $0x2a0] sm:$0xff] }
 0x7a4   : > { %v3481_v38 = vld [vmem:[#allocation6 + $0x8] sm:$0xff] }
 0x7a5   : > { %v3484_v39 = vpack.c.bf16 %v3481_v38, %v3481_v38  ;;  %v3477_v50 = vpop.permute.xlu0 %3476  ;;  %v3916_v38 = vld [vmem:[#allocation19 + $0x160] sm:$0xff] }
 0x7a6   : > { %v11436_v44 = vcombine.high %v3912_v37, %v3916_v38  ;;  %v11435_v5 = vcombine.low %v3912_v37, %v3916_v38  ;;  %v3972_v37 = vld [vmem:[#allocation19 + $0x320] sm:$0xff] }
 0x7a7   : > { %3818 = vmatprep.mubr.bf16.mxu0 %v3484_v39  ;;  %v3937_v39 = vld [vmem:[#allocation19 + $0x208] sm:$0xff] }
 0x7a8   : > { %v3472_v8 = vpop.permute.xlu1 %3471  ;;  %3819 = vmatmul.mubr.bf16.vlgmr.msra.gmra.mrb[52].mxu0 %v3483_v40  ;;  %v3941_v40 = vld [vmem:[#allocation19 + $0x228] sm:$0xff] }
 0x7a9   : > { %3474 = vst.msk [vmem:[#allocation6 + $0x10] sm:$0xff] %vm3440_vm5, %v3472_v8  ;;  %4724 = vmatpush1.bf16.msra.mxu0 %v11397_v18  ;;  %v11438_v18 = vcombine.high %v3913_v11, %v3917_v34  ;;  %v3920_v8 = vld [vmem:[#allocation19 + $0x180] sm:$0xff] }
 0x7aa   : > { %3479 = vst.msk [vmem:[#allocation6 + $0x10] sm:$0xff] %vm3446_vm6, %v3477_v50  ;;  %4725 = vmatprep.subr.bf16.mxu0 %v11406_v41  ;;  %v11427_v41 = vcombine.low %v3904_v51, %v3908_v10  ;;  %v11462_v50 = vcombine.high %v3937_v39, %v3941_v40  ;;  %v3964_v51 = vld [vmem:[#allocation19 + $0x2e0] sm:$0xff] }
 0x7ad   : > { %4726 = vmatpush1.bf16.msra.mxu0 %v11405_v59  ;;  %v3924_v59 = vld [vmem:[#allocation19 + $0x1a0] sm:$0xff] }
 0x7ae   : > { %4727 = vmatprep.subr.bf16.mxu0 %v11414_v60  ;;  %v3945_v60 = vld [vmem:[#allocation19 + $0x248] sm:$0xff]  ;;  %v11444_v12 = vcombine.high %v3920_v8, %v3924_v59 }
 0x7af   : > { %v11470_v63 = vcombine.high %v3945_v60, %v3949_v36 }
 0x7b1   : > { %v3482_v6 = vld [vmem:[#allocation6 + $0x10] sm:$0xff]  ;;  %4728 = vmatpush1.bf16.msra.mxu0 %v11413_v30  ;;  %v11461_v30 = vcombine.low %v3937_v39, %v3941_v40 }
 0x7b2   : > { %v3485_v31 = vpack.c.bf16 %v3482_v6, %v3482_v6  ;;  %4729 = vmatprep.subr.bf16.mxu0 %v11422_v43  ;;  %v3928_v43 = vld [vmem:[#allocation19 + $0x1c0] sm:$0xff]  ;;  %v3957_v6 = vld [vmem:[#allocation19 + $0x2a8] sm:$0xff] }
 0x7b3   : > { %v11478_v61 = vcombine.high %v3953_v4, %v3957_v6  ;;  %v11451_v11 = vcombine.low %v3928_v43, %v3932_v62  ;;  %v11477_v34 = vcombine.low %v3953_v4, %v3957_v6  ;;  %v3973_v40 = vld [vmem:[#allocation19 + $0x328] sm:$0xff] }
 0x7b4   : > { %3860 = vmatmul.mubr.bf16.vlgmr.msra.gmra.mrb[64].mxu1 %v3485_v31  ;;  %v11469_v31 = vcombine.low %v3945_v60, %v3949_v36  ;;  %v3981_v60 = vld [vmem:[#allocation19 + $0x368] sm:$0xff] }
 0x7b5   : > { %4683 = vmatpush1.bf16.msra.mxu1 %v11395_v33  ;;  %4730 = vmatpush1.bf16.msra.mxu0 %v11421_v22  ;;  %v3929_v33 = vld [vmem:[#allocation19 + $0x1c8] sm:$0xff]  ;;  %v11443_v22 = vcombine.low %v3920_v8, %v3924_v59 }
 0x7b6   : > { %4684 = vmatprep.subr.bf16.mxu1 %v11404_v7  ;;  %4731 = vmatprep.subr.bf16.mxu0 %v11430_v9  ;;  %v11454_v21 = vcombine.high %v3929_v33, %v3933_v55  ;;  %v11453_v42 = vcombine.low %v3929_v33, %v3933_v55  ;;  %v11452_v7 = vcombine.high %v3928_v43, %v3932_v62  ;;  %v3936_v9 = vld [vmem:[#allocation19 + $0x200] sm:$0xff]  ;;  %v3965_v33 = vld [vmem:[#allocation19 + $0x2e8] sm:$0xff] }
 0x7b7   : > { %v11459_v16 = vcombine.low %v3936_v9, %v3940_v0  ;;  %v3977_v59 = vld [vmem:[#allocation19 + $0x348] sm:$0xff]  ;;  %v3988_v43 = vld [vmem:[#allocation19 + $0x3a0] sm:$0xff] }
 0x7b8   : > { %v11502_v36 = vcombine.high %v3977_v59, %v3981_v60  ;;  %v3989_v4 = vld [vmem:[#allocation19 + $0x3a8] sm:$0xff] }
 0x7b9   : > { %4685 = vmatpush1.bf16.msra.mxu1 %v11403_v35  ;;  %4732 = vmatpush1.bf16.msra.mxu0 %v11429_v15  ;;  %v11460_v35 = vcombine.high %v3936_v9, %v3940_v0  ;;  %v3944_v15 = vld [vmem:[#allocation19 + $0x240] sm:$0xff]  ;;  %v3993_v9 = vld [vmem:[#allocation19 + $0x3c8] sm:$0xff] }
 0x7ba   : > { %4686 = vmatprep.subr.bf16.mxu1 %v11412_v32  ;;  %4733 = vmatprep.subr.bf16.mxu0 %v11438_v18  ;;  %v3948_v32 = vld [vmem:[#allocation19 + $0x260] sm:$0xff] }
 0x7bb   : > { %v11468_v18 = vcombine.high %v3944_v15, %v3948_v32  ;;  %v11467_v20 = vcombine.low %v3944_v15, %v3948_v32  ;;  %v3874_v32 = vld [vmem:[#allocation19 + $0x10] sm:$0xff] }
 0x7bd   : > { %4687 = vmatpush1.bf16.msra.mxu1 %v11411_v23  ;;  %4734 = vmatpush1.bf16.msra.mxu0 %v11437_v24  ;;  %v11476_v23 = vcombine.high %v3952_v19, %v3956_v1  ;;  %v11475_v24 = vcombine.low %v3952_v19, %v3956_v1 }
 0x7be   : > { %4688 = vmatprep.subr.bf16.mxu1 %v11420_v25  ;;  %4735 = vmatprep.subr.bf16.mxu0 %v11446_v17  ;;  %v3960_v25 = vld [vmem:[#allocation19 + $0x2c0] sm:$0xff]  ;;  %v3961_v17 = vld [vmem:[#allocation19 + $0x2c8] sm:$0xff] }
 0x7bf   : > { %v11484_v10 = vcombine.high %v3960_v25, %v3964_v51  ;;  %v11483_v55 = vcombine.low %v3960_v25, %v3964_v51 }
 0x7c1   : > { %4689 = vmatpush1.bf16.msra.mxu1 %v11419_v26  ;;  %4736 = vmatpush1.bf16.msra.mxu0 %v11445_v2  ;;  %v11485_v26 = vcombine.low %v3961_v17, %v3965_v33  ;;  %v11486_v2 = vcombine.high %v3961_v17, %v3965_v33  ;;  %v3534_v33 = vld [vmem:[%s15710_s4] sm:$0x3]  ;;  %s12130_s4 = sshll.u32 %s14281_s0, 8  ;;  %s10993_s0 = scalar_lea.sflag [#allocation9], %s14568_s7 }
 0x7c2   : > { %4690 = vmatprep.subr.bf16.mxu1 %v11428_v3  ;;  %4737 = vmatprep.subr.bf16.mxu0 %v11454_v21  ;;  %v3968_v3 = vld [vmem:[#allocation19 + $0x300] sm:$0xff]  ;;  %v3969_v21 = vld [vmem:[#allocation19 + $0x308] sm:$0xff] }
 0x7c3   : > { %v11491_v38 = vcombine.low %v3968_v3, %v3972_v37  ;;  %v11492_v39 = vcombine.high %v3968_v3, %v3972_v37  ;;  %v11494_v8 = vcombine.high %v3969_v21, %v3973_v40 }
 0x7c5   : > { %4691 = vmatpush1.bf16.msra.mxu1 %v11427_v41  ;;  %4738 = vmatpush1.bf16.msra.mxu0 %v11453_v42  ;;  %v3976_v41 = vld [vmem:[#allocation19 + $0x340] sm:$0xff] }
 0x7c6   : > { %4692 = vmatprep.subr.bf16.mxu1 %v11436_v44  ;;  %4739 = vmatprep.subr.bf16.mxu0 %v11462_v50  ;;  %v3980_v42 = vld [vmem:[#allocation19 + $0x360] sm:$0xff]  ;;  %v11493_v44 = vcombine.low %v3969_v21, %v3973_v40 }
 0x7c7   : > { %v11500_v50 = vcombine.high %v3976_v41, %v3980_v42 }
 0x7c9   : > { %4693 = vmatpush1.bf16.msra.mxu1 %v11435_v5  ;;  %4740 = vmatpush1.bf16.msra.mxu0 %v11461_v30  ;;  %v11499_v5 = vcombine.low %v3976_v41, %v3980_v42  ;;  %v11501_v30 = vcombine.low %v3977_v59, %v3981_v60  ;;  %v13807_v41 = vld [vmem:[%s14574_s28] sm:$0xff] }
 0x7ca   : > { %4694 = vmatprep.subr.bf16.mxu1 %v11444_v12  ;;  %4741 = vmatprep.subr.bf16.mxu0 %v11470_v63  ;;  %v3984_v12 = vld [vmem:[#allocation19 + $0x380] sm:$0xff]  ;;  %v3985_v63 = vld [vmem:[#allocation19 + $0x388] sm:$0xff]  ;;  %v3882_v59 = vld [vmem:[#allocation19 + $0x50] sm:$0xff] }
 0x7cb   : > { %v11508_v62 = vcombine.high %v3984_v12, %v3988_v43  ;;  %v11507_v6 = vcombine.low %v3984_v12, %v3988_v43  ;;  %v3886_v60 = vld [vmem:[#allocation19 + $0x70] sm:$0xff] }
 0x7cc   : > { %v3890_v43 = vld [vmem:[#allocation19 + $0x90] sm:$0xff] }
 0x7cd   : > { %4695 = vmatpush1.bf16.msra.mxu1 %v11443_v22  ;;  %4742 = vmatpush1.bf16.msra.mxu0 %v11469_v31  ;;  %v11509_v22 = vcombine.low %v3985_v63, %v3989_v4  ;;  %v11510_v31 = vcombine.high %v3985_v63, %v3989_v4  ;;  %v11408_v63 = vcombine.high %v3882_v59, %v3886_v60  ;;  %v3894_v4 = vld [vmem:[#allocation19 + $0xb0] sm:$0xff] }
 0x7ce   : > { %4696 = vmatprep.subr.bf16.mxu1 %v11452_v7  ;;  %4743 = vmatprep.subr.bf16.mxu0 %v11478_v61  ;;  %v3992_v7 = vld [vmem:[#allocation19 + $0x3c0] sm:$0xff] }
 0x7cf   : > { %v3996_v61 = vld [vmem:[#allocation19 + $0x3e0] sm:$0xff] }
 0x7d0   : > { %v11516_v0 = vcombine.high %v3992_v7, %v3996_v61 }
 0x7d1   : > { %4697 = vmatpush1.bf16.msra.mxu1 %v11451_v11  ;;  %4744 = vmatpush1.bf16.msra.mxu0 %v11477_v34  ;;  %v3997_v11 = vld [vmem:[#allocation19 + $0x3e8] sm:$0xff]  ;;  %v11515_v34 = vcombine.low %v3992_v7, %v3996_v61  ;;  %v11416_v61 = vcombine.high %v3890_v43, %v3894_v4 }
 0x7d2   : > { %4698 = vmatprep.subr.bf16.mxu1 %v11460_v35  ;;  %4745 = vmatprep.subr.bf16.mxu0 %v11486_v2  ;;  %v11517_v35 = vcombine.low %v3993_v9, %v3997_v11  ;;  %v11518_v15 = vcombine.high %v3993_v9, %v3997_v11  ;;  %v3902_v11 = vld [vmem:[#allocation19 + $0xf0] sm:$0xff] }
 0x7d5   : > { %4699 = vmatpush1.bf16.msra.mxu1 %v11459_v16  ;;  %4746 = vmatpush1.bf16.msra.mxu0 %v11485_v26  ;;  %v3878_v16 = vld [vmem:[#allocation19 + $0x30] sm:$0xff]  ;;  %v3543_v26 = vrot.slane %v3534_v33, %v14602_v48 }
 0x7d6   : > { %4700 = vmatprep.subr.bf16.mxu1 %v11468_v18  ;;  %4747 = vmatprep.subr.bf16.mxu0 %v11494_v8  ;;  %v3875_v18 = vld [vmem:[#allocation19 + $0x18] sm:$0xff]  ;;  %v11399_v19 = vcombine.low %v3874_v32, %v3878_v16  ;;  %v11400_v1 = vcombine.high %v3874_v32, %v3878_v16 }
 0x7d7   : > { %v13808_v8 = vld [vmem:[%s14574_s28 + $0x8] sm:$0xff]  ;;  %s15713_s28 = sld [smem:[#allocation31_spill]] }
 0x7d9   : > { %4701 = vmatpush1.bf16.msra.mxu1 %v11467_v20  ;;  %4748 = vmatpush1.bf16.msra.mxu0 %v11493_v44  ;;  %v3879_v20 = vld [vmem:[#allocation19 + $0x38] sm:$0xff] }
 0x7da   : > { %4702 = vmatprep.subr.bf16.mxu1 %v11476_v23  ;;  %4749 = vmatprep.subr.bf16.mxu0 %v11502_v36  ;;  %v11401_v23 = vcombine.low %v3875_v18, %v3879_v20  ;;  %v3883_v36 = vld [vmem:[#allocation19 + $0x58] sm:$0xff] }
 0x7dd   : > { %4703 = vmatpush1.bf16.msra.mxu1 %v11475_v24  ;;  %4750 = vmatpush1.bf16.msra.mxu0 %v11501_v30  ;;  %v11402_v24 = vcombine.high %v3875_v18, %v3879_v20  ;;  %v3907_v20 = vld [vmem:[#allocation19 + $0x118] sm:$0xff] }
 0x7de   : > { %4704 = vmatprep.subr.bf16.mxu1 %v11484_v10  ;;  %4751 = vmatprep.subr.bf16.mxu0 %v11510_v31  ;;  %v11407_v31 = vcombine.low %v3882_v59, %v3886_v60 }
 0x7e1   : > { %4705 = vmatpush1.bf16.msra.mxu1 %v11483_v55  ;;  %4752 = vmatpush1.bf16.msra.mxu0 %v11509_v22  ;;  %v3539_v55 = vrot.slane %v3534_v33, %v14605_v49  ;;  %v3895_v22 = vld [vmem:[#allocation19 + $0xb8] sm:$0xff]  ;;  %v3918_v33 = vld [vmem:[#allocation19 + $0x170] sm:$0xff] }
 0x7e2   : > { %4706 = vmatprep.subr.bf16.mxu1 %v11492_v39  ;;  %4753 = vmatprep.subr.bf16.mxu0 %v11518_v15  ;;  %v11415_v15 = vcombine.low %v3890_v43, %v3894_v4  ;;  %v3935_v43 = vld [vmem:[#allocation19 + $0x1f8] sm:$0xff] }
 0x7e5   : > { %4707 = vmatpush1.bf16.msra.mxu1 %v11491_v38  ;;  %4754 = vmatpush1.bf16.msra.mxu0 %v11517_v35  ;;  %v3903_v35 = vld [vmem:[#allocation19 + $0xf8] sm:$0xff] }
 0x7e6   : > { %4708 = vmatprep.subr.bf16.mxu1 %v11500_v50  ;;  %4805 = vmatprep.subr.bf16.mxu0 %v11402_v24 }
 0x7e9   : > { %4709 = vmatpush1.bf16.msra.mxu1 %v11499_v5  ;;  %v3887_v5 = vld [vmem:[#allocation19 + $0x78] sm:$0xff] }
 0x7ea   : > { %4710 = vmatprep.subr.bf16.mxu1 %v11508_v62  ;;  %v11410_v62 = vcombine.high %v3883_v36, %v3887_v5  ;;  %v11409_v7 = vcombine.low %v3883_v36, %v3887_v5  ;;  %v3930_v36 = vld [vmem:[#allocation19 + $0x1d0] sm:$0xff] }
 0x7eb   : > { %v3934_v5 = vld [vmem:[#allocation19 + $0x1f0] sm:$0xff] }
 0x7ec   : > { %v11456_v4 = vcombine.high %v3930_v36, %v3934_v5 }
 0x7ed   : > { %4711 = vmatpush1.bf16.msra.mxu1 %v11507_v6  ;;  %v3891_v6 = vld [vmem:[#allocation19 + $0x98] sm:$0xff] }
 0x7ee   : > { %4712 = vmatprep.subr.bf16.mxu1 %v11516_v0  ;;  %v11418_v9 = vcombine.high %v3891_v6, %v3895_v22  ;;  %v3898_v0 = vld [vmem:[#allocation19 + $0xd0] sm:$0xff]  ;;  %v11417_v32 = vcombine.low %v3891_v6, %v3895_v22 }
 0x7ef   : > { %v11424_v16 = vcombine.high %v3898_v0, %v3902_v11  ;;  %v11423_v24 = vcombine.low %v3898_v0, %v3902_v11  ;;  %v3938_v22 = vld [vmem:[#allocation19 + $0x210] sm:$0xff] }
 0x7f1   : > { %4713 = vmatpush1.bf16.msra.mxu1 %v11515_v34  ;;  %v3899_v34 = vld [vmem:[#allocation19 + $0xd8] sm:$0xff] }
 0x7f2   : > { %4764 = vmatprep.subr.bf16.mxu1 %v11400_v1  ;;  %v11426_v18 = vcombine.high %v3899_v34, %v3903_v35  ;;  %v3910_v1 = vld [vmem:[#allocation19 + $0x130] sm:$0xff] }
 0x87b   : > { %v3820_v25 = vpop.f32.mrb[52].mxu0 }
 0x87c   : > { %v3822_v51 = vpop.f32.mrb[53].mxu0  ;;  %v3821_v2 = vadd.f32 %v3820_v25, %v3539_v55  ;;  %v11425_v25 = vcombine.low %v3899_v34, %v3903_v35  ;;  %v3915_v55 = vld [vmem:[#allocation19 + $0x158] sm:$0xff]  ;;  %v3946_v35 = vld [vmem:[#allocation19 + $0x250] sm:$0xff] }
 0x87d   : > { %v3824_v17 = vpop.f32.mrb[54].mxu0  ;;  %v3823_v3 = vadd.f32 %v3822_v51, %v3543_v26  ;;  %v3919_v26 = vld [vmem:[#allocation19 + $0x178] sm:$0xff] }
 0x87e   : > { %v3825_v10 = vpop.f32.mrb[55].mxu0 }
 0x87f   : > { %v3914_v10 = vld [vmem:[#allocation19 + $0x150] sm:$0xff] }
 0x887   : > { %v3861_v37 = vpop.f32.mrb[64].mxu1 }
 0x888   : > { %v3862_v21 = vadd.f32 %v3861_v37, %v3821_v2  ;;  %v3863_v38 = vpop.f32.mrb[65].mxu1  ;;  %v11440_v37 = vcombine.high %v3914_v10, %v3918_v33 }
 0x889   : > { %v3864_v39 = vadd.f32 %v3863_v38, %v3823_v3  ;;  %v3865_v40 = vpop.f32.mrb[66].mxu1  ;;  %v3922_v38 = vld [vmem:[#allocation19 + $0x190] sm:$0xff] }
 0x88a   : > { %v15044_v42 = vadd.f32 %v13807_v41, %v3862_v21  ;;  %v3866_v44 = vpop.f32.mrb[67].mxu1  ;;  %v11442_v21 = vcombine.high %v3915_v55, %v3919_v26  ;;  %v3923_v40 = vld [vmem:[#allocation19 + $0x198] sm:$0xff] }
 0x88b   : > { %v15047_v50 = vadd.f32 %v13808_v8, %v3864_v39  ;;  %v3926_v39 = vld [vmem:[#allocation19 + $0x1b0] sm:$0xff]  ;;  %v3927_v41 = vld [vmem:[#allocation19 + $0x1b8] sm:$0xff]  ;;  %v11439_v44 = vcombine.low %v3914_v10, %v3918_v33  ;;  %v11441_v8 = vcombine.low %v3915_v55, %v3919_v26 }
 0x88c   : > { %v15053_v12 = vpack.c.bf16 %v15044_v42, %v15044_v42  ;;  %v11448_v59 = vcombine.high %v3922_v38, %v3926_v39  ;;  %v11450_v60 = vcombine.high %v3923_v40, %v3927_v41  ;;  %v3962_v26 = vld [vmem:[#allocation19 + $0x2d0] sm:$0xff] }
 0x88d   : > { %v3871_v30 = vpack.c.bf16 %v15047_v50, %v15047_v50 }
 0x88f   : > { %4714 = vmatprep.mubr.bf16.mxu1 %v3871_v30  ;;  %4755 = vmatprep.mubr.bf16.mxu0 %v3871_v30 }
 0x890   : > { %4715 = vmatmul.mubr.bf16.vlgmr.msra.gmra.mrb[68].mxu1 %v15053_v12  ;;  %4756 = vmatmul.mubr.bf16.vlgmr.msra.gmra.mrb[56].mxu0 %v15053_v12 }
 0x891   : > { %4765 = vmatpush1.bf16.msra.mxu1 %v11399_v19  ;;  %4806 = vmatpush1.bf16.msra.mxu0 %v11401_v23  ;;  %v3906_v19 = vld [vmem:[#allocation19 + $0x110] sm:$0xff]  ;;  %v3911_v23 = vld [vmem:[#allocation19 + $0x138] sm:$0xff] }
 0x892   : > { %4796 = vmatprep.mubr.bf16.mxu1 %v3871_v30  ;;  %4837 = vmatprep.mubr.bf16.mxu0 %v3871_v30  ;;  %v11432_v51 = vcombine.high %v3906_v19, %v3910_v1  ;;  %v11434_v17 = vcombine.high %v3907_v20, %v3911_v23  ;;  %v11431_v2 = vcombine.low %v3906_v19, %v3910_v1  ;;  %v3931_v30 = vld [vmem:[#allocation19 + $0x1d8] sm:$0xff] }
 0x893   : > { %4766 = vmatprep.subr.bf16.mxu1 %v11408_v63  ;;  %4807 = vmatprep.subr.bf16.mxu0 %v11410_v62  ;;  %v11433_v3 = vcombine.low %v3907_v20, %v3911_v23  ;;  %v11447_v63 = vcombine.low %v3922_v38, %v3926_v39  ;;  %v11449_v62 = vcombine.low %v3923_v40, %v3927_v41  ;;  %v3954_v23 = vld [vmem:[#allocation19 + $0x290] sm:$0xff] }
 0x894   : > { %v11458_v6 = vcombine.high %v3931_v30, %v3935_v43  ;;  %v11457_v0 = vcombine.low %v3931_v30, %v3935_v43  ;;  %v3970_v41 = vld [vmem:[#allocation19 + $0x310] sm:$0xff] }
 0x895   : > { %4767 = vmatpush1.bf16.msra.mxu1 %v11407_v31  ;;  %4808 = vmatpush1.bf16.msra.mxu0 %v11409_v7  ;;  %v3942_v31 = vld [vmem:[#allocation19 + $0x230] sm:$0xff]  ;;  %v3939_v7 = vld [vmem:[#allocation19 + $0x218] sm:$0xff] }
 0x896   : > { %4768 = vmatprep.subr.bf16.mxu1 %v11416_v61  ;;  %4809 = vmatprep.subr.bf16.mxu0 %v11418_v9  ;;  %v3943_v61 = vld [vmem:[#allocation19 + $0x238] sm:$0xff]  ;;  %v11455_v9 = vcombine.low %v3930_v36, %v3934_v5  ;;  %v11464_v11 = vcombine.high %v3938_v22, %v3942_v31  ;;  %v3978_v43 = vld [vmem:[#allocation19 + $0x350] sm:$0xff] }
 0x897   : > { %v11466_v34 = vcombine.high %v3939_v7, %v3943_v61  ;;  %v11465_v19 = vcombine.low %v3939_v7, %v3943_v61  ;;  %v3986_v61 = vld [vmem:[#allocation19 + $0x390] sm:$0xff] }
 0x899   : > { %4769 = vmatpush1.bf16.msra.mxu1 %v11415_v15  ;;  %4810 = vmatpush1.bf16.msra.mxu0 %v11417_v32  ;;  %v3950_v15 = vld [vmem:[#allocation19 + $0x270] sm:$0xff]  ;;  %v3947_v32 = vld [vmem:[#allocation19 + $0x258] sm:$0xff] }
 0x89a   : > { %4770 = vmatprep.subr.bf16.mxu1 %v11424_v16  ;;  %4811 = vmatprep.subr.bf16.mxu0 %v11426_v18  ;;  %v3951_v16 = vld [vmem:[#allocation19 + $0x278] sm:$0xff]  ;;  %v11463_v18 = vcombine.low %v3938_v22, %v3942_v31  ;;  %v11472_v1 = vcombine.high %v3946_v35, %v3950_v15 }
 0x89b   : > { %v11474_v20 = vcombine.high %v3947_v32, %v3951_v16  ;;  %v11473_v10 = vcombine.low %v3947_v32, %v3951_v16  ;;  %v3994_v16 = vld [vmem:[#allocation19 + $0x3d0] sm:$0xff] }
 0x89d   : > { %4771 = vmatpush1.bf16.msra.mxu1 %v11423_v24  ;;  %4812 = vmatpush1.bf16.msra.mxu0 %v11425_v25  ;;  %v3958_v24 = vld [vmem:[#allocation19 + $0x2b0] sm:$0xff]  ;;  %v3955_v25 = vld [vmem:[#allocation19 + $0x298] sm:$0xff] }
 0x89e   : > { %4772 = vmatprep.subr.bf16.mxu1 %v11432_v51  ;;  %4813 = vmatprep.subr.bf16.mxu0 %v11434_v17  ;;  %v3959_v51 = vld [vmem:[#allocation19 + $0x2b8] sm:$0xff]  ;;  %v11471_v17 = vcombine.low %v3946_v35, %v3950_v15  ;;  %v11480_v33 = vcombine.high %v3954_v23, %v3958_v24 }
 0x89f   : > { %v11482_v55 = vcombine.high %v3955_v25, %v3959_v51  ;;  %v11481_v38 = vcombine.low %v3955_v25, %v3959_v51 }
 0x8a1   : > { %4773 = vmatpush1.bf16.msra.mxu1 %v11431_v2  ;;  %4814 = vmatpush1.bf16.msra.mxu0 %v11433_v3  ;;  %v3966_v2 = vld [vmem:[#allocation19 + $0x2f0] sm:$0xff]  ;;  %v3963_v3 = vld [vmem:[#allocation19 + $0x2d8] sm:$0xff] }
 0x8a2   : > { %4774 = vmatprep.subr.bf16.mxu1 %v11440_v37  ;;  %4815 = vmatprep.subr.bf16.mxu0 %v11442_v21  ;;  %v3967_v37 = vld [vmem:[#allocation19 + $0x2f8] sm:$0xff]  ;;  %v11479_v21 = vcombine.low %v3954_v23, %v3958_v24  ;;  %v11488_v39 = vcombine.high %v3962_v26, %v3966_v2 }
 0x8a3   : > { %v11490_v40 = vcombine.high %v3963_v3, %v3967_v37  ;;  %v11489_v36 = vcombine.low %v3963_v3, %v3967_v37  ;;  %v13013_v3 = vld [vmem:[#allocation21 + $0x20] ss:$8 sps:$4 sm:$0xff]   ;;  %v13018_v37 = vld [vmem:[#allocation21 + $0x34] ss:$8 sps:$4 sm:$0xff]  }
 0x8a5   : > { %4775 = vmatpush1.bf16.msra.mxu1 %v11439_v44  ;;  %4816 = vmatpush1.bf16.msra.mxu0 %v11441_v8  ;;  %v3974_v44 = vld [vmem:[#allocation19 + $0x330] sm:$0xff]  ;;  %v3971_v8 = vld [vmem:[#allocation19 + $0x318] sm:$0xff] }
 0x8a6   : > { %4776 = vmatprep.subr.bf16.mxu1 %v11448_v59  ;;  %4817 = vmatprep.subr.bf16.mxu0 %v11450_v60  ;;  %v3975_v59 = vld [vmem:[#allocation19 + $0x338] sm:$0xff]  ;;  %v11487_v60 = vcombine.low %v3962_v26, %v3966_v2  ;;  %v11496_v5 = vcombine.high %v3970_v41, %v3974_v44  ;;  %v13015_v2 = vld [vmem:[#allocation21 + $0x24] ss:$8 sps:$4 sm:$0xff]  }
 0x8a7   : > { %v11498_v30 = vcombine.high %v3971_v8, %v3975_v59  ;;  %v11497_v22 = vcombine.low %v3971_v8, %v3975_v59  ;;  %v13010_v26 = vld [vmem:[#allocation21 + $0x10] ss:$8 sps:$4 sm:$0xff]   ;;  %v13030_v8 = vld [vmem:[#allocation21 + $0x74] ss:$8 sps:$4 sm:$0xff]  }
 0x8a8   : > { %v13028_v59 = vld [vmem:[#allocation21 + $0x70] ss:$8 sps:$4 sm:$0xff]  }
 0x8a9   : > { %4777 = vmatpush1.bf16.msra.mxu1 %v11447_v63  ;;  %4818 = vmatpush1.bf16.msra.mxu0 %v11449_v62  ;;  %v3982_v63 = vld [vmem:[#allocation19 + $0x370] sm:$0xff]  ;;  %v3979_v62 = vld [vmem:[#allocation19 + $0x358] sm:$0xff] }
 0x8aa   : > { %4778 = vmatprep.subr.bf16.mxu1 %v11456_v4  ;;  %4819 = vmatprep.subr.bf16.mxu0 %v11458_v6  ;;  %v3983_v4 = vld [vmem:[#allocation19 + $0x378] sm:$0xff]  ;;  %v11495_v6 = vcombine.low %v3970_v41, %v3974_v44  ;;  %v11504_v31 = vcombine.high %v3978_v43, %v3982_v63  ;;  %v13025_v44 = vld [vmem:[#allocation21 + $0x60] ss:$8 sps:$4 sm:$0xff]  }
 0x8ab   : > { %v11506_v7 = vcombine.high %v3979_v62, %v3983_v4  ;;  %v11505_v35 = vcombine.low %v3979_v62, %v3983_v4  ;;  %v13022_v41 = vld [vmem:[#allocation21 + $0x50] ss:$8 sps:$4 sm:$0xff]   ;;  %v13042_v62 = vld [vmem:[#allocation21 + $0xb4] ss:$8 sps:$4 sm:$0xff]  }
 0x8ac   : > { %v13040_v4 = vld [vmem:[#allocation21 + $0xb0] ss:$8 sps:$4 sm:$0xff]  }
 0x8ad   : > { %4779 = vmatpush1.bf16.msra.mxu1 %v11455_v9  ;;  %4820 = vmatpush1.bf16.msra.mxu0 %v11457_v0  ;;  %v3990_v9 = vld [vmem:[#allocation19 + $0x3b0] sm:$0xff]  ;;  %v3987_v0 = vld [vmem:[#allocation19 + $0x398] sm:$0xff] }
 0x8ae   : > { %4780 = vmatprep.subr.bf16.mxu1 %v11464_v11  ;;  %4821 = vmatprep.subr.bf16.mxu0 %v11466_v34  ;;  %v3991_v11 = vld [vmem:[#allocation19 + $0x3b8] sm:$0xff]  ;;  %v11503_v34 = vcombine.low %v3978_v43, %v3982_v63  ;;  %v11512_v15 = vcombine.high %v3986_v61, %v3990_v9  ;;  %v13039_v43 = vld [vmem:[#allocation21 + $0xa4] ss:$8 sps:$4 sm:$0xff]   ;;  %v13037_v63 = vld [vmem:[#allocation21 + $0xa0] ss:$8 sps:$4 sm:$0xff]  }
 0x8af   : > { %v11514_v32 = vcombine.high %v3987_v0, %v3991_v11  ;;  %v11513_v23 = vcombine.low %v3987_v0, %v3991_v11  ;;  %v13054_v0 = vld [vmem:[#allocation21 + $0xf4] ss:$8 sps:$4 sm:$0xff]   ;;  %v13052_v11 = vld [vmem:[#allocation21 + $0xf0] ss:$8 sps:$4 sm:$0xff]  }
 0x8b1   : > { %4781 = vmatpush1.bf16.msra.mxu1 %v11463_v18  ;;  %4822 = vmatpush1.bf16.msra.mxu0 %v11465_v19  ;;  %v3998_v18 = vld [vmem:[#allocation19 + $0x3f0] sm:$0xff]  ;;  %v3995_v19 = vld [vmem:[#allocation19 + $0x3d8] sm:$0xff] }
 0x8b2   : > { %4782 = vmatprep.subr.bf16.mxu1 %v11472_v1  ;;  %4823 = vmatprep.subr.bf16.mxu0 %v11474_v20  ;;  %v3999_v1 = vld [vmem:[#allocation19 + $0x3f8] sm:$0xff]  ;;  %v11511_v20 = vcombine.low %v3986_v61, %v3990_v9  ;;  %v11520_v24 = vcombine.high %v3994_v16, %v3998_v18  ;;  %v11519_v51 = vcombine.low %v3994_v16, %v3998_v18  ;;  %v13051_v61 = vld [vmem:[#allocation21 + $0xe4] ss:$8 sps:$4 sm:$0xff]   ;;  %v13049_v9 = vld [vmem:[#allocation21 + $0xe0] ss:$8 sps:$4 sm:$0xff]  }
 0x8b3   : > { %v11522_v25 = vcombine.high %v3995_v19, %v3999_v1 }
 0x8b5   : > { %4783 = vmatpush1.bf16.msra.mxu1 %v11471_v17  ;;  %4824 = vmatpush1.bf16.msra.mxu0 %v11473_v10  ;;  %v11521_v17 = vcombine.low %v3995_v19, %v3999_v1  ;;  %v13009_v10 = vld [vmem:[#allocation21 + $0x4] ss:$8 sps:$4 sm:$0xff]  }
 0x8b6   : > { %4784 = vmatprep.subr.bf16.mxu1 %v11480_v33  ;;  %4825 = vmatprep.subr.bf16.mxu0 %v11482_v55  ;;  %v13007_v33 = vld [vmem:[#allocation21] ss:$8 sps:$4 sm:$0xff]   ;;  %v13012_v55 = vld [vmem:[#allocation21 + $0x14] ss:$8 sps:$4 sm:$0xff]  }
 0x8b9   : > { %4785 = vmatpush1.bf16.msra.mxu1 %v11479_v21  ;;  %4826 = vmatpush1.bf16.msra.mxu0 %v11481_v38  ;;  %v13016_v21 = vld [vmem:[#allocation21 + $0x30] ss:$8 sps:$4 sm:$0xff]   ;;  %v13021_v38 = vld [vmem:[#allocation21 + $0x44] ss:$8 sps:$4 sm:$0xff]  }
 0x8ba   : > { %4786 = vmatprep.subr.bf16.mxu1 %v11488_v39  ;;  %4827 = vmatprep.subr.bf16.mxu0 %v11490_v40  ;;  %v13019_v39 = vld [vmem:[#allocation21 + $0x40] ss:$8 sps:$4 sm:$0xff]   ;;  %v13024_v40 = vld [vmem:[#allocation21 + $0x54] ss:$8 sps:$4 sm:$0xff]  }
 0x8bd   : > { %4787 = vmatpush1.bf16.msra.mxu1 %v11487_v60  ;;  %4828 = vmatpush1.bf16.msra.mxu0 %v11489_v36  ;;  %v13033_v60 = vld [vmem:[#allocation21 + $0x84] ss:$8 sps:$4 sm:$0xff]   ;;  %v13031_v36 = vld [vmem:[#allocation21 + $0x80] ss:$8 sps:$4 sm:$0xff]  }
 0x8be   : > { %4788 = vmatprep.subr.bf16.mxu1 %v11496_v5  ;;  %4829 = vmatprep.subr.bf16.mxu0 %v11498_v30  ;;  %v13036_v5 = vld [vmem:[#allocation21 + $0x94] ss:$8 sps:$4 sm:$0xff]   ;;  %v13034_v30 = vld [vmem:[#allocation21 + $0x90] ss:$8 sps:$4 sm:$0xff]  }
 0x8c1   : > { %4789 = vmatpush1.bf16.msra.mxu1 %v11495_v6  ;;  %4830 = vmatpush1.bf16.msra.mxu0 %v11497_v22  ;;  %v13045_v6 = vld [vmem:[#allocation21 + $0xc4] ss:$8 sps:$4 sm:$0xff]   ;;  %v13043_v22 = vld [vmem:[#allocation21 + $0xc0] ss:$8 sps:$4 sm:$0xff]  }
 0x8c2   : > { %4790 = vmatprep.subr.bf16.mxu1 %v11504_v31  ;;  %4831 = vmatprep.subr.bf16.mxu0 %v11506_v7  ;;  %v13048_v31 = vld [vmem:[#allocation21 + $0xd4] ss:$8 sps:$4 sm:$0xff]   ;;  %v13046_v7 = vld [vmem:[#allocation21 + $0xd0] ss:$8 sps:$4 sm:$0xff]  }
 0x8c5   : > { %4791 = vmatpush1.bf16.msra.mxu1 %v11503_v34  ;;  %4832 = vmatpush1.bf16.msra.mxu0 %v11505_v35  ;;  %v13057_v34 = vld [vmem:[#allocation21 + $0x104] ss:$8 sps:$4 sm:$0xff]   ;;  %v15062_v35 = vld [vmem:[%s15711_s17] sm:$0xff] }
 0x8c6   : > { %4792 = vmatprep.subr.bf16.mxu1 %v11512_v15  ;;  %4833 = vmatprep.subr.bf16.mxu0 %v11514_v32  ;;  %v4005_v15 = vrot.slane %v15062_v35, %v14605_v49  ;;  %v4009_v32 = vrot.slane %v15062_v35, %v14602_v48  ;;  %v4017_v16 = vrot.slane %v15062_v35, %v14664_v14 }
 0x8c9   : > { %4793 = vmatpush1.bf16.msra.mxu1 %v11511_v20  ;;  %4834 = vmatpush1.bf16.msra.mxu0 %v11513_v23 }
 0x8ca   : > { %4794 = vmatprep.subr.bf16.mxu1 %v11520_v24  ;;  %4835 = vmatprep.subr.bf16.mxu0 %v11522_v25 }
 0x8cd   : > { %4795 = vmatpush1.bf16.msra.mxu1 %v11519_v51  ;;  %4836 = vmatpush1.bf16.msra.mxu0 %v11521_v17 }
 0x8ce   : > { %5674 = vmatprep.subr.bf16.mxu1 %v13009_v10 }
 0x8d0   : > { %4797 = vmatmul.mubr.bf16.vlgmr.msra.gmra.mrb[72].mxu1 %v15053_v12  ;;  %4838 = vmatmul.mubr.bf16.vlgmr.msra.gmra.mrb[60].mxu0 %v15053_v12  ;;  %v13027_v12 = vld [vmem:[#allocation21 + $0x64] ss:$8 sps:$4 sm:$0xff]  }
 0x8d1   : > { %5675 = vmatpush1.bf16.msra.mxu1 %v13007_v33 }
 0x8d2   : > { %5676 = vmatprep.subr.bf16.mxu1 %v13012_v55 }
 0x8d5   : > { %5677 = vmatpush1.bf16.msra.mxu1 %v13010_v26 }
 0x8d6   : > { %5678 = vmatprep.subr.bf16.mxu1 %v13015_v2 }
 0x8d9   : > { %5679 = vmatpush1.bf16.msra.mxu1 %v13013_v3 }
 0x8da   : > { %5680 = vmatprep.subr.bf16.mxu1 %v13018_v37 }
 0x8dd   : > { %5681 = vmatpush1.bf16.msra.mxu1 %v13016_v21 }
 0x8de   : > { %5682 = vmatprep.subr.bf16.mxu1 %v13021_v38 }
 0x8e1   : > { %5683 = vmatpush1.bf16.msra.mxu1 %v13019_v39 }
 0x8e2   : > { %5684 = vmatprep.subr.bf16.mxu1 %v13024_v40 }
 0x8e5   : > { %5685 = vmatpush1.bf16.msra.mxu1 %v13022_v41 }
 0x8e6   : > { %5686 = vmatprep.subr.bf16.mxu1 %v13027_v12 }
 0x8e9   : > { %5687 = vmatpush1.bf16.msra.mxu1 %v13025_v44 }
 0x8ea   : > { %5688 = vmatprep.subr.bf16.mxu1 %v13030_v8 }
 0x8ed   : > { %5689 = vmatpush1.bf16.msra.mxu1 %v13028_v59 }
 0x8ee   : > { %5690 = vmatprep.subr.bf16.mxu1 %v13033_v60 }
 0x8f1   : > { %5691 = vmatpush1.bf16.msra.mxu1 %v13031_v36 }
 0x8f2   : > { %5692 = vmatprep.subr.bf16.mxu1 %v13036_v5  ;;  %v13055_v5 = vld [vmem:[#allocation21 + $0x100] ss:$8 sps:$4 sm:$0xff]  }
 0x8f5   : > { %5693 = vmatpush1.bf16.msra.mxu1 %v13034_v30 }
 0x8f6   : > { %5694 = vmatprep.subr.bf16.mxu1 %v13039_v43  ;;  %v13060_v43 = vld [vmem:[#allocation21 + $0x114] ss:$8 sps:$4 sm:$0xff]  }
 0x8f9   : > { %5695 = vmatpush1.bf16.msra.mxu1 %v13037_v63 }
 0x8fa   : > { %5696 = vmatprep.subr.bf16.mxu1 %v13042_v62  ;;  %v13058_v62 = vld [vmem:[#allocation21 + $0x110] ss:$8 sps:$4 sm:$0xff]  }
 0x8fd   : > { %5697 = vmatpush1.bf16.msra.mxu1 %v13040_v4  ;;  %v13063_v4 = vld [vmem:[#allocation21 + $0x124] ss:$8 sps:$4 sm:$0xff]  }
 0x8fe   : > { %5698 = vmatprep.subr.bf16.mxu1 %v13045_v6  ;;  %v13061_v6 = vld [vmem:[#allocation21 + $0x120] ss:$8 sps:$4 sm:$0xff]  }
 0x901   : > { %5699 = vmatpush1.bf16.msra.mxu1 %v13043_v22  ;;  %v13066_v22 = vld [vmem:[#allocation21 + $0x134] ss:$8 sps:$4 sm:$0xff]  }
 0x902   : > { %5700 = vmatprep.subr.bf16.mxu1 %v13048_v31  ;;  %v13064_v31 = vld [vmem:[#allocation21 + $0x130] ss:$8 sps:$4 sm:$0xff]  }
 0x905   : > { %5701 = vmatpush1.bf16.msra.mxu1 %v13046_v7  ;;  %v13069_v7 = vld [vmem:[#allocation21 + $0x144] ss:$8 sps:$4 sm:$0xff]  }
 0x906   : > { %5702 = vmatprep.subr.bf16.mxu1 %v13051_v61  ;;  %v13067_v61 = vld [vmem:[#allocation21 + $0x140] ss:$8 sps:$4 sm:$0xff]  }
 0x909   : > { %5703 = vmatpush1.bf16.msra.mxu1 %v13049_v9  ;;  %v13072_v9 = vld [vmem:[#allocation21 + $0x154] ss:$8 sps:$4 sm:$0xff]  }
 0x90a   : > { %5704 = vmatprep.subr.bf16.mxu1 %v13054_v0  ;;  %v13070_v0 = vld [vmem:[#allocation21 + $0x150] ss:$8 sps:$4 sm:$0xff]  }
 0x90d   : > { %5705 = vmatpush1.bf16.msra.mxu1 %v13052_v11  ;;  %v13075_v11 = vld [vmem:[#allocation21 + $0x164] ss:$8 sps:$4 sm:$0xff]  }
 0x90e   : > { %5715 = vmatprep.subr.bf16.mxu1 %v13057_v34  ;;  %v13073_v34 = vld [vmem:[#allocation21 + $0x160] ss:$8 sps:$4 sm:$0xff]  }
 0x963   : > { %v4716_v18 = vpop.f32.mrb[68].mxu1  ;;  %v15070_v19 = vpop.f32.mrb[56].mxu0 }
 0x964   : > { %v4717_v1 = vadd.f32 %v4716_v18, %v4005_v15  ;;  %v4718_v20 = vpop.f32.mrb[69].mxu1  ;;  %v4759_v23 = vpop.f32.mrb[57].mxu0  ;;  %v13078_v15 = vld [vmem:[#allocation21 + $0x174] ss:$8 sps:$4 sm:$0xff]   ;;  %v4013_v18 = vrot.slane %v15062_v35, %v14661_v13 }
 0x965   : > { %v4719_v24 = vadd.f32 %v4718_v20, %v4009_v32  ;;  %v4760_v25 = vadd.f32 %v4759_v23, %v4017_v16  ;;  %v4720_v51 = vpop.f32.mrb[70].mxu1  ;;  %v4761_v17 = vpop.f32.mrb[58].mxu0  ;;  %v13076_v32 = vld [vmem:[#allocation21 + $0x170] ss:$8 sps:$4 sm:$0xff]   ;;  %v13081_v16 = vld [vmem:[#allocation21 + $0x184] ss:$8 sps:$4 sm:$0xff]  }
 0x966   : > { %v4854_v10 = vmul.f32 0.70710677, %v4717_v1  ;;  %v4721_v26 = vpop.f32.mrb[71].mxu1  ;;  %v4762_v2 = vpop.f32.mrb[59].mxu0  ;;  %v4846_v38 = vmul.f32 0.5, %v4717_v1  ;;  %v4758_v23 = vadd.f32 %v15070_v19, %v4013_v18 }
 0x967   : > { %v4855_v33 = vmul.f32 0.70710677, %v4719_v24  ;;  %v4857_v55 = vmul.f32 0.70710677, %v4760_v25  ;;  %v4847_v40 = vmul.f32 0.5, %v4719_v24  ;;  %v4849_v44 = vmul.f32 0.5, %v4760_v25 }
 0x968   : > { %13721 = verf.f32 %v4854_v10  ;;  %v13079_v1 = vld [vmem:[#allocation21 + $0x180] ss:$8 sps:$4 sm:$0xff]   ;;  %v13084_v20 = vld [vmem:[#allocation21 + $0x194] ss:$8 sps:$4 sm:$0xff]   ;;  %v13082_v24 = vld [vmem:[#allocation21 + $0x190] ss:$8 sps:$4 sm:$0xff]   ;;  %v4025_v10 = vrot.slane %v15062_v35, %v14689_v28 }
 0x969   : > { %13723 = verf.f32 %v4855_v33  ;;  %v13087_v25 = vld [vmem:[#allocation21 + $0x1a4] ss:$8 sps:$4 sm:$0xff]   ;;  %v4856_v51 = vmul.f32 0.70710677, %v4758_v23  ;;  %v13085_v17 = vld [vmem:[#allocation21 + $0x1a0] ss:$8 sps:$4 sm:$0xff]  }
 0x96a   : > { %13725 = verf.f32 %v4857_v55  ;;  %v13090_v33 = vld [vmem:[#allocation21 + $0x1b4] ss:$8 sps:$4 sm:$0xff]  }
 0x96b   : > { %13727 = verf.f32 %v4856_v51  ;;  %v13114_v18 = vld [vmem:[#allocation21 + $0x234] ss:$8 sps:$4 sm:$0xff]   ;;  %v13123_v51 = vld [vmem:[#allocation21 + $0x264] ss:$8 sps:$4 sm:$0xff]  }
 0x972   : > { %v13722_v3 = vpop.eup %13721 }
 0x973   : > { %v4870_v37 = vadd.f32 1.0, %v13722_v3  ;;  %v13724_v21 = vpop.eup %13723 }
 0x974   : > { %v13726_v39 = vpop.eup %13725  ;;  %v4871_v41 = vadd.f32 1.0, %v13724_v21 }
 0x975   : > { %v4878_v12 = vmul.f32 %v4870_v37, %v4846_v38  ;;  %v4873_v8 = vadd.f32 1.0, %v13726_v39  ;;  %v13088_v38 = vld [vmem:[#allocation21 + $0x1b0] ss:$8 sps:$4 sm:$0xff]   ;;  %v13093_v39 = vld [vmem:[#allocation21 + $0x1c4] ss:$8 sps:$4 sm:$0xff]  }
 0x976   : > { %v4879_v59 = vmul.f32 %v4871_v41, %v4847_v40 }
 0x977   : > { %v4881_v60 = vmul.f32 %v4873_v8, %v4849_v44  ;;  %v4886_v30 = vpack.c.bf16 %v4878_v12, %v4878_v12  ;;  %v13091_v44 = vld [vmem:[#allocation21 + $0x1c0] ss:$8 sps:$4 sm:$0xff]   ;;  %v13096_v8 = vld [vmem:[#allocation21 + $0x1d4] ss:$8 sps:$4 sm:$0xff]  }
 0x978   : > { %v4887_v36 = vpack.c.bf16 %v4879_v59, %v4879_v59  ;;  %v13094_v59 = vld [vmem:[#allocation21 + $0x1d0] ss:$8 sps:$4 sm:$0xff]  }
 0x979   : > { %v4889_v63 = vpack.c.bf16 %v4881_v60, %v4881_v60  ;;  %v13099_v60 = vld [vmem:[#allocation21 + $0x1e4] ss:$8 sps:$4 sm:$0xff]  }
 0x97a   : > { %5706 = vmatprep.mubr.bf16.mxu1 %v4887_v36  ;;  %v13728_v36 = vpop.eup %13727 }
 0x97b   : > { %5707 = vmatmul.mubr.bf16.vlgmr.msra.gmra.mrb[76].mxu1 %v4886_v30  ;;  %v4872_v30 = vadd.f32 1.0, %v13728_v36  ;;  %v13136_v36 = vld [vmem:[#allocation21 + $0x2b0] ss:$8 sps:$4 sm:$0xff]  }
 0x97c   : > { %5716 = vmatpush1.bf16.msra.mxu1 %v13055_v5  ;;  %5747 = vmatprep.mubr.bf16.mxu1 %v4889_v63  ;;  %v13097_v5 = vld [vmem:[#allocation21 + $0x1e0] ss:$8 sps:$4 sm:$0xff]  }
 0x97d   : > { %5717 = vmatprep.subr.bf16.mxu1 %v13060_v43  ;;  %v13102_v43 = vld [vmem:[#allocation21 + $0x1f4] ss:$8 sps:$4 sm:$0xff]  }
 0x980   : > { %5718 = vmatpush1.bf16.msra.mxu1 %v13058_v62  ;;  %v4848_v62 = vmul.f32 0.5, %v4758_v23  ;;  %v13115_v23 = vld [vmem:[#allocation21 + $0x240] ss:$8 sps:$4 sm:$0xff]  }
 0x981   : > { %5719 = vmatprep.subr.bf16.mxu1 %v13063_v4 }
 0x984   : > { %5720 = vmatpush1.bf16.msra.mxu1 %v13061_v6 }
 0x985   : > { %5721 = vmatprep.subr.bf16.mxu1 %v13066_v22  ;;  %v13100_v22 = vld [vmem:[#allocation21 + $0x1f0] ss:$8 sps:$4 sm:$0xff]  }
 0x988   : > { %5722 = vmatpush1.bf16.msra.mxu1 %v13064_v31  ;;  %v4880_v31 = vmul.f32 %v4872_v30, %v4848_v62  ;;  %v13144_v30 = vld [vmem:[#allocation21 + $0x2d4] ss:$8 sps:$4 sm:$0xff]  }
 0x989   : > { %5723 = vmatprep.subr.bf16.mxu1 %v13069_v7  ;;  %v13105_v7 = vld [vmem:[#allocation21 + $0x204] ss:$8 sps:$4 sm:$0xff]  }
 0x98c   : > { %5724 = vmatpush1.bf16.msra.mxu1 %v13067_v61 }
 0x98d   : > { %5725 = vmatprep.subr.bf16.mxu1 %v13072_v9  ;;  %v13103_v9 = vld [vmem:[#allocation21 + $0x200] ss:$8 sps:$4 sm:$0xff]  }
 0x990   : > { %5726 = vmatpush1.bf16.msra.mxu1 %v13070_v0  ;;  %v4888_v0 = vpack.c.bf16 %v4880_v31, %v4880_v31 }
 0x991   : > { %5727 = vmatprep.subr.bf16.mxu1 %v13075_v11  ;;  %v13108_v11 = vld [vmem:[#allocation21 + $0x214] ss:$8 sps:$4 sm:$0xff]  }
 0x994   : > { %5728 = vmatpush1.bf16.msra.mxu1 %v13073_v34 }
 0x995   : > { %5729 = vmatprep.subr.bf16.mxu1 %v13078_v15  ;;  %v13106_v15 = vld [vmem:[#allocation21 + $0x210] ss:$8 sps:$4 sm:$0xff]  }
 0x998   : > { %5730 = vmatpush1.bf16.msra.mxu1 %v13076_v32  ;;  %v13111_v32 = vld [vmem:[#allocation21 + $0x224] ss:$8 sps:$4 sm:$0xff]  }
 0x999   : > { %5731 = vmatprep.subr.bf16.mxu1 %v13081_v16  ;;  %v13109_v16 = vld [vmem:[#allocation21 + $0x220] ss:$8 sps:$4 sm:$0xff]  }
 0x99c   : > { %5732 = vmatpush1.bf16.msra.mxu1 %v13079_v1  ;;  %v13112_v1 = vld [vmem:[#allocation21 + $0x230] ss:$8 sps:$4 sm:$0xff]  }
 0x99d   : > { %5733 = vmatprep.subr.bf16.mxu1 %v13084_v20  ;;  %v13117_v20 = vld [vmem:[#allocation21 + $0x244] ss:$8 sps:$4 sm:$0xff]  }
 0x9a0   : > { %5734 = vmatpush1.bf16.msra.mxu1 %v13082_v24  ;;  %v13120_v24 = vld [vmem:[#allocation21 + $0x254] ss:$8 sps:$4 sm:$0xff]  }
 0x9a1   : > { %5735 = vmatprep.subr.bf16.mxu1 %v13087_v25  ;;  %v13118_v25 = vld [vmem:[#allocation21 + $0x250] ss:$8 sps:$4 sm:$0xff]  }
 0x9a3   : > { %v15077_v55 = vpop.f32.mrb[72].mxu1  ;;  %v15079_v26 = vpop.f32.mrb[60].mxu0 }
 0x9a4   : > { %v4800_v2 = vpop.f32.mrb[73].mxu1  ;;  %v15081_v3 = vpop.f32.mrb[61].mxu0  ;;  %5736 = vmatpush1.bf16.msra.mxu1 %v13085_v17  ;;  %v13121_v17 = vld [vmem:[#allocation21 + $0x260] ss:$8 sps:$4 sm:$0xff]  }
 0x9a5   : > { %v4801_v19 = vadd.f32 %v4800_v2, %v4025_v10  ;;  %v4802_v37 = vpop.f32.mrb[74].mxu1  ;;  %v4843_v21 = vpop.f32.mrb[62].mxu0  ;;  %5737 = vmatprep.subr.bf16.mxu1 %v13090_v33  ;;  %v13126_v10 = vld [vmem:[#allocation21 + $0x274] ss:$8 sps:$4 sm:$0xff]   ;;  %v13124_v33 = vld [vmem:[#allocation21 + $0x270] ss:$8 sps:$4 sm:$0xff]  }
 0x9a6   : > { %v4803_v41 = vpop.f32.mrb[75].mxu1  ;;  %v4844_v12 = vpop.f32.mrb[63].mxu0  ;;  %v13129_v2 = vld [vmem:[#allocation21 + $0x284] ss:$8 sps:$4 sm:$0xff]   ;;  %v13127_v37 = vld [vmem:[#allocation21 + $0x280] ss:$8 sps:$4 sm:$0xff]   ;;  %v4033_v21 = vrot.slane %v15062_v35, %v14718_v54 }
 0x9a7   : > { %v4859_v40 = vmul.f32 0.70710677, %v4801_v19  ;;  %v4851_v4 = vmul.f32 0.5, %v4801_v19  ;;  %v4021_v19 = vrot.slane %v15062_v35, %v14686_v27  ;;  %v13135_v12 = vld [vmem:[#allocation21 + $0x2a4] ss:$8 sps:$4 sm:$0xff]  }
 0x9a8   : > { %5738 = vmatpush1.bf16.msra.mxu1 %v13088_v38  ;;  %v13132_v38 = vld [vmem:[#allocation21 + $0x294] ss:$8 sps:$4 sm:$0xff]   ;;  %v4842_v41 = vadd.f32 %v15081_v3, %v4033_v21  ;;  %v13142_v3 = vld [vmem:[#allocation21 + $0x2d0] ss:$8 sps:$4 sm:$0xff]  }
 0x9a9   : > { %13729 = verf.f32 %v4859_v40  ;;  %5739 = vmatprep.subr.bf16.mxu1 %v13093_v39  ;;  %v4799_v39 = vadd.f32 %v15077_v55, %v4021_v19  ;;  %v13130_v40 = vld [vmem:[#allocation21 + $0x290] ss:$8 sps:$4 sm:$0xff]   ;;  %v13139_v55 = vld [vmem:[#allocation21 + $0x2c0] ss:$8 sps:$4 sm:$0xff]  }
 0x9aa   : > { %v13169_v19 = vld [vmem:[#allocation21 + $0x360] ss:$8 sps:$4 sm:$0xff]   ;;  %v13172_v21 = vld [vmem:[#allocation21 + $0x370] ss:$8 sps:$4 sm:$0xff]  }
 0x9ac   : > { %5740 = vmatpush1.bf16.msra.mxu1 %v13091_v44  ;;  %v4858_v44 = vmul.f32 0.70710677, %v4799_v39 }
 0x9ad   : > { %5741 = vmatprep.subr.bf16.mxu1 %v13096_v8  ;;  %v13133_v8 = vld [vmem:[#allocation21 + $0x2a0] ss:$8 sps:$4 sm:$0xff]  }
 0x9ae   : > { %13731 = verf.f32 %v4858_v44  ;;  %v13178_v44 = vld [vmem:[#allocation21 + $0x390] ss:$8 sps:$4 sm:$0xff]  }
 0x9b0   : > { %5742 = vmatpush1.bf16.msra.mxu1 %v13094_v59  ;;  %v4861_v59 = vmul.f32 0.70710677, %v4842_v41 }
 0x9b1   : > { %5743 = vmatprep.subr.bf16.mxu1 %v13099_v60  ;;  %v13138_v60 = vld [vmem:[#allocation21 + $0x2b4] ss:$8 sps:$4 sm:$0xff]  }
 0x9b2   : > { %13733 = verf.f32 %v4861_v59 }
 0x9b3   : > { %v13730_v63 = vpop.eup %13729 }
 0x9b4   : > { %v4875_v6 = vadd.f32 1.0, %v13730_v63  ;;  %5744 = vmatpush1.bf16.msra.mxu1 %v13097_v5  ;;  %v13141_v5 = vld [vmem:[#allocation21 + $0x2c4] ss:$8 sps:$4 sm:$0xff]  }
 0x9b5   : > { %5745 = vmatprep.subr.bf16.mxu1 %v13102_v43  ;;  %v13147_v43 = vld [vmem:[#allocation21 + $0x2e4] ss:$8 sps:$4 sm:$0xff]  }
 0x9b6   : > { %v4883_v61 = vmul.f32 %v4875_v6, %v4851_v4  ;;  %v13145_v4 = vld [vmem:[#allocation21 + $0x2e0] ss:$8 sps:$4 sm:$0xff]  }
 0x9b8   : > { %5746 = vmatpush1.bf16.msra.mxu1 %v13100_v22  ;;  %v4891_v34 = vpack.c.bf16 %v4883_v61, %v4883_v61  ;;  %v13732_v63 = vpop.eup %13731  ;;  %v13150_v22 = vld [vmem:[#allocation21 + $0x2f4] ss:$8 sps:$4 sm:$0xff]   ;;  %v4853_v61 = vmul.f32 0.5, %v4842_v41 }
 0x9b9   : > { %5756 = vmatprep.subr.bf16.mxu1 %v13105_v7  ;;  %v4874_v6 = vadd.f32 1.0, %v13732_v63  ;;  %v4850_v7 = vmul.f32 0.5, %v4799_v39  ;;  %v4029_v39 = vrot.slane %v15062_v35, %v14715_v46  ;;  %v13180_v41 = vld [vmem:[#allocation21 + $0x394] ss:$8 sps:$4 sm:$0xff]   ;;  %v13189_v35 = vld [vmem:[#allocation21 + $0x3c4] ss:$8 sps:$4 sm:$0xff]  }
 0x9ba   : > { %v13193_v63 = vld [vmem:[#allocation21 + $0x3e0] ss:$8 sps:$4 sm:$0xff]  }
 0x9bb   : > { %5748 = vmatmul.mubr.bf16.vlgmr.msra.gmra.mrb[76].mxu1 %v4888_v0  ;;  %v4882_v0 = vmul.f32 %v4874_v6, %v4850_v7 }
 0x9bc   : > { %5757 = vmatpush1.bf16.msra.mxu1 %v13103_v9  ;;  %5788 = vmatprep.mubr.bf16.mxu1 %v4891_v34  ;;  %v13734_v62 = vpop.eup %13733  ;;  %v13148_v9 = vld [vmem:[#allocation21 + $0x2f0] ss:$8 sps:$4 sm:$0xff]  }
 0x9bd   : > { %5758 = vmatprep.subr.bf16.mxu1 %v13108_v11  ;;  %v4877_v31 = vadd.f32 1.0, %v13734_v62  ;;  %v13153_v11 = vld [vmem:[#allocation21 + $0x304] ss:$8 sps:$4 sm:$0xff]  }
 0x9bf   : > { %v4885_v34 = vmul.f32 %v4877_v31, %v4853_v61  ;;  %v5022_v61 = vld [vmem:[%s15712_s19] sm:$0x3] }
 0x9c0   : > { %5759 = vmatpush1.bf16.msra.mxu1 %v13106_v15  ;;  %v13151_v15 = vld [vmem:[#allocation21 + $0x300] ss:$8 sps:$4 sm:$0xff]  }
 0x9c1   : > { %5760 = vmatprep.subr.bf16.mxu1 %v13111_v32  ;;  %v4890_v32 = vpack.c.bf16 %v4882_v0, %v4882_v0  ;;  %v5031_v0 = vrot.slane %v5022_v61, %v14602_v48 }
 0x9c4   : > { %5761 = vmatpush1.bf16.msra.mxu1 %v13109_v16  ;;  %v13156_v16 = vld [vmem:[#allocation21 + $0x314] ss:$8 sps:$4 sm:$0xff]  }
 0x9c5   : > { %5762 = vmatprep.subr.bf16.mxu1 %v13114_v18  ;;  %v4893_v18 = vpack.c.bf16 %v4885_v34, %v4885_v34 }
 0x9c8   : > { %5763 = vmatpush1.bf16.msra.mxu1 %v13112_v1  ;;  %v13154_v1 = vld [vmem:[#allocation21 + $0x310] ss:$8 sps:$4 sm:$0xff]  }
 0x9c9   : > { %5764 = vmatprep.subr.bf16.mxu1 %v13117_v20  ;;  %v13159_v20 = vld [vmem:[#allocation21 + $0x324] ss:$8 sps:$4 sm:$0xff]  }
 0x9cc   : > { %5765 = vmatpush1.bf16.msra.mxu1 %v13115_v23  ;;  %v13157_v23 = vld [vmem:[#allocation21 + $0x320] ss:$8 sps:$4 sm:$0xff]  }
 0x9cd   : > { %5766 = vmatprep.subr.bf16.mxu1 %v13120_v24  ;;  %v13162_v24 = vld [vmem:[#allocation21 + $0x334] ss:$8 sps:$4 sm:$0xff]  }
 0x9d0   : > { %5767 = vmatpush1.bf16.msra.mxu1 %v13118_v25  ;;  %v13160_v25 = vld [vmem:[#allocation21 + $0x330] ss:$8 sps:$4 sm:$0xff]  }
 0x9d1   : > { %5768 = vmatprep.subr.bf16.mxu1 %v13123_v51  ;;  %v13165_v51 = vld [vmem:[#allocation21 + $0x344] ss:$8 sps:$4 sm:$0xff]  }
 0x9d4   : > { %5769 = vmatpush1.bf16.msra.mxu1 %v13121_v17  ;;  %v13163_v17 = vld [vmem:[#allocation21 + $0x340] ss:$8 sps:$4 sm:$0xff]  }
 0x9d5   : > { %5770 = vmatprep.subr.bf16.mxu1 %v13126_v10  ;;  %v13168_v10 = vld [vmem:[#allocation21 + $0x354] ss:$8 sps:$4 sm:$0xff]  }
 0x9d8   : > { %5771 = vmatpush1.bf16.msra.mxu1 %v13124_v33  ;;  %v13166_v33 = vld [vmem:[#allocation21 + $0x350] ss:$8 sps:$4 sm:$0xff]  }
 0x9d9   : > { %5772 = vmatprep.subr.bf16.mxu1 %v13129_v2  ;;  %v13171_v2 = vld [vmem:[#allocation21 + $0x364] ss:$8 sps:$4 sm:$0xff]  }
 0x9dc   : > { %5773 = vmatpush1.bf16.msra.mxu1 %v13127_v37  ;;  %v13174_v37 = vld [vmem:[#allocation21 + $0x374] ss:$8 sps:$4 sm:$0xff]  }
 0x9dd   : > { %5774 = vmatprep.subr.bf16.mxu1 %v13132_v38  ;;  %v13177_v38 = vld [vmem:[#allocation21 + $0x384] ss:$8 sps:$4 sm:$0xff]  }
 0x9e0   : > { %5775 = vmatpush1.bf16.msra.mxu1 %v13130_v40  ;;  %v13175_v40 = vld [vmem:[#allocation21 + $0x380] ss:$8 sps:$4 sm:$0xff]  }
 0x9e1   : > { %5776 = vmatprep.subr.bf16.mxu1 %v13135_v12  ;;  %v4840_v12 = vadd.f32 %v15079_v26, %v4029_v39  ;;  %v13190_v26 = vld [vmem:[#allocation21 + $0x3d0] ss:$8 sps:$4 sm:$0xff]  }
 0x9e3   : > { %v4860_v59 = vmul.f32 0.70710677, %v4840_v12  ;;  %v4852_v6 = vmul.f32 0.5, %v4840_v12 }
 0x9e4   : > { %5777 = vmatpush1.bf16.msra.mxu1 %v13133_v8  ;;  %v13183_v8 = vld [vmem:[#allocation21 + $0x3a4] ss:$8 sps:$4 sm:$0xff]  }
 0x9e5   : > { %5778 = vmatprep.subr.bf16.mxu1 %v13138_v60  ;;  %v13181_v60 = vld [vmem:[#allocation21 + $0x3a0] ss:$8 sps:$4 sm:$0xff]   ;;  %13735 = verf.f32 %v4860_v59 }
 0x9e8   : > { %5779 = vmatpush1.bf16.msra.mxu1 %v13136_v36  ;;  %v13186_v36 = vld [vmem:[#allocation21 + $0x3b4] ss:$8 sps:$4 sm:$0xff]  }
 0x9e9   : > { %5780 = vmatprep.subr.bf16.mxu1 %v13141_v5  ;;  %v13184_v5 = vld [vmem:[#allocation21 + $0x3b0] ss:$8 sps:$4 sm:$0xff]  }
 0x9ec   : > { %5781 = vmatpush1.bf16.msra.mxu1 %v13139_v55  ;;  %v13187_v55 = vld [vmem:[#allocation21 + $0x3c0] ss:$8 sps:$4 sm:$0xff]  }
 0x9ed   : > { %5782 = vmatprep.subr.bf16.mxu1 %v13144_v30  ;;  %v13192_v30 = vld [vmem:[#allocation21 + $0x3d4] ss:$8 sps:$4 sm:$0xff]  }
 0x9f0   : > { %5783 = vmatpush1.bf16.msra.mxu1 %v13142_v3  ;;  %v13195_v3 = vld [vmem:[#allocation21 + $0x3e4] ss:$8 sps:$4 sm:$0xff]  }
 0x9f1   : > { %5784 = vmatprep.subr.bf16.mxu1 %v13147_v43  ;;  %v13736_v43 = vpop.eup %13735 }
 0x9f2   : > { %v4876_v62 = vadd.f32 1.0, %v13736_v43  ;;  %v13204_v43 = vld [vmem:[#allocation13 + $0x4c] ss:$36 sps:$4 sm:$0xff]  }
 0x9f4   : > { %5785 = vmatpush1.bf16.msra.mxu1 %v13145_v4  ;;  %v13198_v4 = vld [vmem:[#allocation21 + $0x3f4] ss:$8 sps:$4 sm:$0xff]   ;;  %v4884_v31 = vmul.f32 %v4876_v62, %v4852_v6  ;;  %v13207_v62 = vld [vmem:[#allocation13 + $0x94] ss:$36 sps:$4 sm:$0xff]  }
 0x9f5   : > { %5786 = vmatprep.subr.bf16.mxu1 %v13150_v22  ;;  %v13196_v22 = vld [vmem:[#allocation21 + $0x3f0] ss:$8 sps:$4 sm:$0xff]  }
 0x9f6   : > { %v4892_v7 = vpack.c.bf16 %v4884_v31, %v4884_v31  ;;  %v13227_v6 = vld [vmem:[#allocation13 + $0x20] ss:$36 sps:$4 sm:$0xff]   ;;  %v13232_v31 = vld [vmem:[#allocation13 + $0x68] ss:$36 sps:$4 sm:$0xff]  }
 0x9f8   : > { %5787 = vmatpush1.bf16.msra.mxu1 %v13148_v9  ;;  %v5027_v9 = vrot.slane %v5022_v61, %v14605_v49  ;;  %v13213_v61 = vld [vmem:[#allocation13 + $0x124] ss:$36 sps:$4 sm:$0xff]  }
 0x9f9   : > { %5797 = vmatprep.subr.bf16.mxu1 %v13153_v11 }
 0x9fb   : > { %5789 = vmatmul.mubr.bf16.vlgmr.msra.gmra.mrb[76].mxu1 %v4890_v32 }
 0x9fc   : > { %5798 = vmatpush1.bf16.msra.mxu1 %v13151_v15  ;;  %5829 = vmatprep.mubr.bf16.mxu1 %v4893_v18 }
 0x9fd   : > { %5799 = vmatprep.subr.bf16.mxu1 %v13156_v16 }
 0xa00   : > { %5800 = vmatpush1.bf16.msra.mxu1 %v13154_v1 }
 0xa01   : > { %5801 = vmatprep.subr.bf16.mxu1 %v13159_v20 }
 0xa04   : > { %5802 = vmatpush1.bf16.msra.mxu1 %v13157_v23 }
 0xa05   : > { %5803 = vmatprep.subr.bf16.mxu1 %v13162_v24 }
 0xa08   : > { %5804 = vmatpush1.bf16.msra.mxu1 %v13160_v25 }
 0xa09   : > { %5805 = vmatprep.subr.bf16.mxu1 %v13165_v51 }
 0xa0c   : > { %5806 = vmatpush1.bf16.msra.mxu1 %v13163_v17 }
 0xa0d   : > { %5807 = vmatprep.subr.bf16.mxu1 %v13168_v10 }
 0xa10   : > { %5808 = vmatpush1.bf16.msra.mxu1 %v13166_v33 }
 0xa11   : > { %5809 = vmatprep.subr.bf16.mxu1 %v13171_v2 }
 0xa14   : > { %5810 = vmatpush1.bf16.msra.mxu1 %v13169_v19 }
 0xa15   : > { %5811 = vmatprep.subr.bf16.mxu1 %v13174_v37  ;;  %v682_v37 = vld [vmem:[%s15713_s28] sm:$0x3]  ;;  %s676_s28 = scalar_lea.vmem [#allocation22], %s11168_s20 }
 0xa16   : > { %v15107_v39 = vrot.slane %v682_v37, %v14602_v48  ;;  %s11007_s21 = sshll.u32 %s676_s28, 4  ;;  %s15601_s21 = int_to_ptr.vmem [resolvable:$true] %s11007_s21 }
 0xa17   : > { %s14063_s20 = scalar_lea.vmem %s15601_s21, 256 }
 0xa18   : > { %5812 = vmatpush1.bf16.msra.mxu1 %v13172_v21  ;;  %v683_v21 = vld [vmem:[%s15714_s30] sm:$0x3]  ;;  %p14064_p10 = scmp.ne.s32.totalorder %s15601_s21, %s14063_s20 }
 0xa19   : > { %5813 = vmatprep.subr.bf16.mxu1 %v13177_v38  ;;  %v15104_v38 = vrot.slane %v682_v37, %v14605_v49 }
 0xa1a   : > { %p14065_p11 = pnand %p14064_p10, %p15716_p1 }
 0xa1c   : > { %5814 = vmatpush1.bf16.msra.mxu1 %v13175_v40  ;;  %p14066_p12 = pneg %p14065_p11 }
 0xa1d   : > { %5815 = vmatprep.subr.bf16.mxu1 %v13180_v41 }
 0xa20   : > { %5816 = vmatpush1.bf16.msra.mxu1 %v13178_v44  ;;  %v15110_v44 = vrot.slane %v683_v21, %v14605_v49 }
 0xa21   : > { %5817 = vmatprep.subr.bf16.mxu1 %v13183_v8  ;;  %v15113_v8 = vrot.slane %v683_v21, %v14602_v48  ;;  %v13236_v21 = vld [vmem:[#allocation13 + $0x2f0] ss:$36 sps:$4 sm:$0xff]  }
 0xa24   : > { %5818 = vmatpush1.bf16.msra.mxu1 %v13181_v60 }
 0xa25   : > { %5819 = vmatprep.subr.bf16.mxu1 %v13186_v36 }
 0xa28   : > { %5820 = vmatpush1.bf16.msra.mxu1 %v13184_v5 }
 0xa29   : > { %5821 = vmatprep.subr.bf16.mxu1 %v13189_v35 }
 0xa2c   : > { %5822 = vmatpush1.bf16.msra.mxu1 %v13187_v55 }
 0xa2d   : > { %5823 = vmatprep.subr.bf16.mxu1 %v13192_v30 }
 0xa30   : > { %5824 = vmatpush1.bf16.msra.mxu1 %v13190_v26  ;;  %v13199_v26 = vld [vmem:[#allocation13] ss:$36 sps:$4 sm:$0xff]  }
 0xa31   : > { %5825 = vmatprep.subr.bf16.mxu1 %v13195_v3  ;;  %v13201_v3 = vld [vmem:[#allocation13 + $0x4] ss:$36 sps:$4 sm:$0xff]  }
 0xa32   : > { %6849 = vmatprep.subr.bf16.mxu0 %v13201_v3  ;;  %v13250_v3 = vld [vmem:[#allocation13 + $0x3ac] ss:$36 sps:$4 sm:$0xff]  }
 0xa33   : > { %6850 = vmatpush1.bf16.msra.mxu0 %v13199_v26  ;;  %v13247_v26 = vld [vmem:[#allocation13 + $0x140] ss:$36 sps:$4 sm:$0xff]  }
 0xa34   : > { %5826 = vmatpush1.bf16.msra.mxu1 %v13193_v63  ;;  %v13202_v63 = vld [vmem:[#allocation13 + $0x48] ss:$36 sps:$4 sm:$0xff]   ;;  %6851 = vmatprep.subr.bf16.mxu0 %v13204_v43 }
 0xa35   : > { %5827 = vmatprep.subr.bf16.mxu1 %v13198_v4  ;;  %v13226_v4 = vld [vmem:[#allocation13 + $0x260] ss:$36 sps:$4 sm:$0xff]   ;;  %v13248_v43 = vld [vmem:[#allocation13 + $0x3a8] ss:$36 sps:$4 sm:$0xff]  }
 0xa37   : > { %6852 = vmatpush1.bf16.msra.mxu0 %v13202_v63  ;;  %v13251_v63 = vld [vmem:[#allocation13 + $0x3c8] ss:$36 sps:$4 sm:$0xff]  }
 0xa38   : > { %5828 = vmatpush1.bf16.msra.mxu1 %v13196_v22  ;;  %v13231_v22 = vld [vmem:[#allocation13 + $0x2a8] ss:$36 sps:$4 sm:$0xff]   ;;  %6853 = vmatprep.subr.bf16.mxu0 %v13207_v62 }
 0xa39   : > { %12201 = vmatprep.subr.bf16.mxu1 %v13226_v4  ;;  %v13252_v62 = vld [vmem:[#allocation13 + $0x188] ss:$36 sps:$4 sm:$0xff]   ;;  %v13255_v4 = vld [vmem:[#allocation13 + $0x3f4] ss:$36 sps:$4 sm:$0xff]  }
 0xa3b   : > { %5830 = vmatmul.mubr.bf16.vlgmr.msra.gmra.mrb[76].mxu1 %v4892_v7  ;;  %v13208_v7 = vld [vmem:[#allocation13 + $0xd8] ss:$36 sps:$4 sm:$0xff]  }
 0xa3c   : > { %12202 = vmatpush3.bf16.msra.mxu1 %v13227_v6  ;;  %v13253_v6 = vld [vmem:[#allocation13 + $0x3f0] ss:$36 sps:$4 sm:$0xff]  }
 0xa3d   : > { %12203 = vmatprep.subr.bf16.mxu1 %v13231_v22  ;;  %v13257_v22 = vld [vmem:[#allocation13 + $0x1d0] ss:$36 sps:$4 sm:$0xff]  }
 0xa40   : > { %12204 = vmatpush3.bf16.msra.mxu1 %v13232_v31  ;;  %v13261_v31 = vld [vmem:[#allocation13 + $0x458] ss:$36 sps:$4 sm:$0xff]  }
 0xa41   : > { %12205 = vmatprep.subr.bf16.mxu1 %v13236_v21  ;;  %v13283_v21 = vld [vmem:[#allocation13 + $0x1bc] ss:$36 sps:$4 sm:$0xff]  }
 0xb0e   : > { %v5831_v11 = vpop.f32.mrb[76].mxu1 }
 0xb0f   : > { %v12559_v34 = vadd.f32 %v5831_v11, %v5027_v9  ;;  %v5833_v15 = vpop.f32.mrb[77].mxu1  ;;  %v13211_v9 = vld [vmem:[#allocation13 + $0x120] ss:$36 sps:$4 sm:$0xff]   ;;  %v13214_v11 = vld [vmem:[#allocation13 + $0x168] ss:$36 sps:$4 sm:$0xff]  }
 0xb10   : > { %v12560_v32 = vadd.f32 %v5833_v15, %v5031_v0  ;;  %v5835_v16 = vpop.f32.mrb[78].mxu1  ;;  %v13216_v0 = vld [vmem:[#allocation13 + $0x16c] ss:$36 sps:$4 sm:$0xff]  }
 0xb11   : > { %v5836_v18 = vpop.f32.mrb[79].mxu1  ;;  %v13217_v15 = vld [vmem:[#allocation13 + $0x1b0] ss:$36 sps:$4 sm:$0xff]   ;;  %v13220_v16 = vld [vmem:[#allocation13 + $0x1f8] ss:$36 sps:$4 sm:$0xff]  }
 0xb12   : > { %v5838_v1 = vadd.f32 %v12560_v32, %v12559_v34  ;;  %v13225_v18 = vld [vmem:[#allocation13 + $0x244] ss:$36 sps:$4 sm:$0xff]  }
 0xb14   : > { %5839 = vadd.xlane.f32.xlu1 %v5838_v1  ;;  %v13223_v1 = vld [vmem:[#allocation13 + $0x240] ss:$36 sps:$4 sm:$0xff]  }
 0xba1   : > { %v5840_v20 = vpop.xlane.xlu1 %5839 }
 0xba2   : > { %v5841_v23 = vmul.f32 0.00390625, %v5840_v20  ;;  %v13230_v20 = vld [vmem:[#allocation13 + $0x28c] ss:$36 sps:$4 sm:$0xff]  }
 0xba4   : > { %v5842_v24 = vsub.f32 %v12559_v34, %v5841_v23  ;;  %v5843_v25 = vsub.f32 %v12560_v32, %v5841_v23  ;;  %v13219_v34 = vld [vmem:[#allocation13 + $0x1b4] ss:$36 sps:$4 sm:$0xff]   ;;  %v13222_v32 = vld [vmem:[#allocation13 + $0x1fc] ss:$36 sps:$4 sm:$0xff]   ;;  %v13228_v23 = vld [vmem:[#allocation13 + $0x288] ss:$36 sps:$4 sm:$0xff]  }
 0xba6   : > { %v5844_v51 = vmul.f32 %v5842_v24, %v5842_v24  ;;  %v5845_v17 = vmul.f32 %v5843_v25, %v5843_v25 }
 0xba8   : > { %v5846_v10 = vadd.f32 %v5845_v17, %v5844_v51 }
 0xbaa   : > { %5847 = vadd.xlane.f32.xlu0 %v5846_v10 }
 0xc37   : > { %v5848_v33 = vpop.xlane.xlu0 %5847 }
 0xc38   : > { %v5849_v2 = vmul.f32 0.00390625, %v5848_v33 }
 0xc3a   : > { %v5850_v19 = vadd.f32 1e-05, %v5849_v2 }
 0xc3c   : > { %13737 = vrsqrt.f32 %v5850_v19 }
 0xc46   : > { %v13738_v40 = vpop.eup %13737 }
 0xc47   : > { %v5852_v41 = vmul.f32 %v13738_v40, %v5842_v24  ;;  %v5853_v12 = vmul.f32 %v13738_v40, %v5843_v25  ;;  %v13235_v24 = vld [vmem:[#allocation13 + $0x2d4] ss:$36 sps:$4 sm:$0xff]  }
 0xc48   : > { %v13233_v25 = vld [vmem:[#allocation13 + $0x2d0] ss:$36 sps:$4 sm:$0xff]  }
 0xc49   : > { %v5865_v59 = vmul.f32 %v15104_v38, %v5852_v41  ;;  %v5866_v60 = vmul.f32 %v15107_v39, %v5853_v12  ;;  %v13237_v40 = vld [vmem:[#allocation13 + $0xb0] ss:$36 sps:$4 sm:$0xff]   ;;  %v13240_v41 = vld [vmem:[#allocation13 + $0x31c] ss:$36 sps:$4 sm:$0xff]  }
 0xc4a   : > { %12206 = vmatpush3.bf16.msra.mxu1 %v13237_v40  ;;  %v13238_v12 = vld [vmem:[#allocation13 + $0x318] ss:$36 sps:$4 sm:$0xff]  }
 0xc4b   : > { %v5878_v36 = vadd.f32 %v15110_v44, %v5865_v59  ;;  %v5879_v5 = vadd.f32 %v15113_v8, %v5866_v60  ;;  %v13241_v59 = vld [vmem:[#allocation13 + $0x338] ss:$36 sps:$4 sm:$0xff]  }
 0xc4c   : > { %v13242_v60 = vld [vmem:[#allocation13 + $0xf8] ss:$36 sps:$4 sm:$0xff]   ;;  %12207 = vmatprep.subr.bf16.mxu1 %v13241_v59  ;;  %v13289_v59 = vld [vmem:[#allocation13 + $0x24c] ss:$36 sps:$4 sm:$0xff]  }
 0xc4d   : > { %v15120_v35 = vadd.f32 %v5878_v36, %v15044_v42  ;;  %v15123_v55 = vadd.f32 %v5879_v5, %v15047_v50  ;;  %v13205_v42 = vld [vmem:[#allocation13 + $0x90] ss:$36 sps:$4 sm:$0xff]   ;;  %v13210_v50 = vld [vmem:[#allocation13 + $0xdc] ss:$36 sps:$4 sm:$0xff]   ;;  %v13245_v36 = vld [vmem:[#allocation13 + $0x364] ss:$36 sps:$4 sm:$0xff]  }
 0xc4e   : > { %6854 = vmatpush1.bf16.msra.mxu0 %v13205_v42  ;;  %12208 = vmatpush3.bf16.msra.mxu1 %v13242_v60  ;;  %v13243_v5 = vld [vmem:[#allocation13 + $0x360] ss:$36 sps:$4 sm:$0xff]   ;;  %v13256_v42 = vld [vmem:[#allocation13 + $0x410] ss:$36 sps:$4 sm:$0xff]   ;;  %v13281_v40 = vld [vmem:[#allocation13 + $0x1b8] ss:$36 sps:$4 sm:$0xff]  }
 0xc4f   : > { %v5882_v30 = vadd.f32 %v15123_v55, %v15120_v35  ;;  %6855 = vmatprep.subr.bf16.mxu0 %v13210_v50  ;;  %v13260_v50 = vld [vmem:[#allocation13 + $0x43c] ss:$36 sps:$4 sm:$0xff]   ;;  %v13287_v60 = vld [vmem:[#allocation13 + $0x248] ss:$36 sps:$4 sm:$0xff]  }
 0xc51   : > { %5883 = vadd.xlane.f32.xlu0 %v5882_v30  ;;  %v13246_v30 = vld [vmem:[#allocation13 + $0x380] ss:$36 sps:$4 sm:$0xff]  }
 0xc52   : > { %6856 = vmatpush1.bf16.msra.mxu0 %v13208_v7  ;;  %12209 = vmatprep.subr.bf16.mxu1 %v13246_v30  ;;  %v13258_v7 = vld [vmem:[#allocation13 + $0x438] ss:$36 sps:$4 sm:$0xff]  }
 0xc53   : > { %6857 = vmatprep.subr.bf16.mxu0 %v13213_v61  ;;  %12210 = vmatpush3.bf16.msra.mxu1 %v13247_v26  ;;  %v13262_v61 = vld [vmem:[#allocation13 + $0x218] ss:$36 sps:$4 sm:$0xff]  }
 0xc54   : > { %12211 = vmatprep.subr.bf16.mxu1 %v13251_v63  ;;  %v13295_v30 = vld [vmem:[#allocation13 + $0x2dc] ss:$36 sps:$4 sm:$0xff]   ;;  %v13301_v63 = vld [vmem:[#allocation13 + $0x36c] ss:$36 sps:$4 sm:$0xff]  }
 0xc55   : > { %v13293_v26 = vld [vmem:[#allocation13 + $0x2d8] ss:$36 sps:$4 sm:$0xff]  }
 0xc56   : > { %6858 = vmatpush1.bf16.msra.mxu0 %v13211_v9  ;;  %v13265_v9 = vld [vmem:[#allocation13 + $0xc] ss:$36 sps:$4 sm:$0xff]  }
 0xc57   : > { %6859 = vmatprep.subr.bf16.mxu0 %v13216_v0  ;;  %12212 = vmatpush3.bf16.msra.mxu1 %v13252_v62  ;;  %v13299_v62 = vld [vmem:[#allocation13 + $0x368] ss:$36 sps:$4 sm:$0xff]  }
 0xc58   : > { %12213 = vmatprep.subr.bf16.mxu1 %v13256_v42  ;;  %v13307_v42 = vld [vmem:[#allocation13 + $0x3fc] ss:$36 sps:$4 sm:$0xff]  }
 0xc5a   : > { %6860 = vmatpush1.bf16.msra.mxu0 %v13214_v11 }
 0xc5b   : > { %6861 = vmatprep.subr.bf16.mxu0 %v13219_v34  ;;  %12214 = vmatpush3.bf16.msra.mxu1 %v13257_v22  ;;  %v13305_v22 = vld [vmem:[#allocation13 + $0x3f8] ss:$36 sps:$4 sm:$0xff]  }
 0xc5c   : > { %12215 = vmatprep.subr.bf16.mxu1 %v13261_v31  ;;  %v13308_v31 = vld [vmem:[#allocation13 + $0x440] ss:$36 sps:$4 sm:$0xff]  }
 0xc5e   : > { %6862 = vmatpush1.bf16.msra.mxu0 %v13217_v15 }
 0xc5f   : > { %6863 = vmatprep.subr.bf16.mxu0 %v13222_v32  ;;  %12216 = vmatpush3.bf16.msra.mxu1 %v13262_v61  ;;  %v13311_v61 = vld [vmem:[#allocation13 + $0x10] ss:$36 sps:$4 sm:$0xff]  }
 0xc60   : > { %12421 = vmatprep.subr.bf16.mxu1 %v14162_v29 }
 0xc62   : > { %6864 = vmatpush1.bf16.msra.mxu0 %v13220_v16 }
 0xc63   : > { %6865 = vmatprep.subr.bf16.mxu0 %v13225_v18 }
 0xc66   : > { %6866 = vmatpush1.bf16.msra.mxu0 %v13223_v1 }
 0xc67   : > { %6867 = vmatprep.subr.bf16.mxu0 %v13230_v20 }
 0xc6a   : > { %6868 = vmatpush1.bf16.msra.mxu0 %v13228_v23 }
 0xc6b   : > { %6869 = vmatprep.subr.bf16.mxu0 %v13235_v24 }
 0xc6e   : > { %6870 = vmatpush1.bf16.msra.mxu0 %v13233_v25  ;;  %v13263_v25 = vld [vmem:[#allocation13 + $0x8] ss:$36 sps:$4 sm:$0xff]  }
 0xc6f   : > { %6871 = vmatprep.subr.bf16.mxu0 %v13240_v41  ;;  %v13286_v41 = vld [vmem:[#allocation13 + $0x204] ss:$36 sps:$4 sm:$0xff]  }
 0xc72   : > { %6872 = vmatpush1.bf16.msra.mxu0 %v13238_v12  ;;  %v13284_v12 = vld [vmem:[#allocation13 + $0x200] ss:$36 sps:$4 sm:$0xff]  }
 0xc73   : > { %6873 = vmatprep.subr.bf16.mxu0 %v13245_v36  ;;  %v13292_v36 = vld [vmem:[#allocation13 + $0x294] ss:$36 sps:$4 sm:$0xff]  }
 0xc76   : > { %6874 = vmatpush1.bf16.msra.mxu0 %v13243_v5  ;;  %v13290_v5 = vld [vmem:[#allocation13 + $0x290] ss:$36 sps:$4 sm:$0xff]  }
 0xc77   : > { %6875 = vmatprep.subr.bf16.mxu0 %v13250_v3  ;;  %v13298_v3 = vld [vmem:[#allocation13 + $0x324] ss:$36 sps:$4 sm:$0xff]  }
 0xc7a   : > { %6876 = vmatpush1.bf16.msra.mxu0 %v13248_v43  ;;  %v13296_v43 = vld [vmem:[#allocation13 + $0x320] ss:$36 sps:$4 sm:$0xff]  }
 0xc7b   : > { %6877 = vmatprep.subr.bf16.mxu0 %v13255_v4  ;;  %v13304_v4 = vld [vmem:[#allocation13 + $0x3b4] ss:$36 sps:$4 sm:$0xff]  }
 0xc7e   : > { %6878 = vmatpush1.bf16.msra.mxu0 %v13253_v6  ;;  %v13302_v6 = vld [vmem:[#allocation13 + $0x3b0] ss:$36 sps:$4 sm:$0xff]  }
 0xc7f   : > { %6879 = vmatprep.subr.bf16.mxu0 %v13260_v50  ;;  %v13310_v50 = vld [vmem:[#allocation13 + $0x444] ss:$36 sps:$4 sm:$0xff]  }
 0xc82   : > { %6880 = vmatpush1.bf16.msra.mxu0 %v13258_v7  ;;  %v13313_v7 = vld [vmem:[#allocation13 + $0x14] ss:$36 sps:$4 sm:$0xff]  }
 0xc83   : > { %6890 = vmatprep.subr.bf16.mxu0 %v13265_v9  ;;  %v13316_v9 = vld [vmem:[#allocation13 + $0x5c] ss:$36 sps:$4 sm:$0xff]  }
 0xcde   : > { %v5884_v51 = vpop.xlane.xlu0 %5883 }
 0xcdf   : > { %v5885_v17 = vmul.f32 0.00390625, %v5884_v51 }
 0xce1   : > { %v5886_v10 = vsub.f32 %v15120_v35, %v5885_v17  ;;  %v5887_v33 = vsub.f32 %v15123_v55, %v5885_v17  ;;  %v13268_v17 = vld [vmem:[#allocation13 + $0x54] ss:$36 sps:$4 sm:$0xff]  }
 0xce3   : > { %v5888_v2 = vmul.f32 %v5886_v10, %v5886_v10  ;;  %v5889_v19 = vmul.f32 %v5887_v33, %v5887_v33 }
 0xce5   : > { %v5890_v37 = vadd.f32 %v5889_v19, %v5888_v2  ;;  %v13275_v2 = vld [vmem:[#allocation13 + $0x128] ss:$36 sps:$4 sm:$0xff]   ;;  %v13280_v19 = vld [vmem:[#allocation13 + $0x174] ss:$36 sps:$4 sm:$0xff]  }
 0xce7   : > { %5891 = vadd.xlane.f32.xlu1 %v5890_v37  ;;  %v13278_v37 = vld [vmem:[#allocation13 + $0x170] ss:$36 sps:$4 sm:$0xff]  }
 0xd74   : > { %v5892_v0 = vpop.xlane.xlu1 %5891 }
 0xd75   : > { %v5893_v11 = vmul.f32 0.00390625, %v5892_v0  ;;  %v13314_v0 = vld [vmem:[#allocation13 + $0x58] ss:$36 sps:$4 sm:$0xff]  }
 0xd77   : > { %v5894_v34 = vadd.f32 1e-05, %v5893_v11  ;;  %v13319_v11 = vld [vmem:[#allocation13 + $0xa4] ss:$36 sps:$4 sm:$0xff]  }
 0xd79   : > { %13739 = vrsqrt.f32 %v5894_v34  ;;  %v13317_v34 = vld [vmem:[#allocation13 + $0xa0] ss:$36 sps:$4 sm:$0xff]  }
 0xd83   : > { %v13740_v15 = vpop.eup %13739 }
 0xd84   : > { %v5896_v32 = vmul.f32 %v13740_v15, %v5886_v10  ;;  %v5897_v16 = vmul.f32 %v13740_v15, %v5887_v33  ;;  %v13272_v10 = vld [vmem:[#allocation13 + $0xe0] ss:$36 sps:$4 sm:$0xff]   ;;  %v13277_v33 = vld [vmem:[#allocation13 + $0x12c] ss:$36 sps:$4 sm:$0xff]  }
 0xd85   : > { %v13322_v15 = vld [vmem:[#allocation13 + $0xec] ss:$36 sps:$4 sm:$0xff]  }
 0xd86   : > { %v5899_v18 = vmul.f32 %v5897_v16, %v14614_v52  ;;  %v5898_v1 = vmul.f32 %v5896_v32, %v14617_v53  ;;  %v13266_v52 = vld [vmem:[#allocation13 + $0x50] ss:$36 sps:$4 sm:$0xff]   ;;  %v13271_v53 = vld [vmem:[#allocation13 + $0x9c] ss:$36 sps:$4 sm:$0xff]   ;;  %v13320_v32 = vld [vmem:[#allocation13 + $0xe8] ss:$36 sps:$4 sm:$0xff]  }
 0xd87   : > { %v13325_v16 = vld [vmem:[#allocation13 + $0x134] ss:$36 sps:$4 sm:$0xff]  }
 0xd88   : > { %v5901_v20 = vadd.f32 %v5899_v18, %v14620_v57  ;;  %v5900_v23 = vadd.f32 %v5898_v1, %v14623_v58  ;;  %v13269_v57 = vld [vmem:[#allocation13 + $0x98] ss:$36 sps:$4 sm:$0xff]   ;;  %v13274_v58 = vld [vmem:[#allocation13 + $0xe4] ss:$36 sps:$4 sm:$0xff]   ;;  %v13323_v18 = vld [vmem:[#allocation13 + $0x130] ss:$36 sps:$4 sm:$0xff]  }
 0xd89   : > { %v13328_v1 = vld [vmem:[#allocation13 + $0x17c] ss:$36 sps:$4 sm:$0xff]  }
 0xd8a   : > { %v15134_v24 = vpack.c.bf16 %v5901_v20, %v5901_v20  ;;  %v15136_v51 = vpack.c.bf16 %v5900_v23, %v5900_v23  ;;  %v13326_v20 = vld [vmem:[#allocation13 + $0x178] ss:$36 sps:$4 sm:$0xff]   ;;  %v13331_v23 = vld [vmem:[#allocation13 + $0x1c4] ss:$36 sps:$4 sm:$0xff]  }
 0xd8c   : > { %6881 = vmatprep.mubr.bf16.mxu0 %v15134_v24  ;;  %7045 = vmatprep.mubr.bf16.mxu1 %v15134_v24 }
 0xd8d   : > { %6882 = vmatmul.mubr.bf16.vlgmr.msra.gmra.mrb[64].mxu0 %v15136_v51  ;;  %7046 = vmatmul.mubr.bf16.vlgmr.msra.gmra.mrb[80].mxu1 %v15136_v51 }
 0xd8e   : > { %6891 = vmatpush1.bf16.msra.mxu0 %v13263_v25  ;;  %6922 = vmatprep.mubr.bf16.mxu0 %v15134_v24  ;;  %v13329_v25 = vld [vmem:[#allocation13 + $0x1c0] ss:$36 sps:$4 sm:$0xff]  }
 0xd8f   : > { %6892 = vmatprep.subr.bf16.mxu0 %v13268_v17  ;;  %12423 = vmatprep.mubr.msk.bf16.mxu1 %vm14163_vm0, %v14162_v29  ;;  %v13334_v17 = vld [vmem:[#allocation13 + $0x20c] ss:$36 sps:$4 sm:$0xff]  }
 0xd92   : > { %6893 = vmatpush1.bf16.msra.mxu0 %v13266_v52  ;;  %v13332_v52 = vld [vmem:[#allocation13 + $0x208] ss:$36 sps:$4 sm:$0xff]  }
 0xd93   : > { %6894 = vmatprep.subr.bf16.mxu0 %v13271_v53  ;;  %v13337_v53 = vld [vmem:[#allocation13 + $0x254] ss:$36 sps:$4 sm:$0xff]  }
 0xd96   : > { %6895 = vmatpush1.bf16.msra.mxu0 %v13269_v57  ;;  %v13335_v57 = vld [vmem:[#allocation13 + $0x250] ss:$36 sps:$4 sm:$0xff]  }
 0xd97   : > { %6896 = vmatprep.subr.bf16.mxu0 %v13274_v58  ;;  %v13340_v58 = vld [vmem:[#allocation13 + $0x29c] ss:$36 sps:$4 sm:$0xff]  }
 0xd9a   : > { %6897 = vmatpush1.bf16.msra.mxu0 %v13272_v10  ;;  %v13338_v10 = vld [vmem:[#allocation13 + $0x298] ss:$36 sps:$4 sm:$0xff]  }
 0xd9b   : > { %6898 = vmatprep.subr.bf16.mxu0 %v13277_v33  ;;  %v13343_v33 = vld [vmem:[#allocation13 + $0x2e4] ss:$36 sps:$4 sm:$0xff]  }
 0xd9e   : > { %6899 = vmatpush1.bf16.msra.mxu0 %v13275_v2  ;;  %v13341_v2 = vld [vmem:[#allocation13 + $0x2e0] ss:$36 sps:$4 sm:$0xff]  }
 0xd9f   : > { %6900 = vmatprep.subr.bf16.mxu0 %v13280_v19  ;;  %v13346_v19 = vld [vmem:[#allocation13 + $0x32c] ss:$36 sps:$4 sm:$0xff]  }
 0xda2   : > { %6901 = vmatpush1.bf16.msra.mxu0 %v13278_v37  ;;  %v13344_v37 = vld [vmem:[#allocation13 + $0x328] ss:$36 sps:$4 sm:$0xff]  }
 0xda3   : > { %6902 = vmatprep.subr.bf16.mxu0 %v13283_v21  ;;  %v13349_v21 = vld [vmem:[#allocation13 + $0x374] ss:$36 sps:$4 sm:$0xff]  }
 0xda6   : > { %6903 = vmatpush1.bf16.msra.mxu0 %v13281_v40  ;;  %v13347_v40 = vld [vmem:[#allocation13 + $0x370] ss:$36 sps:$4 sm:$0xff]  }
 0xda7   : > { %6904 = vmatprep.subr.bf16.mxu0 %v13286_v41  ;;  %v13352_v41 = vld [vmem:[#allocation13 + $0x3bc] ss:$36 sps:$4 sm:$0xff]  }
 0xdaa   : > { %6905 = vmatpush1.bf16.msra.mxu0 %v13284_v12  ;;  %v13350_v12 = vld [vmem:[#allocation13 + $0x3b8] ss:$36 sps:$4 sm:$0xff]  }
 0xdab   : > { %6906 = vmatprep.subr.bf16.mxu0 %v13289_v59  ;;  %v13355_v59 = vld [vmem:[#allocation13 + $0x404] ss:$36 sps:$4 sm:$0xff]  }
 0xdae   : > { %6907 = vmatpush1.bf16.msra.mxu0 %v13287_v60  ;;  %v13353_v60 = vld [vmem:[#allocation13 + $0x400] ss:$36 sps:$4 sm:$0xff]  }
 0xdaf   : > { %6908 = vmatprep.subr.bf16.mxu0 %v13292_v36  ;;  %v13358_v36 = vld [vmem:[#allocation13 + $0x44c] ss:$36 sps:$4 sm:$0xff]  }
 0xdb2   : > { %6909 = vmatpush1.bf16.msra.mxu0 %v13290_v5  ;;  %v13356_v5 = vld [vmem:[#allocation13 + $0x448] ss:$36 sps:$4 sm:$0xff]  }
 0xdb3   : > { %6910 = vmatprep.subr.bf16.mxu0 %v13295_v30  ;;  %v13361_v30 = vld [vmem:[#allocation13 + $0x1c] ss:$36 sps:$4 sm:$0xff]  }
 0xdb6   : > { %6911 = vmatpush1.bf16.msra.mxu0 %v13293_v26  ;;  %v13359_v26 = vld [vmem:[#allocation13 + $0x18] ss:$36 sps:$4 sm:$0xff]  }
 0xdb7   : > { %6912 = vmatprep.subr.bf16.mxu0 %v13298_v3  ;;  %v13364_v3 = vld [vmem:[#allocation13 + $0x64] ss:$36 sps:$4 sm:$0xff]  }
 0xdba   : > { %6913 = vmatpush1.bf16.msra.mxu0 %v13296_v43  ;;  %v13362_v43 = vld [vmem:[#allocation13 + $0x60] ss:$36 sps:$4 sm:$0xff]  }
 0xdbb   : > { %6914 = vmatprep.subr.bf16.mxu0 %v13301_v63  ;;  %v13367_v63 = vld [vmem:[#allocation13 + $0xac] ss:$36 sps:$4 sm:$0xff]  }
 0xdbe   : > { %6915 = vmatpush1.bf16.msra.mxu0 %v13299_v62  ;;  %v13365_v62 = vld [vmem:[#allocation13 + $0xa8] ss:$36 sps:$4 sm:$0xff]  }
 0xdbf   : > { %6916 = vmatprep.subr.bf16.mxu0 %v13304_v4  ;;  %v13370_v4 = vld [vmem:[#allocation13 + $0xf4] ss:$36 sps:$4 sm:$0xff]  }
 0xdc2   : > { %6917 = vmatpush1.bf16.msra.mxu0 %v13302_v6  ;;  %v13368_v6 = vld [vmem:[#allocation13 + $0xf0] ss:$36 sps:$4 sm:$0xff]  }
 0xdc3   : > { %6918 = vmatprep.subr.bf16.mxu0 %v13307_v42  ;;  %v13373_v42 = vld [vmem:[#allocation13 + $0x13c] ss:$36 sps:$4 sm:$0xff]  }
 0xdc6   : > { %6919 = vmatpush1.bf16.msra.mxu0 %v13305_v22  ;;  %v13371_v22 = vld [vmem:[#allocation13 + $0x138] ss:$36 sps:$4 sm:$0xff]  }
 0xdc7   : > { %6920 = vmatprep.subr.bf16.mxu0 %v13310_v50  ;;  %v13376_v50 = vld [vmem:[#allocation13 + $0x184] ss:$36 sps:$4 sm:$0xff]  }
 0xdca   : > { %6921 = vmatpush1.bf16.msra.mxu0 %v13308_v31  ;;  %v13374_v31 = vld [vmem:[#allocation13 + $0x180] ss:$36 sps:$4 sm:$0xff]  }
 0xdcb   : > { %6931 = vmatprep.subr.bf16.mxu0 %v13313_v7  ;;  %v13379_v7 = vld [vmem:[#allocation13 + $0x1cc] ss:$36 sps:$4 sm:$0xff]  }
 0xdcd   : > { %6923 = vmatmul.mubr.bf16.vlgmr.msra.gmra.mrb[68].mxu0 %v15136_v51 }
 0xdce   : > { %6932 = vmatpush1.bf16.msra.mxu0 %v13311_v61  ;;  %6963 = vmatprep.mubr.bf16.mxu0 %v15134_v24  ;;  %v13382_v61 = vld [vmem:[#allocation13 + $0x214] ss:$36 sps:$4 sm:$0xff]  }
 0xdcf   : > { %6933 = vmatprep.subr.bf16.mxu0 %v13316_v9  ;;  %v13380_v9 = vld [vmem:[#allocation13 + $0x210] ss:$36 sps:$4 sm:$0xff]  }
 0xdd2   : > { %6934 = vmatpush1.bf16.msra.mxu0 %v13314_v0  ;;  %v13385_v0 = vld [vmem:[#allocation13 + $0x25c] ss:$36 sps:$4 sm:$0xff]  }
 0xdd3   : > { %6935 = vmatprep.subr.bf16.mxu0 %v13319_v11  ;;  %v13383_v11 = vld [vmem:[#allocation13 + $0x258] ss:$36 sps:$4 sm:$0xff]  }
 0xdd6   : > { %6936 = vmatpush1.bf16.msra.mxu0 %v13317_v34  ;;  %v13388_v34 = vld [vmem:[#allocation13 + $0x2a4] ss:$36 sps:$4 sm:$0xff]  }
 0xdd7   : > { %6937 = vmatprep.subr.bf16.mxu0 %v13322_v15  ;;  %v13386_v15 = vld [vmem:[#allocation13 + $0x2a0] ss:$36 sps:$4 sm:$0xff]  }
 0xdda   : > { %6938 = vmatpush1.bf16.msra.mxu0 %v13320_v32  ;;  %v13391_v32 = vld [vmem:[#allocation13 + $0x2ec] ss:$36 sps:$4 sm:$0xff]  }
 0xddb   : > { %6939 = vmatprep.subr.bf16.mxu0 %v13325_v16  ;;  %v13389_v16 = vld [vmem:[#allocation13 + $0x2e8] ss:$36 sps:$4 sm:$0xff]  }
 0xdde   : > { %6940 = vmatpush1.bf16.msra.mxu0 %v13323_v18  ;;  %v13394_v18 = vld [vmem:[#allocation13 + $0x334] ss:$36 sps:$4 sm:$0xff]  }
 0xddf   : > { %6941 = vmatprep.subr.bf16.mxu0 %v13328_v1  ;;  %v13392_v1 = vld [vmem:[#allocation13 + $0x330] ss:$36 sps:$4 sm:$0xff]  }
 0xde2   : > { %6942 = vmatpush1.bf16.msra.mxu0 %v13326_v20  ;;  %v13397_v20 = vld [vmem:[#allocation13 + $0x37c] ss:$36 sps:$4 sm:$0xff]  }
 0xde3   : > { %6943 = vmatprep.subr.bf16.mxu0 %v13331_v23  ;;  %v13395_v23 = vld [vmem:[#allocation13 + $0x378] ss:$36 sps:$4 sm:$0xff]  }
 0xde6   : > { %6944 = vmatpush1.bf16.msra.mxu0 %v13329_v25  ;;  %v13400_v25 = vld [vmem:[#allocation13 + $0x3c4] ss:$36 sps:$4 sm:$0xff]  }
 0xde7   : > { %6945 = vmatprep.subr.bf16.mxu0 %v13334_v17  ;;  %v13398_v17 = vld [vmem:[#allocation13 + $0x3c0] ss:$36 sps:$4 sm:$0xff]  }
 0xdea   : > { %6946 = vmatpush1.bf16.msra.mxu0 %v13332_v52  ;;  %v13403_v52 = vld [vmem:[#allocation13 + $0x40c] ss:$36 sps:$4 sm:$0xff]  }
 0xdeb   : > { %6947 = vmatprep.subr.bf16.mxu0 %v13337_v53  ;;  %v13401_v53 = vld [vmem:[#allocation13 + $0x408] ss:$36 sps:$4 sm:$0xff]  }
 0xdee   : > { %6948 = vmatpush1.bf16.msra.mxu0 %v13335_v57  ;;  %v13406_v57 = vld [vmem:[#allocation13 + $0x454] ss:$36 sps:$4 sm:$0xff]  }
 0xdef   : > { %6949 = vmatprep.subr.bf16.mxu0 %v13340_v58  ;;  %v13404_v58 = vld [vmem:[#allocation13 + $0x450] ss:$36 sps:$4 sm:$0xff]  }
 0xdf2   : > { %6950 = vmatpush1.bf16.msra.mxu0 %v13338_v10  ;;  %v15153_v10 = vld [vmem:[#allocation15] sm:$0xff] }
 0xdf3   : > { %6951 = vmatprep.subr.bf16.mxu0 %v13343_v33  ;;  %v6071_v33 = vrot.slane %v15153_v10, %v14605_v49 }
 0xdf6   : > { %6952 = vmatpush1.bf16.msra.mxu0 %v13341_v2  ;;  %v6075_v2 = vrot.slane %v15153_v10, %v14602_v48 }
 0xdf7   : > { %6953 = vmatprep.subr.bf16.mxu0 %v13346_v19 }
 0xdfa   : > { %6954 = vmatpush1.bf16.msra.mxu0 %v13344_v37 }
 0xdfb   : > { %6955 = vmatprep.subr.bf16.mxu0 %v13349_v21 }
 0xdfe   : > { %6956 = vmatpush1.bf16.msra.mxu0 %v13347_v40 }
 0xdff   : > { %6957 = vmatprep.subr.bf16.mxu0 %v13352_v41  ;;  %v11651_v41 = vld [vmem:[#allocation15 + $0x8] ss:$0 sm:$0xff] }
 0xe02   : > { %6958 = vmatpush1.bf16.msra.mxu0 %v13350_v12 }
 0xe03   : > { %6959 = vmatprep.subr.bf16.mxu0 %v13355_v59 }
 0xe06   : > { %6960 = vmatpush1.bf16.msra.mxu0 %v13353_v60 }
 0xe07   : > { %6961 = vmatprep.subr.bf16.mxu0 %v13358_v36 }
 0xe0a   : > { %6962 = vmatpush1.bf16.msra.mxu0 %v13356_v5 }
 0xe0b   : > { %6972 = vmatprep.subr.bf16.mxu0 %v13361_v30 }
 0xe0d   : > { %6964 = vmatmul.mubr.bf16.vlgmr.msra.gmra.mrb[72].mxu0 %v15136_v51 }
 0xe0e   : > { %6973 = vmatpush1.bf16.msra.mxu0 %v13359_v26  ;;  %7004 = vmatprep.mubr.bf16.mxu0 %v15134_v24  ;;  %v13377_v24 = vld [vmem:[#allocation13 + $0x1c8] ss:$36 sps:$4 sm:$0xff]  }
 0xe0f   : > { %6974 = vmatprep.subr.bf16.mxu0 %v13364_v3  ;;  %v6079_v3 = vrot.slane %v15153_v10, %v14661_v13 }
 0xe12   : > { %6975 = vmatpush1.bf16.msra.mxu0 %v13362_v43  ;;  %v6083_v43 = vrot.slane %v15153_v10, %v14664_v14 }
 0xe13   : > { %6976 = vmatprep.subr.bf16.mxu0 %v13367_v63 }
 0xe16   : > { %6977 = vmatpush1.bf16.msra.mxu0 %v13365_v62 }
 0xe17   : > { %6978 = vmatprep.subr.bf16.mxu0 %v13370_v4 }
 0xe1a   : > { %6979 = vmatpush1.bf16.msra.mxu0 %v13368_v6 }
 0xe1b   : > { %6980 = vmatprep.subr.bf16.mxu0 %v13373_v42 }
 0xe1e   : > { %6981 = vmatpush1.bf16.msra.mxu0 %v13371_v22 }
 0xe1f   : > { %6982 = vmatprep.subr.bf16.mxu0 %v13376_v50 }
 0xe22   : > { %6983 = vmatpush1.bf16.msra.mxu0 %v13374_v31 }
 0xe23   : > { %6984 = vmatprep.subr.bf16.mxu0 %v13379_v7 }
 0xe26   : > { %6985 = vmatpush1.bf16.msra.mxu0 %v13377_v24 }
 0xe27   : > { %6986 = vmatprep.subr.bf16.mxu0 %v13382_v61 }
 0xe2a   : > { %6987 = vmatpush1.bf16.msra.mxu0 %v13380_v9  ;;  %v6087_v9 = vrot.slane %v15153_v10, %v14686_v27 }
 0xe2b   : > { %6988 = vmatprep.subr.bf16.mxu0 %v13385_v0  ;;  %v6091_v0 = vrot.slane %v15153_v10, %v14689_v28 }
 0xe2e   : > { %6989 = vmatpush1.bf16.msra.mxu0 %v13383_v11 }
 0xe2f   : > { %6990 = vmatprep.subr.bf16.mxu0 %v13388_v34 }
 0xe32   : > { %6991 = vmatpush1.bf16.msra.mxu0 %v13386_v15 }
 0xe33   : > { %6992 = vmatprep.subr.bf16.mxu0 %v13391_v32 }
 0xe36   : > { %6993 = vmatpush1.bf16.msra.mxu0 %v13389_v16 }
 0xe37   : > { %6994 = vmatprep.subr.bf16.mxu0 %v13394_v18 }
 0xe3a   : > { %6995 = vmatpush1.bf16.msra.mxu0 %v13392_v1 }
 0xe3b   : > { %6996 = vmatprep.subr.bf16.mxu0 %v13397_v20 }
 0xe3e   : > { %6997 = vmatpush1.bf16.msra.mxu0 %v13395_v23 }
 0xe3f   : > { %6998 = vmatprep.subr.bf16.mxu0 %v13400_v25 }
 0xe42   : > { %6999 = vmatpush1.bf16.msra.mxu0 %v13398_v17  ;;  %v6095_v17 = vrot.slane %v15153_v10, %v14715_v46 }
 0xe43   : > { %7000 = vmatprep.subr.bf16.mxu0 %v13403_v52 }
 0xe46   : > { %7001 = vmatpush1.bf16.msra.mxu0 %v13401_v53 }
 0xe47   : > { %7002 = vmatprep.subr.bf16.mxu0 %v13406_v57  ;;  %v6099_v57 = vrot.slane %v15153_v10, %v14718_v54 }
 0xe4a   : > { %7003 = vmatpush1.bf16.msra.mxu0 %v13404_v58 }
 0xe4b   : > { %12415 = vmatprep.subr.bf16.mxu0 %v14162_v29 }
 0xe4d   : > { %7005 = vmatmul.mubr.bf16.vlgmr.msra.gmra.mrb[76].mxu0 %v15136_v51 }
 0xe4e   : > { %12417 = vmatprep.mubr.msk.bf16.mxu0 %vm14163_vm0, %v14162_v29 }
 0xe60   : > { %v6883_v19 = vpop.f32.mrb[64].mxu0  ;;  %v12217_v37 = vpop.f32.mrb[80].mxu1 }
 0xe61   : > { %v6884_v21 = vadd.f32 %v6883_v19, %v6071_v33  ;;  %v6885_v40 = vpop.f32.mrb[65].mxu0  ;;  %v12218_v12 = vpop.f32.mrb[81].mxu1 }
 0xe62   : > { %v6886_v59 = vadd.f32 %v6885_v40, %v6075_v2  ;;  %v12219_v60 = vadd.f32 %v12218_v12, %v12217_v37  ;;  %v6887_v51 = vpop.f32.mrb[66].mxu0  ;;  %v12220_v36 = vpop.f32.mrb[82].mxu1 }
 0xe63   : > { %7063 = vst.msk [vmem:[#allocation3] sm:$0xff] %vm1894_vm1, %v6884_v21  ;;  %v6888_v5 = vpop.f32.mrb[67].mxu0  ;;  %v12221_v30 = vpop.f32.mrb[83].mxu1 }
 0xe64   : > { %7123 = vst.msk [vmem:[#allocation3 + $0x20] sm:$0xff] %vm1894_vm1, %v6886_v59  ;;  %v15161_v26 = vadd.f32 %v12219_v60, %v11651_v41 }
 0xe66   : > { %7187 = vst.msk [vmem:[#allocation5 + $0x40] sm:$0xff] %vm1894_vm1, %v15161_v26 }
 0xe6a   : > { %v7242_v24 = vld [vmem:[#allocation3] sm:$0xff] }
 0xe6b   : > { %v7254_v61 = vpack.c.bf16 %v7242_v24, %v7242_v24 }
 0xea0   : > { %v6924_v63 = vpop.f32.mrb[68].mxu0 }
 0xea1   : > { %v6925_v62 = vadd.f32 %v6924_v63, %v6079_v3  ;;  %v6926_v4 = vpop.f32.mrb[69].mxu0 }
 0xea2   : > { %v6927_v6 = vadd.f32 %v6926_v4, %v6083_v43  ;;  %v6928_v42 = vpop.f32.mrb[70].mxu0 }
 0xea3   : > { %7183 = vst.msk [vmem:[#allocation3 + $0x40] sm:$0xff] %vm1894_vm1, %v6925_v62  ;;  %v6929_v22 = vpop.f32.mrb[71].mxu0 }
 0xea4   : > { %7065 = vst.msk [vmem:[#allocation4] sm:$0xff] %vm1894_vm1, %v6927_v6  ;;  %7094 = vrot.lane.b32.xlu1 %v6927_v6, %s14164_s3  ;;  %7076 = vrot.lane.b32.xlu0 %v6927_v6, %s14165_s6  ;;  %v7246_v22 = vld [vmem:[#allocation3 + $0x20] sm:$0xff] }
 0xea8   : > { %7112 = vrot.lane.b32.xlu0 %v6927_v6, %s14166_s14  ;;  %7070 = vrot.lane.b32.xlu1 %v6884_v21, %s14165_s6 }
 0xeab   : > { %v7266_v50 = vld [vmem:[#allocation4] sm:$0xff] }
 0xeac   : > { %7106 = vrot.lane.b32.xlu0 %v6884_v21, %s14166_s14  ;;  %7088 = vrot.lane.b32.xlu1 %v6884_v21, %s14164_s3  ;;  %v7278_v31 = vpack.c.bf16 %v7266_v50, %v7266_v50 }
 0xeae   : > { %v7318_v7 = vsel %vm1894_vm1, %v7278_v31, 0  ;;  %v7258_v31 = vpack.c.bf16 %v7246_v22, %v7246_v22 }
 0xeaf   : > { %12416 = vmatpush3.bf16.xpose.msra.mxu0 %v7318_v7 }
 0xeb0   : > { %12427 = vmatprep.subr.bf16.mxu0 %v14162_v29 }
 0xeb6   : > { %12418 = vmatmul.mubr.msk.bf16.vlgmr.msra.gmra.mrb[80].mxu0 %vm1894_vm1, %v7254_v61 }
 0xeb7   : > { %12429 = vmatprep.mubr.msk.bf16.mxu0 %vm14163_vm0, %v14162_v29 }
 0xee0   : > { %v6965_v11 = vpop.f32.mrb[72].mxu0 }
 0xee1   : > { %v6966_v34 = vadd.f32 %v6965_v11, %v6087_v9  ;;  %v6967_v15 = vpop.f32.mrb[73].mxu0 }
 0xee2   : > { %v6968_v32 = vadd.f32 %v6967_v15, %v6091_v0  ;;  %v6969_v16 = vpop.f32.mrb[74].mxu0 }
 0xee3   : > { %7125 = vst.msk [vmem:[#allocation4 + $0x20] sm:$0xff] %vm1894_vm1, %v6966_v34  ;;  %v6970_v18 = vpop.f32.mrb[75].mxu0  ;;  %7154 = vrot.lane.b32.xlu0 %v6966_v34, %s14164_s3  ;;  %7136 = vrot.lane.b32.xlu1 %v6966_v34, %s14165_s6 }
 0xee4   : > { %7185 = vst.msk [vmem:[#allocation4 + $0x40] sm:$0xff] %vm1894_vm1, %v6968_v32 }
 0xee7   : > { %7172 = vrot.lane.b32.xlu0 %v6966_v34, %s14166_s14  ;;  %7130 = vrot.lane.b32.xlu1 %v6886_v59, %s14165_s6 }
 0xeea   : > { %v7270_v51 = vld [vmem:[#allocation4 + $0x20] sm:$0xff] }
 0xeeb   : > { %7166 = vrot.lane.b32.xlu0 %v6886_v59, %s14166_s14  ;;  %7148 = vrot.lane.b32.xlu1 %v6886_v59, %s14164_s3  ;;  %v7282_v3 = vpack.c.bf16 %v7270_v51, %v7270_v51 }
 0xeed   : > { %v7502_v6 = vsel %vm1894_vm1, %v7282_v3, 0 }
 0xeef   : > { %7214 = vrot.lane.b32.xlu0 %v6968_v32, %s14164_s3  ;;  %7196 = vrot.lane.b32.xlu1 %v6968_v32, %s14165_s6 }
 0xef3   : > { %7232 = vrot.lane.b32.xlu0 %v6968_v32, %s14166_s14  ;;  %7190 = vrot.lane.b32.xlu1 %v6925_v62, %s14165_s6 }
 0xef7   : > { %7226 = vrot.lane.b32.xlu0 %v6925_v62, %s14166_s14  ;;  %7208 = vrot.lane.b32.xlu1 %v6925_v62, %s14164_s3 }
 0xf16   : > { %v7095_v1 = vpop.permute.xlu1 %7094  ;;  %v7077_v20 = vpop.permute.xlu0 %7076 }
 0xf17   : > { %7097 = vst.msk [vmem:[#allocation4 + $0x10] sm:$0xff] %vm1894_vm1, %v7095_v1  ;;  %7079 = vst.msk [vmem:[#allocation4 + $0x8] sm:$0xff] %vm1894_vm1, %v7077_v20 }
 0xf1a   : > { %v7113_v23 = vpop.permute.xlu0 %7112  ;;  %v7071_v25 = vpop.permute.xlu1 %7070 }
 0xf1b   : > { %7115 = vst.msk [vmem:[#allocation4 + $0x18] sm:$0xff] %vm1894_vm1, %v7113_v23  ;;  %7073 = vst.msk [vmem:[#allocation3 + $0x8] sm:$0xff] %vm1894_vm1, %v7071_v25 }
 0xf1e   : > { %v7107_v52 = vpop.permute.xlu0 %7106  ;;  %v7089_v53 = vpop.permute.xlu1 %7088  ;;  %v7267_v58 = vld [vmem:[#allocation4 + $0x8] sm:$0xff]  ;;  %v7268_v33 = vld [vmem:[#allocation4 + $0x10] sm:$0xff] }
 0xf1f   : > { %7109 = vst.msk [vmem:[#allocation3 + $0x18] sm:$0xff] %vm1894_vm1, %v7107_v52  ;;  %7091 = vst.msk [vmem:[#allocation3 + $0x10] sm:$0xff] %vm1894_vm1, %v7089_v53  ;;  %v7279_v2 = vpack.c.bf16 %v7267_v58, %v7267_v58  ;;  %v7280_v19 = vpack.c.bf16 %v7268_v33, %v7268_v33 }
 0xf20   : > { %v7006_v37 = vpop.f32.mrb[76].mxu0 }
 0xf21   : > { %v15210_v21 = vadd.f32 %v7006_v37, %v6095_v17  ;;  %v7008_v40 = vpop.f32.mrb[77].mxu0  ;;  %v7364_v41 = vsel %vm1894_vm1, %v7279_v2, 0  ;;  %v7410_v12 = vsel %vm1894_vm1, %v7280_v19, 0  ;;  %v7274_v17 = vld [vmem:[#allocation4 + $0x40] sm:$0xff] }
 0xf22   : > { %v15214_v59 = vadd.f32 %v7008_v40, %v6099_v57  ;;  %v7010_v60 = vpop.f32.mrb[78].mxu0  ;;  %12422 = vmatpush3.bf16.xpose.msra.mxu1 %v7364_v41  ;;  %12428 = vmatpush3.bf16.xpose.msra.mxu0 %v7410_v12  ;;  %v7269_v10 = vld [vmem:[#allocation4 + $0x18] sm:$0xff]  ;;  %v7243_v5 = vld [vmem:[#allocation3 + $0x8] sm:$0xff]  ;;  %v7286_v57 = vpack.c.bf16 %v7274_v17, %v7274_v17 }
 0xf23   : > { %7067 = vst.msk [vmem:[#allocation5] sm:$0xff] %vm1894_vm1, %v15210_v21  ;;  %v7011_v36 = vpop.f32.mrb[79].mxu0  ;;  %7082 = vrot.lane.b32.xlu0 %v15210_v21, %s14165_s6  ;;  %12433 = vmatprep.subr.bf16.mxu1 %v14162_v29  ;;  %v7281_v30 = vpack.c.bf16 %v7269_v10, %v7269_v10  ;;  %v7255_v63 = vpack.c.bf16 %v7243_v5, %v7243_v5  ;;  %v7250_v5 = vld [vmem:[#allocation3 + $0x40] sm:$0xff] }
 0xf24   : > { %7127 = vst.msk [vmem:[#allocation5 + $0x20] sm:$0xff] %vm1894_vm1, %v15214_v59  ;;  %12439 = vmatprep.subr.bf16.mxu0 %v14162_v29  ;;  %v7686_v41 = vsel %vm1894_vm1, %v7286_v57, 0 }
 0xf25   : > { %v7456_v4 = vsel %vm1894_vm1, %v7281_v30, 0 }
 0xf26   : > { %v7244_v43 = vld [vmem:[#allocation3 + $0x10] sm:$0xff]  ;;  %v7245_v42 = vld [vmem:[#allocation3 + $0x18] sm:$0xff] }
 0xf27   : > { %v7256_v62 = vpack.c.bf16 %v7244_v43, %v7244_v43  ;;  %v7257_v50 = vpack.c.bf16 %v7245_v42, %v7245_v42 }
 0xf29   : > { %12424 = vmatmul.mubr.msk.bf16.vlgmr.msra.gmra.mrb[84].mxu1 %vm1894_vm1, %v7255_v63  ;;  %12430 = vmatmul.mubr.msk.bf16.vlgmr.msra.gmra.mrb[84].mxu0 %vm1894_vm1, %v7256_v62  ;;  %v7262_v63 = vpack.c.bf16 %v7250_v5, %v7250_v5 }
 0xf2a   : > { %12434 = vmatpush3.bf16.xpose.msra.mxu1 %v7456_v4  ;;  %12440 = vmatpush3.bf16.xpose.msra.mxu0 %v7502_v6  ;;  %v7290_v42 = vld [vmem:[#allocation5] sm:$0xff] }
 0xf2b   : > { %12435 = vmatprep.mubr.msk.bf16.mxu1 %vm14163_vm0, %v14162_v29  ;;  %12441 = vmatprep.mubr.msk.bf16.mxu0 %vm14163_vm0, %v14162_v29 }
 0xf2c   : > { %12445 = vmatprep.subr.bf16.mxu1 %v14162_v29  ;;  %12451 = vmatprep.subr.bf16.mxu0 %v14162_v29 }
 0xf31   : > { %12436 = vmatmul.mubr.msk.bf16.vlgmr.msra.gmra.mrb[88].mxu1 %vm1894_vm1, %v7257_v50  ;;  %12442 = vmatmul.mubr.msk.bf16.vlgmr.msra.gmra.mrb[88].mxu0 %vm1894_vm1, %v7258_v31 }
 0xf32   : > { %12447 = vmatprep.mubr.msk.bf16.mxu1 %vm14163_vm0, %v14162_v29  ;;  %12453 = vmatprep.mubr.msk.bf16.mxu0 %vm14163_vm0, %v14162_v29 }
 0xf55   : > { %v7155_v7 = vpop.permute.xlu0 %7154  ;;  %v7137_v24 = vpop.permute.xlu1 %7136 }
 0xf56   : > { %7157 = vst.msk [vmem:[#allocation4 + $0x30] sm:$0xff] %vm1894_vm1, %v7155_v7  ;;  %7139 = vst.msk [vmem:[#allocation4 + $0x28] sm:$0xff] %vm1894_vm1, %v7137_v24  ;;  %v7302_v7 = vpack.c.bf16 %v7290_v42, %v7290_v42 }
 0xf59   : > { %v7173_v61 = vpop.permute.xlu0 %7172  ;;  %v7131_v9 = vpop.permute.xlu1 %7130 }
 0xf5a   : > { %7175 = vst.msk [vmem:[#allocation4 + $0x38] sm:$0xff] %vm1894_vm1, %v7173_v61  ;;  %7133 = vst.msk [vmem:[#allocation3 + $0x28] sm:$0xff] %vm1894_vm1, %v7131_v9 }
 0xf5d   : > { %v7167_v0 = vpop.permute.xlu0 %7166  ;;  %v7149_v11 = vpop.permute.xlu1 %7148  ;;  %v7271_v34 = vld [vmem:[#allocation4 + $0x28] sm:$0xff]  ;;  %v7272_v15 = vld [vmem:[#allocation4 + $0x30] sm:$0xff] }
 0xf5e   : > { %7169 = vst.msk [vmem:[#allocation3 + $0x38] sm:$0xff] %vm1894_vm1, %v7167_v0  ;;  %7151 = vst.msk [vmem:[#allocation3 + $0x30] sm:$0xff] %vm1894_vm1, %v7149_v11  ;;  %v7283_v32 = vpack.c.bf16 %v7271_v34, %v7271_v34  ;;  %v7284_v16 = vpack.c.bf16 %v7272_v15, %v7272_v15  ;;  %v8014_v0 = vsel %vm2879_vm2, %v7302_v7, 0  ;;  %v687_v15 = vand.u32 127, %v684_v45 }
 0xf60   : > { %v7548_v18 = vsel %vm1894_vm1, %v7283_v32, 0  ;;  %v7594_v1 = vsel %vm1894_vm1, %v7284_v16, 0  ;;  %vm688_vm7 = vcmp.le.s32.totalorder %v687_v15, %v14599_v47  ;;  %v14168_v32 = vmov -1e+30  }
 0xf61   : > { %v7215_v20 = vpop.permute.xlu0 %7214  ;;  %12446 = vmatpush3.bf16.xpose.msra.mxu1 %v7548_v18  ;;  %v7197_v23 = vpop.permute.xlu1 %7196  ;;  %12452 = vmatpush3.bf16.xpose.msra.mxu0 %v7594_v1  ;;  %v7273_v25 = vld [vmem:[#allocation4 + $0x38] sm:$0xff]  ;;  %v7247_v52 = vld [vmem:[#allocation3 + $0x28] sm:$0xff]  ;;  %v15291_v16 = vsel %vm688_vm7, 0.0, %v14168_v32 }
 0xf62   : > { %7217 = vst.msk [vmem:[#allocation4 + $0x50] sm:$0xff] %vm1894_vm1, %v7215_v20  ;;  %7199 = vst.msk [vmem:[#allocation4 + $0x48] sm:$0xff] %vm1894_vm1, %v7197_v23  ;;  %12457 = vmatprep.subr.bf16.mxu1 %v14162_v29  ;;  %12463 = vmatprep.subr.bf16.mxu0 %v14162_v29  ;;  %v7285_v53 = vpack.c.bf16 %v7273_v25, %v7273_v25  ;;  %v7259_v19 = vpack.c.bf16 %v7247_v52, %v7247_v52 }
 0xf64   : > { %v7640_v40 = vsel %vm1894_vm1, %v7285_v53, 0 }
 0xf65   : > { %v7233_v58 = vpop.permute.xlu0 %7232  ;;  %v7191_v33 = vpop.permute.xlu1 %7190  ;;  %v7248_v2 = vld [vmem:[#allocation3 + $0x30] sm:$0xff]  ;;  %v7249_v36 = vld [vmem:[#allocation3 + $0x38] sm:$0xff] }
 0xf66   : > { %7235 = vst.msk [vmem:[#allocation4 + $0x58] sm:$0xff] %vm1894_vm1, %v7233_v58  ;;  %7193 = vst.msk [vmem:[#allocation3 + $0x48] sm:$0xff] %vm1894_vm1, %v7191_v33  ;;  %v7260_v37 = vpack.c.bf16 %v7248_v2, %v7248_v2  ;;  %v7261_v43 = vpack.c.bf16 %v7249_v36, %v7249_v36 }
 0xf68   : > { %12448 = vmatmul.mubr.msk.bf16.vlgmr.msra.gmra.mrb[92].mxu1 %vm1894_vm1, %v7259_v19  ;;  %12454 = vmatmul.mubr.msk.bf16.vlgmr.msra.gmra.mrb[92].mxu0 %vm1894_vm1, %v7260_v37 }
 0xf69   : > { %v7227_v12 = vpop.permute.xlu0 %7226  ;;  %12458 = vmatpush3.bf16.xpose.msra.mxu1 %v7640_v40  ;;  %v7209_v60 = vpop.permute.xlu1 %7208  ;;  %12464 = vmatpush3.bf16.xpose.msra.mxu0 %v7686_v41  ;;  %v7275_v10 = vld [vmem:[#allocation4 + $0x48] sm:$0xff]  ;;  %v7276_v51 = vld [vmem:[#allocation4 + $0x50] sm:$0xff] }
 0xf6a   : > { %7229 = vst.msk [vmem:[#allocation3 + $0x58] sm:$0xff] %vm1894_vm1, %v7227_v12  ;;  %7211 = vst.msk [vmem:[#allocation3 + $0x50] sm:$0xff] %vm1894_vm1, %v7209_v60  ;;  %12459 = vmatprep.mubr.msk.bf16.mxu1 %vm14163_vm0, %v14162_v29  ;;  %12465 = vmatprep.mubr.msk.bf16.mxu0 %vm14163_vm0, %v14162_v29  ;;  %v7287_v30 = vpack.c.bf16 %v7275_v10, %v7275_v10  ;;  %v7288_v3 = vpack.c.bf16 %v7276_v51, %v7276_v51 }
 0xf6b   : > { %12469 = vmatprep.subr.bf16.mxu1 %v14162_v29  ;;  %12475 = vmatprep.subr.bf16.mxu0 %v14162_v29 }
 0xf6c   : > { %v7732_v62 = vsel %vm1894_vm1, %v7287_v30, 0  ;;  %v7778_v4 = vsel %vm1894_vm1, %v7288_v3, 0 }
 0xf6d   : > { %v7277_v6 = vld [vmem:[#allocation4 + $0x58] sm:$0xff]  ;;  %v7251_v22 = vld [vmem:[#allocation3 + $0x48] sm:$0xff] }
 0xf6e   : > { %v7289_v31 = vpack.c.bf16 %v7277_v6, %v7277_v6  ;;  %v7263_v24 = vpack.c.bf16 %v7251_v22, %v7251_v22 }
 0xf70   : > { %12460 = vmatmul.mubr.msk.bf16.vlgmr.msra.gmra.mrb[96].mxu1 %vm1894_vm1, %v7261_v43  ;;  %12466 = vmatmul.mubr.msk.bf16.vlgmr.msra.gmra.mrb[96].mxu0 %vm1894_vm1, %v7262_v63  ;;  %v7824_v9 = vsel %vm1894_vm1, %v7289_v31, 0 }
 0xf71   : > { %12470 = vmatpush3.bf16.xpose.msra.mxu1 %v7732_v62  ;;  %12476 = vmatpush3.bf16.xpose.msra.mxu0 %v7778_v4  ;;  %v7252_v50 = vld [vmem:[#allocation3 + $0x50] sm:$0xff]  ;;  %v7253_v11 = vld [vmem:[#allocation3 + $0x58] sm:$0xff] }
 0xf72   : > { %12471 = vmatprep.mubr.msk.bf16.mxu1 %vm14163_vm0, %v14162_v29  ;;  %12477 = vmatprep.mubr.msk.bf16.mxu0 %vm14163_vm0, %v14162_v29  ;;  %v7264_v61 = vpack.c.bf16 %v7252_v50, %v7252_v50  ;;  %v7265_v34 = vpack.c.bf16 %v7253_v11, %v7253_v11 }
 0xf73   : > { %12481 = vmatprep.subr.bf16.mxu1 %v14162_v29  ;;  %12487 = vmatprep.subr.bf16.mxu0 %v14162_v29 }
 0xf78   : > { %12472 = vmatmul.mubr.msk.bf16.vlgmr.msra.gmra.mrb[100].mxu1 %vm1894_vm1, %v7263_v24  ;;  %12478 = vmatmul.mubr.msk.bf16.vlgmr.msra.gmra.mrb[100].mxu0 %vm1894_vm1, %v7264_v61 }
 0xf79   : > { %12482 = vmatpush3.bf16.xpose.msra.mxu1 %v7824_v9  ;;  %12488 = vmatpush3.bf16.msra.mxu0 %v8014_v0 }
 0xf7a   : > { %12483 = vmatprep.mubr.msk.bf16.mxu1 %vm14163_vm0, %v14162_v29  ;;  %12493 = vmatprep.subr.bf16.mxu1 %v14162_v29 }
 0xf7b   : > { %12489 = vmatprep.mubr.msk.bf16.mxu0 %vm14163_vm0, %v14162_v29  ;;  %12499 = vmatprep.subr.bf16.mxu0 %v14162_v29 }
 0xf80   : > { %12484 = vmatmul.mubr.msk.bf16.vlgmr.msra.gmra.mrb[104].mxu1 %vm1894_vm1, %v7265_v34 }
 0xf81   : > { %12495 = vmatprep.mubr.msk.bf16.mxu1 %vm14163_vm0, %v14162_v29 }
 0xf89   : > { %v7354_v18 = vpop.f32.mrb[80].mxu0 }
 0xf8a   : > { %v7355_v1 = vadd.f32 %v7354_v18, %v15291_v16  ;;  %v12419_v20 = vpop.f32.mrb[81].mxu0 }
 0xf8b   : > { %v7357_v23 = vpop.f32.mrb[82].mxu0 }
 0xf8c   : > { %v12420_v25 = vpop.f32.mrb[83].mxu0  ;;  %v7866_v17 = vsel %vm2731_vm3, %v7355_v1, -inf }
 0xf8d   : > { %7867 = vmax.xlane.f32.xlu1 %v7866_v17 }
 0xf95   : > { %v7083_v52 = vpop.permute.xlu0 %7082 }
 0xf96   : > { %7085 = vst.msk [vmem:[#allocation5 + $0x8] sm:$0xff] %vm1894_vm1, %v7083_v52 }
 0xf9d   : > { %v7291_v45 = vld [vmem:[#allocation5 + $0x8] sm:$0xff] }
 0xf9e   : > { %v7303_v53 = vpack.c.bf16 %v7291_v45, %v7291_v45 }
 0xfa0   : > { %v8060_v57 = vsel %vm2879_vm2, %v7303_v53, 0 }
 0xfa1   : > { %12494 = vmatpush3.bf16.msra.mxu1 %v8060_v57 }
 0xfa2   : > { %12505 = vmatprep.subr.bf16.mxu1 %v14162_v29 }
 0xffc   : > { %v7400_v47 = vpop.f32.mrb[84].mxu1  ;;  %v7446_v58 = vpop.f32.mrb[84].mxu0 }
 0xffd   : > { %v15299_v33 = vadd.f32 %v7400_v47, %v15291_v16  ;;  %v12425_v2 = vpop.f32.mrb[85].mxu1  ;;  %v12431_v19 = vpop.f32.mrb[85].mxu0  ;;  %v15302_v41 = vadd.f32 %v7446_v58, %v15291_v16 }
 0xffe   : > { %v7403_v37 = vpop.f32.mrb[86].mxu1  ;;  %v7449_v40 = vpop.f32.mrb[86].mxu0 }
 0xfff   : > { %v12426_v12 = vpop.f32.mrb[87].mxu1  ;;  %v12432_v60 = vpop.f32.mrb[87].mxu0  ;;  %v7869_v10 = vsel %vm2731_vm3, %v15299_v33, -inf  ;;  %v7872_v51 = vsel %vm2731_vm3, %v15302_v41, -inf }
0x1000   : > { %7870 = vmax.xlane.f32.xlu0 %v7869_v10 }
0x1004   : > { %v7492_v36 = vpop.f32.mrb[88].mxu1  ;;  %7873 = vmax.xlane.f32.xlu0 %v7872_v51  ;;  %v7538_v5 = vpop.f32.mrb[88].mxu0 }
0x1005   : > { %v15309_v30 = vadd.f32 %v7492_v36, %v15291_v16  ;;  %v12437_v3 = vpop.f32.mrb[89].mxu1  ;;  %v12443_v43 = vpop.f32.mrb[89].mxu0  ;;  %v15320_v7 = vadd.f32 %v7538_v5, %v15291_v16 }
0x1006   : > { %v7495_v63 = vpop.f32.mrb[90].mxu1  ;;  %v7541_v62 = vpop.f32.mrb[90].mxu0 }
0x1007   : > { %v12438_v4 = vpop.f32.mrb[91].mxu1  ;;  %v12444_v6 = vpop.f32.mrb[91].mxu0  ;;  %v7875_v42 = vsel %vm2731_vm3, %v15309_v30, -inf }
0x1008   : > { %7876 = vmax.xlane.f32.xlu1 %v7875_v42 }
0x1019   : > { %7100 = vrot.lane.b32.xlu1 %v15210_v21, %s14164_s3 }
0x101a   : > { %7118 = vrot.lane.b32.xlu0 %v15210_v21, %s14166_s14  ;;  %v7868_v22 = vpop.xlane.xlu1 %7867  ;;  %v7878_v21 = vsel %vm2731_vm3, %v15320_v7, -inf }
0x101b   : > { %v7902_v50 = vsub.f32 %v7355_v1, %v7868_v22 }
0x101d   : > { %v7914_v31 = vmul.f32 1.442695, %v7902_v50 }
0x101e   : > { %7142 = vrot.lane.b32.xlu0 %v15214_v59, %s14165_s6 }
0x101f   : > { %13741 = vpow2.f32 %v7914_v31 }
0x1029   : > { %v15327_v34 = vpop.eup %13741 }
0x102a   : > { %v7938_v25 = vsel %vm2731_vm3, %v15327_v34, 0.0 }
0x103b   : > { %v7584_v24 = vpop.f32.mrb[92].mxu1  ;;  %v7630_v61 = vpop.f32.mrb[92].mxu0 }
0x103c   : > { %v15323_v9 = vadd.f32 %v7584_v24, %v15291_v16  ;;  %v12449_v0 = vpop.f32.mrb[93].mxu1  ;;  %v12455_v11 = vpop.f32.mrb[93].mxu0  ;;  %v15332_v23 = vadd.f32 %v7630_v61, %v15291_v16 }
0x103d   : > { %v7587_v15 = vpop.f32.mrb[94].mxu1  ;;  %7879 = vmax.xlane.f32.xlu0 %v7878_v21  ;;  %v7633_v32 = vpop.f32.mrb[94].mxu0 }
0x103e   : > { %v12450_v18 = vpop.f32.mrb[95].mxu1  ;;  %v12456_v1 = vpop.f32.mrb[95].mxu0  ;;  %v7881_v20 = vsel %vm2731_vm3, %v15323_v9, -inf  ;;  %v7884_v58 = vsel %vm2731_vm3, %v15332_v23, -inf }
0x103f   : > { %7882 = vmax.xlane.f32.xlu1 %v7881_v20 }
0x1041   : > { %7939 = vadd.xlane.f32.xlu0 %v7938_v25 }
0x1043   : > { %v7676_v17 = vpop.f32.mrb[96].mxu1  ;;  %v7722_v52 = vpop.f32.mrb[96].mxu0 }
0x1044   : > { %v15337_v45 = vadd.f32 %v7676_v17, %v15291_v16  ;;  %v15340_v53 = vadd.f32 %v7722_v52, %v15291_v16  ;;  %v12461_v57 = vpop.f32.mrb[97].mxu1  ;;  %v12467_v47 = vpop.f32.mrb[97].mxu0 }
0x1045   : > { %v7679_v2 = vpop.f32.mrb[98].mxu1  ;;  %7885 = vmax.xlane.f32.xlu0 %v7884_v58  ;;  %v7725_v19 = vpop.f32.mrb[98].mxu0 }
0x1046   : > { %v12462_v37 = vpop.f32.mrb[99].mxu1  ;;  %v12468_v40 = vpop.f32.mrb[99].mxu0  ;;  %v7887_v12 = vsel %vm2731_vm3, %v15337_v45, -inf  ;;  %v7890_v60 = vsel %vm2731_vm3, %v15340_v53, -inf }
0x1047   : > { %7888 = vmax.xlane.f32.xlu1 %v7887_v12 }
0x1049   : > { %7891 = vmax.xlane.f32.xlu0 %v7890_v60 }
0x104b   : > { %v7768_v10 = vpop.f32.mrb[100].mxu1  ;;  %v7814_v51 = vpop.f32.mrb[100].mxu0 }
0x104c   : > { %v15349_v36 = vadd.f32 %v7768_v10, %v15291_v16  ;;  %v15352_v5 = vadd.f32 %v7814_v51, %v15291_v16  ;;  %v12473_v3 = vpop.f32.mrb[101].mxu1  ;;  %v12479_v43 = vpop.f32.mrb[101].mxu0 }
0x104d   : > { %v7771_v63 = vpop.f32.mrb[102].mxu1  ;;  %v7817_v62 = vpop.f32.mrb[102].mxu0 }
0x104e   : > { %v12474_v4 = vpop.f32.mrb[103].mxu1  ;;  %v12480_v6 = vpop.f32.mrb[103].mxu0  ;;  %v7893_v42 = vsel %vm2731_vm3, %v15349_v36, -inf  ;;  %v7896_v22 = vsel %vm2731_vm3, %v15352_v5, -inf }
0x104f   : > { %7894 = vmax.xlane.f32.xlu1 %v7893_v42  ;;  %7897 = vmax.xlane.f32.xlu0 %v7896_v22 }
0x1053   : > { %v7860_v50 = vpop.f32.mrb[104].mxu1 }
0x1054   : > { %v15359_v31 = vadd.f32 %v7860_v50, %v15291_v16  ;;  %v12485_v24 = vpop.f32.mrb[105].mxu1 }
0x1055   : > { %v7863_v61 = vpop.f32.mrb[106].mxu1 }
0x1056   : > { %v12486_v0 = vpop.f32.mrb[107].mxu1  ;;  %v7899_v11 = vsel %vm2731_vm3, %v15359_v31, -inf }
0x1057   : > { %7900 = vmax.xlane.f32.xlu1 %v7899_v11 }
0x1065   : > { %7178 = vrot.lane.b32.xlu0 %v15214_v59, %s14166_s14 }
0x1068   : > { %7160 = vrot.lane.b32.xlu1 %v15214_v59, %s14164_s3 }
0x108d   : > { %v7871_v21 = vpop.xlane.xlu0 %7870 }
0x108e   : > { %v7903_v15 = vsub.f32 %v15299_v33, %v7871_v21 }
0x1090   : > { %v7916_v32 = vmul.f32 1.442695, %v7903_v15 }
0x1091   : > { %v7874_v18 = vpop.xlane.xlu0 %7873 }
0x1092   : > { %13743 = vpow2.f32 %v7916_v32  ;;  %v7904_v16 = vsub.f32 %v15302_v41, %v7874_v18 }
0x1094   : > { %v7918_v1 = vmul.f32 1.442695, %v7904_v16 }
0x1095   : > { %v7877_v20 = vpop.xlane.xlu1 %7876  ;;  %v7119_v25 = vpop.permute.xlu0 %7118 }
0x1096   : > { %13745 = vpow2.f32 %v7918_v1  ;;  %v7905_v17 = vsub.f32 %v15309_v30, %v7877_v20  ;;  %7121 = vst.msk [vmem:[#allocation5 + $0x18] sm:$0xff] %vm1894_vm1, %v7119_v25 }
0x1098   : > { %v7920_v52 = vmul.f32 1.442695, %v7905_v17 }
0x1099   : > { %v7101_v57 = vpop.permute.xlu1 %7100  ;;  %v7143_v47 = vpop.permute.xlu0 %7142 }
0x109a   : > { %13747 = vpow2.f32 %v7920_v52  ;;  %7103 = vst.msk [vmem:[#allocation5 + $0x10] sm:$0xff] %vm1894_vm1, %v7101_v57  ;;  %7145 = vst.msk [vmem:[#allocation5 + $0x28] sm:$0xff] %vm1894_vm1, %v7143_v47 }
0x109c   : > { %v15373_v59 = vpop.eup %13743 }
0x109d   : > { %v7941_v33 = vsel %vm2731_vm3, %v15373_v59, 0.0 }
0x109e   : > { %7942 = vadd.xlane.f32.xlu1 %v7941_v33 }
0x10a0   : > { %v15377_v41 = vpop.eup %13745 }
0x10a1   : > { %v7944_v30 = vsel %vm2731_vm3, %v15377_v41, 0.0  ;;  %v7292_v22 = vld [vmem:[#allocation5 + $0x10] sm:$0xff] }
0x10a2   : > { %7945 = vadd.xlane.f32.xlu0 %v7944_v30 }
0x10a4   : > { %v15381_v58 = vpop.eup %13747 }
0x10a5   : > { %v7947_v2 = vsel %vm2731_vm3, %v15381_v58, 0.0 }
0x10a6   : > { %7948 = vadd.xlane.f32.xlu1 %v7947_v2 }
0x10b8   : > { %7202 = vrot.lane.b32.xlu0 %v15161_v26, %s14165_s6 }
0x10ca   : > { %v7880_v19 = vpop.xlane.xlu0 %7879 }
0x10cb   : > { %v7906_v37 = vsub.f32 %v15320_v7, %v7880_v19 }
0x10cc   : > { %v7883_v40 = vpop.xlane.xlu1 %7882 }
0x10cd   : > { %v7922_v12 = vmul.f32 1.442695, %v7906_v37  ;;  %v7907_v60 = vsub.f32 %v15323_v9, %v7883_v40 }
0x10ce   : > { %v7940_v10 = vpop.xlane.xlu0 %7939 }
0x10cf   : > { %13749 = vpow2.f32 %v7922_v12  ;;  %v7924_v51 = vmul.f32 1.442695, %v7907_v60 }
0x10d0   : > { %13751 = vrcp.f32 %v7940_v10 }
0x10d1   : > { %13753 = vpow2.f32 %v7924_v51 }
0x10d2   : > { %v7886_v3 = vpop.xlane.xlu0 %7885 }
0x10d3   : > { %v7908_v43 = vsub.f32 %v15332_v23, %v7886_v3 }
0x10d4   : > { %v7889_v63 = vpop.xlane.xlu1 %7888 }
0x10d5   : > { %v7926_v62 = vmul.f32 1.442695, %v7908_v43  ;;  %v7909_v4 = vsub.f32 %v15337_v45, %v7889_v63  ;;  %v7304_v45 = vpack.c.bf16 %v7292_v22, %v7292_v22  ;;  %v7293_v63 = vld [vmem:[#allocation5 + $0x18] sm:$0xff] }
0x10d6   : > { %v7892_v6 = vpop.xlane.xlu0 %7891 }
0x10d7   : > { %13755 = vpow2.f32 %v7926_v62  ;;  %v7928_v42 = vmul.f32 1.442695, %v7909_v4  ;;  %v7910_v7 = vsub.f32 %v15340_v53, %v7892_v6  ;;  %v8106_v20 = vsel %vm2879_vm2, %v7304_v45, 0 }
0x10d8   : > { %v7305_v6 = vpack.c.bf16 %v7293_v63, %v7293_v63 }
0x10d9   : > { %v15392_v50 = vpop.eup %13749  ;;  %13757 = vpow2.f32 %v7928_v42  ;;  %v7930_v9 = vmul.f32 1.442695, %v7910_v7  ;;  %v7294_v42 = vld [vmem:[#allocation5 + $0x20] sm:$0xff] }
0x10da   : > { %v13752_v24 = vpop.eup %13751  ;;  %v7950_v61 = vsel %vm2731_vm3, %v15392_v50, 0.0 }
0x10db   : > { %v15396_v0 = vpop.eup %13753  ;;  %v7986_v23 = vmul.f32 %v13752_v24, %v15327_v34  ;;  %13759 = vpow2.f32 %v7930_v9  ;;  %7951 = vadd.xlane.f32.xlu1 %v7950_v61  ;;  %v7306_v24 = vpack.c.bf16 %v7294_v42, %v7294_v42  ;;  %v7295_v61 = vld [vmem:[#allocation5 + $0x28] sm:$0xff] }
0x10dc   : > { %v7895_v11 = vpop.xlane.xlu1 %7894  ;;  %v7898_v21 = vpop.xlane.xlu0 %7897  ;;  %v7953_v18 = vsel %vm2731_vm3, %v15396_v0, 0.0 }
0x10dd   : > { %v7911_v53 = vsub.f32 %v15349_v36, %v7895_v11  ;;  %v7912_v15 = vsub.f32 %v15352_v5, %v7898_v21  ;;  %v7998_v32 = vpack.c.bf16 %v7986_v23, %v7986_v23  ;;  %v7307_v11 = vpack.c.bf16 %v7295_v61, %v7295_v61 }
0x10df   : > { %v7932_v16 = vmul.f32 1.442695, %v7911_v53  ;;  %v7934_v1 = vmul.f32 1.442695, %v7912_v15  ;;  %12490 = vmatmul.mubr.msk.bf16.vlgmr.msra.gmra.mrb[104].mxu0 %vm2731_vm3, %v7998_v32  ;;  %7954 = vadd.xlane.f32.xlu1 %v7953_v18  ;;  %v8244_v53 = vsel %vm2879_vm2, %v7307_v11, 0 }
0x10e0   : > { %12500 = vmatpush3.bf16.msra.mxu0 %v8106_v20  ;;  %v7179_v34 = vpop.permute.xlu0 %7178  ;;  %12501 = vmatprep.mubr.msk.bf16.mxu0 %vm14163_vm0, %v14162_v29 }
0x10e1   : > { %v15407_v25 = vpop.eup %13755  ;;  %13761 = vpow2.f32 %v7932_v16  ;;  %7181 = vst.msk [vmem:[#allocation5 + $0x38] sm:$0xff] %vm1894_vm1, %v7179_v34  ;;  %12511 = vmatprep.subr.bf16.mxu0 %v14162_v29 }
0x10e2   : > { %13763 = vpow2.f32 %v7934_v1  ;;  %v7956_v36 = vsel %vm2731_vm3, %v15407_v25, 0.0 }
0x10e3   : > { %v15413_v5 = vpop.eup %13757  ;;  %7957 = vadd.xlane.f32.xlu0 %v7956_v36 }
0x10e4   : > { %v7901_v17 = vpop.xlane.xlu1 %7900  ;;  %v7959_v52 = vsel %vm2731_vm3, %v15413_v5, 0.0 }
0x10e5   : > { %v15417_v57 = vpop.eup %13759  ;;  %v7913_v47 = vsub.f32 %v15359_v31, %v7901_v17  ;;  %7960 = vadd.xlane.f32.xlu1 %v7959_v52 }
0x10e6   : > { %v7962_v2 = vsel %vm2731_vm3, %v15417_v57, 0.0 }
0x10e7   : > { %v7936_v33 = vmul.f32 1.442695, %v7913_v47 }
0x10e8   : > { %v7161_v30 = vpop.permute.xlu1 %7160  ;;  %v7297_v36 = vld [vmem:[#allocation5 + $0x38] sm:$0xff] }
0x10e9   : > { %13765 = vpow2.f32 %v7936_v33  ;;  %7163 = vst.msk [vmem:[#allocation5 + $0x30] sm:$0xff] %vm1894_vm1, %v7161_v30  ;;  %7963 = vadd.xlane.f32.xlu1 %v7962_v2  ;;  %v7309_v2 = vpack.c.bf16 %v7297_v36, %v7297_v36  ;;  %v13407_v36 = vld [vmem:[#allocation16] ss:$8 sps:$4 sm:$0xff]  }
0x10eb   : > { %v15423_v19 = vpop.eup %13761 }
0x10ec   : > { %v15425_v37 = vpop.eup %13763  ;;  %v7965_v40 = vsel %vm2731_vm3, %v15423_v19, 0.0 }
0x10ed   : > { %7966 = vadd.xlane.f32.xlu1 %v7965_v40  ;;  %v7968_v31 = vsel %vm2731_vm3, %v15425_v37, 0.0  ;;  %v7298_v40 = vld [vmem:[#allocation5 + $0x40] sm:$0xff] }
0x10ee   : > { %7969 = vadd.xlane.f32.xlu0 %v7968_v31 }
0x10f0   : > { %v7296_v18 = vld [vmem:[#allocation5 + $0x30] sm:$0xff] }
0x10f1   : > { %v7308_v34 = vpack.c.bf16 %v7296_v18, %v7296_v18 }
0x10f3   : > { %v15431_v12 = vpop.eup %13765  ;;  %v8290_v30 = vsel %vm2879_vm2, %v7308_v34, 0 }
0x10f4   : > { %v7971_v60 = vsel %vm2731_vm3, %v15431_v12, 0.0 }
0x10f5   : > { %7972 = vadd.xlane.f32.xlu1 %v7971_v60 }
0x1104   : > { %7238 = vrot.lane.b32.xlu0 %v15161_v26, %s14166_s14 }
0x1106   : > { %7220 = vrot.lane.b32.xlu1 %v15161_v26, %s14164_s3  ;;  %v8152_v26 = vsel %vm2879_vm2, %v7305_v6, 0 }
0x112b   : > { %v7943_v10 = vpop.xlane.xlu1 %7942 }
0x112c   : > { %13767 = vrcp.f32 %v7943_v10 }
0x112f   : > { %v7946_v51 = vpop.xlane.xlu0 %7945 }
0x1130   : > { %13769 = vrcp.f32 %v7946_v51 }
0x1133   : > { %v7949_v3 = vpop.xlane.xlu1 %7948  ;;  %v7203_v43 = vpop.permute.xlu0 %7202 }
0x1134   : > { %13771 = vrcp.f32 %v7949_v3  ;;  %7205 = vst.msk [vmem:[#allocation5 + $0x48] sm:$0xff] %vm1894_vm1, %v7203_v43  ;;  %v7310_v3 = vpack.c.bf16 %v7298_v40, %v7298_v40  ;;  %v13413_v40 = vld [vmem:[#allocation16 + $0x20] ss:$8 sps:$4 sm:$0xff]  }
0x1136   : > { %v13768_v62 = vpop.eup %13767 }
0x1137   : > { %v7987_v4 = vmul.f32 %v13768_v62, %v15373_v59 }
0x1139   : > { %v7999_v7 = vpack.c.bf16 %v7987_v4, %v7987_v4 }
0x113a   : > { %v13770_v22 = vpop.eup %13769 }
0x113b   : > { %v7988_v9 = vmul.f32 %v13770_v22, %v15377_v41  ;;  %12496 = vmatmul.mubr.msk.bf16.vlgmr.msra.gmra.mrb[108].mxu1 %vm2731_vm3, %v7999_v7  ;;  %v8198_v41 = vsel %vm2879_vm2, %v7306_v24, 0  ;;  %v7299_v63 = vld [vmem:[#allocation5 + $0x48] sm:$0xff] }
0x113c   : > { %12506 = vmatpush3.bf16.msra.mxu1 %v8152_v26  ;;  %12507 = vmatprep.mubr.msk.bf16.mxu1 %vm14163_vm0, %v14162_v29  ;;  %v7311_v42 = vpack.c.bf16 %v7299_v63, %v7299_v63 }
0x113d   : > { %v8000_v23 = vpack.c.bf16 %v7988_v9, %v7988_v9  ;;  %12517 = vmatprep.subr.bf16.mxu1 %v14162_v29 }
0x113e   : > { %v13772_v59 = vpop.eup %13771  ;;  %v8428_v26 = vsel %vm2879_vm2, %v7311_v42, 0  ;;  %v13422_v42 = vld [vmem:[#allocation16 + $0x50] ss:$8 sps:$4 sm:$0xff]  }
0x113f   : > { %v7989_v45 = vmul.f32 %v13772_v59, %v15381_v58  ;;  %12502 = vmatmul.mubr.msk.bf16.vlgmr.msra.gmra.mrb[108].mxu0 %vm2731_vm3, %v8000_v23 }
0x1140   : > { %12512 = vmatpush3.bf16.msra.mxu0 %v8198_v41  ;;  %12513 = vmatprep.mubr.msk.bf16.mxu0 %vm14163_vm0, %v14162_v29 }
0x1141   : > { %v8001_v21 = vpack.c.bf16 %v7989_v45, %v7989_v45  ;;  %12523 = vmatprep.subr.bf16.mxu0 %v14162_v29 }
0x1143   : > { %12508 = vmatmul.mubr.msk.bf16.vlgmr.msra.gmra.mrb[112].mxu1 %vm2731_vm3, %v8001_v21 }
0x1144   : > { %12518 = vmatpush3.bf16.msra.mxu1 %v8244_v53  ;;  %12519 = vmatprep.mubr.msk.bf16.mxu1 %vm14163_vm0, %v14162_v29 }
0x1145   : > { %12529 = vmatprep.subr.bf16.mxu1 %v14162_v29 }
0x1168   : > { %v7952_v58 = vpop.xlane.xlu1 %7951 }
0x1169   : > { %13773 = vrcp.f32 %v7952_v58 }
0x116c   : > { %v7955_v15 = vpop.xlane.xlu1 %7954 }
0x116d   : > { %13775 = vrcp.f32 %v7955_v15 }
0x1170   : > { %v7958_v32 = vpop.xlane.xlu0 %7957 }
0x1171   : > { %13777 = vrcp.f32 %v7958_v32 }
0x1172   : > { %v7961_v16 = vpop.xlane.xlu1 %7960 }
0x1173   : > { %v13774_v1 = vpop.eup %13773  ;;  %13779 = vrcp.f32 %v7961_v16 }
0x1174   : > { %v7990_v20 = vmul.f32 %v13774_v1, %v15392_v50 }
0x1176   : > { %v7964_v17 = vpop.xlane.xlu1 %7963  ;;  %v8002_v52 = vpack.c.bf16 %v7990_v20, %v7990_v20 }
0x1177   : > { %v13776_v47 = vpop.eup %13775  ;;  %13781 = vrcp.f32 %v7964_v17  ;;  %v13412_v17 = vld [vmem:[#allocation16 + $0x14] ss:$8 sps:$4 sm:$0xff]  }
0x1178   : > { %v7991_v33 = vmul.f32 %v13776_v47, %v15396_v0  ;;  %12514 = vmatmul.mubr.msk.bf16.vlgmr.msra.gmra.mrb[112].mxu0 %vm2731_vm3, %v8002_v52  ;;  %v8336_v0 = vsel %vm2879_vm2, %v7309_v2, 0  ;;  %v13410_v52 = vld [vmem:[#allocation16 + $0x10] ss:$8 sps:$4 sm:$0xff]  }
0x1179   : > { %12524 = vmatpush3.bf16.msra.mxu0 %v8290_v30  ;;  %12525 = vmatprep.mubr.msk.bf16.mxu0 %vm14163_vm0, %v14162_v29 }
0x117a   : > { %v7967_v31 = vpop.xlane.xlu1 %7966  ;;  %v8003_v50 = vpack.c.bf16 %v7991_v33, %v7991_v33  ;;  %12535 = vmatprep.subr.bf16.mxu0 %v14162_v29  ;;  %v13415_v33 = vld [vmem:[#allocation16 + $0x24] ss:$8 sps:$4 sm:$0xff]  }
0x117b   : > { %v13778_v60 = vpop.eup %13777  ;;  %13783 = vrcp.f32 %v7967_v31  ;;  %v7970_v10 = vpop.xlane.xlu0 %7969 }
0x117c   : > { %v7992_v51 = vmul.f32 %v13778_v60, %v15407_v25  ;;  %12520 = vmatmul.mubr.msk.bf16.vlgmr.msra.gmra.mrb[116].mxu1 %vm2731_vm3, %v8003_v50  ;;  %v8382_v25 = vsel %vm2879_vm2, %v7310_v3, 0  ;;  %13785 = vrcp.f32 %v7970_v10  ;;  %v13418_v50 = vld [vmem:[#allocation16 + $0x34] ss:$8 sps:$4 sm:$0xff]  }
0x117d   : > { %v13780_v43 = vpop.eup %13779  ;;  %12530 = vmatpush3.bf16.msra.mxu1 %v8336_v0  ;;  %12531 = vmatprep.mubr.msk.bf16.mxu1 %vm14163_vm0, %v14162_v29  ;;  %v13416_v0 = vld [vmem:[#allocation16 + $0x30] ss:$8 sps:$4 sm:$0xff]  }
0x117e   : > { %v7993_v62 = vmul.f32 %v13780_v43, %v15413_v5  ;;  %v8004_v4 = vpack.c.bf16 %v7992_v51, %v7992_v51  ;;  %12541 = vmatprep.subr.bf16.mxu1 %v14162_v29  ;;  %v13421_v43 = vld [vmem:[#allocation16 + $0x44] ss:$8 sps:$4 sm:$0xff]  }
0x117f   : > { %v7239_v6 = vpop.permute.xlu0 %7238 }
0x1180   : > { %7241 = vst.msk [vmem:[#allocation5 + $0x58] sm:$0xff] %vm1894_vm1, %v7239_v6  ;;  %12526 = vmatmul.mubr.msk.bf16.vlgmr.msra.gmra.mrb[116].mxu0 %vm2731_vm3, %v8004_v4  ;;  %v8005_v9 = vpack.c.bf16 %v7993_v62, %v7993_v62  ;;  %v13419_v6 = vld [vmem:[#allocation16 + $0x40] ss:$8 sps:$4 sm:$0xff]  }
0x1181   : > { %v13782_v7 = vpop.eup %13781  ;;  %12536 = vmatpush3.bf16.msra.mxu0 %v8382_v25  ;;  %12537 = vmatprep.mubr.msk.bf16.mxu0 %vm14163_vm0, %v14162_v29  ;;  %v13424_v25 = vld [vmem:[#allocation16 + $0x54] ss:$8 sps:$4 sm:$0xff]  }
0x1182   : > { %v7994_v22 = vmul.f32 %v13782_v7, %v15417_v57  ;;  %v7973_v5 = vpop.xlane.xlu1 %7972  ;;  %12547 = vmatprep.subr.bf16.mxu0 %v14162_v29  ;;  %v13427_v7 = vld [vmem:[#allocation16 + $0x64] ss:$8 sps:$4 sm:$0xff]  }
0x1183   : > { %13787 = vrcp.f32 %v7973_v5  ;;  %v13430_v5 = vld [vmem:[#allocation16 + $0x74] ss:$8 sps:$4 sm:$0xff]  }
0x1184   : > { %12532 = vmatmul.mubr.msk.bf16.vlgmr.msra.gmra.mrb[120].mxu1 %vm2731_vm3, %v8005_v9  ;;  %v8006_v59 = vpack.c.bf16 %v7994_v22, %v7994_v22  ;;  %v13425_v22 = vld [vmem:[#allocation16 + $0x60] ss:$8 sps:$4 sm:$0xff]   ;;  %v13428_v9 = vld [vmem:[#allocation16 + $0x70] ss:$8 sps:$4 sm:$0xff]  }
0x1185   : > { %v13784_v24 = vpop.eup %13783  ;;  %12542 = vmatpush3.bf16.msra.mxu1 %v8428_v26  ;;  %12543 = vmatprep.mubr.msk.bf16.mxu1 %vm14163_vm0, %v14162_v29  ;;  %v13433_v26 = vld [vmem:[#allocation16 + $0x84] ss:$8 sps:$4 sm:$0xff]  }
0x1186   : > { %v7995_v61 = vmul.f32 %v13784_v24, %v15423_v19  ;;  %v7221_v23 = vpop.permute.xlu1 %7220  ;;  %12553 = vmatprep.subr.bf16.mxu1 %v14162_v29  ;;  %v13786_v11 = vpop.eup %13785  ;;  %v13431_v24 = vld [vmem:[#allocation16 + $0x80] ss:$8 sps:$4 sm:$0xff]  }
0x1187   : > { %7223 = vst.msk [vmem:[#allocation5 + $0x50] sm:$0xff] %vm1894_vm1, %v7221_v23  ;;  %v7301_v57 = vld [vmem:[#allocation5 + $0x58] sm:$0xff]  ;;  %v7996_v15 = vmul.f32 %v13786_v11, %v15425_v37  ;;  %v13409_v37 = vld [vmem:[#allocation16 + $0x4] ss:$8 sps:$4 sm:$0xff]   ;;  %v13443_v11 = vld [vmem:[#allocation16 + $0xc0] ss:$8 sps:$4 sm:$0xff]  }
0x1188   : > { %12538 = vmatmul.mubr.msk.bf16.vlgmr.msra.gmra.mrb[120].mxu0 %vm2731_vm3, %v8006_v59  ;;  %v7313_v45 = vpack.c.bf16 %v7301_v57, %v7301_v57  ;;  %v8007_v41 = vpack.c.bf16 %v7995_v61, %v7995_v61  ;;  %v13436_v61 = vld [vmem:[#allocation16 + $0x94] ss:$8 sps:$4 sm:$0xff]   ;;  %v13434_v23 = vld [vmem:[#allocation16 + $0x90] ss:$8 sps:$4 sm:$0xff]   ;;  %v13439_v59 = vld [vmem:[#allocation16 + $0xa4] ss:$8 sps:$4 sm:$0xff]  }
0x1189   : > { %12549 = vmatprep.mubr.msk.bf16.mxu0 %vm14163_vm0, %v14162_v29  ;;  %v8008_v1 = vpack.c.bf16 %v7996_v15, %v7996_v15  ;;  %v13437_v57 = vld [vmem:[#allocation16 + $0xa0] ss:$8 sps:$4 sm:$0xff]   ;;  %v13451_v15 = vld [vmem:[#allocation16 + $0xd4] ss:$8 sps:$4 sm:$0xff]  }
0x118a   : > { %v8520_v21 = vsel %vm2879_vm2, %v7313_v45, 0  ;;  %v13442_v45 = vld [vmem:[#allocation16 + $0xb4] ss:$8 sps:$4 sm:$0xff]  }
0x118c   : > { %12544 = vmatmul.mubr.msk.bf16.vlgmr.msra.gmra.mrb[124].mxu1 %vm2731_vm3, %v8007_v41  ;;  %v13440_v41 = vld [vmem:[#allocation16 + $0xb0] ss:$8 sps:$4 sm:$0xff]  }
0x118d   : > { %v13788_v19 = vpop.eup %13787  ;;  %12554 = vmatpush3.bf16.msra.mxu1 %v8520_v21  ;;  %12555 = vmatprep.mubr.msk.bf16.mxu1 %vm14163_vm0, %v14162_v29  ;;  %v13445_v21 = vld [vmem:[#allocation16 + $0xc4] ss:$8 sps:$4 sm:$0xff]  }
0x118e   : > { %v7997_v53 = vmul.f32 %v13788_v19, %v15431_v12  ;;  %v7300_v58 = vld [vmem:[#allocation5 + $0x50] sm:$0xff]  ;;  %v13446_v19 = vld [vmem:[#allocation16 + $0x100] ss:$8 sps:$4 sm:$0xff]  }
0x118f   : > { %v7312_v32 = vpack.c.bf16 %v7300_v58, %v7300_v58  ;;  %v13449_v58 = vld [vmem:[#allocation16 + $0xd0] ss:$8 sps:$4 sm:$0xff]  }
0x1190   : > { %v8009_v16 = vpack.c.bf16 %v7997_v53, %v7997_v53  ;;  %v13448_v53 = vld [vmem:[#allocation16 + $0x104] ss:$8 sps:$4 sm:$0xff]  }
0x1191   : > { %v8474_v18 = vsel %vm2879_vm2, %v7312_v32, 0  ;;  %8957 = vmatprep.subr.bf16.mxu1 %v13448_v53 }
0x1192   : > { %12548 = vmatpush3.bf16.msra.mxu0 %v8474_v18  ;;  %v13452_v18 = vld [vmem:[#allocation16 + $0x110] ss:$8 sps:$4 sm:$0xff]  }
0x1193   : > { %8916 = vmatprep.subr.bf16.mxu0 %v13409_v37  ;;  %v13458_v37 = vld [vmem:[#allocation16 + $0x120] ss:$8 sps:$4 sm:$0xff]  }
0x1194   : > { %12556 = vmatmul.mubr.msk.bf16.vlgmr.msra.gmra.mrb[128].mxu1 %vm2731_vm3, %v8009_v16  ;;  %v13454_v16 = vld [vmem:[#allocation16 + $0x114] ss:$8 sps:$4 sm:$0xff]  }
0x1195   : > { %12550 = vmatmul.mubr.msk.bf16.vlgmr.msra.gmra.mrb[124].mxu0 %vm2731_vm3, %v8008_v1  ;;  %8989 = vmatprep.mubr.bf16.mxu1 %v14167_v56 }
0x1196   : > { %8917 = vmatpush1.bf16.msra.mxu0 %v13407_v36  ;;  %8958 = vmatpush1.bf16.msra.mxu1 %v13446_v19 }
0x1197   : > { %8918 = vmatprep.subr.bf16.mxu0 %v13412_v17  ;;  %8959 = vmatprep.subr.bf16.mxu1 %v13454_v16  ;;  %v13463_v17 = vld [vmem:[#allocation16 + $0xf4] ss:$8 sps:$4 sm:$0xff]  }
0x119a   : > { %8919 = vmatpush1.bf16.msra.mxu0 %v13410_v52  ;;  %8960 = vmatpush1.bf16.msra.mxu1 %v13452_v18 }
0x119b   : > { %8920 = vmatprep.subr.bf16.mxu0 %v13415_v33 }
0x119e   : > { %8921 = vmatpush1.bf16.msra.mxu0 %v13413_v40  ;;  %v13464_v40 = vld [vmem:[#allocation16 + $0x130] ss:$8 sps:$4 sm:$0xff]  }
0x119f   : > { %8922 = vmatprep.subr.bf16.mxu0 %v13418_v50 }
0x11a2   : > { %8923 = vmatpush1.bf16.msra.mxu0 %v13416_v0  ;;  %v13469_v0 = vld [vmem:[#allocation16 + $0x144] ss:$8 sps:$4 sm:$0xff]  }
0x11a3   : > { %8924 = vmatprep.subr.bf16.mxu0 %v13421_v43 }
0x11a6   : > { %8925 = vmatpush1.bf16.msra.mxu0 %v13419_v6  ;;  %v13472_v6 = vld [vmem:[#allocation16 + $0x154] ss:$8 sps:$4 sm:$0xff]  }
0x11a7   : > { %8926 = vmatprep.subr.bf16.mxu0 %v13424_v25 }
0x11aa   : > { %8927 = vmatpush1.bf16.msra.mxu0 %v13422_v42 }
0x11ab   : > { %8928 = vmatprep.subr.bf16.mxu0 %v13427_v7 }
0x11ae   : > { %8929 = vmatpush1.bf16.msra.mxu0 %v13425_v22  ;;  %v13475_v22 = vld [vmem:[#allocation16 + $0x164] ss:$8 sps:$4 sm:$0xff]  }
0x11af   : > { %8930 = vmatprep.subr.bf16.mxu0 %v13430_v5 }
0x11b2   : > { %v8050_v20 = vpop.f32.mrb[104].mxu0  ;;  %8931 = vmatpush1.bf16.msra.mxu0 %v13428_v9  ;;  %v13473_v9 = vld [vmem:[#allocation16 + $0x160] ss:$8 sps:$4 sm:$0xff]  }
0x11b3   : > { %8562 = vst.msk [vmem:[#allocation6] sm:$0xff] %vm1894_vm1, %v8050_v20  ;;  %v12491_v29 = vpop.f32.mrb[105].mxu0  ;;  %8932 = vmatprep.subr.bf16.mxu0 %v13433_v26  ;;  %v13455_v20 = vld [vmem:[#allocation16 + $0xe0] ss:$8 sps:$4 sm:$0xff]  }
0x11b4   : > { %v8053_v12 = vpop.f32.mrb[106].mxu0  ;;  %v13457_v29 = vld [vmem:[#allocation16 + $0xe4] ss:$8 sps:$4 sm:$0xff]  }
0x11b5   : > { %v12492_v34 = vpop.f32.mrb[107].mxu0 }
0x11b6   : > { %8933 = vmatpush1.bf16.msra.mxu0 %v13431_v24  ;;  %v13460_v34 = vld [vmem:[#allocation16 + $0x124] ss:$8 sps:$4 sm:$0xff]   ;;  %v13478_v24 = vld [vmem:[#allocation16 + $0x174] ss:$8 sps:$4 sm:$0xff]  }
0x11b7   : > { %8934 = vmatprep.subr.bf16.mxu0 %v13436_v61  ;;  %8961 = vmatprep.subr.bf16.mxu1 %v13460_v34 }
0x11b8   : > { %8962 = vmatpush1.bf16.msra.mxu1 %v13458_v37 }
0x11ba   : > { %8935 = vmatpush1.bf16.msra.mxu0 %v13434_v23 }
0x11bb   : > { %8936 = vmatprep.subr.bf16.mxu0 %v13439_v59 }
0x11be   : > { %8937 = vmatpush1.bf16.msra.mxu0 %v13437_v57  ;;  %v13476_v57 = vld [vmem:[#allocation16 + $0x170] ss:$8 sps:$4 sm:$0xff]  }
0x11bf   : > { %8938 = vmatprep.subr.bf16.mxu0 %v13442_v45 }
0x11c2   : > { %8939 = vmatpush1.bf16.msra.mxu0 %v13440_v41  ;;  %v15509_v41 = vld [vmem:[#allocation19] sm:$0xff] }
0x11c3   : > { %8940 = vmatprep.subr.bf16.mxu0 %v13445_v21  ;;  %v9003_v21 = vld [vmem:[#allocation19 + $0x8] sm:$0xff] }
0x11c6   : > { %8941 = vmatpush1.bf16.msra.mxu0 %v13443_v11  ;;  %v15511_v11 = vld [vmem:[#allocation19 + $0x20] sm:$0xff] }
0x11c7   : > { %8942 = vmatprep.subr.bf16.mxu0 %v13451_v15  ;;  %v11869_v15 = vcombine.high %v15509_v41, %v15511_v11 }
0x11ca   : > { %8943 = vmatpush1.bf16.msra.mxu0 %v13449_v58  ;;  %v11868_v58 = vcombine.low %v15509_v41, %v15511_v11  ;;  %v9071_v41 = vld [vmem:[#allocation19 + $0x228] sm:$0xff]  ;;  %v9034_v11 = vld [vmem:[#allocation19 + $0x100] sm:$0xff] }
0x11cb   : > { %8944 = vmatprep.subr.bf16.mxu0 %v13457_v29 }
0x11ce   : > { %8945 = vmatpush1.bf16.msra.mxu0 %v13455_v20 }
0x11cf   : > { %8946 = vmatprep.subr.bf16.mxu0 %v13463_v17 }
0x120e   : > { %v8096_v47 = vpop.f32.mrb[108].mxu1 }
0x120f   : > { %v12497_v30 = vpop.f32.mrb[109].mxu1  ;;  %8564 = vrot.lane.b32.xlu1 %v8096_v47, %s14166_s14  ;;  %v13461_v47 = vld [vmem:[#allocation16 + $0xf0] ss:$8 sps:$4 sm:$0xff]  }
0x1210   : > { %v8099_v2 = vpop.f32.mrb[110].mxu1  ;;  %8947 = vmatpush1.bf16.msra.mxu0 %v13461_v47 }
0x1211   : > { %v12498_v56 = vpop.f32.mrb[111].mxu1 }
0x1212   : > { %v8142_v31 = vpop.f32.mrb[108].mxu0 }
0x1213   : > { %8569 = vrot.lane.b32.xlu1 %v8142_v31, %s14164_s3  ;;  %v12503_v60 = vpop.f32.mrb[109].mxu0  ;;  %v13466_v31 = vld [vmem:[#allocation16 + $0x134] ss:$8 sps:$4 sm:$0xff]  }
0x1214   : > { %v8145_v10 = vpop.f32.mrb[110].mxu0  ;;  %8963 = vmatprep.subr.bf16.mxu1 %v13466_v31 }
0x1215   : > { %v12504_v51 = vpop.f32.mrb[111].mxu0  ;;  %8964 = vmatpush1.bf16.msra.mxu1 %v13464_v40 }
0x1216   : > { %v8188_v3 = vpop.f32.mrb[112].mxu1  ;;  %v13467_v51 = vld [vmem:[#allocation16 + $0x140] ss:$8 sps:$4 sm:$0xff]   ;;  %8965 = vmatprep.subr.bf16.mxu1 %v13469_v0 }
0x1217   : > { %v12509_v63 = vpop.f32.mrb[113].mxu1  ;;  %8574 = vrot.lane.b32.xlu1 %v8188_v3, %s14165_s6  ;;  %v9023_v0 = vld [vmem:[#allocation19 + $0xa8] sm:$0xff] }
0x1218   : > { %v8191_v62 = vpop.f32.mrb[114].mxu1 }
0x1219   : > { %v12510_v4 = vpop.f32.mrb[115].mxu1  ;;  %8966 = vmatpush1.bf16.msra.mxu1 %v13467_v51  ;;  %v9019_v51 = vld [vmem:[#allocation19 + $0x88] sm:$0xff] }
0x121a   : > { %v13470_v4 = vld [vmem:[#allocation16 + $0x150] ss:$8 sps:$4 sm:$0xff]   ;;  %8967 = vmatprep.subr.bf16.mxu1 %v13472_v6  ;;  %v11886_v6 = vcombine.low %v9019_v51, %v9023_v0 }
0x121d   : > { %8968 = vmatpush1.bf16.msra.mxu1 %v13470_v4 }
0x121e   : > { %8969 = vmatprep.subr.bf16.mxu1 %v13475_v22  ;;  %v9039_v22 = vld [vmem:[#allocation19 + $0x128] sm:$0xff] }
0x1221   : > { %8970 = vmatpush1.bf16.msra.mxu1 %v13473_v9 }
0x1222   : > { %8971 = vmatprep.subr.bf16.mxu1 %v13478_v24  ;;  %v9047_v24 = vld [vmem:[#allocation19 + $0x168] sm:$0xff] }
0x1225   : > { %8972 = vmatpush1.bf16.msra.mxu1 %v13476_v57 }
0x1226   : > { %9812 = vmatprep.subr.bf16.mxu1 %v11869_v15  ;;  %v9055_v15 = vld [vmem:[#allocation19 + $0x1a8] sm:$0xff] }
0x124b   : > { %v8234_v32 = vpop.f32.mrb[112].mxu0 }
0x124c   : > { %8578 = vst.msk [vmem:[#allocation6 + $0x8] sm:$0xff] %vm1894_vm1, %v8234_v32  ;;  %v12515_v1 = vpop.f32.mrb[113].mxu0  ;;  %v9007_v32 = vld [vmem:[#allocation19 + $0x28] sm:$0xff] }
0x124d   : > { %v8237_v12 = vpop.f32.mrb[114].mxu0  ;;  %v11870_v1 = vcombine.low %v9003_v21, %v9007_v32  ;;  %v11871_v20 = vcombine.high %v9003_v21, %v9007_v32  ;;  %v9018_v32 = vld [vmem:[#allocation19 + $0x80] sm:$0xff] }
0x124e   : > { %v12516_v36 = vpop.f32.mrb[115].mxu0 }
0x124f   : > { %v8280_v52 = vpop.f32.mrb[116].mxu1  ;;  %9853 = vmatprep.subr.bf16.mxu0 %v11871_v20 }
0x1250   : > { %v12521_v33 = vpop.f32.mrb[117].mxu1  ;;  %8580 = vrot.lane.b32.xlu0 %v8280_v52, %s14166_s14 }
0x1251   : > { %v8283_v30 = vpop.f32.mrb[118].mxu1 }
0x1252   : > { %v12522_v2 = vpop.f32.mrb[119].mxu1 }
0x1253   : > { %v8326_v56 = vpop.f32.mrb[116].mxu0  ;;  %v9011_v2 = vld [vmem:[#allocation19 + $0x48] sm:$0xff] }
0x1254   : > { %8585 = vrot.lane.b32.xlu0 %v8326_v56, %s14164_s3  ;;  %v12527_v50 = vpop.f32.mrb[117].mxu0  ;;  %v9015_v56 = vld [vmem:[#allocation19 + $0x68] sm:$0xff] }
0x1255   : > { %v8329_v60 = vpop.f32.mrb[118].mxu0 }
0x1256   : > { %v12528_v10 = vpop.f32.mrb[119].mxu0 }
0x1257   : > { %v8372_v3 = vpop.f32.mrb[120].mxu1  ;;  %v11879_v10 = vcombine.high %v9011_v2, %v9015_v56 }
0x1258   : > { %v12533_v43 = vpop.f32.mrb[121].mxu1  ;;  %8590 = vrot.lane.b32.xlu0 %v8372_v3, %s14165_s6  ;;  %v11878_v3 = vcombine.low %v9011_v2, %v9015_v56 }
0x1259   : > { %v8375_v63 = vpop.f32.mrb[122].mxu1  ;;  %v11887_v43 = vcombine.high %v9019_v51, %v9023_v0  ;;  %v9046_v51 = vld [vmem:[#allocation19 + $0x160] sm:$0xff] }
0x125a   : > { %v12534_v62 = vpop.f32.mrb[123].mxu1  ;;  %v9027_v63 = vld [vmem:[#allocation19 + $0xc8] sm:$0xff] }
0x125b   : > { %v8418_v25 = vpop.f32.mrb[120].mxu0  ;;  %v9031_v62 = vld [vmem:[#allocation19 + $0xe8] sm:$0xff] }
0x125c   : > { %8594 = vst.msk [vmem:[#allocation6 + $0x10] sm:$0xff] %vm1894_vm1, %v8418_v25  ;;  %v12539_v42 = vpop.f32.mrb[121].mxu0 }
0x125d   : > { %v8421_v7 = vpop.f32.mrb[122].mxu0  ;;  %v11895_v42 = vcombine.high %v9027_v63, %v9031_v62 }
0x125e   : > { %v12540_v5 = vpop.f32.mrb[123].mxu0  ;;  %v9035_v7 = vld [vmem:[#allocation19 + $0x108] sm:$0xff] }
0x125f   : > { %v8464_v26 = vpop.f32.mrb[124].mxu1  ;;  %v11894_v5 = vcombine.low %v9027_v63, %v9031_v62  ;;  %v11903_v9 = vcombine.high %v9035_v7, %v9039_v22  ;;  %v9050_v62 = vld [vmem:[#allocation19 + $0x180] sm:$0xff] }
0x1260   : > { %v12545_v61 = vpop.f32.mrb[125].mxu1  ;;  %8596 = vrot.lane.b32.xlu0 %v8464_v26, %s14166_s14  ;;  %v9043_v26 = vld [vmem:[#allocation19 + $0x148] sm:$0xff]  ;;  %s14169_s14 = smov [#allocation22]  }
0x1261   : > { %v8467_v23 = vpop.f32.mrb[126].mxu1  ;;  %v9010_v61 = vld [vmem:[#allocation19 + $0x40] sm:$0xff]  ;;  %s14067_s22 = sshll.u32 %s14169_s14, 4  ;;  %s14068_s22 = int_to_ptr.vmem [resolvable:$false] %s14067_s22 }
0x1262   : > { %v12546_v59 = vpop.f32.mrb[127].mxu1  ;;  %v9014_v23 = vld [vmem:[#allocation19 + $0x60] sm:$0xff]  ;;  %s14069_s1 = scalar_lea.vmem %s14068_s22, 512  ;;  %p14070_p13 = scmp.lt.s32.totalorder %s15601_s21, %s14068_s22 }
0x1263   : > { %v11902_v59 = vcombine.low %v9035_v7, %v9039_v22  ;;  %v9058_v7 = vld [vmem:[#allocation19 + $0x1c0] sm:$0xff]  ;;  %p14071_p3 = scmp.lt.s32.totalorder %s14069_s1, %s14063_s20 }
0x1264   : > { %v9062_v22 = vld [vmem:[#allocation19 + $0x1e0] sm:$0xff] }
0x1265   : > { %p14072_p7 = por %p14071_p3, %p14070_p13 }
0x1267   : > { %v8556_v45 = vpop.f32.mrb[128].mxu1  ;;  %p14073_p9 = pnand %p14072_p7, %p14066_p12 }
0x1268   : > { %v12557_v19 = vpop.f32.mrb[129].mxu1  ;;  %8606 = vrot.lane.b32.xlu0 %v8556_v45, %s14165_s6  ;;  %v8510_v53 = vpop.f32.mrb[124].mxu0  ;;  %v11911_v45 = vcombine.high %v9043_v26, %v9047_v24 }
0x1269   : > { %v8559_v18 = vpop.f32.mrb[130].mxu1  ;;  %8601 = vrot.lane.b32.xlu1 %v8510_v53, %s14164_s3  ;;  %v12551_v16 = vpop.f32.mrb[125].mxu0  ;;  %v11877_v19 = vcombine.high %v9010_v61, %v9014_v23  ;;  %v9051_v53 = vld [vmem:[#allocation19 + $0x188] sm:$0xff]  ;;  %s15715_s3 = sld [smem:[#allocation39_spill]] }
0x126a   : > { %v8513_v29 = vpop.f32.mrb[126].mxu0  ;;  %v12558_v12 = vpop.f32.mrb[131].mxu1  ;;  %v9022_v18 = vld [vmem:[#allocation19 + $0xa0] sm:$0xff]  ;;  %v11910_v16 = vcombine.low %v9043_v26, %v9047_v24  ;;  %v11919_v20 = vcombine.high %v9051_v53, %v9055_v15 }
0x126b   : > { %v12552_v34 = vpop.f32.mrb[127].mxu0  ;;  %v11885_v29 = vcombine.high %v9018_v32, %v9022_v18  ;;  %v9059_v12 = vld [vmem:[#allocation19 + $0x1c8] sm:$0xff]  ;;  %v9066_v26 = vld [vmem:[#allocation19 + $0x200] sm:$0xff] }
0x126c   : > { %v9063_v34 = vld [vmem:[#allocation19 + $0x1e8] sm:$0xff]  ;;  %v9070_v24 = vld [vmem:[#allocation19 + $0x220] sm:$0xff] }
0x126d   : > { %v11926_v2 = vcombine.low %v9059_v12, %v9063_v34 }
0x126f   : > { %s15599_s6 = scalar_lea.hbm %s15715_s3, %s12130_s4 }
0x1281   : > { %v8565_v36 = vpop.permute.xlu1 %8564 }
0x1282   : > { %8567 = vst.msk [vmem:[#allocation6] sm:$0xff] %vm3434_vm4, %v8565_v36  ;;  %v9026_v36 = vld [vmem:[#allocation19 + $0xc0] sm:$0xff] }
0x1285   : > { %v8570_v37 = vpop.permute.xlu1 %8569 }
0x1286   : > { %8572 = vst.msk [vmem:[#allocation6] sm:$0xff] %vm3440_vm5, %v8570_v37  ;;  %v9030_v37 = vld [vmem:[#allocation19 + $0xe0] sm:$0xff] }
0x1287   : > { %v11892_v56 = vcombine.low %v9026_v36, %v9030_v37 }
0x1289   : > { %v8575_v17 = vpop.permute.xlu1 %8574 }
0x128a   : > { %8577 = vst.msk [vmem:[#allocation6] sm:$0xff] %vm3446_vm6, %v8575_v17  ;;  %v11918_v17 = vcombine.low %v9051_v53, %v9055_v15  ;;  %v9082_v53 = vld [vmem:[#allocation19 + $0x280] sm:$0xff] }
0x128b   : > { %v9086_v15 = vld [vmem:[#allocation19 + $0x2a0] sm:$0xff] }
0x1291   : > { %v8610_v30 = vld [vmem:[#allocation6] sm:$0xff] }
0x1292   : > { %v8613_v60 = vpack.c.bf16 %v8610_v30, %v8610_v30  ;;  %v9067_v30 = vld [vmem:[#allocation19 + $0x208] sm:$0xff] }
0x1293   : > { %v11934_v0 = vcombine.low %v9067_v30, %v9071_v41 }
0x12c2   : > { %v8581_v52 = vpop.permute.xlu0 %8580 }
0x12c3   : > { %8583 = vst.msk [vmem:[#allocation6 + $0x8] sm:$0xff] %vm3434_vm4, %v8581_v52  ;;  %v11884_v52 = vcombine.low %v9018_v32, %v9022_v18  ;;  %v9083_v32 = vld [vmem:[#allocation19 + $0x288] sm:$0xff]  ;;  %v11949_v18 = vcombine.high %v9082_v53, %v9086_v15 }
0x12c6   : > { %v8586_v47 = vpop.permute.xlu0 %8585 }
0x12c7   : > { %8588 = vst.msk [vmem:[#allocation6 + $0x8] sm:$0xff] %vm3440_vm5, %v8586_v47  ;;  %v11927_v47 = vcombine.high %v9059_v12, %v9063_v34  ;;  %v9090_v12 = vld [vmem:[#allocation19 + $0x2c0] sm:$0xff] }
0x12c8   : > { %v9094_v34 = vld [vmem:[#allocation19 + $0x2e0] sm:$0xff] }
0x12ca   : > { %v8591_v33 = vpop.permute.xlu0 %8590 }
0x12cb   : > { %8593 = vst.msk [vmem:[#allocation6 + $0x8] sm:$0xff] %vm3446_vm6, %v8591_v33  ;;  %v11893_v33 = vcombine.high %v9026_v36, %v9030_v37  ;;  %v9091_v36 = vld [vmem:[#allocation19 + $0x2c8] sm:$0xff]  ;;  %v11956_v37 = vcombine.low %v9090_v12, %v9094_v34 }
0x12d2   : > { %v8597_v40 = vpop.permute.xlu0 %8596  ;;  %v8611_v31 = vld [vmem:[#allocation6 + $0x8] sm:$0xff] }
0x12d3   : > { %8599 = vst.msk [vmem:[#allocation6 + $0x10] sm:$0xff] %vm3434_vm4, %v8597_v40  ;;  %v8614_v50 = vpack.c.bf16 %v8611_v31, %v8611_v31  ;;  %v11935_v40 = vcombine.high %v9067_v30, %v9071_v41 }
0x12d5   : > { %8948 = vmatprep.mubr.bf16.mxu0 %v8614_v50  ;;  %v9075_v50 = vld [vmem:[#allocation19 + $0x248] sm:$0xff] }
0x12d6   : > { %8949 = vmatmul.mubr.bf16.vlgmr.msra.gmra.mrb[128].mxu0 %v8613_v60  ;;  %v9079_v60 = vld [vmem:[#allocation19 + $0x268] sm:$0xff] }
0x12d7   : > { %9854 = vmatpush1.bf16.msra.mxu0 %v11870_v1  ;;  %v11876_v1 = vcombine.low %v9010_v61, %v9014_v23  ;;  %v11924_v61 = vcombine.low %v9058_v7, %v9062_v22  ;;  %v11933_v23 = vcombine.high %v9066_v26, %v9070_v24 }
0x12d8   : > { %9855 = vmatprep.subr.bf16.mxu0 %v11879_v10  ;;  %v9042_v10 = vld [vmem:[#allocation19 + $0x140] sm:$0xff] }
0x12d9   : > { %v11909_v63 = vcombine.high %v9042_v10, %v9046_v51 }
0x12da   : > { %v8607_v25 = vpop.permute.xlu0 %8606 }
0x12db   : > { %v8602_v4 = vpop.permute.xlu1 %8601  ;;  %9856 = vmatpush1.bf16.msra.mxu0 %v11878_v3 }
0x12dc   : > { %8604 = vst.msk [vmem:[#allocation6 + $0x10] sm:$0xff] %vm3440_vm5, %v8602_v4  ;;  %9857 = vmatprep.subr.bf16.mxu0 %v11887_v43  ;;  %v11943_v43 = vcombine.high %v9075_v50, %v9079_v60  ;;  %v9054_v4 = vld [vmem:[#allocation19 + $0x1a0] sm:$0xff] }
0x12dd   : > { %8609 = vst.msk [vmem:[#allocation6 + $0x10] sm:$0xff] %vm3446_vm6, %v8607_v25  ;;  %v11908_v25 = vcombine.low %v9042_v10, %v9046_v51 }
0x12df   : > { %9858 = vmatpush1.bf16.msra.mxu0 %v11886_v6  ;;  %v11942_v6 = vcombine.low %v9075_v50, %v9079_v60  ;;  %v9107_v50 = vld [vmem:[#allocation19 + $0x348] sm:$0xff] }
0x12e0   : > { %9859 = vmatprep.subr.bf16.mxu0 %v11895_v42  ;;  %v11917_v42 = vcombine.high %v9050_v62, %v9054_v4  ;;  %v9111_v60 = vld [vmem:[#allocation19 + $0x368] sm:$0xff] }
0x12e3   : > { %9860 = vmatpush1.bf16.msra.mxu0 %v11894_v5  ;;  %v11916_v5 = vcombine.low %v9050_v62, %v9054_v4  ;;  %v9114_v62 = vld [vmem:[#allocation19 + $0x380] sm:$0xff] }
0x12e4   : > { %v8612_v57 = vld [vmem:[#allocation6 + $0x10] sm:$0xff]  ;;  %9861 = vmatprep.subr.bf16.mxu0 %v11903_v9  ;;  %v11925_v9 = vcombine.high %v9058_v7, %v9062_v22  ;;  %v9118_v4 = vld [vmem:[#allocation19 + $0x3a0] sm:$0xff] }
0x12e5   : > { %v8615_v21 = vpack.c.bf16 %v8612_v57, %v8612_v57  ;;  %v9078_v57 = vld [vmem:[#allocation19 + $0x260] sm:$0xff]  ;;  %v11980_v7 = vcombine.low %v9114_v62, %v9118_v4 }
0x12e7   : > { %8990 = vmatmul.mubr.bf16.vlgmr.msra.gmra.mrb[132].mxu1 %v8615_v21  ;;  %9862 = vmatpush1.bf16.msra.mxu0 %v11902_v59  ;;  %v9074_v59 = vld [vmem:[#allocation19 + $0x240] sm:$0xff] }
0x12e8   : > { %9813 = vmatpush1.bf16.msra.mxu1 %v11868_v58  ;;  %9863 = vmatprep.subr.bf16.mxu0 %v11911_v45  ;;  %v9038_v58 = vld [vmem:[#allocation19 + $0x120] sm:$0xff]  ;;  %v11932_v45 = vcombine.low %v9066_v26, %v9070_v24  ;;  %v11941_v21 = vcombine.high %v9074_v59, %v9078_v57  ;;  %v9123_v24 = vld [vmem:[#allocation19 + $0x3c8] sm:$0xff] }
0x12e9   : > { %9814 = vmatprep.subr.bf16.mxu1 %v11877_v19  ;;  %v11901_v31 = vcombine.high %v9034_v11, %v9038_v58  ;;  %v11900_v3 = vcombine.low %v9034_v11, %v9038_v58  ;;  %v11940_v19 = vcombine.low %v9074_v59, %v9078_v57  ;;  %v9099_v58 = vld [vmem:[#allocation19 + $0x308] sm:$0xff]  ;;  %v9126_v26 = vld [vmem:[#allocation19 + $0x3e0] sm:$0xff] }
0x12eb   : > { %9864 = vmatpush1.bf16.msra.mxu0 %v11910_v16  ;;  %v9087_v16 = vld [vmem:[#allocation19 + $0x2a8] sm:$0xff] }
0x12ec   : > { %9815 = vmatpush1.bf16.msra.mxu1 %v11876_v1  ;;  %9865 = vmatprep.subr.bf16.mxu0 %v11919_v20  ;;  %v11948_v1 = vcombine.low %v9082_v53, %v9086_v15  ;;  %v11950_v20 = vcombine.low %v9083_v32, %v9087_v16  ;;  %v9005_v53 = vld [vmem:[#allocation19 + $0x18] sm:$0xff] }
0x12ed   : > { %9816 = vmatprep.subr.bf16.mxu1 %v11885_v29  ;;  %v11951_v29 = vcombine.high %v9083_v32, %v9087_v16 }
0x12ef   : > { %9866 = vmatpush1.bf16.msra.mxu0 %v11918_v17  ;;  %v11957_v17 = vcombine.high %v9090_v12, %v9094_v34 }
0x12f0   : > { %9817 = vmatpush1.bf16.msra.mxu1 %v11884_v52  ;;  %9867 = vmatprep.subr.bf16.mxu0 %v11927_v47  ;;  %v9095_v52 = vld [vmem:[#allocation19 + $0x2e8] sm:$0xff]  ;;  %v9098_v47 = vld [vmem:[#allocation19 + $0x300] sm:$0xff] }
0x12f1   : > { %9818 = vmatprep.subr.bf16.mxu1 %v11893_v33  ;;  %v9102_v33 = vld [vmem:[#allocation19 + $0x320] sm:$0xff]  ;;  %v11958_v30 = vcombine.low %v9091_v36, %v9095_v52  ;;  %v11959_v41 = vcombine.high %v9091_v36, %v9095_v52  ;;  %v8664_v36 = vld [vmem:[#allocation18] sm:$0x3] }
0x12f2   : > { %v11965_v11 = vcombine.high %v9098_v47, %v9102_v33  ;;  %v11964_v10 = vcombine.low %v9098_v47, %v9102_v33 }
0x12f3   : > { %9868 = vmatpush1.bf16.msra.mxu0 %v11926_v2  ;;  %v9103_v2 = vld [vmem:[#allocation19 + $0x328] sm:$0xff] }
0x12f4   : > { %9819 = vmatpush1.bf16.msra.mxu1 %v11892_v56  ;;  %9869 = vmatprep.subr.bf16.mxu0 %v11935_v40  ;;  %v11967_v56 = vcombine.high %v9099_v58, %v9103_v2  ;;  %v9106_v40 = vld [vmem:[#allocation19 + $0x340] sm:$0xff]  ;;  %v11966_v51 = vcombine.low %v9099_v58, %v9103_v2 }
0x12f5   : > { %9820 = vmatprep.subr.bf16.mxu1 %v11901_v31  ;;  %v9110_v31 = vld [vmem:[#allocation19 + $0x360] sm:$0xff] }
0x12f7   : > { %9870 = vmatpush1.bf16.msra.mxu0 %v11934_v0  ;;  %v11973_v0 = vcombine.high %v9106_v40, %v9110_v31 }
0x12f8   : > { %9821 = vmatpush1.bf16.msra.mxu1 %v11900_v3  ;;  %9871 = vmatprep.subr.bf16.mxu0 %v11943_v43  ;;  %v11975_v3 = vcombine.high %v9107_v50, %v9111_v60  ;;  %v11972_v43 = vcombine.low %v9106_v40, %v9110_v31  ;;  %v9012_v31 = vld [vmem:[#allocation19 + $0x50] sm:$0xff] }
0x12f9   : > { %9822 = vmatprep.subr.bf16.mxu1 %v11909_v63  ;;  %v11974_v63 = vcombine.low %v9107_v50, %v9111_v60  ;;  %v9016_v50 = vld [vmem:[#allocation19 + $0x70] sm:$0xff]  ;;  %v9013_v60 = vld [vmem:[#allocation19 + $0x58] sm:$0xff] }
0x12fb   : > { %9872 = vmatpush1.bf16.msra.mxu0 %v11942_v6  ;;  %v9115_v6 = vld [vmem:[#allocation19 + $0x388] sm:$0xff] }
0x12fc   : > { %9823 = vmatpush1.bf16.msra.mxu1 %v11908_v25  ;;  %9873 = vmatprep.subr.bf16.mxu0 %v11951_v29  ;;  %v11981_v25 = vcombine.high %v9114_v62, %v9118_v4  ;;  %v9021_v62 = vld [vmem:[#allocation19 + $0x98] sm:$0xff]  ;;  %v11880_v4 = vcombine.low %v9012_v31, %v9016_v50 }
0x12fd   : > { %9824 = vmatprep.subr.bf16.mxu1 %v11917_v42  ;;  %v9119_v42 = vld [vmem:[#allocation19 + $0x3a8] sm:$0xff] }
0x12fe   : > { %v11982_v22 = vcombine.low %v9115_v6, %v9119_v42 }
0x12ff   : > { %9874 = vmatpush1.bf16.msra.mxu0 %v11950_v20 }
0x1300   : > { %9825 = vmatpush1.bf16.msra.mxu1 %v11916_v5  ;;  %9875 = vmatprep.subr.bf16.mxu0 %v11959_v41  ;;  %v11983_v5 = vcombine.high %v9115_v6, %v9119_v42 }
0x1301   : > { %9826 = vmatprep.subr.bf16.mxu1 %v11925_v9  ;;  %v9122_v9 = vld [vmem:[#allocation19 + $0x3c0] sm:$0xff] }
0x1302   : > { %v11988_v59 = vcombine.low %v9122_v9, %v9126_v26 }
0x1303   : > { %9876 = vmatpush1.bf16.msra.mxu0 %v11958_v30 }
0x1304   : > { %9827 = vmatpush1.bf16.msra.mxu1 %v11924_v61  ;;  %9877 = vmatprep.subr.bf16.mxu0 %v11967_v56  ;;  %v11989_v61 = vcombine.high %v9122_v9, %v9126_v26  ;;  %v9033_v9 = vld [vmem:[#allocation19 + $0xf8] sm:$0xff] }
0x1305   : > { %9828 = vmatprep.subr.bf16.mxu1 %v11933_v23  ;;  %v9127_v23 = vld [vmem:[#allocation19 + $0x3e8] sm:$0xff] }
0x1306   : > { %v11990_v57 = vcombine.low %v9123_v24, %v9127_v23 }
0x1307   : > { %9878 = vmatpush1.bf16.msra.mxu0 %v11966_v51 }
0x1308   : > { %9829 = vmatpush1.bf16.msra.mxu1 %v11932_v45  ;;  %9879 = vmatprep.subr.bf16.mxu0 %v11975_v3  ;;  %v11991_v45 = vcombine.high %v9123_v24, %v9127_v23  ;;  %v9020_v3 = vld [vmem:[#allocation19 + $0x90] sm:$0xff] }
0x1309   : > { %9830 = vmatprep.subr.bf16.mxu1 %v11941_v21  ;;  %v9004_v21 = vld [vmem:[#allocation19 + $0x10] sm:$0xff] }
0x130b   : > { %9880 = vmatpush1.bf16.msra.mxu0 %v11974_v63  ;;  %v9024_v63 = vld [vmem:[#allocation19 + $0xb0] sm:$0xff] }
0x130c   : > { %9831 = vmatpush1.bf16.msra.mxu1 %v11940_v19  ;;  %9881 = vmatprep.subr.bf16.mxu0 %v11983_v5  ;;  %v9008_v19 = vld [vmem:[#allocation19 + $0x30] sm:$0xff]  ;;  %v9029_v5 = vld [vmem:[#allocation19 + $0xd8] sm:$0xff]  ;;  %v11888_v26 = vcombine.low %v9020_v3, %v9024_v63 }
0x130d   : > { %9832 = vmatprep.subr.bf16.mxu1 %v11949_v18  ;;  %v11872_v15 = vcombine.low %v9004_v21, %v9008_v19  ;;  %v11873_v32 = vcombine.high %v9004_v21, %v9008_v19  ;;  %v9009_v18 = vld [vmem:[#allocation19 + $0x38] sm:$0xff]  ;;  %v11899_v23 = vcombine.high %v9029_v5, %v9033_v9 }
0x130e   : > { %v11874_v16 = vcombine.low %v9005_v53, %v9009_v18  ;;  %v9041_v21 = vld [vmem:[#allocation19 + $0x138] sm:$0xff] }
0x130f   : > { %9882 = vmatpush1.bf16.msra.mxu0 %v11982_v22  ;;  %v9032_v22 = vld [vmem:[#allocation19 + $0xf0] sm:$0xff] }
0x1310   : > { %9833 = vmatpush1.bf16.msra.mxu1 %v11948_v1  ;;  %9883 = vmatprep.subr.bf16.mxu0 %v11991_v45  ;;  %v11875_v1 = vcombine.high %v9005_v53, %v9009_v18  ;;  %v9037_v45 = vld [vmem:[#allocation19 + $0x118] sm:$0xff]  ;;  %v11898_v53 = vcombine.low %v9029_v5, %v9033_v9  ;;  %v9044_v18 = vld [vmem:[#allocation19 + $0x150] sm:$0xff] }
0x1311   : > { %9834 = vmatprep.subr.bf16.mxu1 %v11957_v17  ;;  %v8673_v17 = vrot.slane %v8664_v36, %v14602_v48  ;;  %v9081_v5 = vld [vmem:[#allocation19 + $0x278] sm:$0xff] }
0x1313   : > { %9884 = vmatpush1.bf16.msra.mxu0 %v11990_v57  ;;  %v9040_v57 = vld [vmem:[#allocation19 + $0x130] sm:$0xff] }
0x1314   : > { %9835 = vmatpush1.bf16.msra.mxu1 %v11956_v37  ;;  %9935 = vmatprep.subr.bf16.mxu0 %v11875_v1  ;;  %v8669_v37 = vrot.slane %v8664_v36, %v14605_v49  ;;  %v9045_v1 = vld [vmem:[#allocation19 + $0x158] sm:$0xff] }
0x1315   : > { %9836 = vmatprep.subr.bf16.mxu1 %v11965_v11 }
0x1318   : > { %9837 = vmatpush1.bf16.msra.mxu1 %v11964_v10  ;;  %v9017_v10 = vld [vmem:[#allocation19 + $0x78] sm:$0xff] }
0x1319   : > { %9838 = vmatprep.subr.bf16.mxu1 %v11973_v0  ;;  %v11882_v6 = vcombine.low %v9013_v60, %v9017_v10 }
0x131c   : > { %9839 = vmatpush1.bf16.msra.mxu1 %v11972_v43  ;;  %v11883_v43 = vcombine.high %v9013_v60, %v9017_v10 }
0x131d   : > { %9840 = vmatprep.subr.bf16.mxu1 %v11981_v25  ;;  %v11889_v25 = vcombine.high %v9020_v3, %v9024_v63  ;;  %v9069_v63 = vld [vmem:[#allocation19 + $0x218] sm:$0xff] }
0x1320   : > { %9841 = vmatpush1.bf16.msra.mxu1 %v11980_v7  ;;  %v9028_v7 = vld [vmem:[#allocation19 + $0xd0] sm:$0xff] }
0x1321   : > { %9842 = vmatprep.subr.bf16.mxu1 %v11989_v61  ;;  %v11897_v61 = vcombine.high %v9028_v7, %v9032_v22  ;;  %v11896_v19 = vcombine.low %v9028_v7, %v9032_v22  ;;  %v9080_v7 = vld [vmem:[#allocation19 + $0x270] sm:$0xff]  ;;  %v9077_v22 = vld [vmem:[#allocation19 + $0x258] sm:$0xff] }
0x1324   : > { %9843 = vmatpush1.bf16.msra.mxu1 %v11988_v59  ;;  %v9036_v59 = vld [vmem:[#allocation19 + $0x110] sm:$0xff] }
0x1325   : > { %9894 = vmatprep.subr.bf16.mxu1 %v11873_v32  ;;  %v11907_v32 = vcombine.high %v9037_v45, %v9041_v21 }
0x13a9   : > { %v8950_v20 = vpop.f32.mrb[128].mxu0 }
0x13aa   : > { %v8952_v29 = vpop.f32.mrb[129].mxu0  ;;  %v8951_v52 = vadd.f32 %v8950_v20, %v8669_v37  ;;  %v9049_v20 = vld [vmem:[#allocation19 + $0x178] sm:$0xff]  ;;  %v9052_v37 = vld [vmem:[#allocation19 + $0x190] sm:$0xff] }
0x13ab   : > { %v8954_v12 = vpop.f32.mrb[130].mxu0  ;;  %v8953_v47 = vadd.f32 %v8952_v29, %v8673_v17  ;;  %v11904_v29 = vcombine.low %v9036_v59, %v9040_v57  ;;  %v11915_v36 = vcombine.high %v9045_v1, %v9049_v20  ;;  %v9056_v17 = vld [vmem:[#allocation19 + $0x1b0] sm:$0xff] }
0x13ac   : > { %v8955_v34 = vpop.f32.mrb[131].mxu0  ;;  %v11906_v12 = vcombine.low %v9037_v45, %v9041_v21  ;;  %v11920_v60 = vcombine.low %v9052_v37, %v9056_v17  ;;  %v9089_v45 = vld [vmem:[#allocation19 + $0x2b8] sm:$0xff] }
0x13ba   : > { %v8991_v33 = vpop.f32.mrb[132].mxu1 }
0x13bb   : > { %v8992_v30 = vadd.f32 %v8991_v33, %v8951_v52  ;;  %v8993_v41 = vpop.f32.mrb[133].mxu1  ;;  %v9053_v52 = vld [vmem:[#allocation19 + $0x198] sm:$0xff] }
0x13bc   : > { %v8994_v11 = vadd.f32 %v8993_v41, %v8953_v47  ;;  %v8995_v58 = vpop.f32.mrb[134].mxu1  ;;  %v9057_v47 = vld [vmem:[#allocation19 + $0x1b8] sm:$0xff]  ;;  %v11921_v41 = vcombine.high %v9052_v37, %v9056_v17  ;;  %v9104_v37 = vld [vmem:[#allocation19 + $0x330] sm:$0xff] }
0x13bd   : > { %v15534_v2 = vadd.f32 %v8992_v30, %v15120_v35  ;;  %v8996_v56 = vpop.f32.mrb[135].mxu1  ;;  %v11881_v35 = vcombine.high %v9012_v31, %v9016_v50  ;;  %v11914_v30 = vcombine.low %v9045_v1, %v9049_v20  ;;  %v9060_v58 = vld [vmem:[#allocation19 + $0x1d0] sm:$0xff]  ;;  %v9061_v31 = vld [vmem:[#allocation19 + $0x1d8] sm:$0xff]  ;;  %v11922_v10 = vcombine.low %v9053_v52, %v9057_v47 }
0x13be   : > { %v15537_v40 = vadd.f32 %v8994_v11, %v15123_v55  ;;  %v9025_v55 = vld [vmem:[#allocation19 + $0xb8] sm:$0xff]  ;;  %v11923_v11 = vcombine.high %v9053_v52, %v9057_v47  ;;  %v9064_v56 = vld [vmem:[#allocation19 + $0x1f0] sm:$0xff] }
0x13bf   : > { %v15543_v0 = vpack.c.bf16 %v15534_v2, %v15534_v2  ;;  %v11891_v42 = vcombine.high %v9021_v62, %v9025_v55  ;;  %v11890_v24 = vcombine.low %v9021_v62, %v9025_v55  ;;  %v9065_v50 = vld [vmem:[#allocation19 + $0x1f8] sm:$0xff]  ;;  %v11928_v55 = vcombine.low %v9060_v58, %v9064_v56 }
0x13c0   : > { %v9001_v51 = vpack.c.bf16 %v15537_v40, %v15537_v40  ;;  %v11931_v3 = vcombine.high %v9061_v31, %v9065_v50  ;;  %v9073_v62 = vld [vmem:[#allocation19 + $0x238] sm:$0xff] }
0x13c1   : > { %v9097_v1 = vld [vmem:[#allocation19 + $0x2f8] sm:$0xff] }
0x13c2   : > { %9844 = vmatprep.mubr.bf16.mxu1 %v9001_v51  ;;  %9885 = vmatprep.mubr.bf16.mxu0 %v9001_v51  ;;  %v9101_v17 = vld [vmem:[#allocation19 + $0x318] sm:$0xff] }
0x13c3   : > { %9845 = vmatmul.mubr.bf16.vlgmr.msra.gmra.mrb[136].mxu1 %v15543_v0  ;;  %9886 = vmatmul.mubr.bf16.vlgmr.msra.gmra.mrb[132].mxu0 %v15543_v0  ;;  %v9105_v52 = vld [vmem:[#allocation19 + $0x338] sm:$0xff] }
0x13c4   : > { %9895 = vmatpush1.bf16.msra.mxu1 %v11872_v15  ;;  %9936 = vmatpush1.bf16.msra.mxu0 %v11874_v16  ;;  %v11905_v15 = vcombine.high %v9036_v59, %v9040_v57  ;;  %v9048_v16 = vld [vmem:[#allocation19 + $0x170] sm:$0xff]  ;;  %v9085_v57 = vld [vmem:[#allocation19 + $0x298] sm:$0xff] }
0x13c5   : > { %9926 = vmatprep.mubr.bf16.mxu1 %v9001_v51  ;;  %9967 = vmatprep.mubr.bf16.mxu0 %v9001_v51  ;;  %v11913_v34 = vcombine.high %v9044_v18, %v9048_v16  ;;  %v11912_v33 = vcombine.low %v9044_v18, %v9048_v16  ;;  %v11929_v51 = vcombine.high %v9060_v58, %v9064_v56  ;;  %v9088_v59 = vld [vmem:[#allocation19 + $0x2b0] sm:$0xff]  ;;  %v9093_v16 = vld [vmem:[#allocation19 + $0x2d8] sm:$0xff] }
0x13c6   : > { %9896 = vmatprep.subr.bf16.mxu1 %v11881_v35  ;;  %9937 = vmatprep.subr.bf16.mxu0 %v11883_v43  ;;  %v9068_v35 = vld [vmem:[#allocation19 + $0x210] sm:$0xff]  ;;  %v9109_v56 = vld [vmem:[#allocation19 + $0x358] sm:$0xff] }
0x13c7   : > { %v9072_v43 = vld [vmem:[#allocation19 + $0x230] sm:$0xff] }
0x13c8   : > { %9897 = vmatpush1.bf16.msra.mxu1 %v11880_v4  ;;  %9938 = vmatpush1.bf16.msra.mxu0 %v11882_v6  ;;  %v11930_v4 = vcombine.low %v9061_v31, %v9065_v50  ;;  %v11937_v6 = vcombine.high %v9068_v35, %v9072_v43  ;;  %v11936_v9 = vcombine.low %v9068_v35, %v9072_v43  ;;  %v9096_v18 = vld [vmem:[#allocation19 + $0x2f0] sm:$0xff]  ;;  %v9113_v31 = vld [vmem:[#allocation19 + $0x378] sm:$0xff] }
0x13c9   : > { %9898 = vmatprep.subr.bf16.mxu1 %v11889_v25  ;;  %9939 = vmatprep.subr.bf16.mxu0 %v11891_v42  ;;  %v11939_v25 = vcombine.high %v9069_v63, %v9073_v62  ;;  %v9076_v42 = vld [vmem:[#allocation19 + $0x250] sm:$0xff]  ;;  %v9117_v43 = vld [vmem:[#allocation19 + $0x398] sm:$0xff] }
0x13ca   : > { %v11944_v21 = vcombine.low %v9076_v42, %v9080_v7  ;;  %v9112_v58 = vld [vmem:[#allocation19 + $0x370] sm:$0xff] }
0x13cb   : > { %v9120_v35 = vld [vmem:[#allocation19 + $0x3b0] sm:$0xff] }
0x13cc   : > { %9899 = vmatpush1.bf16.msra.mxu1 %v11888_v26  ;;  %9940 = vmatpush1.bf16.msra.mxu0 %v11890_v24  ;;  %v11938_v26 = vcombine.low %v9069_v63, %v9073_v62  ;;  %v11945_v24 = vcombine.high %v9076_v42, %v9080_v7  ;;  %v9121_v63 = vld [vmem:[#allocation19 + $0x3b8] sm:$0xff]  ;;  %v9128_v42 = vld [vmem:[#allocation19 + $0x3f0] sm:$0xff] }
0x13cd   : > { %9900 = vmatprep.subr.bf16.mxu1 %v11897_v61  ;;  %9941 = vmatprep.subr.bf16.mxu0 %v11899_v23  ;;  %v11947_v61 = vcombine.high %v9077_v22, %v9081_v5  ;;  %v9084_v23 = vld [vmem:[#allocation19 + $0x290] sm:$0xff]  ;;  %v9125_v7 = vld [vmem:[#allocation19 + $0x3d8] sm:$0xff] }
0x13ce   : > { %v11952_v20 = vcombine.low %v9084_v23, %v9088_v59 }
0x13d0   : > { %9901 = vmatpush1.bf16.msra.mxu1 %v11896_v19  ;;  %9942 = vmatpush1.bf16.msra.mxu0 %v11898_v53  ;;  %v11946_v19 = vcombine.low %v9077_v22, %v9081_v5  ;;  %v11953_v53 = vcombine.high %v9084_v23, %v9088_v59  ;;  %v9129_v22 = vld [vmem:[#allocation19 + $0x3f8] sm:$0xff]  ;;  %v13481_v59 = vld [vmem:[#allocation21 + $0x4] ss:$8 sps:$4 sm:$0xff]  }
0x13d1   : > { %9902 = vmatprep.subr.bf16.mxu1 %v11905_v15  ;;  %9943 = vmatprep.subr.bf16.mxu0 %v11907_v32  ;;  %v11955_v15 = vcombine.high %v9085_v57, %v9089_v45  ;;  %v9092_v32 = vld [vmem:[#allocation19 + $0x2d0] sm:$0xff]  ;;  %v11994_v23 = vcombine.low %v9125_v7, %v9129_v22 }
0x13d2   : > { %v11960_v47 = vcombine.low %v9092_v32, %v9096_v18 }
0x13d4   : > { %9903 = vmatpush1.bf16.msra.mxu1 %v11904_v29  ;;  %9944 = vmatpush1.bf16.msra.mxu0 %v11906_v12  ;;  %v11954_v29 = vcombine.low %v9085_v57, %v9089_v45  ;;  %v11961_v12 = vcombine.high %v9092_v32, %v9096_v18  ;;  %v13479_v57 = vld [vmem:[#allocation21] ss:$8 sps:$4 sm:$0xff]   ;;  %v13484_v45 = vld [vmem:[#allocation21 + $0x14] ss:$8 sps:$4 sm:$0xff]   ;;  %v13488_v32 = vld [vmem:[#allocation21 + $0x30] ss:$8 sps:$4 sm:$0xff]  }
0x13d5   : > { %9904 = vmatprep.subr.bf16.mxu1 %v11913_v34  ;;  %9945 = vmatprep.subr.bf16.mxu0 %v11915_v36  ;;  %v11963_v34 = vcombine.high %v9093_v16, %v9097_v1  ;;  %v9100_v36 = vld [vmem:[#allocation19 + $0x310] sm:$0xff]  ;;  %v13493_v18 = vld [vmem:[#allocation21 + $0x44] ss:$8 sps:$4 sm:$0xff]  }
0x13d6   : > { %v11968_v50 = vcombine.low %v9100_v36, %v9104_v37 }
0x13d8   : > { %9905 = vmatpush1.bf16.msra.mxu1 %v11912_v33  ;;  %9946 = vmatpush1.bf16.msra.mxu0 %v11914_v30  ;;  %v11962_v33 = vcombine.low %v9093_v16, %v9097_v1  ;;  %v11969_v30 = vcombine.high %v9100_v36, %v9104_v37  ;;  %v13491_v16 = vld [vmem:[#allocation21 + $0x40] ss:$8 sps:$4 sm:$0xff]   ;;  %v13496_v1 = vld [vmem:[#allocation21 + $0x54] ss:$8 sps:$4 sm:$0xff]   ;;  %v13505_v36 = vld [vmem:[#allocation21 + $0x84] ss:$8 sps:$4 sm:$0xff]  }
0x13d9   : > { %9906 = vmatprep.subr.bf16.mxu1 %v11921_v41  ;;  %9947 = vmatprep.subr.bf16.mxu0 %v11923_v11  ;;  %v11971_v41 = vcombine.high %v9101_v17, %v9105_v52  ;;  %v9108_v11 = vld [vmem:[#allocation19 + $0x350] sm:$0xff]  ;;  %v13503_v37 = vld [vmem:[#allocation21 + $0x80] ss:$8 sps:$4 sm:$0xff]  }
0x13da   : > { %v11976_v62 = vcombine.low %v9108_v11, %v9112_v58 }
0x13dc   : > { %9907 = vmatpush1.bf16.msra.mxu1 %v11920_v60  ;;  %9948 = vmatpush1.bf16.msra.mxu0 %v11922_v10  ;;  %v11970_v60 = vcombine.low %v9101_v17, %v9105_v52  ;;  %v11977_v10 = vcombine.high %v9108_v11, %v9112_v58  ;;  %v13508_v17 = vld [vmem:[#allocation21 + $0x94] ss:$8 sps:$4 sm:$0xff]   ;;  %v13506_v52 = vld [vmem:[#allocation21 + $0x90] ss:$8 sps:$4 sm:$0xff]   ;;  %v13517_v11 = vld [vmem:[#allocation21 + $0xc4] ss:$8 sps:$4 sm:$0xff]  }
0x13dd   : > { %9908 = vmatprep.subr.bf16.mxu1 %v11929_v51  ;;  %9949 = vmatprep.subr.bf16.mxu0 %v11931_v3  ;;  %v11979_v51 = vcombine.high %v9109_v56, %v9113_v31  ;;  %v9116_v3 = vld [vmem:[#allocation19 + $0x390] sm:$0xff]  ;;  %v13515_v58 = vld [vmem:[#allocation21 + $0xc0] ss:$8 sps:$4 sm:$0xff]  }
0x13de   : > { %v11984_v5 = vcombine.low %v9116_v3, %v9120_v35 }
0x13e0   : > { %9909 = vmatpush1.bf16.msra.mxu1 %v11928_v55  ;;  %9950 = vmatpush1.bf16.msra.mxu0 %v11930_v4  ;;  %v11978_v55 = vcombine.low %v9109_v56, %v9113_v31  ;;  %v11985_v4 = vcombine.high %v9116_v3, %v9120_v35  ;;  %v13520_v56 = vld [vmem:[#allocation21 + $0xd4] ss:$8 sps:$4 sm:$0xff]   ;;  %v13518_v31 = vld [vmem:[#allocation21 + $0xd0] ss:$8 sps:$4 sm:$0xff]   ;;  %v13529_v3 = vld [vmem:[#allocation21 + $0x104] ss:$8 sps:$4 sm:$0xff]  }
0x13e1   : > { %9910 = vmatprep.subr.bf16.mxu1 %v11937_v6  ;;  %9951 = vmatprep.subr.bf16.mxu0 %v11939_v25  ;;  %v11987_v6 = vcombine.high %v9117_v43, %v9121_v63  ;;  %v9124_v25 = vld [vmem:[#allocation19 + $0x3d0] sm:$0xff]  ;;  %v15552_v35 = vld [vmem:[%s15711_s17] sm:$0xff] }
0x13e4   : > { %9911 = vmatpush1.bf16.msra.mxu1 %v11936_v9  ;;  %9952 = vmatpush1.bf16.msra.mxu0 %v11938_v26  ;;  %v11986_v9 = vcombine.low %v9117_v43, %v9121_v63  ;;  %v11993_v26 = vcombine.high %v9124_v25, %v9128_v42  ;;  %v9135_v43 = vrot.slane %v15552_v35, %v14605_v49 }
0x13e5   : > { %9912 = vmatprep.subr.bf16.mxu1 %v11945_v24  ;;  %9953 = vmatprep.subr.bf16.mxu0 %v11947_v61  ;;  %v11995_v24 = vcombine.high %v9125_v7, %v9129_v22  ;;  %v11992_v61 = vcombine.low %v9124_v25, %v9128_v42  ;;  %v9139_v63 = vrot.slane %v15552_v35, %v14602_v48 }
0x13e8   : > { %9913 = vmatpush1.bf16.msra.mxu1 %v11944_v21  ;;  %9954 = vmatpush1.bf16.msra.mxu0 %v11946_v19  ;;  %v13482_v21 = vld [vmem:[#allocation21 + $0x10] ss:$8 sps:$4 sm:$0xff]   ;;  %v13487_v19 = vld [vmem:[#allocation21 + $0x24] ss:$8 sps:$4 sm:$0xff]  }
0x13e9   : > { %9914 = vmatprep.subr.bf16.mxu1 %v11953_v53  ;;  %9955 = vmatprep.subr.bf16.mxu0 %v11955_v15  ;;  %v13485_v53 = vld [vmem:[#allocation21 + $0x20] ss:$8 sps:$4 sm:$0xff]   ;;  %v13490_v15 = vld [vmem:[#allocation21 + $0x34] ss:$8 sps:$4 sm:$0xff]  }
0x13ec   : > { %9915 = vmatpush1.bf16.msra.mxu1 %v11952_v20  ;;  %9956 = vmatpush1.bf16.msra.mxu0 %v11954_v29  ;;  %v13494_v20 = vld [vmem:[#allocation21 + $0x50] ss:$8 sps:$4 sm:$0xff]   ;;  %v13497_v29 = vld [vmem:[#allocation21 + $0x60] ss:$8 sps:$4 sm:$0xff]  }
0x13ed   : > { %9916 = vmatprep.subr.bf16.mxu1 %v11961_v12  ;;  %9957 = vmatprep.subr.bf16.mxu0 %v11963_v34  ;;  %v13502_v12 = vld [vmem:[#allocation21 + $0x74] ss:$8 sps:$4 sm:$0xff]   ;;  %v13500_v34 = vld [vmem:[#allocation21 + $0x70] ss:$8 sps:$4 sm:$0xff]  }
0x13f0   : > { %9917 = vmatpush1.bf16.msra.mxu1 %v11960_v47  ;;  %9958 = vmatpush1.bf16.msra.mxu0 %v11962_v33  ;;  %v13511_v47 = vld [vmem:[#allocation21 + $0xa4] ss:$8 sps:$4 sm:$0xff]   ;;  %v13509_v33 = vld [vmem:[#allocation21 + $0xa0] ss:$8 sps:$4 sm:$0xff]  }
0x13f1   : > { %9918 = vmatprep.subr.bf16.mxu1 %v11969_v30  ;;  %9959 = vmatprep.subr.bf16.mxu0 %v11971_v41  ;;  %v13514_v30 = vld [vmem:[#allocation21 + $0xb4] ss:$8 sps:$4 sm:$0xff]   ;;  %v13512_v41 = vld [vmem:[#allocation21 + $0xb0] ss:$8 sps:$4 sm:$0xff]  }
0x13f4   : > { %9919 = vmatpush1.bf16.msra.mxu1 %v11968_v50  ;;  %9960 = vmatpush1.bf16.msra.mxu0 %v11970_v60  ;;  %v13523_v50 = vld [vmem:[#allocation21 + $0xe4] ss:$8 sps:$4 sm:$0xff]   ;;  %v13521_v60 = vld [vmem:[#allocation21 + $0xe0] ss:$8 sps:$4 sm:$0xff]  }
0x13f5   : > { %9920 = vmatprep.subr.bf16.mxu1 %v11977_v10  ;;  %9961 = vmatprep.subr.bf16.mxu0 %v11979_v51  ;;  %v13526_v10 = vld [vmem:[#allocation21 + $0xf4] ss:$8 sps:$4 sm:$0xff]   ;;  %v13524_v51 = vld [vmem:[#allocation21 + $0xf0] ss:$8 sps:$4 sm:$0xff]  }
0x13f8   : > { %9921 = vmatpush1.bf16.msra.mxu1 %v11976_v62  ;;  %9962 = vmatpush1.bf16.msra.mxu0 %v11978_v55  ;;  %v9147_v62 = vrot.slane %v15552_v35, %v14664_v14 }
0x13f9   : > { %9922 = vmatprep.subr.bf16.mxu1 %v11985_v4  ;;  %9963 = vmatprep.subr.bf16.mxu0 %v11987_v6 }
0x13fc   : > { %9923 = vmatpush1.bf16.msra.mxu1 %v11984_v5  ;;  %9964 = vmatpush1.bf16.msra.mxu0 %v11986_v9 }
0x13fd   : > { %9924 = vmatprep.subr.bf16.mxu1 %v11993_v26  ;;  %9965 = vmatprep.subr.bf16.mxu0 %v11995_v24 }
0x1400   : > { %9925 = vmatpush1.bf16.msra.mxu1 %v11992_v61  ;;  %9966 = vmatpush1.bf16.msra.mxu0 %v11994_v23 }
0x1401   : > { %10804 = vmatprep.subr.bf16.mxu1 %v13481_v59 }
0x1403   : > { %9927 = vmatmul.mubr.bf16.vlgmr.msra.gmra.mrb[140].mxu1 %v15543_v0  ;;  %9968 = vmatmul.mubr.bf16.vlgmr.msra.gmra.mrb[136].mxu0 %v15543_v0  ;;  %v13499_v0 = vld [vmem:[#allocation21 + $0x64] ss:$8 sps:$4 sm:$0xff]  }
0x1404   : > { %10805 = vmatpush1.bf16.msra.mxu1 %v13479_v57 }
0x1405   : > { %10806 = vmatprep.subr.bf16.mxu1 %v13484_v45 }
0x1408   : > { %10807 = vmatpush1.bf16.msra.mxu1 %v13482_v21 }
0x1409   : > { %10808 = vmatprep.subr.bf16.mxu1 %v13487_v19 }
0x140c   : > { %10809 = vmatpush1.bf16.msra.mxu1 %v13485_v53 }
0x140d   : > { %10810 = vmatprep.subr.bf16.mxu1 %v13490_v15 }
0x1410   : > { %10811 = vmatpush1.bf16.msra.mxu1 %v13488_v32 }
0x1411   : > { %10812 = vmatprep.subr.bf16.mxu1 %v13493_v18 }
0x1414   : > { %10813 = vmatpush1.bf16.msra.mxu1 %v13491_v16 }
0x1415   : > { %10814 = vmatprep.subr.bf16.mxu1 %v13496_v1 }
0x1418   : > { %10815 = vmatpush1.bf16.msra.mxu1 %v13494_v20 }
0x1419   : > { %10816 = vmatprep.subr.bf16.mxu1 %v13499_v0 }
0x141c   : > { %10817 = vmatpush1.bf16.msra.mxu1 %v13497_v29  ;;  %v13527_v29 = vld [vmem:[#allocation21 + $0x100] ss:$8 sps:$4 sm:$0xff]  }
0x141d   : > { %10818 = vmatprep.subr.bf16.mxu1 %v13502_v12 }
0x1420   : > { %10819 = vmatpush1.bf16.msra.mxu1 %v13500_v34  ;;  %v13532_v34 = vld [vmem:[#allocation21 + $0x114] ss:$8 sps:$4 sm:$0xff]  }
0x1421   : > { %10820 = vmatprep.subr.bf16.mxu1 %v13505_v36 }
0x1424   : > { %10821 = vmatpush1.bf16.msra.mxu1 %v13503_v37  ;;  %v13530_v37 = vld [vmem:[#allocation21 + $0x110] ss:$8 sps:$4 sm:$0xff]  }
0x1425   : > { %10822 = vmatprep.subr.bf16.mxu1 %v13508_v17  ;;  %v13535_v17 = vld [vmem:[#allocation21 + $0x124] ss:$8 sps:$4 sm:$0xff]  }
0x1428   : > { %10823 = vmatpush1.bf16.msra.mxu1 %v13506_v52  ;;  %v13533_v52 = vld [vmem:[#allocation21 + $0x120] ss:$8 sps:$4 sm:$0xff]  }
0x1429   : > { %10824 = vmatprep.subr.bf16.mxu1 %v13511_v47  ;;  %v13538_v47 = vld [vmem:[#allocation21 + $0x134] ss:$8 sps:$4 sm:$0xff]  }
0x142c   : > { %10825 = vmatpush1.bf16.msra.mxu1 %v13509_v33  ;;  %v13536_v33 = vld [vmem:[#allocation21 + $0x130] ss:$8 sps:$4 sm:$0xff]  }
0x142d   : > { %10826 = vmatprep.subr.bf16.mxu1 %v13514_v30  ;;  %v13541_v30 = vld [vmem:[#allocation21 + $0x144] ss:$8 sps:$4 sm:$0xff]  }
0x1430   : > { %10827 = vmatpush1.bf16.msra.mxu1 %v13512_v41  ;;  %v13539_v41 = vld [vmem:[#allocation21 + $0x140] ss:$8 sps:$4 sm:$0xff]  }
0x1431   : > { %10828 = vmatprep.subr.bf16.mxu1 %v13517_v11  ;;  %v13544_v11 = vld [vmem:[#allocation21 + $0x154] ss:$8 sps:$4 sm:$0xff]  }
0x1434   : > { %10829 = vmatpush1.bf16.msra.mxu1 %v13515_v58  ;;  %v13542_v58 = vld [vmem:[#allocation21 + $0x150] ss:$8 sps:$4 sm:$0xff]  }
0x1435   : > { %10830 = vmatprep.subr.bf16.mxu1 %v13520_v56  ;;  %v13547_v56 = vld [vmem:[#allocation21 + $0x164] ss:$8 sps:$4 sm:$0xff]  }
0x1438   : > { %10831 = vmatpush1.bf16.msra.mxu1 %v13518_v31  ;;  %v13545_v31 = vld [vmem:[#allocation21 + $0x160] ss:$8 sps:$4 sm:$0xff]  }
0x1439   : > { %10832 = vmatprep.subr.bf16.mxu1 %v13523_v50  ;;  %v13550_v50 = vld [vmem:[#allocation21 + $0x174] ss:$8 sps:$4 sm:$0xff]  }
0x143c   : > { %10833 = vmatpush1.bf16.msra.mxu1 %v13521_v60  ;;  %v13548_v60 = vld [vmem:[#allocation21 + $0x170] ss:$8 sps:$4 sm:$0xff]  }
0x143d   : > { %10834 = vmatprep.subr.bf16.mxu1 %v13526_v10  ;;  %v13553_v10 = vld [vmem:[#allocation21 + $0x184] ss:$8 sps:$4 sm:$0xff]  }
0x1440   : > { %10835 = vmatpush1.bf16.msra.mxu1 %v13524_v51  ;;  %v9143_v51 = vrot.slane %v15552_v35, %v14661_v13 }
0x1441   : > { %10845 = vmatprep.subr.bf16.mxu1 %v13529_v3  ;;  %v13551_v3 = vld [vmem:[#allocation21 + $0x180] ss:$8 sps:$4 sm:$0xff]  }
0x1496   : > { %v9846_v55 = vpop.f32.mrb[136].mxu1  ;;  %v15560_v4 = vpop.f32.mrb[132].mxu0 }
0x1497   : > { %v9847_v6 = vadd.f32 %v9846_v55, %v9135_v43  ;;  %v9848_v25 = vpop.f32.mrb[137].mxu1  ;;  %v9889_v42 = vpop.f32.mrb[133].mxu0  ;;  %v13556_v43 = vld [vmem:[#allocation21 + $0x194] ss:$8 sps:$4 sm:$0xff]   ;;  %v13559_v55 = vld [vmem:[#allocation21 + $0x1a4] ss:$8 sps:$4 sm:$0xff]  }
0x1498   : > { %v9849_v7 = vadd.f32 %v9848_v25, %v9139_v63  ;;  %v9890_v22 = vadd.f32 %v9889_v42, %v9147_v62  ;;  %v9850_v5 = vpop.f32.mrb[138].mxu1  ;;  %v9891_v9 = vpop.f32.mrb[134].mxu0  ;;  %v9888_v63 = vadd.f32 %v15560_v4, %v9143_v51  ;;  %v13554_v62 = vld [vmem:[#allocation21 + $0x190] ss:$8 sps:$4 sm:$0xff]   ;;  %v13557_v25 = vld [vmem:[#allocation21 + $0x1a0] ss:$8 sps:$4 sm:$0xff]   ;;  %v9155_v42 = vrot.slane %v15552_v35, %v14689_v28 }
0x1499   : > { %v9984_v26 = vmul.f32 0.70710677, %v9847_v6  ;;  %v9851_v23 = vpop.f32.mrb[139].mxu1  ;;  %v9892_v59 = vpop.f32.mrb[135].mxu0  ;;  %v9976_v21 = vmul.f32 0.5, %v9847_v6 }
0x149a   : > { %v9985_v24 = vmul.f32 0.70710677, %v9849_v7  ;;  %v9987_v61 = vmul.f32 0.70710677, %v9890_v22  ;;  %v9977_v53 = vmul.f32 0.5, %v9849_v7  ;;  %v9979_v18 = vmul.f32 0.5, %v9890_v22 }
0x149b   : > { %13789 = verf.f32 %v9984_v26  ;;  %v9986_v6 = vmul.f32 0.70710677, %v9888_v63  ;;  %v13562_v7 = vld [vmem:[#allocation21 + $0x1b4] ss:$8 sps:$4 sm:$0xff]   ;;  %v13565_v23 = vld [vmem:[#allocation21 + $0x1c4] ss:$8 sps:$4 sm:$0xff]  }
0x149c   : > { %13791 = verf.f32 %v9985_v24  ;;  %v13593_v51 = vld [vmem:[#allocation21 + $0x260] ss:$8 sps:$4 sm:$0xff]  }
0x149d   : > { %13793 = verf.f32 %v9987_v61  ;;  %v13560_v61 = vld [vmem:[#allocation21 + $0x1b0] ss:$8 sps:$4 sm:$0xff]  }
0x149e   : > { %13795 = verf.f32 %v9986_v6  ;;  %v9163_v6 = vrot.slane %v15552_v35, %v14718_v54  ;;  %v13613_v54 = vld [vmem:[#allocation21 + $0x2c4] ss:$8 sps:$4 sm:$0xff]  }
0x14a5   : > { %v13790_v57 = vpop.eup %13789 }
0x14a6   : > { %v10000_v14 = vadd.f32 1.0, %v13790_v57  ;;  %v13792_v45 = vpop.eup %13791 }
0x14a7   : > { %v13794_v19 = vpop.eup %13793  ;;  %v10001_v15 = vadd.f32 1.0, %v13792_v45  ;;  %v13568_v45 = vld [vmem:[#allocation21 + $0x1d4] ss:$8 sps:$4 sm:$0xff]  }
0x14a8   : > { %v10008_v32 = vmul.f32 %v10000_v14, %v9976_v21  ;;  %v10003_v16 = vadd.f32 1.0, %v13794_v19  ;;  %v13563_v14 = vld [vmem:[#allocation21 + $0x1c0] ss:$8 sps:$4 sm:$0xff]   ;;  %v13566_v21 = vld [vmem:[#allocation21 + $0x1d0] ss:$8 sps:$4 sm:$0xff]  }
0x14a9   : > { %v10009_v1 = vmul.f32 %v10001_v15, %v9977_v53  ;;  %v13571_v19 = vld [vmem:[#allocation21 + $0x1e4] ss:$8 sps:$4 sm:$0xff]   ;;  %v13796_v53 = vpop.eup %13795  ;;  %v13569_v15 = vld [vmem:[#allocation21 + $0x1e0] ss:$8 sps:$4 sm:$0xff]  }
0x14aa   : > { %v10011_v20 = vmul.f32 %v10003_v16, %v9979_v18  ;;  %v10016_v12 = vpack.c.bf16 %v10008_v32, %v10008_v32  ;;  %v10002_v32 = vadd.f32 1.0, %v13796_v53  ;;  %v13574_v18 = vld [vmem:[#allocation21 + $0x1f4] ss:$8 sps:$4 sm:$0xff]  }
0x14ab   : > { %v10017_v0 = vpack.c.bf16 %v10009_v1, %v10009_v1  ;;  %v9978_v1 = vmul.f32 0.5, %v9888_v63  ;;  %v13601_v63 = vld [vmem:[#allocation21 + $0x284] ss:$8 sps:$4 sm:$0xff]  }
0x14ac   : > { %v10019_v36 = vpack.c.bf16 %v10011_v20, %v10011_v20 }
0x14ad   : > { %10836 = vmatprep.mubr.bf16.mxu1 %v10017_v0 }
0x14ae   : > { %10837 = vmatmul.mubr.bf16.vlgmr.msra.gmra.mrb[144].mxu1 %v10016_v12  ;;  %v10010_v12 = vmul.f32 %v10002_v32, %v9978_v1  ;;  %v13625_v1 = vld [vmem:[#allocation21 + $0x304] ss:$8 sps:$4 sm:$0xff]  }
0x14af   : > { %10846 = vmatpush1.bf16.msra.mxu1 %v13527_v29  ;;  %10877 = vmatprep.mubr.bf16.mxu1 %v10019_v36  ;;  %v13572_v29 = vld [vmem:[#allocation21 + $0x1f0] ss:$8 sps:$4 sm:$0xff]  }
0x14b0   : > { %10847 = vmatprep.subr.bf16.mxu1 %v13532_v34  ;;  %v13577_v34 = vld [vmem:[#allocation21 + $0x204] ss:$8 sps:$4 sm:$0xff]  }
0x14b3   : > { %10848 = vmatpush1.bf16.msra.mxu1 %v13530_v37  ;;  %v13575_v37 = vld [vmem:[#allocation21 + $0x200] ss:$8 sps:$4 sm:$0xff]  }
0x14b4   : > { %10849 = vmatprep.subr.bf16.mxu1 %v13535_v17  ;;  %v10018_v17 = vpack.c.bf16 %v10010_v12, %v10010_v12  ;;  %v13628_v12 = vld [vmem:[#allocation21 + $0x314] ss:$8 sps:$4 sm:$0xff]  }
0x14b7   : > { %10850 = vmatpush1.bf16.msra.mxu1 %v13533_v52  ;;  %v13580_v52 = vld [vmem:[#allocation21 + $0x214] ss:$8 sps:$4 sm:$0xff]  }
0x14b8   : > { %10851 = vmatprep.subr.bf16.mxu1 %v13538_v47 }
0x14bb   : > { %10852 = vmatpush1.bf16.msra.mxu1 %v13536_v33  ;;  %v13578_v33 = vld [vmem:[#allocation21 + $0x210] ss:$8 sps:$4 sm:$0xff]  }
0x14bc   : > { %10853 = vmatprep.subr.bf16.mxu1 %v13541_v30  ;;  %v13583_v30 = vld [vmem:[#allocation21 + $0x224] ss:$8 sps:$4 sm:$0xff]  }
0x14bf   : > { %10854 = vmatpush1.bf16.msra.mxu1 %v13539_v41  ;;  %v13581_v41 = vld [vmem:[#allocation21 + $0x220] ss:$8 sps:$4 sm:$0xff]  }
0x14c0   : > { %10855 = vmatprep.subr.bf16.mxu1 %v13544_v11  ;;  %v13586_v11 = vld [vmem:[#allocation21 + $0x234] ss:$8 sps:$4 sm:$0xff]  }
0x14c3   : > { %10856 = vmatpush1.bf16.msra.mxu1 %v13542_v58  ;;  %v13584_v58 = vld [vmem:[#allocation21 + $0x230] ss:$8 sps:$4 sm:$0xff]  }
0x14c4   : > { %10857 = vmatprep.subr.bf16.mxu1 %v13547_v56  ;;  %v13589_v56 = vld [vmem:[#allocation21 + $0x244] ss:$8 sps:$4 sm:$0xff]  }
0x14c7   : > { %10858 = vmatpush1.bf16.msra.mxu1 %v13545_v31  ;;  %v13587_v31 = vld [vmem:[#allocation21 + $0x240] ss:$8 sps:$4 sm:$0xff]  }
0x14c8   : > { %10859 = vmatprep.subr.bf16.mxu1 %v13550_v50  ;;  %v13592_v50 = vld [vmem:[#allocation21 + $0x254] ss:$8 sps:$4 sm:$0xff]  }
0x14cb   : > { %10860 = vmatpush1.bf16.msra.mxu1 %v13548_v60  ;;  %v13590_v60 = vld [vmem:[#allocation21 + $0x250] ss:$8 sps:$4 sm:$0xff]  }
0x14cc   : > { %10861 = vmatprep.subr.bf16.mxu1 %v13553_v10  ;;  %v13595_v10 = vld [vmem:[#allocation21 + $0x264] ss:$8 sps:$4 sm:$0xff]  }
0x14cf   : > { %10862 = vmatpush1.bf16.msra.mxu1 %v13551_v3  ;;  %v13598_v3 = vld [vmem:[#allocation21 + $0x274] ss:$8 sps:$4 sm:$0xff]  }
0x14d0   : > { %10863 = vmatprep.subr.bf16.mxu1 %v13556_v43  ;;  %v13596_v43 = vld [vmem:[#allocation21 + $0x270] ss:$8 sps:$4 sm:$0xff]  }
0x14d3   : > { %10864 = vmatpush1.bf16.msra.mxu1 %v13554_v62  ;;  %v9151_v62 = vrot.slane %v15552_v35, %v14686_v27  ;;  %v13610_v27 = vld [vmem:[#allocation21 + $0x2b4] ss:$8 sps:$4 sm:$0xff]  }
0x14d4   : > { %10865 = vmatprep.subr.bf16.mxu1 %v13559_v55  ;;  %v13599_v55 = vld [vmem:[#allocation21 + $0x280] ss:$8 sps:$4 sm:$0xff]  }
0x14d6   : > { %v15567_v22 = vpop.f32.mrb[140].mxu1  ;;  %v15569_v13 = vpop.f32.mrb[136].mxu0 }
0x14d7   : > { %v9930_v5 = vpop.f32.mrb[141].mxu1  ;;  %v15571_v9 = vpop.f32.mrb[137].mxu0  ;;  %10866 = vmatpush1.bf16.msra.mxu1 %v13557_v25  ;;  %v13604_v25 = vld [vmem:[#allocation21 + $0x294] ss:$8 sps:$4 sm:$0xff]  }
0x14d8   : > { %v9931_v4 = vadd.f32 %v9930_v5, %v9155_v42  ;;  %v9932_v26 = vpop.f32.mrb[142].mxu1  ;;  %v9973_v24 = vpop.f32.mrb[138].mxu0  ;;  %10867 = vmatprep.subr.bf16.mxu1 %v13562_v7  ;;  %v9929_v42 = vadd.f32 %v15567_v22, %v9151_v62  ;;  %v13602_v7 = vld [vmem:[#allocation21 + $0x290] ss:$8 sps:$4 sm:$0xff]   ;;  %v9972_v5 = vadd.f32 %v15571_v9, %v9163_v6  ;;  %v13611_v22 = vld [vmem:[#allocation21 + $0x2c0] ss:$8 sps:$4 sm:$0xff]  }
0x14d9   : > { %v9933_v57 = vpop.f32.mrb[143].mxu1  ;;  %v9974_v28 = vpop.f32.mrb[139].mxu0  ;;  %v13605_v24 = vld [vmem:[#allocation21 + $0x2a0] ss:$8 sps:$4 sm:$0xff]   ;;  %v13614_v9 = vld [vmem:[#allocation21 + $0x2d0] ss:$8 sps:$4 sm:$0xff]  }
0x14da   : > { %v9989_v59 = vmul.f32 0.70710677, %v9931_v4  ;;  %v9981_v20 = vmul.f32 0.5, %v9931_v4  ;;  %v13607_v4 = vld [vmem:[#allocation21 + $0x2a4] ss:$8 sps:$4 sm:$0xff]   ;;  %v9983_v32 = vmul.f32 0.5, %v9972_v5 }
0x14db   : > { %10868 = vmatpush1.bf16.msra.mxu1 %v13560_v61  ;;  %v9988_v26 = vmul.f32 0.70710677, %v9929_v42  ;;  %v9991_v61 = vmul.f32 0.70710677, %v9972_v5  ;;  %v13619_v57 = vld [vmem:[#allocation21 + $0x2e4] ss:$8 sps:$4 sm:$0xff]  }
0x14dc   : > { %13797 = verf.f32 %v9989_v59  ;;  %10869 = vmatprep.subr.bf16.mxu1 %v13565_v23  ;;  %v13608_v23 = vld [vmem:[#allocation21 + $0x2b0] ss:$8 sps:$4 sm:$0xff]   ;;  %v13616_v59 = vld [vmem:[#allocation21 + $0x2d4] ss:$8 sps:$4 sm:$0xff]   ;;  %v13655_v62 = vld [vmem:[#allocation21 + $0x3a4] ss:$8 sps:$4 sm:$0xff]  }
0x14dd   : > { %13799 = verf.f32 %v9988_v26  ;;  %v13653_v6 = vld [vmem:[#allocation21 + $0x3a0] ss:$8 sps:$4 sm:$0xff]   ;;  %v13667_v5 = vld [vmem:[#allocation21 + $0x3e4] ss:$8 sps:$4 sm:$0xff]  }
0x14de   : > { %13801 = verf.f32 %v9991_v61  ;;  %v13665_v26 = vld [vmem:[#allocation21 + $0x3e0] ss:$8 sps:$4 sm:$0xff]   ;;  %v13670_v61 = vld [vmem:[#allocation21 + $0x3f4] ss:$8 sps:$4 sm:$0xff]  }
0x14df   : > { %10870 = vmatpush1.bf16.msra.mxu1 %v13563_v14 }
0x14e0   : > { %10871 = vmatprep.subr.bf16.mxu1 %v13568_v45  ;;  %v13617_v45 = vld [vmem:[#allocation21 + $0x2e0] ss:$8 sps:$4 sm:$0xff]  }
0x14e3   : > { %10872 = vmatpush1.bf16.msra.mxu1 %v13566_v21 }
0x14e4   : > { %10873 = vmatprep.subr.bf16.mxu1 %v13571_v19  ;;  %v13622_v19 = vld [vmem:[#allocation21 + $0x2f4] ss:$8 sps:$4 sm:$0xff]  }
0x14e6   : > { %v13798_v16 = vpop.eup %13797 }
0x14e7   : > { %v10005_v0 = vadd.f32 1.0, %v13798_v16  ;;  %10874 = vmatpush1.bf16.msra.mxu1 %v13569_v15  ;;  %v13800_v28 = vpop.eup %13799  ;;  %v9980_v15 = vmul.f32 0.5, %v9929_v42  ;;  %v13656_v42 = vld [vmem:[#allocation21 + $0x3b0] ss:$8 sps:$4 sm:$0xff]  }
0x14e8   : > { %10875 = vmatprep.subr.bf16.mxu1 %v13574_v18  ;;  %v13802_v14 = vpop.eup %13801  ;;  %v10004_v21 = vadd.f32 1.0, %v13800_v28  ;;  %v13620_v18 = vld [vmem:[#allocation21 + $0x2f0] ss:$8 sps:$4 sm:$0xff]  }
0x14e9   : > { %v10013_v36 = vmul.f32 %v10005_v0, %v9981_v20  ;;  %v10007_v53 = vadd.f32 1.0, %v13802_v14  ;;  %v13623_v0 = vld [vmem:[#allocation21 + $0x300] ss:$8 sps:$4 sm:$0xff]  }
0x14ea   : > { %v10012_v16 = vmul.f32 %v10004_v21, %v9980_v15 }
0x14eb   : > { %10876 = vmatpush1.bf16.msra.mxu1 %v13572_v29  ;;  %v10021_v47 = vpack.c.bf16 %v10013_v36, %v10013_v36  ;;  %v10015_v20 = vmul.f32 %v10007_v53, %v9983_v32  ;;  %v13626_v36 = vld [vmem:[#allocation21 + $0x310] ss:$8 sps:$4 sm:$0xff]  }
0x14ec   : > { %10886 = vmatprep.subr.bf16.mxu1 %v13577_v34  ;;  %v10020_v29 = vpack.c.bf16 %v10012_v16, %v10012_v16 }
0x14ed   : > { %v10023_v34 = vpack.c.bf16 %v10015_v20, %v10015_v20 }
0x14ee   : > { %10878 = vmatmul.mubr.bf16.vlgmr.msra.gmra.mrb[144].mxu1 %v10018_v17  ;;  %v13629_v17 = vld [vmem:[#allocation21 + $0x320] ss:$8 sps:$4 sm:$0xff]  }
0x14ef   : > { %10887 = vmatpush1.bf16.msra.mxu1 %v13575_v37  ;;  %10918 = vmatprep.mubr.bf16.mxu1 %v10021_v47  ;;  %v13631_v37 = vld [vmem:[#allocation21 + $0x324] ss:$8 sps:$4 sm:$0xff]   ;;  %v13632_v47 = vld [vmem:[#allocation21 + $0x330] ss:$8 sps:$4 sm:$0xff]  }
0x14f0   : > { %10888 = vmatprep.subr.bf16.mxu1 %v13580_v52  ;;  %v13634_v52 = vld [vmem:[#allocation21 + $0x334] ss:$8 sps:$4 sm:$0xff]  }
0x14f3   : > { %10889 = vmatpush1.bf16.msra.mxu1 %v13578_v33  ;;  %v13637_v33 = vld [vmem:[#allocation21 + $0x344] ss:$8 sps:$4 sm:$0xff]  }
0x14f4   : > { %10890 = vmatprep.subr.bf16.mxu1 %v13583_v30  ;;  %v13635_v30 = vld [vmem:[#allocation21 + $0x340] ss:$8 sps:$4 sm:$0xff]  }
0x14f7   : > { %10891 = vmatpush1.bf16.msra.mxu1 %v13581_v41  ;;  %v13640_v41 = vld [vmem:[#allocation21 + $0x354] ss:$8 sps:$4 sm:$0xff]  }
0x14f8   : > { %10892 = vmatprep.subr.bf16.mxu1 %v13586_v11  ;;  %v13638_v11 = vld [vmem:[#allocation21 + $0x350] ss:$8 sps:$4 sm:$0xff]  }
0x14fb   : > { %10893 = vmatpush1.bf16.msra.mxu1 %v13584_v58  ;;  %v13643_v58 = vld [vmem:[#allocation21 + $0x364] ss:$8 sps:$4 sm:$0xff]  }
0x14fc   : > { %10894 = vmatprep.subr.bf16.mxu1 %v13589_v56  ;;  %v13641_v56 = vld [vmem:[#allocation21 + $0x360] ss:$8 sps:$4 sm:$0xff]  }
0x14ff   : > { %10895 = vmatpush1.bf16.msra.mxu1 %v13587_v31  ;;  %v13646_v31 = vld [vmem:[#allocation21 + $0x374] ss:$8 sps:$4 sm:$0xff]  }
0x1500   : > { %10896 = vmatprep.subr.bf16.mxu1 %v13592_v50  ;;  %v13644_v50 = vld [vmem:[#allocation21 + $0x370] ss:$8 sps:$4 sm:$0xff]  }
0x1503   : > { %10897 = vmatpush1.bf16.msra.mxu1 %v13590_v60  ;;  %v13649_v60 = vld [vmem:[#allocation21 + $0x384] ss:$8 sps:$4 sm:$0xff]  }
0x1504   : > { %10898 = vmatprep.subr.bf16.mxu1 %v13595_v10  ;;  %v9159_v10 = vrot.slane %v15552_v35, %v14715_v46  ;;  %v13661_v46 = vld [vmem:[#allocation21 + $0x3c4] ss:$8 sps:$4 sm:$0xff]   ;;  %v13659_v35 = vld [vmem:[#allocation21 + $0x3c0] ss:$8 sps:$4 sm:$0xff]  }
0x1507   : > { %10899 = vmatpush1.bf16.msra.mxu1 %v13593_v51  ;;  %v13647_v51 = vld [vmem:[#allocation21 + $0x380] ss:$8 sps:$4 sm:$0xff]  }
0x1508   : > { %10900 = vmatprep.subr.bf16.mxu1 %v13598_v3  ;;  %v13652_v3 = vld [vmem:[#allocation21 + $0x394] ss:$8 sps:$4 sm:$0xff]  }
0x150b   : > { %10901 = vmatpush1.bf16.msra.mxu1 %v13596_v43  ;;  %v9970_v43 = vadd.f32 %v15569_v13, %v9159_v10  ;;  %v13662_v13 = vld [vmem:[#allocation21 + $0x3d0] ss:$8 sps:$4 sm:$0xff]  }
0x150c   : > { %10902 = vmatprep.subr.bf16.mxu1 %v13601_v63  ;;  %v13650_v63 = vld [vmem:[#allocation21 + $0x390] ss:$8 sps:$4 sm:$0xff]  }
0x150f   : > { %10903 = vmatpush1.bf16.msra.mxu1 %v13599_v55  ;;  %v9990_v55 = vmul.f32 0.70710677, %v9970_v43 }
0x1510   : > { %10904 = vmatprep.subr.bf16.mxu1 %v13604_v25  ;;  %v13658_v25 = vld [vmem:[#allocation21 + $0x3b4] ss:$8 sps:$4 sm:$0xff]  }
0x1511   : > { %13803 = verf.f32 %v9990_v55 }
0x1513   : > { %10905 = vmatpush1.bf16.msra.mxu1 %v13602_v7  ;;  %v13664_v7 = vld [vmem:[#allocation21 + $0x3d4] ss:$8 sps:$4 sm:$0xff]  }
0x1514   : > { %10906 = vmatprep.subr.bf16.mxu1 %v13607_v4 }
0x1517   : > { %10907 = vmatpush1.bf16.msra.mxu1 %v13605_v24 }
0x1518   : > { %10908 = vmatprep.subr.bf16.mxu1 %v13610_v27  ;;  %v9982_v27 = vmul.f32 0.5, %v9970_v43 }
0x151b   : > { %10909 = vmatpush1.bf16.msra.mxu1 %v13608_v23  ;;  %v13804_v4 = vpop.eup %13803  ;;  %v13668_v23 = vld [vmem:[#allocation21 + $0x3f0] ss:$8 sps:$4 sm:$0xff]  }
0x151c   : > { %10910 = vmatprep.subr.bf16.mxu1 %v13613_v54  ;;  %v10006_v24 = vadd.f32 1.0, %v13804_v4 }
0x151e   : > { %v10014_v54 = vmul.f32 %v10006_v24, %v9982_v27 }
0x151f   : > { %10911 = vmatpush1.bf16.msra.mxu1 %v13611_v22 }
0x1520   : > { %10912 = vmatprep.subr.bf16.mxu1 %v13616_v59  ;;  %v10022_v22 = vpack.c.bf16 %v10014_v54, %v10014_v54  ;;  %v10152_v59 = vld [vmem:[%s15712_s19] sm:$0x3] }
0x1523   : > { %10913 = vmatpush1.bf16.msra.mxu1 %v13614_v9  ;;  %v10157_v9 = vrot.slane %v10152_v59, %v14605_v49 }
0x1524   : > { %10914 = vmatprep.subr.bf16.mxu1 %v13619_v57  ;;  %v10161_v57 = vrot.slane %v10152_v59, %v14602_v48 }
0x1527   : > { %10915 = vmatpush1.bf16.msra.mxu1 %v13617_v45 }
0x1528   : > { %10916 = vmatprep.subr.bf16.mxu1 %v13622_v19 }
0x152b   : > { %10917 = vmatpush1.bf16.msra.mxu1 %v13620_v18 }
0x152c   : > { %10927 = vmatprep.subr.bf16.mxu1 %v13625_v1 }
0x152e   : > { %10919 = vmatmul.mubr.bf16.vlgmr.msra.gmra.mrb[144].mxu1 %v10020_v29 }
0x152f   : > { %10928 = vmatpush1.bf16.msra.mxu1 %v13623_v0  ;;  %10959 = vmatprep.mubr.bf16.mxu1 %v10023_v34 }
0x1530   : > { %10929 = vmatprep.subr.bf16.mxu1 %v13628_v12 }
0x1533   : > { %10930 = vmatpush1.bf16.msra.mxu1 %v13626_v36 }
0x1534   : > { %10931 = vmatprep.subr.bf16.mxu1 %v13631_v37 }
0x1537   : > { %10932 = vmatpush1.bf16.msra.mxu1 %v13629_v17 }
0x1538   : > { %10933 = vmatprep.subr.bf16.mxu1 %v13634_v52 }
0x153b   : > { %10934 = vmatpush1.bf16.msra.mxu1 %v13632_v47 }
0x153c   : > { %10935 = vmatprep.subr.bf16.mxu1 %v13637_v33 }
0x153f   : > { %10936 = vmatpush1.bf16.msra.mxu1 %v13635_v30 }
0x1540   : > { %10937 = vmatprep.subr.bf16.mxu1 %v13640_v41 }
0x1543   : > { %10938 = vmatpush1.bf16.msra.mxu1 %v13638_v11 }
0x1544   : > { %10939 = vmatprep.subr.bf16.mxu1 %v13643_v58 }
0x1547   : > { %10940 = vmatpush1.bf16.msra.mxu1 %v13641_v56 }
0x1548   : > { %10941 = vmatprep.subr.bf16.mxu1 %v13646_v31 }
0x154b   : > { %10942 = vmatpush1.bf16.msra.mxu1 %v13644_v50 }
0x154c   : > { %10943 = vmatprep.subr.bf16.mxu1 %v13649_v60 }
0x154f   : > { %10944 = vmatpush1.bf16.msra.mxu1 %v13647_v51 }
0x1550   : > { %10945 = vmatprep.subr.bf16.mxu1 %v13652_v3 }
0x1553   : > { %10946 = vmatpush1.bf16.msra.mxu1 %v13650_v63 }
0x1554   : > { %10947 = vmatprep.subr.bf16.mxu1 %v13655_v62 }
0x1557   : > { %10948 = vmatpush1.bf16.msra.mxu1 %v13653_v6 }
0x1558   : > { %10949 = vmatprep.subr.bf16.mxu1 %v13658_v25 }
0x155b   : > { %10950 = vmatpush1.bf16.msra.mxu1 %v13656_v42 }
0x155c   : > { %10951 = vmatprep.subr.bf16.mxu1 %v13661_v46 }
0x155f   : > { %10952 = vmatpush1.bf16.msra.mxu1 %v13659_v35 }
0x1560   : > { %10953 = vmatprep.subr.bf16.mxu1 %v13664_v7 }
0x1563   : > { %10954 = vmatpush1.bf16.msra.mxu1 %v13662_v13 }
0x1564   : > { %10955 = vmatprep.subr.bf16.mxu1 %v13667_v5 }
0x1567   : > { %10956 = vmatpush1.bf16.msra.mxu1 %v13665_v26 }
0x1568   : > { %10957 = vmatprep.subr.bf16.mxu1 %v13670_v61 }
0x156b   : > { %10958 = vmatpush1.bf16.msra.mxu1 %v13668_v23 }
0x156e   : > { %10960 = vmatmul.mubr.bf16.vlgmr.msra.gmra.mrb[144].mxu1 %v10022_v22 }
0x1641   : > { %v10961_v28 = vpop.f32.mrb[144].mxu1 }
0x1642   : > { %v12561_v14 = vadd.f32 %v10961_v28, %v10157_v9  ;;  %v10963_v45 = vpop.f32.mrb[145].mxu1 }
0x1643   : > { %v12562_v21 = vadd.f32 %v10963_v45, %v10161_v57  ;;  %v10965_v19 = vpop.f32.mrb[146].mxu1 }
0x1644   : > { %v10966_v53 = vpop.f32.mrb[147].mxu1 }
0x1645   : > { %v10968_v15 = vadd.f32 %v12562_v21, %v12561_v14 }
0x1647   : > { %10969 = vadd.xlane.f32.xlu1 %v10968_v15 }
0x16d4   : > { %v10970_v32 = vpop.xlane.xlu1 %10969 }
0x16d5   : > { %v10971_v18 = vmul.f32 0.00390625, %v10970_v32 }
0x16d7   : > { %v10972_v16 = vsub.f32 %v12561_v14, %v10971_v18  ;;  %v10973_v1 = vsub.f32 %v12562_v21, %v10971_v18 }
0x16d9   : > { %v10974_v20 = vmul.f32 %v10972_v16, %v10972_v16  ;;  %v10975_v0 = vmul.f32 %v10973_v1, %v10973_v1 }
0x16db   : > { %v10976_v29 = vadd.f32 %v10975_v0, %v10974_v20 }
0x16dd   : > { %10977 = vadd.xlane.f32.xlu0 %v10976_v29 }
0x176a   : > { %v10978_v49 = vpop.xlane.xlu0 %10977 }
0x176b   : > { %v10979_v48 = vmul.f32 0.00390625, %v10978_v49 }
0x176d   : > { %v10980_v12 = vadd.f32 1e-05, %v10979_v48 }
0x176f   : > { %13805 = vrsqrt.f32 %v10980_v12 }
0x1779   : > { %v13806_v34 = vpop.eup %13805 }
0x177a   : > { %v10982_v36 = vmul.f32 %v13806_v34, %v10972_v16  ;;  %v10983_v37 = vmul.f32 %v13806_v34, %v10973_v1 }
0x177c   : > { %v10984_v17 = vmul.f32 %v10982_v36, %v15104_v38  ;;  %v10985_v52 = vmul.f32 %v10983_v37, %v15107_v39 }
0x177e   : > { %v10986_v47 = vadd.f32 %v10984_v17, %v15110_v44  ;;  %v10987_v33 = vadd.f32 %v10985_v52, %v15113_v8 }
0x1780   : > { %v10988_v30 = vadd.f32 %v10986_v47, %v15534_v2  ;;  %v10989_v41 = vadd.f32 %v10987_v33, %v15537_v40 }
0x1782   : > { %10990 = vst [vmem:[%s676_s28] sm:$0xff] %v10988_v30  ;;  %10991 = vst [vmem:[%s676_s28 + $0x8] sm:$0xff] %v10989_v41 }
0x1783   : > { %14076 = shalt.err (!%p14073_p9)
}
0x1784   : > { %s14077_s7 = scalar_lea.hbm %s15599_s6, 256  ;;  %s14081_s5 = scalar_lea.hbm %s15715_s3, 512 }
0x1785   : > { %p14078_p4 = scmp.ne.s32.totalorder %s15599_s6, %s14077_s7  ;;  %p14082_p2 = scmp.lt.u32.totalorder %s15599_s6, %s15715_s3 }
0x1786   : > { %p14083_p6 = scmp.lt.u32.totalorder %s14081_s5, %s14077_s7  ;;  %p14085_p10 = scmp.lt.u32.totalorder %s14077_s7, %s15599_s6 }
0x1787   : > { %p14079_p8 = pnand %p14078_p4, %p15716_p1 }
0x1788   : > { %p14084_p5 = por %p14083_p6, %p14082_p2 }
0x1789   : > { %p14080_p0 = pneg %p14079_p8 }
0x178a   : > { %p14086_p11 = por %p14085_p10, %p14084_p5 }
0x178c   : > { %p14087_p12 = pnand %p14086_p11, %p14080_p0 }
0x178e   : > { %14090 = shalt.err (!%p14087_p12)
}
0x178f   : > { %12621 = dma.vmem_to_hbm [thread:$0]  (%p15716_p1), %s15601_s21, 256, %s15599_s6, %s10993_s0  }
0x1790 PF: > { %s11019_s1 = sand.u32 1, %s14133_s24   ;;  %p15717_p13 = scmp.ne.s32.totalorder %s15696_s23, 0 }
0x1791   : > { %p15718_p3 = scmp.ge.s32.totalorder %s14145_s27, 2  ;;  %s11020_s20 = scalar_lea.sflag [#allocation9], %s11019_s1 }
0x1793   : > { %p12653_p7 = pnand %p15718_p3, %p15717_p13 }
0x1795   : > { %14128 = dma.done.wait (!%p12653_p7), %s11020_s20, 256  }
0x1796   : > { %14130 = vsyncadd (!%p12653_p7), %s11020_s20, 4294967040  ;;  %p34_p9 = scmp.ge.s32.totalorder %s14492_s18, 4   ;;  %s15719_s24 = smov %s14137_s25 }
0x1797   : > { %s15720_s25 = smov %s14141_s26  ;;  %s15721_s26 = smov %s14503_s8 }
0x1798   : > { %s15722_s27 = smov %s14492_s18  ;;  %36 = sbr.rel (!%p34_p9) target bundleno = 21 (0x15), region = 198 }
0x179f   :  { %11025 = vsyncpa [#allocation8], 1 }
0x17a0   :  { %11027 = vsyncpa [#allocation8 + $0x1], 1 }
0x17a1   :  { %11028 = vsyncpa [#allocation11], 1 }
0x17a2   :  { %11029 = vsyncpa [#allocation14], 1 }
0x17a3   :  { %11030 = vsyncpa [#allocation17], 1 }
0x17a4   :  { %11031 = vsyncpa [#allocation20], 1 }
0x17a5   :  { %11032 = vsyncpa [#allocation9], 1 }
0x17a6   :  { %11034 = vsyncpa [#allocation9 + $0x1], 1 }

</bundles_post_ra>
